<compile_context>
chip_gen: v7x
topology: tpu7x:2x2x1
jax: 0.10.0
libtpu: 0.0.40
codegen_flags: <defaults>
</compile_context>

<pallas_src>
import functools
import math

import jax
import jax.numpy as jnp
from jax import lax
from jax.experimental import pallas as pl
from jax.experimental.pallas import tpu as pltpu


# ------------------------------ fused kernel ------------------------------

def _make_fused_kernel(B, Te, Td, D, F, H, L, Vp):
    dh = D // H
    scale = 1.0 / math.sqrt(dh)

    def _ln(x, g, b):
        mean = jnp.mean(x, axis=-1, keepdims=True)
        var = jnp.mean((x - mean) ** 2, axis=-1, keepdims=True)
        return (x - mean) * lax.rsqrt(var + 1e-5) * g + b

    def _mha(x2d, keep, wq, bq, wk, bk, wv, bv, wo, bo, T):
        """Multi-head self-attention on a (B*T, D) slab.

        Head-major weights (H, D, dh)/(H, dh, D): no lane slicing of the fused
        projection and no 8-lane concat (out-projection is a sum over heads).
        Batch is the leading dim of the 3-D einsums.
        """
        out = None
        for h in range(H):
            q = jnp.dot(x2d, wq[h], preferred_element_type=jnp.float32) + bq[h]
            k = jnp.dot(x2d, wk[h], preferred_element_type=jnp.float32) + bk[h]
            v = jnp.dot(x2d, wv[h], preferred_element_type=jnp.float32) + bv[h]
            q3 = q.reshape(B, T, dh)
            k3 = k.reshape(B, T, dh)
            v3 = v.reshape(B, T, dh)
            s = jnp.einsum('bqd,bkd->bqk', q3, k3,
                           preferred_element_type=jnp.float32) * scale
            s = jnp.where(keep, s, -10000.0)            # masked_fill(mask==0,-1e4)
            s = s - jnp.max(s, axis=-1, keepdims=True)
            p = jnp.exp(s)
            p = p / jnp.sum(p, axis=-1, keepdims=True)   # exact softmax division
            ctx = jnp.einsum('bqk,bkd->bqd', p, v3,
                             preferred_element_type=jnp.float32)
            oh = jnp.dot(ctx.reshape(B * T, dh), wo[h],
                         preferred_element_type=jnp.float32)
            out = oh if out is None else out + oh
        return out + bo

    def kernel(x_enc_ref, x_dec_ref, m_enc_ref, m_dec_ref,
               e_wq, e_bq, e_wk, e_bk, e_wv, e_bv, e_wo, e_bo,
               e_ln1, e_w1, e_b1, e_w2, e_b2, e_ln2,
               d_wq, d_bq, d_wk, d_bk, d_wv, d_bv, d_wo, d_bo,
               d_ln1, d_cv_w, d_cv_b, d_co_w, d_co_b, d_ln2,
               d_w1, d_b1, d_w2, d_b2, d_ln3,
               out_w, out_b,
               out_ref, hid_ref):
        # ------------------------------ encoder ------------------------------
        x = x_enc_ref[...].reshape(B * Te, D)
        keep_e = (m_enc_ref[...] != 0.0)[:, None, :]            # (B,1,Te) key pad
        for l in range(L):
            ln1 = e_ln1[l]
            ln2 = e_ln2[l]
            attn = _mha(x, keep_e, e_wq[l], e_bq[l], e_wk[l], e_bk[l],
                        e_wv[l], e_bv[l], e_wo[l], e_bo[l], Te)
            h1 = _ln(attn + x, ln1[0], ln1[1])
            ff = jnp.maximum(
                jnp.dot(h1, e_w1[l], preferred_element_type=jnp.float32) + e_b1[l],
                0.0)
            ff = jnp.dot(ff, e_w2[l], preferred_element_type=jnp.float32) + e_b2[l]
            x = _ln(ff + h1, ln2[0], ln2[1])

        hid3 = x.reshape(B, Te, D)[:, 0:1, :]                   # (B,1,D)
        hid_ref[...] = hid3
        hid2 = hid3.reshape(B, D)

        # ------------------------------ decoder ------------------------------
        d = x_dec_ref[...].reshape(B * Td, D)
        pad_d = (m_dec_ref[...] != 0.0)[:, None, :]              # (B,1,Td)
        row = lax.broadcasted_iota(jnp.int32, (Td, Td), 0)
        col = lax.broadcasted_iota(jnp.int32, (Td, Td), 1)
        keep_d = jnp.logical_and(col <= row, pad_d)              # (B,Td,Td)
        for l in range(L):
            ln1 = d_ln1[l]
            ln2 = d_ln2[l]
            ln3 = d_ln3[l]
            sa = _mha(d, keep_d, d_wq[l], d_bq[l], d_wk[l], d_bk[l],
                      d_wv[l], d_bv[l], d_wo[l], d_bo[l], Td)
            h1 = _ln(sa + d, ln1[0], ln1[1])
            # Cross-attention over the single encoder token: softmax over one key
            # is exactly 1, so the context equals the V projection of hidden_repr;
            # Q/K projections, score matmuls and exp/normalize drop out (bit-exact).
            ca = jnp.dot(hid2, d_cv_w[l], preferred_element_type=jnp.float32) + d_cv_b[l]
            ca = jnp.dot(ca, d_co_w[l], preferred_element_type=jnp.float32) + d_co_b[l]
            h2 = (h1.reshape(B, Td, D) + ca[:, None, :]).reshape(B * Td, D)
            h2 = _ln(h2, ln2[0], ln2[1])
            ff = jnp.maximum(
                jnp.dot(h2, d_w1[l], preferred_element_type=jnp.float32) + d_b1[l],
                0.0)
            ff = jnp.dot(ff, d_w2[l], preferred_element_type=jnp.float32) + d_b2[l]
            d = _ln(ff + h2, ln3[0], ln3[1])

        # -------------------- vocab head (128-lane padded) --------------------
        y = jnp.dot(d, out_w[...], preferred_element_type=jnp.float32) + out_b[...]
        out_ref[...] = y.reshape(B, Td, Vp)

    return kernel


_PARAM_ORDER = [
    'e_wq', 'e_bq', 'e_wk', 'e_bk', 'e_wv', 'e_bv', 'e_wo', 'e_bo',
    'e_ln1', 'e_w1', 'e_b1', 'e_w2', 'e_b2', 'e_ln2',
    'd_wq', 'd_bq', 'd_wk', 'd_bk', 'd_wv', 'd_bv', 'd_wo', 'd_bo',
    'd_ln1', 'd_cv_w', 'd_cv_b', 'd_co_w', 'd_co_b', 'd_ln2',
    'd_w1', 'd_b1', 'd_w2', 'd_b2', 'd_ln3',
    'out_w', 'out_b',
]


def fused_transformer_call(params, emb_e, emb_d, mask_enc, mask_dec, n_head):
    """Single pallas_call for the whole network (no grid, whole batch in VMEM)."""
    B, Te, D = emb_e.shape
    Td = emb_d.shape[1]
    L = params['e_wq'].shape[0]
    F = params['e_w1'].shape[-1]
    Vp = params['out_w'].shape[-1]
    kernel = _make_fused_kernel(B, Te, Td, D, F, n_head, L, Vp)
    ins = [emb_e, emb_d, mask_enc, mask_dec] + [params[k] for k in _PARAM_ORDER]
    out_shapes = (jax.ShapeDtypeStruct((B, Td, Vp), jnp.float32),
                  jax.ShapeDtypeStruct((B, 1, D), jnp.float32))
    return pl.pallas_call(
        kernel,
        out_shape=out_shapes,
        compiler_params=pltpu.CompilerParams(vmem_limit_bytes=32 * 1024 * 1024),
    )(*ins)


# ----------------------------- model forward ------------------------------

@functools.partial(jax.jit,
                   static_argnames=("n_head", "d_model", "voc", "return_embedding"))
def transformer_discrete_forward(params, input_enc, input_dec, mask_enc, mask_dec,
                                 n_head, d_model, voc, return_embedding=False):
    # Embedding gather + positional encoding stay in plain (jitted) XLA; a VMEM
    # gather kernel buys nothing at this scale.
    emb_e = jnp.take(params['emb_enc'], input_enc, axis=0)             # (B,Te,D)
    emb_d = jnp.take(params['emb_dec'], input_dec, axis=0) * math.sqrt(d_model)
    Td = emb_d.shape[1]
    emb_d = emb_d + params['pos_enc'][:Td][None, :, :]                 # PositionalEncodingLoc

    out_pad, hid = fused_transformer_call(
        params, emb_e, emb_d,
        mask_enc.astype(jnp.float32), mask_dec.astype(jnp.float32), n_head)
    if return_embedding:
        # NOTE: the fused kernel also ran the (tiny) decoder; its result is unused.
        return hid
    return {'output': out_pad[:, :, :voc], 'hidden_repr': hid}


# --------------------------- deterministic params --------------------------

def sinusoidal_encoding(max_len, d_model):
    pos = jnp.arange(max_len, dtype=jnp.float32)[:, None]
    i2 = jnp.arange(0, d_model, 2, dtype=jnp.float32)
    angle = pos / (10000.0 ** (i2 / d_model))
    enc = jnp.zeros((max_len, d_model), jnp.float32)
    enc = enc.at[:, 0::2].set(jnp.sin(angle))
    enc = enc.at[:, 1::2].set(jnp.cos(angle))
    return enc


def init_params(key, d_model, n_head, ffn_hidden, n_layers, voc, max_len):
    D, F, H, L = d_model, ffn_hidden, n_head, n_layers
    dh = D // H
    Vp = ((voc + 127) // 128) * 128
    keys = iter(jax.random.split(key, 64))

    def w(shape):
        return 0.02 * jax.random.normal(next(keys), shape, jnp.float32)

    def head_w():           # (L,H,D,dh): per-head column slices of a (D,D) proj
        return w((L, D, D)).reshape(L, D, H, dh).transpose(0, 2, 1, 3)

    def head_b():
        return jnp.zeros((L, H, 1, dh), jnp.float32)

    def ln():               # [:,0]=gamma (ones), [:,1]=beta (zeros)
        return jnp.concatenate([jnp.ones((L, 1, 1, D), jnp.float32),
                                jnp.zeros((L, 1, 1, D), jnp.float32)], axis=1)

    params = {
        # encoder layers (stacked along L)
        'e_wq': head_w(), 'e_bq': head_b(),
        'e_wk': head_w(), 'e_bk': head_b(),
        'e_wv': head_w(), 'e_bv': head_b(),
        'e_wo': w((L, D, D)).reshape(L, H, dh, D),
        'e_bo': jnp.zeros((L, 1, D), jnp.float32),
        'e_ln1': ln(),
        'e_w1': w((L, D, F)), 'e_b1': jnp.zeros((L, 1, F), jnp.float32),
        'e_w2': w((L, F, D)), 'e_b2': jnp.zeros((L, 1, D), jnp.float32),
        'e_ln2': ln(),
        # decoder layers
        'd_wq': head_w(), 'd_bq': head_b(),
        'd_wk': head_w(), 'd_bk': head_b(),
        'd_wv': head_w(), 'd_bv': head_b(),
        'd_wo': w((L, D, D)).reshape(L, H, dh, D),
        'd_bo': jnp.zeros((L, 1, D), jnp.float32),
        'd_ln1': ln(),
        # cross-attention: only V and out projections are mathematically needed
        # (single encoder token) -- Q/K weights of the reference do not affect
        # the output, so they are not instantiated.
        'd_cv_w': w((L, D, D)), 'd_cv_b': jnp.zeros((L, 1, D), jnp.float32),
        'd_co_w': w((L, D, D)), 'd_co_b': jnp.zeros((L, 1, D), jnp.float32),
        'd_ln2': ln(),
        'd_w1': w((L, D, F)), 'd_b1': jnp.zeros((L, 1, F), jnp.float32),
        'd_w2': w((L, F, D)), 'd_b2': jnp.zeros((L, 1, D), jnp.float32),
        'd_ln3': ln(),
        # vocab head, pre-padded to 128 output lanes (lane-dense stores)
        'out_w': jnp.pad(w((D, voc)), ((0, 0), (0, Vp - voc))),
        'out_b': jnp.zeros((1, Vp), jnp.float32),
    }
    emb_enc = 0.02 * jax.random.normal(next(keys), (voc, D), jnp.float32)
    emb_dec = 0.02 * jax.random.normal(next(keys), (voc, D), jnp.float32)
    params['emb_enc'] = emb_enc.at[3].set(0.0)       # padding_idx=3
    params['emb_dec'] = emb_dec.at[3].set(0.0)       # padding_idx=3
    params['pos_enc'] = sinusoidal_encoding(max_len + 2, D)
    return params


# ---------------------------------- main -----------------------------------

if __name__ == "__main__":
    # small config consistent with the module's __init__
    d_model, n_head, max_len, ffn_hidden, n_layers = 32, 4, 8, 64, 2
    num_bins = 8
    voc = num_bins ** 2 + 4              # enc/dec vocab = num_bins**2 + 4
    B = 2
    T_enc = T_dec = max_len

    key = jax.random.PRNGKey(0)
    kp, ke, kd = jax.random.split(key, 3)
    params = init_params(kp, d_model, n_head, ffn_hidden, n_layers, voc, max_len)

    input_enc = jax.random.randint(ke, (B, T_enc), 0, voc, dtype=jnp.int32)
    input_dec = jax.random.randint(kd, (B, T_dec), 0, voc, dtype=jnp.int32)
    mask_enc = jnp.ones((B, T_enc), jnp.float32).at[0, -2:].set(0.0)
    mask_dec = jnp.ones((B, T_dec), jnp.float32).at[0, -1:].set(0.0)

    out = transformer_discrete_forward(params, input_enc, input_dec,
                                       mask_enc, mask_dec,
                                       n_head=n_head, d_model=d_model, voc=voc)
    jax.block_until_ready(out['output'])
    jax.block_until_ready(out['hidden_repr'])
    assert out['output'].shape == (B, T_dec, voc)
    assert out['hidden_repr'].shape == (B, 1, d_model)

    hid_only = transformer_discrete_forward(params, input_enc, input_dec,
                                            mask_enc, mask_dec,
                                            n_head=n_head, d_model=d_model,
                                            voc=voc, return_embedding=True)
    jax.block_until_ready(hid_only)
    assert hid_only.shape == (B, 1, d_model)

    # TODO(synk): generate() (autoregressive decoding loop) and the numpy
    # grid-conversion helpers are host-side utilities, not part of forward().
    print("KERNEL_OK")
</pallas_src>

<mosaic_0001>
module attributes {stable_mosaic.version = 11 : i64} {
  func.func @kernel(%arg0: memref<2x8x32xf32, #tpu.memory_space<vmem>>, %arg1: memref<2x8x32xf32, #tpu.memory_space<vmem>>, %arg2: memref<2x8xf32, #tpu.memory_space<vmem>>, %arg3: memref<2x8xf32, #tpu.memory_space<vmem>>, %arg4: memref<2x4x32x8xf32, #tpu.memory_space<vmem>>, %arg5: memref<2x4x1x8xf32, #tpu.memory_space<vmem>>, %arg6: memref<2x4x32x8xf32, #tpu.memory_space<vmem>>, %arg7: memref<2x4x1x8xf32, #tpu.memory_space<vmem>>, %arg8: memref<2x4x32x8xf32, #tpu.memory_space<vmem>>, %arg9: memref<2x4x1x8xf32, #tpu.memory_space<vmem>>, %arg10: memref<2x4x8x32xf32, #tpu.memory_space<vmem>>, %arg11: memref<2x1x32xf32, #tpu.memory_space<vmem>>, %arg12: memref<2x2x1x32xf32, #tpu.memory_space<vmem>>, %arg13: memref<2x32x64xf32, #tpu.memory_space<vmem>>, %arg14: memref<2x1x64xf32, #tpu.memory_space<vmem>>, %arg15: memref<2x64x32xf32, #tpu.memory_space<vmem>>, %arg16: memref<2x1x32xf32, #tpu.memory_space<vmem>>, %arg17: memref<2x2x1x32xf32, #tpu.memory_space<vmem>>, %arg18: memref<2x4x32x8xf32, #tpu.memory_space<vmem>>, %arg19: memref<2x4x1x8xf32, #tpu.memory_space<vmem>>, %arg20: memref<2x4x32x8xf32, #tpu.memory_space<vmem>>, %arg21: memref<2x4x1x8xf32, #tpu.memory_space<vmem>>, %arg22: memref<2x4x32x8xf32, #tpu.memory_space<vmem>>, %arg23: memref<2x4x1x8xf32, #tpu.memory_space<vmem>>, %arg24: memref<2x4x8x32xf32, #tpu.memory_space<vmem>>, %arg25: memref<2x1x32xf32, #tpu.memory_space<vmem>>, %arg26: memref<2x2x1x32xf32, #tpu.memory_space<vmem>>, %arg27: memref<2x32x32xf32, #tpu.memory_space<vmem>>, %arg28: memref<2x1x32xf32, #tpu.memory_space<vmem>>, %arg29: memref<2x32x32xf32, #tpu.memory_space<vmem>>, %arg30: memref<2x1x32xf32, #tpu.memory_space<vmem>>, %arg31: memref<2x2x1x32xf32, #tpu.memory_space<vmem>>, %arg32: memref<2x32x64xf32, #tpu.memory_space<vmem>>, %arg33: memref<2x1x64xf32, #tpu.memory_space<vmem>>, %arg34: memref<2x64x32xf32, #tpu.memory_space<vmem>>, %arg35: memref<2x1x32xf32, #tpu.memory_space<vmem>>, %arg36: memref<2x2x1x32xf32, #tpu.memory_space<vmem>>, %arg37: memref<32x128xf32, #tpu.memory_space<vmem>>, %arg38: memref<1x128xf32, #tpu.memory_space<vmem>>, %arg39: memref<2x8x128xf32, #tpu.memory_space<vmem>>, %arg40: memref<2x1x32xf32, #tpu.memory_space<vmem>>) attributes {dimension_semantics = [], scalar_prefetch = 0 : i64, scratch_operands = 0 : i64, tpu.core_type = #tpu.core_type<tc>} {
    %c0 = arith.constant 0 : index
    %c0_0 = arith.constant 0 : index
    %c0_1 = arith.constant 0 : index
    %0 = vector.load %arg0[%c0, %c0_0, %c0_1] : memref<2x8x32xf32, #tpu.memory_space<vmem>>, vector<2x8x32xf32>
    %1 = vector.shape_cast %0 : vector<2x8x32xf32> to vector<16x32xf32>
    %c0_2 = arith.constant 0 : index
    %c0_3 = arith.constant 0 : index
    %2 = vector.load %arg2[%c0_2, %c0_3] : memref<2x8xf32, #tpu.memory_space<vmem>>, vector<2x8xf32>
    %cst = arith.constant 0.000000e+00 : f32
    %3 = vector.broadcast %cst : f32 to vector<2x8xf32>
    %4 = arith.cmpf one, %2, %3 : vector<2x8xf32>
    %5 = vector.shape_cast %4 : vector<2x8xi1> to vector<2x1x8xi1>
    %c0_4 = arith.constant 0 : index
    %c0_5 = arith.constant 0 : index
    %c0_6 = arith.constant 0 : index
    %c0_7 = arith.constant 0 : index
    %6 = vector.load %arg12[%c0_4, %c0_5, %c0_6, %c0_7] : memref<2x2x1x32xf32, #tpu.memory_space<vmem>>, vector<1x2x1x32xf32>
    %7 = vector.shape_cast %6 : vector<1x2x1x32xf32> to vector<2x1x32xf32>
    %c0_8 = arith.constant 0 : index
    %c0_9 = arith.constant 0 : index
    %c0_10 = arith.constant 0 : index
    %c0_11 = arith.constant 0 : index
    %8 = vector.load %arg17[%c0_8, %c0_9, %c0_10, %c0_11] : memref<2x2x1x32xf32, #tpu.memory_space<vmem>>, vector<1x2x1x32xf32>
    %9 = vector.shape_cast %8 : vector<1x2x1x32xf32> to vector<2x1x32xf32>
    %c0_12 = arith.constant 0 : index
    %c0_13 = arith.constant 0 : index
    %c0_14 = arith.constant 0 : index
    %c0_15 = arith.constant 0 : index
    %10 = vector.load %arg4[%c0_12, %c0_13, %c0_14, %c0_15] : memref<2x4x32x8xf32, #tpu.memory_space<vmem>>, vector<1x4x32x8xf32>
    %11 = vector.shape_cast %10 : vector<1x4x32x8xf32> to vector<4x32x8xf32>
    %c0_16 = arith.constant 0 : index
    %c0_17 = arith.constant 0 : index
    %c0_18 = arith.constant 0 : index
    %c0_19 = arith.constant 0 : index
    %12 = vector.load %arg5[%c0_16, %c0_17, %c0_18, %c0_19] : memref<2x4x1x8xf32, #tpu.memory_space<vmem>>, vector<1x4x1x8xf32>
    %13 = vector.shape_cast %12 : vector<1x4x1x8xf32> to vector<4x1x8xf32>
    %c0_20 = arith.constant 0 : index
    %c0_21 = arith.constant 0 : index
    %c0_22 = arith.constant 0 : index
    %c0_23 = arith.constant 0 : index
    %14 = vector.load %arg6[%c0_20, %c0_21, %c0_22, %c0_23] : memref<2x4x32x8xf32, #tpu.memory_space<vmem>>, vector<1x4x32x8xf32>
    %15 = vector.shape_cast %14 : vector<1x4x32x8xf32> to vector<4x32x8xf32>
    %c0_24 = arith.constant 0 : index
    %c0_25 = arith.constant 0 : index
    %c0_26 = arith.constant 0 : index
    %c0_27 = arith.constant 0 : index
    %16 = vector.load %arg7[%c0_24, %c0_25, %c0_26, %c0_27] : memref<2x4x1x8xf32, #tpu.memory_space<vmem>>, vector<1x4x1x8xf32>
    %17 = vector.shape_cast %16 : vector<1x4x1x8xf32> to vector<4x1x8xf32>
    %c0_28 = arith.constant 0 : index
    %c0_29 = arith.constant 0 : index
    %c0_30 = arith.constant 0 : index
    %c0_31 = arith.constant 0 : index
    %18 = vector.load %arg8[%c0_28, %c0_29, %c0_30, %c0_31] : memref<2x4x32x8xf32, #tpu.memory_space<vmem>>, vector<1x4x32x8xf32>
    %19 = vector.shape_cast %18 : vector<1x4x32x8xf32> to vector<4x32x8xf32>
    %c0_32 = arith.constant 0 : index
    %c0_33 = arith.constant 0 : index
    %c0_34 = arith.constant 0 : index
    %c0_35 = arith.constant 0 : index
    %20 = vector.load %arg9[%c0_32, %c0_33, %c0_34, %c0_35] : memref<2x4x1x8xf32, #tpu.memory_space<vmem>>, vector<1x4x1x8xf32>
    %21 = vector.shape_cast %20 : vector<1x4x1x8xf32> to vector<4x1x8xf32>
    %c0_36 = arith.constant 0 : index
    %c0_37 = arith.constant 0 : index
    %c0_38 = arith.constant 0 : index
    %c0_39 = arith.constant 0 : index
    %22 = vector.load %arg10[%c0_36, %c0_37, %c0_38, %c0_39] : memref<2x4x8x32xf32, #tpu.memory_space<vmem>>, vector<1x4x8x32xf32>
    %23 = vector.shape_cast %22 : vector<1x4x8x32xf32> to vector<4x8x32xf32>
    %c0_40 = arith.constant 0 : index
    %c0_41 = arith.constant 0 : index
    %c0_42 = arith.constant 0 : index
    %24 = vector.load %arg11[%c0_40, %c0_41, %c0_42] : memref<2x1x32xf32, #tpu.memory_space<vmem>>, vector<1x1x32xf32>
    %25 = vector.shape_cast %24 : vector<1x1x32xf32> to vector<1x32xf32>
    %26 = vector.extract_strided_slice %11 {offsets = [0, 0, 0], sizes = [1, 32, 8], strides = [1, 1, 1]} : vector<4x32x8xf32> to vector<1x32x8xf32>
    %27 = vector.shape_cast %26 : vector<1x32x8xf32> to vector<32x8xf32>
    %cst_43 = arith.constant dense<0.000000e+00> : vector<16x8xf32>
    %28 = tpu.matmul %1, %27, %cst_43 {dimension_numbers = #tpu.dot_dimension_numbers<[1], [0], [0], [1], [0, 0, 1, 1], [], []>} : vector<16x32xf32>, vector<32x8xf32>, vector<16x8xf32> -> vector<16x8xf32>
    %29 = vector.extract_strided_slice %13 {offsets = [0, 0, 0], sizes = [1, 1, 8], strides = [1, 1, 1]} : vector<4x1x8xf32> to vector<1x1x8xf32>
    %30 = vector.shape_cast %29 : vector<1x1x8xf32> to vector<1x8xf32>
    %31 = vector.broadcast %30 : vector<1x8xf32> to vector<16x8xf32>
    %32 = arith.addf %28, %31 : vector<16x8xf32>
    %33 = vector.extract_strided_slice %15 {offsets = [0, 0, 0], sizes = [1, 32, 8], strides = [1, 1, 1]} : vector<4x32x8xf32> to vector<1x32x8xf32>
    %34 = vector.shape_cast %33 : vector<1x32x8xf32> to vector<32x8xf32>
    %cst_44 = arith.constant dense<0.000000e+00> : vector<16x8xf32>
    %35 = tpu.matmul %1, %34, %cst_44 {dimension_numbers = #tpu.dot_dimension_numbers<[1], [0], [0], [1], [0, 0, 1, 1], [], []>} : vector<16x32xf32>, vector<32x8xf32>, vector<16x8xf32> -> vector<16x8xf32>
    %36 = vector.extract_strided_slice %17 {offsets = [0, 0, 0], sizes = [1, 1, 8], strides = [1, 1, 1]} : vector<4x1x8xf32> to vector<1x1x8xf32>
    %37 = vector.shape_cast %36 : vector<1x1x8xf32> to vector<1x8xf32>
    %38 = vector.broadcast %37 : vector<1x8xf32> to vector<16x8xf32>
    %39 = arith.addf %35, %38 : vector<16x8xf32>
    %40 = vector.extract_strided_slice %19 {offsets = [0, 0, 0], sizes = [1, 32, 8], strides = [1, 1, 1]} : vector<4x32x8xf32> to vector<1x32x8xf32>
    %41 = vector.shape_cast %40 : vector<1x32x8xf32> to vector<32x8xf32>
    %cst_45 = arith.constant dense<0.000000e+00> : vector<16x8xf32>
    %42 = tpu.matmul %1, %41, %cst_45 {dimension_numbers = #tpu.dot_dimension_numbers<[1], [0], [0], [1], [0, 0, 1, 1], [], []>} : vector<16x32xf32>, vector<32x8xf32>, vector<16x8xf32> -> vector<16x8xf32>
    %43 = vector.extract_strided_slice %21 {offsets = [0, 0, 0], sizes = [1, 1, 8], strides = [1, 1, 1]} : vector<4x1x8xf32> to vector<1x1x8xf32>
    %44 = vector.shape_cast %43 : vector<1x1x8xf32> to vector<1x8xf32>
    %45 = vector.broadcast %44 : vector<1x8xf32> to vector<16x8xf32>
    %46 = arith.addf %42, %45 : vector<16x8xf32>
    %47 = vector.shape_cast %32 : vector<16x8xf32> to vector<2x8x8xf32>
    %48 = vector.shape_cast %39 : vector<16x8xf32> to vector<2x8x8xf32>
    %49 = vector.shape_cast %46 : vector<16x8xf32> to vector<2x8x8xf32>
    "tpu.trace_start"() <{level = 10 : i32, message = "bqd,bkd->bqk"}> : () -> ()
    %cst_46 = arith.constant dense<0.000000e+00> : vector<2x8x8xf32>
    %50 = tpu.matmul %47, %48, %cst_46 {dimension_numbers = #tpu.dot_dimension_numbers<[2], [2], [1], [1], [0, 0, 0, 1, 1, 1], [0], [0]>} : vector<2x8x8xf32>, vector<2x8x8xf32>, vector<2x8x8xf32> -> vector<2x8x8xf32>
    "tpu.trace_stop"() : () -> ()
    %cst_47 = arith.constant 0.353553385 : f32
    %51 = vector.broadcast %cst_47 : f32 to vector<2x8x8xf32>
    %52 = arith.mulf %50, %51 : vector<2x8x8xf32>
    %cst_48 = arith.constant -1.000000e+04 : f32
    %53 = vector.shape_cast %5 : vector<2x1x8xi1> to vector<2x1x8xi1>
    %54 = vector.broadcast %53 : vector<2x1x8xi1> to vector<2x8x8xi1>
    %55 = vector.broadcast %cst_48 : f32 to vector<2x8x8xf32>
    %56 = arith.select %54, %52, %55 : vector<2x8x8xi1>, vector<2x8x8xf32>
    %cst_49 = arith.constant dense<0xFF800000> : vector<2x8xf32>
    %57 = vector.multi_reduction <maximumf>, %56, %cst_49 [2] : vector<2x8x8xf32> to vector<2x8xf32>
    %58 = vector.shape_cast %57 : vector<2x8xf32> to vector<2x8x1xf32>
    %59 = vector.broadcast %58 : vector<2x8x1xf32> to vector<2x8x8xf32>
    %60 = arith.subf %56, %59 : vector<2x8x8xf32>
    %61 = math.exp %60 : vector<2x8x8xf32>
    %cst_50 = arith.constant dense<0.000000e+00> : vector<2x8xf32>
    %62 = vector.multi_reduction <add>, %61, %cst_50 [2] : vector<2x8x8xf32> to vector<2x8xf32>
    %63 = vector.shape_cast %62 : vector<2x8xf32> to vector<2x8x1xf32>
    %64 = vector.broadcast %63 : vector<2x8x1xf32> to vector<2x8x8xf32>
    %65 = arith.divf %61, %64 : vector<2x8x8xf32>
    "tpu.trace_start"() <{level = 10 : i32, message = "bqk,bkd->bqd"}> : () -> ()
    %cst_51 = arith.constant dense<0.000000e+00> : vector<2x8x8xf32>
    %66 = tpu.matmul %65, %49, %cst_51 {dimension_numbers = #tpu.dot_dimension_numbers<[2], [1], [1], [2], [0, 0, 0, 1, 1, 2], [0], [0]>} : vector<2x8x8xf32>, vector<2x8x8xf32>, vector<2x8x8xf32> -> vector<2x8x8xf32>
    "tpu.trace_stop"() : () -> ()
    %67 = vector.shape_cast %66 : vector<2x8x8xf32> to vector<16x8xf32>
    %68 = vector.extract_strided_slice %23 {offsets = [0, 0, 0], sizes = [1, 8, 32], strides = [1, 1, 1]} : vector<4x8x32xf32> to vector<1x8x32xf32>
    %69 = vector.shape_cast %68 : vector<1x8x32xf32> to vector<8x32xf32>
    %cst_52 = arith.constant dense<0.000000e+00> : vector<16x32xf32>
    %70 = tpu.matmul %67, %69, %cst_52 {dimension_numbers = #tpu.dot_dimension_numbers<[1], [0], [0], [1], [0, 0, 1, 1], [], []>} : vector<16x8xf32>, vector<8x32xf32>, vector<16x32xf32> -> vector<16x32xf32>
    %71 = vector.extract_strided_slice %11 {offsets = [1, 0, 0], sizes = [1, 32, 8], strides = [1, 1, 1]} : vector<4x32x8xf32> to vector<1x32x8xf32>
    %72 = vector.shape_cast %71 : vector<1x32x8xf32> to vector<32x8xf32>
    %cst_53 = arith.constant dense<0.000000e+00> : vector<16x8xf32>
    %73 = tpu.matmul %1, %72, %cst_53 {dimension_numbers = #tpu.dot_dimension_numbers<[1], [0], [0], [1], [0, 0, 1, 1], [], []>} : vector<16x32xf32>, vector<32x8xf32>, vector<16x8xf32> -> vector<16x8xf32>
    %74 = vector.extract_strided_slice %13 {offsets = [1, 0, 0], sizes = [1, 1, 8], strides = [1, 1, 1]} : vector<4x1x8xf32> to vector<1x1x8xf32>
    %75 = vector.shape_cast %74 : vector<1x1x8xf32> to vector<1x8xf32>
    %76 = vector.broadcast %75 : vector<1x8xf32> to vector<16x8xf32>
    %77 = arith.addf %73, %76 : vector<16x8xf32>
    %78 = vector.extract_strided_slice %15 {offsets = [1, 0, 0], sizes = [1, 32, 8], strides = [1, 1, 1]} : vector<4x32x8xf32> to vector<1x32x8xf32>
    %79 = vector.shape_cast %78 : vector<1x32x8xf32> to vector<32x8xf32>
    %cst_54 = arith.constant dense<0.000000e+00> : vector<16x8xf32>
    %80 = tpu.matmul %1, %79, %cst_54 {dimension_numbers = #tpu.dot_dimension_numbers<[1], [0], [0], [1], [0, 0, 1, 1], [], []>} : vector<16x32xf32>, vector<32x8xf32>, vector<16x8xf32> -> vector<16x8xf32>
    %81 = vector.extract_strided_slice %17 {offsets = [1, 0, 0], sizes = [1, 1, 8], strides = [1, 1, 1]} : vector<4x1x8xf32> to vector<1x1x8xf32>
    %82 = vector.shape_cast %81 : vector<1x1x8xf32> to vector<1x8xf32>
    %83 = vector.broadcast %82 : vector<1x8xf32> to vector<16x8xf32>
    %84 = arith.addf %80, %83 : vector<16x8xf32>
    %85 = vector.extract_strided_slice %19 {offsets = [1, 0, 0], sizes = [1, 32, 8], strides = [1, 1, 1]} : vector<4x32x8xf32> to vector<1x32x8xf32>
    %86 = vector.shape_cast %85 : vector<1x32x8xf32> to vector<32x8xf32>
    %cst_55 = arith.constant dense<0.000000e+00> : vector<16x8xf32>
    %87 = tpu.matmul %1, %86, %cst_55 {dimension_numbers = #tpu.dot_dimension_numbers<[1], [0], [0], [1], [0, 0, 1, 1], [], []>} : vector<16x32xf32>, vector<32x8xf32>, vector<16x8xf32> -> vector<16x8xf32>
    %88 = vector.extract_strided_slice %21 {offsets = [1, 0, 0], sizes = [1, 1, 8], strides = [1, 1, 1]} : vector<4x1x8xf32> to vector<1x1x8xf32>
    %89 = vector.shape_cast %88 : vector<1x1x8xf32> to vector<1x8xf32>
    %90 = vector.broadcast %89 : vector<1x8xf32> to vector<16x8xf32>
    %91 = arith.addf %87, %90 : vector<16x8xf32>
    %92 = vector.shape_cast %77 : vector<16x8xf32> to vector<2x8x8xf32>
    %93 = vector.shape_cast %84 : vector<16x8xf32> to vector<2x8x8xf32>
    %94 = vector.shape_cast %91 : vector<16x8xf32> to vector<2x8x8xf32>
    "tpu.trace_start"() <{level = 10 : i32, message = "bqd,bkd->bqk"}> : () -> ()
    %cst_56 = arith.constant dense<0.000000e+00> : vector<2x8x8xf32>
    %95 = tpu.matmul %92, %93, %cst_56 {dimension_numbers = #tpu.dot_dimension_numbers<[2], [2], [1], [1], [0, 0, 0, 1, 1, 1], [0], [0]>} : vector<2x8x8xf32>, vector<2x8x8xf32>, vector<2x8x8xf32> -> vector<2x8x8xf32>
    "tpu.trace_stop"() : () -> ()
    %cst_57 = arith.constant 0.353553385 : f32
    %96 = vector.broadcast %cst_57 : f32 to vector<2x8x8xf32>
    %97 = arith.mulf %95, %96 : vector<2x8x8xf32>
    %cst_58 = arith.constant -1.000000e+04 : f32
    %98 = vector.shape_cast %5 : vector<2x1x8xi1> to vector<2x1x8xi1>
    %99 = vector.broadcast %98 : vector<2x1x8xi1> to vector<2x8x8xi1>
    %100 = vector.broadcast %cst_58 : f32 to vector<2x8x8xf32>
    %101 = arith.select %99, %97, %100 : vector<2x8x8xi1>, vector<2x8x8xf32>
    %cst_59 = arith.constant dense<0xFF800000> : vector<2x8xf32>
    %102 = vector.multi_reduction <maximumf>, %101, %cst_59 [2] : vector<2x8x8xf32> to vector<2x8xf32>
    %103 = vector.shape_cast %102 : vector<2x8xf32> to vector<2x8x1xf32>
    %104 = vector.broadcast %103 : vector<2x8x1xf32> to vector<2x8x8xf32>
    %105 = arith.subf %101, %104 : vector<2x8x8xf32>
    %106 = math.exp %105 : vector<2x8x8xf32>
    %cst_60 = arith.constant dense<0.000000e+00> : vector<2x8xf32>
    %107 = vector.multi_reduction <add>, %106, %cst_60 [2] : vector<2x8x8xf32> to vector<2x8xf32>
    %108 = vector.shape_cast %107 : vector<2x8xf32> to vector<2x8x1xf32>
    %109 = vector.broadcast %108 : vector<2x8x1xf32> to vector<2x8x8xf32>
    %110 = arith.divf %106, %109 : vector<2x8x8xf32>
    "tpu.trace_start"() <{level = 10 : i32, message = "bqk,bkd->bqd"}> : () -> ()
    %cst_61 = arith.constant dense<0.000000e+00> : vector<2x8x8xf32>
    %111 = tpu.matmul %110, %94, %cst_61 {dimension_numbers = #tpu.dot_dimension_numbers<[2], [1], [1], [2], [0, 0, 0, 1, 1, 2], [0], [0]>} : vector<2x8x8xf32>, vector<2x8x8xf32>, vector<2x8x8xf32> -> vector<2x8x8xf32>
    "tpu.trace_stop"() : () -> ()
    %112 = vector.shape_cast %111 : vector<2x8x8xf32> to vector<16x8xf32>
    %113 = vector.extract_strided_slice %23 {offsets = [1, 0, 0], sizes = [1, 8, 32], strides = [1, 1, 1]} : vector<4x8x32xf32> to vector<1x8x32xf32>
    %114 = vector.shape_cast %113 : vector<1x8x32xf32> to vector<8x32xf32>
    %cst_62 = arith.constant dense<0.000000e+00> : vector<16x32xf32>
    %115 = tpu.matmul %112, %114, %cst_62 {dimension_numbers = #tpu.dot_dimension_numbers<[1], [0], [0], [1], [0, 0, 1, 1], [], []>} : vector<16x8xf32>, vector<8x32xf32>, vector<16x32xf32> -> vector<16x32xf32>
    %116 = arith.addf %70, %115 : vector<16x32xf32>
    %117 = vector.extract_strided_slice %11 {offsets = [2, 0, 0], sizes = [1, 32, 8], strides = [1, 1, 1]} : vector<4x32x8xf32> to vector<1x32x8xf32>
    %118 = vector.shape_cast %117 : vector<1x32x8xf32> to vector<32x8xf32>
    %cst_63 = arith.constant dense<0.000000e+00> : vector<16x8xf32>
    %119 = tpu.matmul %1, %118, %cst_63 {dimension_numbers = #tpu.dot_dimension_numbers<[1], [0], [0], [1], [0, 0, 1, 1], [], []>} : vector<16x32xf32>, vector<32x8xf32>, vector<16x8xf32> -> vector<16x8xf32>
    %120 = vector.extract_strided_slice %13 {offsets = [2, 0, 0], sizes = [1, 1, 8], strides = [1, 1, 1]} : vector<4x1x8xf32> to vector<1x1x8xf32>
    %121 = vector.shape_cast %120 : vector<1x1x8xf32> to vector<1x8xf32>
    %122 = vector.broadcast %121 : vector<1x8xf32> to vector<16x8xf32>
    %123 = arith.addf %119, %122 : vector<16x8xf32>
    %124 = vector.extract_strided_slice %15 {offsets = [2, 0, 0], sizes = [1, 32, 8], strides = [1, 1, 1]} : vector<4x32x8xf32> to vector<1x32x8xf32>
    %125 = vector.shape_cast %124 : vector<1x32x8xf32> to vector<32x8xf32>
    %cst_64 = arith.constant dense<0.000000e+00> : vector<16x8xf32>
    %126 = tpu.matmul %1, %125, %cst_64 {dimension_numbers = #tpu.dot_dimension_numbers<[1], [0], [0], [1], [0, 0, 1, 1], [], []>} : vector<16x32xf32>, vector<32x8xf32>, vector<16x8xf32> -> vector<16x8xf32>
    %127 = vector.extract_strided_slice %17 {offsets = [2, 0, 0], sizes = [1, 1, 8], strides = [1, 1, 1]} : vector<4x1x8xf32> to vector<1x1x8xf32>
    %128 = vector.shape_cast %127 : vector<1x1x8xf32> to vector<1x8xf32>
    %129 = vector.broadcast %128 : vector<1x8xf32> to vector<16x8xf32>
    %130 = arith.addf %126, %129 : vector<16x8xf32>
    %131 = vector.extract_strided_slice %19 {offsets = [2, 0, 0], sizes = [1, 32, 8], strides = [1, 1, 1]} : vector<4x32x8xf32> to vector<1x32x8xf32>
    %132 = vector.shape_cast %131 : vector<1x32x8xf32> to vector<32x8xf32>
    %cst_65 = arith.constant dense<0.000000e+00> : vector<16x8xf32>
    %133 = tpu.matmul %1, %132, %cst_65 {dimension_numbers = #tpu.dot_dimension_numbers<[1], [0], [0], [1], [0, 0, 1, 1], [], []>} : vector<16x32xf32>, vector<32x8xf32>, vector<16x8xf32> -> vector<16x8xf32>
    %134 = vector.extract_strided_slice %21 {offsets = [2, 0, 0], sizes = [1, 1, 8], strides = [1, 1, 1]} : vector<4x1x8xf32> to vector<1x1x8xf32>
    %135 = vector.shape_cast %134 : vector<1x1x8xf32> to vector<1x8xf32>
    %136 = vector.broadcast %135 : vector<1x8xf32> to vector<16x8xf32>
    %137 = arith.addf %133, %136 : vector<16x8xf32>
    %138 = vector.shape_cast %123 : vector<16x8xf32> to vector<2x8x8xf32>
    %139 = vector.shape_cast %130 : vector<16x8xf32> to vector<2x8x8xf32>
    %140 = vector.shape_cast %137 : vector<16x8xf32> to vector<2x8x8xf32>
    "tpu.trace_start"() <{level = 10 : i32, message = "bqd,bkd->bqk"}> : () -> ()
    %cst_66 = arith.constant dense<0.000000e+00> : vector<2x8x8xf32>
    %141 = tpu.matmul %138, %139, %cst_66 {dimension_numbers = #tpu.dot_dimension_numbers<[2], [2], [1], [1], [0, 0, 0, 1, 1, 1], [0], [0]>} : vector<2x8x8xf32>, vector<2x8x8xf32>, vector<2x8x8xf32> -> vector<2x8x8xf32>
    "tpu.trace_stop"() : () -> ()
    %cst_67 = arith.constant 0.353553385 : f32
    %142 = vector.broadcast %cst_67 : f32 to vector<2x8x8xf32>
    %143 = arith.mulf %141, %142 : vector<2x8x8xf32>
    %cst_68 = arith.constant -1.000000e+04 : f32
    %144 = vector.shape_cast %5 : vector<2x1x8xi1> to vector<2x1x8xi1>
    %145 = vector.broadcast %144 : vector<2x1x8xi1> to vector<2x8x8xi1>
    %146 = vector.broadcast %cst_68 : f32 to vector<2x8x8xf32>
    %147 = arith.select %145, %143, %146 : vector<2x8x8xi1>, vector<2x8x8xf32>
    %cst_69 = arith.constant dense<0xFF800000> : vector<2x8xf32>
    %148 = vector.multi_reduction <maximumf>, %147, %cst_69 [2] : vector<2x8x8xf32> to vector<2x8xf32>
    %149 = vector.shape_cast %148 : vector<2x8xf32> to vector<2x8x1xf32>
    %150 = vector.broadcast %149 : vector<2x8x1xf32> to vector<2x8x8xf32>
    %151 = arith.subf %147, %150 : vector<2x8x8xf32>
    %152 = math.exp %151 : vector<2x8x8xf32>
    %cst_70 = arith.constant dense<0.000000e+00> : vector<2x8xf32>
    %153 = vector.multi_reduction <add>, %152, %cst_70 [2] : vector<2x8x8xf32> to vector<2x8xf32>
    %154 = vector.shape_cast %153 : vector<2x8xf32> to vector<2x8x1xf32>
    %155 = vector.broadcast %154 : vector<2x8x1xf32> to vector<2x8x8xf32>
    %156 = arith.divf %152, %155 : vector<2x8x8xf32>
    "tpu.trace_start"() <{level = 10 : i32, message = "bqk,bkd->bqd"}> : () -> ()
    %cst_71 = arith.constant dense<0.000000e+00> : vector<2x8x8xf32>
    %157 = tpu.matmul %156, %140, %cst_71 {dimension_numbers = #tpu.dot_dimension_numbers<[2], [1], [1], [2], [0, 0, 0, 1, 1, 2], [0], [0]>} : vector<2x8x8xf32>, vector<2x8x8xf32>, vector<2x8x8xf32> -> vector<2x8x8xf32>
    "tpu.trace_stop"() : () -> ()
    %158 = vector.shape_cast %157 : vector<2x8x8xf32> to vector<16x8xf32>
    %159 = vector.extract_strided_slice %23 {offsets = [2, 0, 0], sizes = [1, 8, 32], strides = [1, 1, 1]} : vector<4x8x32xf32> to vector<1x8x32xf32>
    %160 = vector.shape_cast %159 : vector<1x8x32xf32> to vector<8x32xf32>
    %cst_72 = arith.constant dense<0.000000e+00> : vector<16x32xf32>
    %161 = tpu.matmul %158, %160, %cst_72 {dimension_numbers = #tpu.dot_dimension_numbers<[1], [0], [0], [1], [0, 0, 1, 1], [], []>} : vector<16x8xf32>, vector<8x32xf32>, vector<16x32xf32> -> vector<16x32xf32>
    %162 = arith.addf %116, %161 : vector<16x32xf32>
    %163 = vector.extract_strided_slice %11 {offsets = [3, 0, 0], sizes = [1, 32, 8], strides = [1, 1, 1]} : vector<4x32x8xf32> to vector<1x32x8xf32>
    %164 = vector.shape_cast %163 : vector<1x32x8xf32> to vector<32x8xf32>
    %cst_73 = arith.constant dense<0.000000e+00> : vector<16x8xf32>
    %165 = tpu.matmul %1, %164, %cst_73 {dimension_numbers = #tpu.dot_dimension_numbers<[1], [0], [0], [1], [0, 0, 1, 1], [], []>} : vector<16x32xf32>, vector<32x8xf32>, vector<16x8xf32> -> vector<16x8xf32>
    %166 = vector.extract_strided_slice %13 {offsets = [3, 0, 0], sizes = [1, 1, 8], strides = [1, 1, 1]} : vector<4x1x8xf32> to vector<1x1x8xf32>
    %167 = vector.shape_cast %166 : vector<1x1x8xf32> to vector<1x8xf32>
    %168 = vector.broadcast %167 : vector<1x8xf32> to vector<16x8xf32>
    %169 = arith.addf %165, %168 : vector<16x8xf32>
    %170 = vector.extract_strided_slice %15 {offsets = [3, 0, 0], sizes = [1, 32, 8], strides = [1, 1, 1]} : vector<4x32x8xf32> to vector<1x32x8xf32>
    %171 = vector.shape_cast %170 : vector<1x32x8xf32> to vector<32x8xf32>
    %cst_74 = arith.constant dense<0.000000e+00> : vector<16x8xf32>
    %172 = tpu.matmul %1, %171, %cst_74 {dimension_numbers = #tpu.dot_dimension_numbers<[1], [0], [0], [1], [0, 0, 1, 1], [], []>} : vector<16x32xf32>, vector<32x8xf32>, vector<16x8xf32> -> vector<16x8xf32>
    %173 = vector.extract_strided_slice %17 {offsets = [3, 0, 0], sizes = [1, 1, 8], strides = [1, 1, 1]} : vector<4x1x8xf32> to vector<1x1x8xf32>
    %174 = vector.shape_cast %173 : vector<1x1x8xf32> to vector<1x8xf32>
    %175 = vector.broadcast %174 : vector<1x8xf32> to vector<16x8xf32>
    %176 = arith.addf %172, %175 : vector<16x8xf32>
    %177 = vector.extract_strided_slice %19 {offsets = [3, 0, 0], sizes = [1, 32, 8], strides = [1, 1, 1]} : vector<4x32x8xf32> to vector<1x32x8xf32>
    %178 = vector.shape_cast %177 : vector<1x32x8xf32> to vector<32x8xf32>
    %cst_75 = arith.constant dense<0.000000e+00> : vector<16x8xf32>
    %179 = tpu.matmul %1, %178, %cst_75 {dimension_numbers = #tpu.dot_dimension_numbers<[1], [0], [0], [1], [0, 0, 1, 1], [], []>} : vector<16x32xf32>, vector<32x8xf32>, vector<16x8xf32> -> vector<16x8xf32>
    %180 = vector.extract_strided_slice %21 {offsets = [3, 0, 0], sizes = [1, 1, 8], strides = [1, 1, 1]} : vector<4x1x8xf32> to vector<1x1x8xf32>
    %181 = vector.shape_cast %180 : vector<1x1x8xf32> to vector<1x8xf32>
    %182 = vector.broadcast %181 : vector<1x8xf32> to vector<16x8xf32>
    %183 = arith.addf %179, %182 : vector<16x8xf32>
    %184 = vector.shape_cast %169 : vector<16x8xf32> to vector<2x8x8xf32>
    %185 = vector.shape_cast %176 : vector<16x8xf32> to vector<2x8x8xf32>
    %186 = vector.shape_cast %183 : vector<16x8xf32> to vector<2x8x8xf32>
    "tpu.trace_start"() <{level = 10 : i32, message = "bqd,bkd->bqk"}> : () -> ()
    %cst_76 = arith.constant dense<0.000000e+00> : vector<2x8x8xf32>
    %187 = tpu.matmul %184, %185, %cst_76 {dimension_numbers = #tpu.dot_dimension_numbers<[2], [2], [1], [1], [0, 0, 0, 1, 1, 1], [0], [0]>} : vector<2x8x8xf32>, vector<2x8x8xf32>, vector<2x8x8xf32> -> vector<2x8x8xf32>
    "tpu.trace_stop"() : () -> ()
    %cst_77 = arith.constant 0.353553385 : f32
    %188 = vector.broadcast %cst_77 : f32 to vector<2x8x8xf32>
    %189 = arith.mulf %187, %188 : vector<2x8x8xf32>
    %cst_78 = arith.constant -1.000000e+04 : f32
    %190 = vector.shape_cast %5 : vector<2x1x8xi1> to vector<2x1x8xi1>
    %191 = vector.broadcast %190 : vector<2x1x8xi1> to vector<2x8x8xi1>
    %192 = vector.broadcast %cst_78 : f32 to vector<2x8x8xf32>
    %193 = arith.select %191, %189, %192 : vector<2x8x8xi1>, vector<2x8x8xf32>
    %cst_79 = arith.constant dense<0xFF800000> : vector<2x8xf32>
    %194 = vector.multi_reduction <maximumf>, %193, %cst_79 [2] : vector<2x8x8xf32> to vector<2x8xf32>
    %195 = vector.shape_cast %194 : vector<2x8xf32> to vector<2x8x1xf32>
    %196 = vector.broadcast %195 : vector<2x8x1xf32> to vector<2x8x8xf32>
    %197 = arith.subf %193, %196 : vector<2x8x8xf32>
    %198 = math.exp %197 : vector<2x8x8xf32>
    %cst_80 = arith.constant dense<0.000000e+00> : vector<2x8xf32>
    %199 = vector.multi_reduction <add>, %198, %cst_80 [2] : vector<2x8x8xf32> to vector<2x8xf32>
    %200 = vector.shape_cast %199 : vector<2x8xf32> to vector<2x8x1xf32>
    %201 = vector.broadcast %200 : vector<2x8x1xf32> to vector<2x8x8xf32>
    %202 = arith.divf %198, %201 : vector<2x8x8xf32>
    "tpu.trace_start"() <{level = 10 : i32, message = "bqk,bkd->bqd"}> : () -> ()
    %cst_81 = arith.constant dense<0.000000e+00> : vector<2x8x8xf32>
    %203 = tpu.matmul %202, %186, %cst_81 {dimension_numbers = #tpu.dot_dimension_numbers<[2], [1], [1], [2], [0, 0, 0, 1, 1, 2], [0], [0]>} : vector<2x8x8xf32>, vector<2x8x8xf32>, vector<2x8x8xf32> -> vector<2x8x8xf32>
    "tpu.trace_stop"() : () -> ()
    %204 = vector.shape_cast %203 : vector<2x8x8xf32> to vector<16x8xf32>
    %205 = vector.extract_strided_slice %23 {offsets = [3, 0, 0], sizes = [1, 8, 32], strides = [1, 1, 1]} : vector<4x8x32xf32> to vector<1x8x32xf32>
    %206 = vector.shape_cast %205 : vector<1x8x32xf32> to vector<8x32xf32>
    %cst_82 = arith.constant dense<0.000000e+00> : vector<16x32xf32>
    %207 = tpu.matmul %204, %206, %cst_82 {dimension_numbers = #tpu.dot_dimension_numbers<[1], [0], [0], [1], [0, 0, 1, 1], [], []>} : vector<16x8xf32>, vector<8x32xf32>, vector<16x32xf32> -> vector<16x32xf32>
    %208 = arith.addf %162, %207 : vector<16x32xf32>
    %209 = vector.broadcast %25 : vector<1x32xf32> to vector<16x32xf32>
    %210 = arith.addf %208, %209 : vector<16x32xf32>
    %211 = arith.addf %210, %1 : vector<16x32xf32>
    %212 = vector.extract_strided_slice %7 {offsets = [0, 0, 0], sizes = [1, 1, 32], strides = [1, 1, 1]} : vector<2x1x32xf32> to vector<1x1x32xf32>
    %213 = vector.shape_cast %212 : vector<1x1x32xf32> to vector<1x32xf32>
    %214 = vector.extract_strided_slice %7 {offsets = [1, 0, 0], sizes = [1, 1, 32], strides = [1, 1, 1]} : vector<2x1x32xf32> to vector<1x1x32xf32>
    %215 = vector.shape_cast %214 : vector<1x1x32xf32> to vector<1x32xf32>
    %cst_83 = arith.constant dense<0.000000e+00> : vector<16xf32>
    %216 = vector.multi_reduction <add>, %211, %cst_83 [1] : vector<16x32xf32> to vector<16xf32>
    %217 = vector.shape_cast %216 : vector<16xf32> to vector<16x1xf32>
    %cst_84 = arith.constant 3.200000e+01 : f32
    %218 = vector.broadcast %cst_84 : f32 to vector<16x1xf32>
    %219 = arith.divf %217, %218 : vector<16x1xf32>
    %220 = vector.broadcast %219 : vector<16x1xf32> to vector<16x32xf32>
    %221 = arith.subf %211, %220 : vector<16x32xf32>
    %222 = arith.mulf %221, %221 : vector<16x32xf32>
    %cst_85 = arith.constant dense<0.000000e+00> : vector<16xf32>
    %223 = vector.multi_reduction <add>, %222, %cst_85 [1] : vector<16x32xf32> to vector<16xf32>
    %224 = vector.shape_cast %223 : vector<16xf32> to vector<16x1xf32>
    %cst_86 = arith.constant 3.200000e+01 : f32
    %225 = vector.broadcast %cst_86 : f32 to vector<16x1xf32>
    %226 = arith.divf %224, %225 : vector<16x1xf32>
    %227 = vector.broadcast %219 : vector<16x1xf32> to vector<16x32xf32>
    %228 = arith.subf %211, %227 : vector<16x32xf32>
    %cst_87 = arith.constant 9.99999974E-6 : f32
    %229 = vector.broadcast %cst_87 : f32 to vector<16x1xf32>
    %230 = arith.addf %226, %229 : vector<16x1xf32>
    %231 = math.rsqrt %230 : vector<16x1xf32>
    %232 = vector.broadcast %231 : vector<16x1xf32> to vector<16x32xf32>
    %233 = arith.mulf %228, %232 : vector<16x32xf32>
    %234 = vector.broadcast %213 : vector<1x32xf32> to vector<16x32xf32>
    %235 = arith.mulf %233, %234 : vector<16x32xf32>
    %236 = vector.broadcast %215 : vector<1x32xf32> to vector<16x32xf32>
    %237 = arith.addf %235, %236 : vector<16x32xf32>
    %c0_88 = arith.constant 0 : index
    %c0_89 = arith.constant 0 : index
    %c0_90 = arith.constant 0 : index
    %238 = vector.load %arg13[%c0_88, %c0_89, %c0_90] : memref<2x32x64xf32, #tpu.memory_space<vmem>>, vector<1x32x64xf32>
    %239 = vector.shape_cast %238 : vector<1x32x64xf32> to vector<32x64xf32>
    %cst_91 = arith.constant dense<0.000000e+00> : vector<16x64xf32>
    %240 = tpu.matmul %237, %239, %cst_91 {dimension_numbers = #tpu.dot_dimension_numbers<[1], [0], [0], [1], [0, 0, 1, 1], [], []>} : vector<16x32xf32>, vector<32x64xf32>, vector<16x64xf32> -> vector<16x64xf32>
    %c0_92 = arith.constant 0 : index
    %c0_93 = arith.constant 0 : index
    %c0_94 = arith.constant 0 : index
    %241 = vector.load %arg14[%c0_92, %c0_93, %c0_94] : memref<2x1x64xf32, #tpu.memory_space<vmem>>, vector<1x1x64xf32>
    %242 = vector.shape_cast %241 : vector<1x1x64xf32> to vector<1x64xf32>
    %243 = vector.broadcast %242 : vector<1x64xf32> to vector<16x64xf32>
    %244 = arith.addf %240, %243 : vector<16x64xf32>
    %cst_95 = arith.constant 0.000000e+00 : f32
    %245 = vector.broadcast %cst_95 : f32 to vector<16x64xf32>
    %246 = arith.maximumf %244, %245 : vector<16x64xf32>
    %c0_96 = arith.constant 0 : index
    %c0_97 = arith.constant 0 : index
    %c0_98 = arith.constant 0 : index
    %247 = vector.load %arg15[%c0_96, %c0_97, %c0_98] : memref<2x64x32xf32, #tpu.memory_space<vmem>>, vector<1x64x32xf32>
    %248 = vector.shape_cast %247 : vector<1x64x32xf32> to vector<64x32xf32>
    %cst_99 = arith.constant dense<0.000000e+00> : vector<16x32xf32>
    %249 = tpu.matmul %246, %248, %cst_99 {dimension_numbers = #tpu.dot_dimension_numbers<[1], [0], [0], [1], [0, 0, 1, 1], [], []>} : vector<16x64xf32>, vector<64x32xf32>, vector<16x32xf32> -> vector<16x32xf32>
    %c0_100 = arith.constant 0 : index
    %c0_101 = arith.constant 0 : index
    %c0_102 = arith.constant 0 : index
    %250 = vector.load %arg16[%c0_100, %c0_101, %c0_102] : memref<2x1x32xf32, #tpu.memory_space<vmem>>, vector<1x1x32xf32>
    %251 = vector.shape_cast %250 : vector<1x1x32xf32> to vector<1x32xf32>
    %252 = vector.broadcast %251 : vector<1x32xf32> to vector<16x32xf32>
    %253 = arith.addf %249, %252 : vector<16x32xf32>
    %254 = arith.addf %253, %237 : vector<16x32xf32>
    %255 = vector.extract_strided_slice %9 {offsets = [0, 0, 0], sizes = [1, 1, 32], strides = [1, 1, 1]} : vector<2x1x32xf32> to vector<1x1x32xf32>
    %256 = vector.shape_cast %255 : vector<1x1x32xf32> to vector<1x32xf32>
    %257 = vector.extract_strided_slice %9 {offsets = [1, 0, 0], sizes = [1, 1, 32], strides = [1, 1, 1]} : vector<2x1x32xf32> to vector<1x1x32xf32>
    %258 = vector.shape_cast %257 : vector<1x1x32xf32> to vector<1x32xf32>
    %cst_103 = arith.constant dense<0.000000e+00> : vector<16xf32>
    %259 = vector.multi_reduction <add>, %254, %cst_103 [1] : vector<16x32xf32> to vector<16xf32>
    %260 = vector.shape_cast %259 : vector<16xf32> to vector<16x1xf32>
    %cst_104 = arith.constant 3.200000e+01 : f32
    %261 = vector.broadcast %cst_104 : f32 to vector<16x1xf32>
    %262 = arith.divf %260, %261 : vector<16x1xf32>
    %263 = vector.broadcast %262 : vector<16x1xf32> to vector<16x32xf32>
    %264 = arith.subf %254, %263 : vector<16x32xf32>
    %265 = arith.mulf %264, %264 : vector<16x32xf32>
    %cst_105 = arith.constant dense<0.000000e+00> : vector<16xf32>
    %266 = vector.multi_reduction <add>, %265, %cst_105 [1] : vector<16x32xf32> to vector<16xf32>
    %267 = vector.shape_cast %266 : vector<16xf32> to vector<16x1xf32>
    %cst_106 = arith.constant 3.200000e+01 : f32
    %268 = vector.broadcast %cst_106 : f32 to vector<16x1xf32>
    %269 = arith.divf %267, %268 : vector<16x1xf32>
    %270 = vector.broadcast %262 : vector<16x1xf32> to vector<16x32xf32>
    %271 = arith.subf %254, %270 : vector<16x32xf32>
    %cst_107 = arith.constant 9.99999974E-6 : f32
    %272 = vector.broadcast %cst_107 : f32 to vector<16x1xf32>
    %273 = arith.addf %269, %272 : vector<16x1xf32>
    %274 = math.rsqrt %273 : vector<16x1xf32>
    %275 = vector.broadcast %274 : vector<16x1xf32> to vector<16x32xf32>
    %276 = arith.mulf %271, %275 : vector<16x32xf32>
    %277 = vector.broadcast %256 : vector<1x32xf32> to vector<16x32xf32>
    %278 = arith.mulf %276, %277 : vector<16x32xf32>
    %279 = vector.broadcast %258 : vector<1x32xf32> to vector<16x32xf32>
    %280 = arith.addf %278, %279 : vector<16x32xf32>
    %c1 = arith.constant 1 : index
    %c0_108 = arith.constant 0 : index
    %c0_109 = arith.constant 0 : index
    %c0_110 = arith.constant 0 : index
    %281 = vector.load %arg12[%c1, %c0_108, %c0_109, %c0_110] : memref<2x2x1x32xf32, #tpu.memory_space<vmem>>, vector<1x2x1x32xf32>
    %282 = vector.shape_cast %281 : vector<1x2x1x32xf32> to vector<2x1x32xf32>
    %c1_111 = arith.constant 1 : index
    %c0_112 = arith.constant 0 : index
    %c0_113 = arith.constant 0 : index
    %c0_114 = arith.constant 0 : index
    %283 = vector.load %arg17[%c1_111, %c0_112, %c0_113, %c0_114] : memref<2x2x1x32xf32, #tpu.memory_space<vmem>>, vector<1x2x1x32xf32>
    %284 = vector.shape_cast %283 : vector<1x2x1x32xf32> to vector<2x1x32xf32>
    %c1_115 = arith.constant 1 : index
    %c0_116 = arith.constant 0 : index
    %c0_117 = arith.constant 0 : index
    %c0_118 = arith.constant 0 : index
    %285 = vector.load %arg4[%c1_115, %c0_116, %c0_117, %c0_118] : memref<2x4x32x8xf32, #tpu.memory_space<vmem>>, vector<1x4x32x8xf32>
    %286 = vector.shape_cast %285 : vector<1x4x32x8xf32> to vector<4x32x8xf32>
    %c1_119 = arith.constant 1 : index
    %c0_120 = arith.constant 0 : index
    %c0_121 = arith.constant 0 : index
    %c0_122 = arith.constant 0 : index
    %287 = vector.load %arg5[%c1_119, %c0_120, %c0_121, %c0_122] : memref<2x4x1x8xf32, #tpu.memory_space<vmem>>, vector<1x4x1x8xf32>
    %288 = vector.shape_cast %287 : vector<1x4x1x8xf32> to vector<4x1x8xf32>
    %c1_123 = arith.constant 1 : index
    %c0_124 = arith.constant 0 : index
    %c0_125 = arith.constant 0 : index
    %c0_126 = arith.constant 0 : index
    %289 = vector.load %arg6[%c1_123, %c0_124, %c0_125, %c0_126] : memref<2x4x32x8xf32, #tpu.memory_space<vmem>>, vector<1x4x32x8xf32>
    %290 = vector.shape_cast %289 : vector<1x4x32x8xf32> to vector<4x32x8xf32>
    %c1_127 = arith.constant 1 : index
    %c0_128 = arith.constant 0 : index
    %c0_129 = arith.constant 0 : index
    %c0_130 = arith.constant 0 : index
    %291 = vector.load %arg7[%c1_127, %c0_128, %c0_129, %c0_130] : memref<2x4x1x8xf32, #tpu.memory_space<vmem>>, vector<1x4x1x8xf32>
    %292 = vector.shape_cast %291 : vector<1x4x1x8xf32> to vector<4x1x8xf32>
    %c1_131 = arith.constant 1 : index
    %c0_132 = arith.constant 0 : index
    %c0_133 = arith.constant 0 : index
    %c0_134 = arith.constant 0 : index
    %293 = vector.load %arg8[%c1_131, %c0_132, %c0_133, %c0_134] : memref<2x4x32x8xf32, #tpu.memory_space<vmem>>, vector<1x4x32x8xf32>
    %294 = vector.shape_cast %293 : vector<1x4x32x8xf32> to vector<4x32x8xf32>
    %c1_135 = arith.constant 1 : index
    %c0_136 = arith.constant 0 : index
    %c0_137 = arith.constant 0 : index
    %c0_138 = arith.constant 0 : index
    %295 = vector.load %arg9[%c1_135, %c0_136, %c0_137, %c0_138] : memref<2x4x1x8xf32, #tpu.memory_space<vmem>>, vector<1x4x1x8xf32>
    %296 = vector.shape_cast %295 : vector<1x4x1x8xf32> to vector<4x1x8xf32>
    %c1_139 = arith.constant 1 : index
    %c0_140 = arith.constant 0 : index
    %c0_141 = arith.constant 0 : index
    %c0_142 = arith.constant 0 : index
    %297 = vector.load %arg10[%c1_139, %c0_140, %c0_141, %c0_142] : memref<2x4x8x32xf32, #tpu.memory_space<vmem>>, vector<1x4x8x32xf32>
    %298 = vector.shape_cast %297 : vector<1x4x8x32xf32> to vector<4x8x32xf32>
    %c1_143 = arith.constant 1 : index
    %c0_144 = arith.constant 0 : index
    %c0_145 = arith.constant 0 : index
    %299 = vector.load %arg11[%c1_143, %c0_144, %c0_145] : memref<2x1x32xf32, #tpu.memory_space<vmem>>, vector<1x1x32xf32>
    %300 = vector.shape_cast %299 : vector<1x1x32xf32> to vector<1x32xf32>
    %301 = vector.extract_strided_slice %286 {offsets = [0, 0, 0], sizes = [1, 32, 8], strides = [1, 1, 1]} : vector<4x32x8xf32> to vector<1x32x8xf32>
    %302 = vector.shape_cast %301 : vector<1x32x8xf32> to vector<32x8xf32>
    %cst_146 = arith.constant dense<0.000000e+00> : vector<16x8xf32>
    %303 = tpu.matmul %280, %302, %cst_146 {dimension_numbers = #tpu.dot_dimension_numbers<[1], [0], [0], [1], [0, 0, 1, 1], [], []>} : vector<16x32xf32>, vector<32x8xf32>, vector<16x8xf32> -> vector<16x8xf32>
    %304 = vector.extract_strided_slice %288 {offsets = [0, 0, 0], sizes = [1, 1, 8], strides = [1, 1, 1]} : vector<4x1x8xf32> to vector<1x1x8xf32>
    %305 = vector.shape_cast %304 : vector<1x1x8xf32> to vector<1x8xf32>
    %306 = vector.broadcast %305 : vector<1x8xf32> to vector<16x8xf32>
    %307 = arith.addf %303, %306 : vector<16x8xf32>
    %308 = vector.extract_strided_slice %290 {offsets = [0, 0, 0], sizes = [1, 32, 8], strides = [1, 1, 1]} : vector<4x32x8xf32> to vector<1x32x8xf32>
    %309 = vector.shape_cast %308 : vector<1x32x8xf32> to vector<32x8xf32>
    %cst_147 = arith.constant dense<0.000000e+00> : vector<16x8xf32>
    %310 = tpu.matmul %280, %309, %cst_147 {dimension_numbers = #tpu.dot_dimension_numbers<[1], [0], [0], [1], [0, 0, 1, 1], [], []>} : vector<16x32xf32>, vector<32x8xf32>, vector<16x8xf32> -> vector<16x8xf32>
    %311 = vector.extract_strided_slice %292 {offsets = [0, 0, 0], sizes = [1, 1, 8], strides = [1, 1, 1]} : vector<4x1x8xf32> to vector<1x1x8xf32>
    %312 = vector.shape_cast %311 : vector<1x1x8xf32> to vector<1x8xf32>
    %313 = vector.broadcast %312 : vector<1x8xf32> to vector<16x8xf32>
    %314 = arith.addf %310, %313 : vector<16x8xf32>
    %315 = vector.extract_strided_slice %294 {offsets = [0, 0, 0], sizes = [1, 32, 8], strides = [1, 1, 1]} : vector<4x32x8xf32> to vector<1x32x8xf32>
    %316 = vector.shape_cast %315 : vector<1x32x8xf32> to vector<32x8xf32>
    %cst_148 = arith.constant dense<0.000000e+00> : vector<16x8xf32>
    %317 = tpu.matmul %280, %316, %cst_148 {dimension_numbers = #tpu.dot_dimension_numbers<[1], [0], [0], [1], [0, 0, 1, 1], [], []>} : vector<16x32xf32>, vector<32x8xf32>, vector<16x8xf32> -> vector<16x8xf32>
    %318 = vector.extract_strided_slice %296 {offsets = [0, 0, 0], sizes = [1, 1, 8], strides = [1, 1, 1]} : vector<4x1x8xf32> to vector<1x1x8xf32>
    %319 = vector.shape_cast %318 : vector<1x1x8xf32> to vector<1x8xf32>
    %320 = vector.broadcast %319 : vector<1x8xf32> to vector<16x8xf32>
    %321 = arith.addf %317, %320 : vector<16x8xf32>
    %322 = vector.shape_cast %307 : vector<16x8xf32> to vector<2x8x8xf32>
    %323 = vector.shape_cast %314 : vector<16x8xf32> to vector<2x8x8xf32>
    %324 = vector.shape_cast %321 : vector<16x8xf32> to vector<2x8x8xf32>
    "tpu.trace_start"() <{level = 10 : i32, message = "bqd,bkd->bqk"}> : () -> ()
    %cst_149 = arith.constant dense<0.000000e+00> : vector<2x8x8xf32>
    %325 = tpu.matmul %322, %323, %cst_149 {dimension_numbers = #tpu.dot_dimension_numbers<[2], [2], [1], [1], [0, 0, 0, 1, 1, 1], [0], [0]>} : vector<2x8x8xf32>, vector<2x8x8xf32>, vector<2x8x8xf32> -> vector<2x8x8xf32>
    "tpu.trace_stop"() : () -> ()
    %cst_150 = arith.constant 0.353553385 : f32
    %326 = vector.broadcast %cst_150 : f32 to vector<2x8x8xf32>
    %327 = arith.mulf %325, %326 : vector<2x8x8xf32>
    %cst_151 = arith.constant -1.000000e+04 : f32
    %328 = vector.shape_cast %5 : vector<2x1x8xi1> to vector<2x1x8xi1>
    %329 = vector.broadcast %328 : vector<2x1x8xi1> to vector<2x8x8xi1>
    %330 = vector.broadcast %cst_151 : f32 to vector<2x8x8xf32>
    %331 = arith.select %329, %327, %330 : vector<2x8x8xi1>, vector<2x8x8xf32>
    %cst_152 = arith.constant dense<0xFF800000> : vector<2x8xf32>
    %332 = vector.multi_reduction <maximumf>, %331, %cst_152 [2] : vector<2x8x8xf32> to vector<2x8xf32>
    %333 = vector.shape_cast %332 : vector<2x8xf32> to vector<2x8x1xf32>
    %334 = vector.broadcast %333 : vector<2x8x1xf32> to vector<2x8x8xf32>
    %335 = arith.subf %331, %334 : vector<2x8x8xf32>
    %336 = math.exp %335 : vector<2x8x8xf32>
    %cst_153 = arith.constant dense<0.000000e+00> : vector<2x8xf32>
    %337 = vector.multi_reduction <add>, %336, %cst_153 [2] : vector<2x8x8xf32> to vector<2x8xf32>
    %338 = vector.shape_cast %337 : vector<2x8xf32> to vector<2x8x1xf32>
    %339 = vector.broadcast %338 : vector<2x8x1xf32> to vector<2x8x8xf32>
    %340 = arith.divf %336, %339 : vector<2x8x8xf32>
    "tpu.trace_start"() <{level = 10 : i32, message = "bqk,bkd->bqd"}> : () -> ()
    %cst_154 = arith.constant dense<0.000000e+00> : vector<2x8x8xf32>
    %341 = tpu.matmul %340, %324, %cst_154 {dimension_numbers = #tpu.dot_dimension_numbers<[2], [1], [1], [2], [0, 0, 0, 1, 1, 2], [0], [0]>} : vector<2x8x8xf32>, vector<2x8x8xf32>, vector<2x8x8xf32> -> vector<2x8x8xf32>
    "tpu.trace_stop"() : () -> ()
    %342 = vector.shape_cast %341 : vector<2x8x8xf32> to vector<16x8xf32>
    %343 = vector.extract_strided_slice %298 {offsets = [0, 0, 0], sizes = [1, 8, 32], strides = [1, 1, 1]} : vector<4x8x32xf32> to vector<1x8x32xf32>
    %344 = vector.shape_cast %343 : vector<1x8x32xf32> to vector<8x32xf32>
    %cst_155 = arith.constant dense<0.000000e+00> : vector<16x32xf32>
    %345 = tpu.matmul %342, %344, %cst_155 {dimension_numbers = #tpu.dot_dimension_numbers<[1], [0], [0], [1], [0, 0, 1, 1], [], []>} : vector<16x8xf32>, vector<8x32xf32>, vector<16x32xf32> -> vector<16x32xf32>
    %346 = vector.extract_strided_slice %286 {offsets = [1, 0, 0], sizes = [1, 32, 8], strides = [1, 1, 1]} : vector<4x32x8xf32> to vector<1x32x8xf32>
    %347 = vector.shape_cast %346 : vector<1x32x8xf32> to vector<32x8xf32>
    %cst_156 = arith.constant dense<0.000000e+00> : vector<16x8xf32>
    %348 = tpu.matmul %280, %347, %cst_156 {dimension_numbers = #tpu.dot_dimension_numbers<[1], [0], [0], [1], [0, 0, 1, 1], [], []>} : vector<16x32xf32>, vector<32x8xf32>, vector<16x8xf32> -> vector<16x8xf32>
    %349 = vector.extract_strided_slice %288 {offsets = [1, 0, 0], sizes = [1, 1, 8], strides = [1, 1, 1]} : vector<4x1x8xf32> to vector<1x1x8xf32>
    %350 = vector.shape_cast %349 : vector<1x1x8xf32> to vector<1x8xf32>
    %351 = vector.broadcast %350 : vector<1x8xf32> to vector<16x8xf32>
    %352 = arith.addf %348, %351 : vector<16x8xf32>
    %353 = vector.extract_strided_slice %290 {offsets = [1, 0, 0], sizes = [1, 32, 8], strides = [1, 1, 1]} : vector<4x32x8xf32> to vector<1x32x8xf32>
    %354 = vector.shape_cast %353 : vector<1x32x8xf32> to vector<32x8xf32>
    %cst_157 = arith.constant dense<0.000000e+00> : vector<16x8xf32>
    %355 = tpu.matmul %280, %354, %cst_157 {dimension_numbers = #tpu.dot_dimension_numbers<[1], [0], [0], [1], [0, 0, 1, 1], [], []>} : vector<16x32xf32>, vector<32x8xf32>, vector<16x8xf32> -> vector<16x8xf32>
    %356 = vector.extract_strided_slice %292 {offsets = [1, 0, 0], sizes = [1, 1, 8], strides = [1, 1, 1]} : vector<4x1x8xf32> to vector<1x1x8xf32>
    %357 = vector.shape_cast %356 : vector<1x1x8xf32> to vector<1x8xf32>
    %358 = vector.broadcast %357 : vector<1x8xf32> to vector<16x8xf32>
    %359 = arith.addf %355, %358 : vector<16x8xf32>
    %360 = vector.extract_strided_slice %294 {offsets = [1, 0, 0], sizes = [1, 32, 8], strides = [1, 1, 1]} : vector<4x32x8xf32> to vector<1x32x8xf32>
    %361 = vector.shape_cast %360 : vector<1x32x8xf32> to vector<32x8xf32>
    %cst_158 = arith.constant dense<0.000000e+00> : vector<16x8xf32>
    %362 = tpu.matmul %280, %361, %cst_158 {dimension_numbers = #tpu.dot_dimension_numbers<[1], [0], [0], [1], [0, 0, 1, 1], [], []>} : vector<16x32xf32>, vector<32x8xf32>, vector<16x8xf32> -> vector<16x8xf32>
    %363 = vector.extract_strided_slice %296 {offsets = [1, 0, 0], sizes = [1, 1, 8], strides = [1, 1, 1]} : vector<4x1x8xf32> to vector<1x1x8xf32>
    %364 = vector.shape_cast %363 : vector<1x1x8xf32> to vector<1x8xf32>
    %365 = vector.broadcast %364 : vector<1x8xf32> to vector<16x8xf32>
    %366 = arith.addf %362, %365 : vector<16x8xf32>
    %367 = vector.shape_cast %352 : vector<16x8xf32> to vector<2x8x8xf32>
    %368 = vector.shape_cast %359 : vector<16x8xf32> to vector<2x8x8xf32>
    %369 = vector.shape_cast %366 : vector<16x8xf32> to vector<2x8x8xf32>
    "tpu.trace_start"() <{level = 10 : i32, message = "bqd,bkd->bqk"}> : () -> ()
    %cst_159 = arith.constant dense<0.000000e+00> : vector<2x8x8xf32>
    %370 = tpu.matmul %367, %368, %cst_159 {dimension_numbers = #tpu.dot_dimension_numbers<[2], [2], [1], [1], [0, 0, 0, 1, 1, 1], [0], [0]>} : vector<2x8x8xf32>, vector<2x8x8xf32>, vector<2x8x8xf32> -> vector<2x8x8xf32>
    "tpu.trace_stop"() : () -> ()
    %cst_160 = arith.constant 0.353553385 : f32
    %371 = vector.broadcast %cst_160 : f32 to vector<2x8x8xf32>
    %372 = arith.mulf %370, %371 : vector<2x8x8xf32>
    %cst_161 = arith.constant -1.000000e+04 : f32
    %373 = vector.shape_cast %5 : vector<2x1x8xi1> to vector<2x1x8xi1>
    %374 = vector.broadcast %373 : vector<2x1x8xi1> to vector<2x8x8xi1>
    %375 = vector.broadcast %cst_161 : f32 to vector<2x8x8xf32>
    %376 = arith.select %374, %372, %375 : vector<2x8x8xi1>, vector<2x8x8xf32>
    %cst_162 = arith.constant dense<0xFF800000> : vector<2x8xf32>
    %377 = vector.multi_reduction <maximumf>, %376, %cst_162 [2] : vector<2x8x8xf32> to vector<2x8xf32>
    %378 = vector.shape_cast %377 : vector<2x8xf32> to vector<2x8x1xf32>
    %379 = vector.broadcast %378 : vector<2x8x1xf32> to vector<2x8x8xf32>
    %380 = arith.subf %376, %379 : vector<2x8x8xf32>
    %381 = math.exp %380 : vector<2x8x8xf32>
    %cst_163 = arith.constant dense<0.000000e+00> : vector<2x8xf32>
    %382 = vector.multi_reduction <add>, %381, %cst_163 [2] : vector<2x8x8xf32> to vector<2x8xf32>
    %383 = vector.shape_cast %382 : vector<2x8xf32> to vector<2x8x1xf32>
    %384 = vector.broadcast %383 : vector<2x8x1xf32> to vector<2x8x8xf32>
    %385 = arith.divf %381, %384 : vector<2x8x8xf32>
    "tpu.trace_start"() <{level = 10 : i32, message = "bqk,bkd->bqd"}> : () -> ()
    %cst_164 = arith.constant dense<0.000000e+00> : vector<2x8x8xf32>
    %386 = tpu.matmul %385, %369, %cst_164 {dimension_numbers = #tpu.dot_dimension_numbers<[2], [1], [1], [2], [0, 0, 0, 1, 1, 2], [0], [0]>} : vector<2x8x8xf32>, vector<2x8x8xf32>, vector<2x8x8xf32> -> vector<2x8x8xf32>
    "tpu.trace_stop"() : () -> ()
    %387 = vector.shape_cast %386 : vector<2x8x8xf32> to vector<16x8xf32>
    %388 = vector.extract_strided_slice %298 {offsets = [1, 0, 0], sizes = [1, 8, 32], strides = [1, 1, 1]} : vector<4x8x32xf32> to vector<1x8x32xf32>
    %389 = vector.shape_cast %388 : vector<1x8x32xf32> to vector<8x32xf32>
    %cst_165 = arith.constant dense<0.000000e+00> : vector<16x32xf32>
    %390 = tpu.matmul %387, %389, %cst_165 {dimension_numbers = #tpu.dot_dimension_numbers<[1], [0], [0], [1], [0, 0, 1, 1], [], []>} : vector<16x8xf32>, vector<8x32xf32>, vector<16x32xf32> -> vector<16x32xf32>
    %391 = arith.addf %345, %390 : vector<16x32xf32>
    %392 = vector.extract_strided_slice %286 {offsets = [2, 0, 0], sizes = [1, 32, 8], strides = [1, 1, 1]} : vector<4x32x8xf32> to vector<1x32x8xf32>
    %393 = vector.shape_cast %392 : vector<1x32x8xf32> to vector<32x8xf32>
    %cst_166 = arith.constant dense<0.000000e+00> : vector<16x8xf32>
    %394 = tpu.matmul %280, %393, %cst_166 {dimension_numbers = #tpu.dot_dimension_numbers<[1], [0], [0], [1], [0, 0, 1, 1], [], []>} : vector<16x32xf32>, vector<32x8xf32>, vector<16x8xf32> -> vector<16x8xf32>
    %395 = vector.extract_strided_slice %288 {offsets = [2, 0, 0], sizes = [1, 1, 8], strides = [1, 1, 1]} : vector<4x1x8xf32> to vector<1x1x8xf32>
    %396 = vector.shape_cast %395 : vector<1x1x8xf32> to vector<1x8xf32>
    %397 = vector.broadcast %396 : vector<1x8xf32> to vector<16x8xf32>
    %398 = arith.addf %394, %397 : vector<16x8xf32>
    %399 = vector.extract_strided_slice %290 {offsets = [2, 0, 0], sizes = [1, 32, 8], strides = [1, 1, 1]} : vector<4x32x8xf32> to vector<1x32x8xf32>
    %400 = vector.shape_cast %399 : vector<1x32x8xf32> to vector<32x8xf32>
    %cst_167 = arith.constant dense<0.000000e+00> : vector<16x8xf32>
    %401 = tpu.matmul %280, %400, %cst_167 {dimension_numbers = #tpu.dot_dimension_numbers<[1], [0], [0], [1], [0, 0, 1, 1], [], []>} : vector<16x32xf32>, vector<32x8xf32>, vector<16x8xf32> -> vector<16x8xf32>
    %402 = vector.extract_strided_slice %292 {offsets = [2, 0, 0], sizes = [1, 1, 8], strides = [1, 1, 1]} : vector<4x1x8xf32> to vector<1x1x8xf32>
    %403 = vector.shape_cast %402 : vector<1x1x8xf32> to vector<1x8xf32>
    %404 = vector.broadcast %403 : vector<1x8xf32> to vector<16x8xf32>
    %405 = arith.addf %401, %404 : vector<16x8xf32>
    %406 = vector.extract_strided_slice %294 {offsets = [2, 0, 0], sizes = [1, 32, 8], strides = [1, 1, 1]} : vector<4x32x8xf32> to vector<1x32x8xf32>
    %407 = vector.shape_cast %406 : vector<1x32x8xf32> to vector<32x8xf32>
    %cst_168 = arith.constant dense<0.000000e+00> : vector<16x8xf32>
    %408 = tpu.matmul %280, %407, %cst_168 {dimension_numbers = #tpu.dot_dimension_numbers<[1], [0], [0], [1], [0, 0, 1, 1], [], []>} : vector<16x32xf32>, vector<32x8xf32>, vector<16x8xf32> -> vector<16x8xf32>
    %409 = vector.extract_strided_slice %296 {offsets = [2, 0, 0], sizes = [1, 1, 8], strides = [1, 1, 1]} : vector<4x1x8xf32> to vector<1x1x8xf32>
    %410 = vector.shape_cast %409 : vector<1x1x8xf32> to vector<1x8xf32>
    %411 = vector.broadcast %410 : vector<1x8xf32> to vector<16x8xf32>
    %412 = arith.addf %408, %411 : vector<16x8xf32>
    %413 = vector.shape_cast %398 : vector<16x8xf32> to vector<2x8x8xf32>
    %414 = vector.shape_cast %405 : vector<16x8xf32> to vector<2x8x8xf32>
    %415 = vector.shape_cast %412 : vector<16x8xf32> to vector<2x8x8xf32>
    "tpu.trace_start"() <{level = 10 : i32, message = "bqd,bkd->bqk"}> : () -> ()
    %cst_169 = arith.constant dense<0.000000e+00> : vector<2x8x8xf32>
    %416 = tpu.matmul %413, %414, %cst_169 {dimension_numbers = #tpu.dot_dimension_numbers<[2], [2], [1], [1], [0, 0, 0, 1, 1, 1], [0], [0]>} : vector<2x8x8xf32>, vector<2x8x8xf32>, vector<2x8x8xf32> -> vector<2x8x8xf32>
    "tpu.trace_stop"() : () -> ()
    %cst_170 = arith.constant 0.353553385 : f32
    %417 = vector.broadcast %cst_170 : f32 to vector<2x8x8xf32>
    %418 = arith.mulf %416, %417 : vector<2x8x8xf32>
    %cst_171 = arith.constant -1.000000e+04 : f32
    %419 = vector.shape_cast %5 : vector<2x1x8xi1> to vector<2x1x8xi1>
    %420 = vector.broadcast %419 : vector<2x1x8xi1> to vector<2x8x8xi1>
    %421 = vector.broadcast %cst_171 : f32 to vector<2x8x8xf32>
    %422 = arith.select %420, %418, %421 : vector<2x8x8xi1>, vector<2x8x8xf32>
    %cst_172 = arith.constant dense<0xFF800000> : vector<2x8xf32>
    %423 = vector.multi_reduction <maximumf>, %422, %cst_172 [2] : vector<2x8x8xf32> to vector<2x8xf32>
    %424 = vector.shape_cast %423 : vector<2x8xf32> to vector<2x8x1xf32>
    %425 = vector.broadcast %424 : vector<2x8x1xf32> to vector<2x8x8xf32>
    %426 = arith.subf %422, %425 : vector<2x8x8xf32>
    %427 = math.exp %426 : vector<2x8x8xf32>
    %cst_173 = arith.constant dense<0.000000e+00> : vector<2x8xf32>
    %428 = vector.multi_reduction <add>, %427, %cst_173 [2] : vector<2x8x8xf32> to vector<2x8xf32>
    %429 = vector.shape_cast %428 : vector<2x8xf32> to vector<2x8x1xf32>
    %430 = vector.broadcast %429 : vector<2x8x1xf32> to vector<2x8x8xf32>
    %431 = arith.divf %427, %430 : vector<2x8x8xf32>
    "tpu.trace_start"() <{level = 10 : i32, message = "bqk,bkd->bqd"}> : () -> ()
    %cst_174 = arith.constant dense<0.000000e+00> : vector<2x8x8xf32>
    %432 = tpu.matmul %431, %415, %cst_174 {dimension_numbers = #tpu.dot_dimension_numbers<[2], [1], [1], [2], [0, 0, 0, 1, 1, 2], [0], [0]>} : vector<2x8x8xf32>, vector<2x8x8xf32>, vector<2x8x8xf32> -> vector<2x8x8xf32>
    "tpu.trace_stop"() : () -> ()
    %433 = vector.shape_cast %432 : vector<2x8x8xf32> to vector<16x8xf32>
    %434 = vector.extract_strided_slice %298 {offsets = [2, 0, 0], sizes = [1, 8, 32], strides = [1, 1, 1]} : vector<4x8x32xf32> to vector<1x8x32xf32>
    %435 = vector.shape_cast %434 : vector<1x8x32xf32> to vector<8x32xf32>
    %cst_175 = arith.constant dense<0.000000e+00> : vector<16x32xf32>
    %436 = tpu.matmul %433, %435, %cst_175 {dimension_numbers = #tpu.dot_dimension_numbers<[1], [0], [0], [1], [0, 0, 1, 1], [], []>} : vector<16x8xf32>, vector<8x32xf32>, vector<16x32xf32> -> vector<16x32xf32>
    %437 = arith.addf %391, %436 : vector<16x32xf32>
    %438 = vector.extract_strided_slice %286 {offsets = [3, 0, 0], sizes = [1, 32, 8], strides = [1, 1, 1]} : vector<4x32x8xf32> to vector<1x32x8xf32>
    %439 = vector.shape_cast %438 : vector<1x32x8xf32> to vector<32x8xf32>
    %cst_176 = arith.constant dense<0.000000e+00> : vector<16x8xf32>
    %440 = tpu.matmul %280, %439, %cst_176 {dimension_numbers = #tpu.dot_dimension_numbers<[1], [0], [0], [1], [0, 0, 1, 1], [], []>} : vector<16x32xf32>, vector<32x8xf32>, vector<16x8xf32> -> vector<16x8xf32>
    %441 = vector.extract_strided_slice %288 {offsets = [3, 0, 0], sizes = [1, 1, 8], strides = [1, 1, 1]} : vector<4x1x8xf32> to vector<1x1x8xf32>
    %442 = vector.shape_cast %441 : vector<1x1x8xf32> to vector<1x8xf32>
    %443 = vector.broadcast %442 : vector<1x8xf32> to vector<16x8xf32>
    %444 = arith.addf %440, %443 : vector<16x8xf32>
    %445 = vector.extract_strided_slice %290 {offsets = [3, 0, 0], sizes = [1, 32, 8], strides = [1, 1, 1]} : vector<4x32x8xf32> to vector<1x32x8xf32>
    %446 = vector.shape_cast %445 : vector<1x32x8xf32> to vector<32x8xf32>
    %cst_177 = arith.constant dense<0.000000e+00> : vector<16x8xf32>
    %447 = tpu.matmul %280, %446, %cst_177 {dimension_numbers = #tpu.dot_dimension_numbers<[1], [0], [0], [1], [0, 0, 1, 1], [], []>} : vector<16x32xf32>, vector<32x8xf32>, vector<16x8xf32> -> vector<16x8xf32>
    %448 = vector.extract_strided_slice %292 {offsets = [3, 0, 0], sizes = [1, 1, 8], strides = [1, 1, 1]} : vector<4x1x8xf32> to vector<1x1x8xf32>
    %449 = vector.shape_cast %448 : vector<1x1x8xf32> to vector<1x8xf32>
    %450 = vector.broadcast %449 : vector<1x8xf32> to vector<16x8xf32>
    %451 = arith.addf %447, %450 : vector<16x8xf32>
    %452 = vector.extract_strided_slice %294 {offsets = [3, 0, 0], sizes = [1, 32, 8], strides = [1, 1, 1]} : vector<4x32x8xf32> to vector<1x32x8xf32>
    %453 = vector.shape_cast %452 : vector<1x32x8xf32> to vector<32x8xf32>
    %cst_178 = arith.constant dense<0.000000e+00> : vector<16x8xf32>
    %454 = tpu.matmul %280, %453, %cst_178 {dimension_numbers = #tpu.dot_dimension_numbers<[1], [0], [0], [1], [0, 0, 1, 1], [], []>} : vector<16x32xf32>, vector<32x8xf32>, vector<16x8xf32> -> vector<16x8xf32>
    %455 = vector.extract_strided_slice %296 {offsets = [3, 0, 0], sizes = [1, 1, 8], strides = [1, 1, 1]} : vector<4x1x8xf32> to vector<1x1x8xf32>
    %456 = vector.shape_cast %455 : vector<1x1x8xf32> to vector<1x8xf32>
    %457 = vector.broadcast %456 : vector<1x8xf32> to vector<16x8xf32>
    %458 = arith.addf %454, %457 : vector<16x8xf32>
    %459 = vector.shape_cast %444 : vector<16x8xf32> to vector<2x8x8xf32>
    %460 = vector.shape_cast %451 : vector<16x8xf32> to vector<2x8x8xf32>
    %461 = vector.shape_cast %458 : vector<16x8xf32> to vector<2x8x8xf32>
    "tpu.trace_start"() <{level = 10 : i32, message = "bqd,bkd->bqk"}> : () -> ()
    %cst_179 = arith.constant dense<0.000000e+00> : vector<2x8x8xf32>
    %462 = tpu.matmul %459, %460, %cst_179 {dimension_numbers = #tpu.dot_dimension_numbers<[2], [2], [1], [1], [0, 0, 0, 1, 1, 1], [0], [0]>} : vector<2x8x8xf32>, vector<2x8x8xf32>, vector<2x8x8xf32> -> vector<2x8x8xf32>
    "tpu.trace_stop"() : () -> ()
    %cst_180 = arith.constant 0.353553385 : f32
    %463 = vector.broadcast %cst_180 : f32 to vector<2x8x8xf32>
    %464 = arith.mulf %462, %463 : vector<2x8x8xf32>
    %cst_181 = arith.constant -1.000000e+04 : f32
    %465 = vector.shape_cast %5 : vector<2x1x8xi1> to vector<2x1x8xi1>
    %466 = vector.broadcast %465 : vector<2x1x8xi1> to vector<2x8x8xi1>
    %467 = vector.broadcast %cst_181 : f32 to vector<2x8x8xf32>
    %468 = arith.select %466, %464, %467 : vector<2x8x8xi1>, vector<2x8x8xf32>
    %cst_182 = arith.constant dense<0xFF800000> : vector<2x8xf32>
    %469 = vector.multi_reduction <maximumf>, %468, %cst_182 [2] : vector<2x8x8xf32> to vector<2x8xf32>
    %470 = vector.shape_cast %469 : vector<2x8xf32> to vector<2x8x1xf32>
    %471 = vector.broadcast %470 : vector<2x8x1xf32> to vector<2x8x8xf32>
    %472 = arith.subf %468, %471 : vector<2x8x8xf32>
    %473 = math.exp %472 : vector<2x8x8xf32>
    %cst_183 = arith.constant dense<0.000000e+00> : vector<2x8xf32>
    %474 = vector.multi_reduction <add>, %473, %cst_183 [2] : vector<2x8x8xf32> to vector<2x8xf32>
    %475 = vector.shape_cast %474 : vector<2x8xf32> to vector<2x8x1xf32>
    %476 = vector.broadcast %475 : vector<2x8x1xf32> to vector<2x8x8xf32>
    %477 = arith.divf %473, %476 : vector<2x8x8xf32>
    "tpu.trace_start"() <{level = 10 : i32, message = "bqk,bkd->bqd"}> : () -> ()
    %cst_184 = arith.constant dense<0.000000e+00> : vector<2x8x8xf32>
    %478 = tpu.matmul %477, %461, %cst_184 {dimension_numbers = #tpu.dot_dimension_numbers<[2], [1], [1], [2], [0, 0, 0, 1, 1, 2], [0], [0]>} : vector<2x8x8xf32>, vector<2x8x8xf32>, vector<2x8x8xf32> -> vector<2x8x8xf32>
    "tpu.trace_stop"() : () -> ()
    %479 = vector.shape_cast %478 : vector<2x8x8xf32> to vector<16x8xf32>
    %480 = vector.extract_strided_slice %298 {offsets = [3, 0, 0], sizes = [1, 8, 32], strides = [1, 1, 1]} : vector<4x8x32xf32> to vector<1x8x32xf32>
    %481 = vector.shape_cast %480 : vector<1x8x32xf32> to vector<8x32xf32>
    %cst_185 = arith.constant dense<0.000000e+00> : vector<16x32xf32>
    %482 = tpu.matmul %479, %481, %cst_185 {dimension_numbers = #tpu.dot_dimension_numbers<[1], [0], [0], [1], [0, 0, 1, 1], [], []>} : vector<16x8xf32>, vector<8x32xf32>, vector<16x32xf32> -> vector<16x32xf32>
    %483 = arith.addf %437, %482 : vector<16x32xf32>
    %484 = vector.broadcast %300 : vector<1x32xf32> to vector<16x32xf32>
    %485 = arith.addf %483, %484 : vector<16x32xf32>
    %486 = arith.addf %485, %280 : vector<16x32xf32>
    %487 = vector.extract_strided_slice %282 {offsets = [0, 0, 0], sizes = [1, 1, 32], strides = [1, 1, 1]} : vector<2x1x32xf32> to vector<1x1x32xf32>
    %488 = vector.shape_cast %487 : vector<1x1x32xf32> to vector<1x32xf32>
    %489 = vector.extract_strided_slice %282 {offsets = [1, 0, 0], sizes = [1, 1, 32], strides = [1, 1, 1]} : vector<2x1x32xf32> to vector<1x1x32xf32>
    %490 = vector.shape_cast %489 : vector<1x1x32xf32> to vector<1x32xf32>
    %cst_186 = arith.constant dense<0.000000e+00> : vector<16xf32>
    %491 = vector.multi_reduction <add>, %486, %cst_186 [1] : vector<16x32xf32> to vector<16xf32>
    %492 = vector.shape_cast %491 : vector<16xf32> to vector<16x1xf32>
    %cst_187 = arith.constant 3.200000e+01 : f32
    %493 = vector.broadcast %cst_187 : f32 to vector<16x1xf32>
    %494 = arith.divf %492, %493 : vector<16x1xf32>
    %495 = vector.broadcast %494 : vector<16x1xf32> to vector<16x32xf32>
    %496 = arith.subf %486, %495 : vector<16x32xf32>
    %497 = arith.mulf %496, %496 : vector<16x32xf32>
    %cst_188 = arith.constant dense<0.000000e+00> : vector<16xf32>
    %498 = vector.multi_reduction <add>, %497, %cst_188 [1] : vector<16x32xf32> to vector<16xf32>
    %499 = vector.shape_cast %498 : vector<16xf32> to vector<16x1xf32>
    %cst_189 = arith.constant 3.200000e+01 : f32
    %500 = vector.broadcast %cst_189 : f32 to vector<16x1xf32>
    %501 = arith.divf %499, %500 : vector<16x1xf32>
    %502 = vector.broadcast %494 : vector<16x1xf32> to vector<16x32xf32>
    %503 = arith.subf %486, %502 : vector<16x32xf32>
    %cst_190 = arith.constant 9.99999974E-6 : f32
    %504 = vector.broadcast %cst_190 : f32 to vector<16x1xf32>
    %505 = arith.addf %501, %504 : vector<16x1xf32>
    %506 = math.rsqrt %505 : vector<16x1xf32>
    %507 = vector.broadcast %506 : vector<16x1xf32> to vector<16x32xf32>
    %508 = arith.mulf %503, %507 : vector<16x32xf32>
    %509 = vector.broadcast %488 : vector<1x32xf32> to vector<16x32xf32>
    %510 = arith.mulf %508, %509 : vector<16x32xf32>
    %511 = vector.broadcast %490 : vector<1x32xf32> to vector<16x32xf32>
    %512 = arith.addf %510, %511 : vector<16x32xf32>
    %c1_191 = arith.constant 1 : index
    %c0_192 = arith.constant 0 : index
    %c0_193 = arith.constant 0 : index
    %513 = vector.load %arg13[%c1_191, %c0_192, %c0_193] : memref<2x32x64xf32, #tpu.memory_space<vmem>>, vector<1x32x64xf32>
    %514 = vector.shape_cast %513 : vector<1x32x64xf32> to vector<32x64xf32>
    %cst_194 = arith.constant dense<0.000000e+00> : vector<16x64xf32>
    %515 = tpu.matmul %512, %514, %cst_194 {dimension_numbers = #tpu.dot_dimension_numbers<[1], [0], [0], [1], [0, 0, 1, 1], [], []>} : vector<16x32xf32>, vector<32x64xf32>, vector<16x64xf32> -> vector<16x64xf32>
    %c1_195 = arith.constant 1 : index
    %c0_196 = arith.constant 0 : index
    %c0_197 = arith.constant 0 : index
    %516 = vector.load %arg14[%c1_195, %c0_196, %c0_197] : memref<2x1x64xf32, #tpu.memory_space<vmem>>, vector<1x1x64xf32>
    %517 = vector.shape_cast %516 : vector<1x1x64xf32> to vector<1x64xf32>
    %518 = vector.broadcast %517 : vector<1x64xf32> to vector<16x64xf32>
    %519 = arith.addf %515, %518 : vector<16x64xf32>
    %cst_198 = arith.constant 0.000000e+00 : f32
    %520 = vector.broadcast %cst_198 : f32 to vector<16x64xf32>
    %521 = arith.maximumf %519, %520 : vector<16x64xf32>
    %c1_199 = arith.constant 1 : index
    %c0_200 = arith.constant 0 : index
    %c0_201 = arith.constant 0 : index
    %522 = vector.load %arg15[%c1_199, %c0_200, %c0_201] : memref<2x64x32xf32, #tpu.memory_space<vmem>>, vector<1x64x32xf32>
    %523 = vector.shape_cast %522 : vector<1x64x32xf32> to vector<64x32xf32>
    %cst_202 = arith.constant dense<0.000000e+00> : vector<16x32xf32>
    %524 = tpu.matmul %521, %523, %cst_202 {dimension_numbers = #tpu.dot_dimension_numbers<[1], [0], [0], [1], [0, 0, 1, 1], [], []>} : vector<16x64xf32>, vector<64x32xf32>, vector<16x32xf32> -> vector<16x32xf32>
    %c1_203 = arith.constant 1 : index
    %c0_204 = arith.constant 0 : index
    %c0_205 = arith.constant 0 : index
    %525 = vector.load %arg16[%c1_203, %c0_204, %c0_205] : memref<2x1x32xf32, #tpu.memory_space<vmem>>, vector<1x1x32xf32>
    %526 = vector.shape_cast %525 : vector<1x1x32xf32> to vector<1x32xf32>
    %527 = vector.broadcast %526 : vector<1x32xf32> to vector<16x32xf32>
    %528 = arith.addf %524, %527 : vector<16x32xf32>
    %529 = arith.addf %528, %512 : vector<16x32xf32>
    %530 = vector.extract_strided_slice %284 {offsets = [0, 0, 0], sizes = [1, 1, 32], strides = [1, 1, 1]} : vector<2x1x32xf32> to vector<1x1x32xf32>
    %531 = vector.shape_cast %530 : vector<1x1x32xf32> to vector<1x32xf32>
    %532 = vector.extract_strided_slice %284 {offsets = [1, 0, 0], sizes = [1, 1, 32], strides = [1, 1, 1]} : vector<2x1x32xf32> to vector<1x1x32xf32>
    %533 = vector.shape_cast %532 : vector<1x1x32xf32> to vector<1x32xf32>
    %cst_206 = arith.constant dense<0.000000e+00> : vector<16xf32>
    %534 = vector.multi_reduction <add>, %529, %cst_206 [1] : vector<16x32xf32> to vector<16xf32>
    %535 = vector.shape_cast %534 : vector<16xf32> to vector<16x1xf32>
    %cst_207 = arith.constant 3.200000e+01 : f32
    %536 = vector.broadcast %cst_207 : f32 to vector<16x1xf32>
    %537 = arith.divf %535, %536 : vector<16x1xf32>
    %538 = vector.broadcast %537 : vector<16x1xf32> to vector<16x32xf32>
    %539 = arith.subf %529, %538 : vector<16x32xf32>
    %540 = arith.mulf %539, %539 : vector<16x32xf32>
    %cst_208 = arith.constant dense<0.000000e+00> : vector<16xf32>
    %541 = vector.multi_reduction <add>, %540, %cst_208 [1] : vector<16x32xf32> to vector<16xf32>
    %542 = vector.shape_cast %541 : vector<16xf32> to vector<16x1xf32>
    %cst_209 = arith.constant 3.200000e+01 : f32
    %543 = vector.broadcast %cst_209 : f32 to vector<16x1xf32>
    %544 = arith.divf %542, %543 : vector<16x1xf32>
    %545 = vector.broadcast %537 : vector<16x1xf32> to vector<16x32xf32>
    %546 = arith.subf %529, %545 : vector<16x32xf32>
    %cst_210 = arith.constant 9.99999974E-6 : f32
    %547 = vector.broadcast %cst_210 : f32 to vector<16x1xf32>
    %548 = arith.addf %544, %547 : vector<16x1xf32>
    %549 = math.rsqrt %548 : vector<16x1xf32>
    %550 = vector.broadcast %549 : vector<16x1xf32> to vector<16x32xf32>
    %551 = arith.mulf %546, %550 : vector<16x32xf32>
    %552 = vector.broadcast %531 : vector<1x32xf32> to vector<16x32xf32>
    %553 = arith.mulf %551, %552 : vector<16x32xf32>
    %554 = vector.broadcast %533 : vector<1x32xf32> to vector<16x32xf32>
    %555 = arith.addf %553, %554 : vector<16x32xf32>
    %556 = vector.shape_cast %555 : vector<16x32xf32> to vector<2x8x32xf32>
    %557 = vector.extract_strided_slice %556 {offsets = [0, 0, 0], sizes = [2, 1, 32], strides = [1, 1, 1]} : vector<2x8x32xf32> to vector<2x1x32xf32>
    %c0_211 = arith.constant 0 : index
    %c0_212 = arith.constant 0 : index
    %c0_213 = arith.constant 0 : index
    %558 = vector.load %arg40[%c0_211, %c0_212, %c0_213] : memref<2x1x32xf32, #tpu.memory_space<vmem>>, vector<2x1x32xf32>
    tpu.vector_store %arg40[%c0_211, %c0_212, %c0_213], %557 {strides = array<i32>} : memref<2x1x32xf32, #tpu.memory_space<vmem>>, vector<2x1x32xf32>,
    %559 = vector.shape_cast %557 : vector<2x1x32xf32> to vector<2x32xf32>
    %c0_214 = arith.constant 0 : index
    %c0_215 = arith.constant 0 : index
    %c0_216 = arith.constant 0 : index
    %560 = vector.load %arg1[%c0_214, %c0_215, %c0_216] : memref<2x8x32xf32, #tpu.memory_space<vmem>>, vector<2x8x32xf32>
    %561 = vector.shape_cast %560 : vector<2x8x32xf32> to vector<16x32xf32>
    %c0_217 = arith.constant 0 : index
    %c0_218 = arith.constant 0 : index
    %562 = vector.load %arg3[%c0_217, %c0_218] : memref<2x8xf32, #tpu.memory_space<vmem>>, vector<2x8xf32>
    %cst_219 = arith.constant 0.000000e+00 : f32
    %563 = vector.broadcast %cst_219 : f32 to vector<2x8xf32>
    %564 = arith.cmpf one, %562, %563 : vector<2x8xf32>
    %565 = vector.shape_cast %564 : vector<2x8xi1> to vector<2x1x8xi1>
    %566 = tpu.iota {dimensions = array<i32: 0>} : vector<8x8xi32>
    %567 = tpu.iota {dimensions = array<i32: 1>} : vector<8x8xi32>
    %568 = arith.cmpi sle, %567, %566 : vector<8x8xi32>
    %569 = vector.shape_cast %568 : vector<8x8xi1> to vector<1x8x8xi1>
    %570 = vector.broadcast %569 : vector<1x8x8xi1> to vector<2x8x8xi1>
    %571 = vector.broadcast %565 : vector<2x1x8xi1> to vector<2x8x8xi1>
    %572 = arith.andi %570, %571 : vector<2x8x8xi1>
    %c0_220 = arith.constant 0 : index
    %c0_221 = arith.constant 0 : index
    %c0_222 = arith.constant 0 : index
    %c0_223 = arith.constant 0 : index
    %573 = vector.load %arg26[%c0_220, %c0_221, %c0_222, %c0_223] : memref<2x2x1x32xf32, #tpu.memory_space<vmem>>, vector<1x2x1x32xf32>
    %574 = vector.shape_cast %573 : vector<1x2x1x32xf32> to vector<2x1x32xf32>
    %c0_224 = arith.constant 0 : index
    %c0_225 = arith.constant 0 : index
    %c0_226 = arith.constant 0 : index
    %c0_227 = arith.constant 0 : index
    %575 = vector.load %arg31[%c0_224, %c0_225, %c0_226, %c0_227] : memref<2x2x1x32xf32, #tpu.memory_space<vmem>>, vector<1x2x1x32xf32>
    %576 = vector.shape_cast %575 : vector<1x2x1x32xf32> to vector<2x1x32xf32>
    %c0_228 = arith.constant 0 : index
    %c0_229 = arith.constant 0 : index
    %c0_230 = arith.constant 0 : index
    %c0_231 = arith.constant 0 : index
    %577 = vector.load %arg36[%c0_228, %c0_229, %c0_230, %c0_231] : memref<2x2x1x32xf32, #tpu.memory_space<vmem>>, vector<1x2x1x32xf32>
    %578 = vector.shape_cast %577 : vector<1x2x1x32xf32> to vector<2x1x32xf32>
    %c0_232 = arith.constant 0 : index
    %c0_233 = arith.constant 0 : index
    %c0_234 = arith.constant 0 : index
    %c0_235 = arith.constant 0 : index
    %579 = vector.load %arg18[%c0_232, %c0_233, %c0_234, %c0_235] : memref<2x4x32x8xf32, #tpu.memory_space<vmem>>, vector<1x4x32x8xf32>
    %580 = vector.shape_cast %579 : vector<1x4x32x8xf32> to vector<4x32x8xf32>
    %c0_236 = arith.constant 0 : index
    %c0_237 = arith.constant 0 : index
    %c0_238 = arith.constant 0 : index
    %c0_239 = arith.constant 0 : index
    %581 = vector.load %arg19[%c0_236, %c0_237, %c0_238, %c0_239] : memref<2x4x1x8xf32, #tpu.memory_space<vmem>>, vector<1x4x1x8xf32>
    %582 = vector.shape_cast %581 : vector<1x4x1x8xf32> to vector<4x1x8xf32>
    %c0_240 = arith.constant 0 : index
    %c0_241 = arith.constant 0 : index
    %c0_242 = arith.constant 0 : index
    %c0_243 = arith.constant 0 : index
    %583 = vector.load %arg20[%c0_240, %c0_241, %c0_242, %c0_243] : memref<2x4x32x8xf32, #tpu.memory_space<vmem>>, vector<1x4x32x8xf32>
    %584 = vector.shape_cast %583 : vector<1x4x32x8xf32> to vector<4x32x8xf32>
    %c0_244 = arith.constant 0 : index
    %c0_245 = arith.constant 0 : index
    %c0_246 = arith.constant 0 : index
    %c0_247 = arith.constant 0 : index
    %585 = vector.load %arg21[%c0_244, %c0_245, %c0_246, %c0_247] : memref<2x4x1x8xf32, #tpu.memory_space<vmem>>, vector<1x4x1x8xf32>
    %586 = vector.shape_cast %585 : vector<1x4x1x8xf32> to vector<4x1x8xf32>
    %c0_248 = arith.constant 0 : index
    %c0_249 = arith.constant 0 : index
    %c0_250 = arith.constant 0 : index
    %c0_251 = arith.constant 0 : index
    %587 = vector.load %arg22[%c0_248, %c0_249, %c0_250, %c0_251] : memref<2x4x32x8xf32, #tpu.memory_space<vmem>>, vector<1x4x32x8xf32>
    %588 = vector.shape_cast %587 : vector<1x4x32x8xf32> to vector<4x32x8xf32>
    %c0_252 = arith.constant 0 : index
    %c0_253 = arith.constant 0 : index
    %c0_254 = arith.constant 0 : index
    %c0_255 = arith.constant 0 : index
    %589 = vector.load %arg23[%c0_252, %c0_253, %c0_254, %c0_255] : memref<2x4x1x8xf32, #tpu.memory_space<vmem>>, vector<1x4x1x8xf32>
    %590 = vector.shape_cast %589 : vector<1x4x1x8xf32> to vector<4x1x8xf32>
    %c0_256 = arith.constant 0 : index
    %c0_257 = arith.constant 0 : index
    %c0_258 = arith.constant 0 : index
    %c0_259 = arith.constant 0 : index
    %591 = vector.load %arg24[%c0_256, %c0_257, %c0_258, %c0_259] : memref<2x4x8x32xf32, #tpu.memory_space<vmem>>, vector<1x4x8x32xf32>
    %592 = vector.shape_cast %591 : vector<1x4x8x32xf32> to vector<4x8x32xf32>
    %c0_260 = arith.constant 0 : index
    %c0_261 = arith.constant 0 : index
    %c0_262 = arith.constant 0 : index
    %593 = vector.load %arg25[%c0_260, %c0_261, %c0_262] : memref<2x1x32xf32, #tpu.memory_space<vmem>>, vector<1x1x32xf32>
    %594 = vector.shape_cast %593 : vector<1x1x32xf32> to vector<1x32xf32>
    %595 = vector.extract_strided_slice %580 {offsets = [0, 0, 0], sizes = [1, 32, 8], strides = [1, 1, 1]} : vector<4x32x8xf32> to vector<1x32x8xf32>
    %596 = vector.shape_cast %595 : vector<1x32x8xf32> to vector<32x8xf32>
    %cst_263 = arith.constant dense<0.000000e+00> : vector<16x8xf32>
    %597 = tpu.matmul %561, %596, %cst_263 {dimension_numbers = #tpu.dot_dimension_numbers<[1], [0], [0], [1], [0, 0, 1, 1], [], []>} : vector<16x32xf32>, vector<32x8xf32>, vector<16x8xf32> -> vector<16x8xf32>
    %598 = vector.extract_strided_slice %582 {offsets = [0, 0, 0], sizes = [1, 1, 8], strides = [1, 1, 1]} : vector<4x1x8xf32> to vector<1x1x8xf32>
    %599 = vector.shape_cast %598 : vector<1x1x8xf32> to vector<1x8xf32>
    %600 = vector.broadcast %599 : vector<1x8xf32> to vector<16x8xf32>
    %601 = arith.addf %597, %600 : vector<16x8xf32>
    %602 = vector.extract_strided_slice %584 {offsets = [0, 0, 0], sizes = [1, 32, 8], strides = [1, 1, 1]} : vector<4x32x8xf32> to vector<1x32x8xf32>
    %603 = vector.shape_cast %602 : vector<1x32x8xf32> to vector<32x8xf32>
    %cst_264 = arith.constant dense<0.000000e+00> : vector<16x8xf32>
    %604 = tpu.matmul %561, %603, %cst_264 {dimension_numbers = #tpu.dot_dimension_numbers<[1], [0], [0], [1], [0, 0, 1, 1], [], []>} : vector<16x32xf32>, vector<32x8xf32>, vector<16x8xf32> -> vector<16x8xf32>
    %605 = vector.extract_strided_slice %586 {offsets = [0, 0, 0], sizes = [1, 1, 8], strides = [1, 1, 1]} : vector<4x1x8xf32> to vector<1x1x8xf32>
    %606 = vector.shape_cast %605 : vector<1x1x8xf32> to vector<1x8xf32>
    %607 = vector.broadcast %606 : vector<1x8xf32> to vector<16x8xf32>
    %608 = arith.addf %604, %607 : vector<16x8xf32>
    %609 = vector.extract_strided_slice %588 {offsets = [0, 0, 0], sizes = [1, 32, 8], strides = [1, 1, 1]} : vector<4x32x8xf32> to vector<1x32x8xf32>
    %610 = vector.shape_cast %609 : vector<1x32x8xf32> to vector<32x8xf32>
    %cst_265 = arith.constant dense<0.000000e+00> : vector<16x8xf32>
    %611 = tpu.matmul %561, %610, %cst_265 {dimension_numbers = #tpu.dot_dimension_numbers<[1], [0], [0], [1], [0, 0, 1, 1], [], []>} : vector<16x32xf32>, vector<32x8xf32>, vector<16x8xf32> -> vector<16x8xf32>
    %612 = vector.extract_strided_slice %590 {offsets = [0, 0, 0], sizes = [1, 1, 8], strides = [1, 1, 1]} : vector<4x1x8xf32> to vector<1x1x8xf32>
    %613 = vector.shape_cast %612 : vector<1x1x8xf32> to vector<1x8xf32>
    %614 = vector.broadcast %613 : vector<1x8xf32> to vector<16x8xf32>
    %615 = arith.addf %611, %614 : vector<16x8xf32>
    %616 = vector.shape_cast %601 : vector<16x8xf32> to vector<2x8x8xf32>
    %617 = vector.shape_cast %608 : vector<16x8xf32> to vector<2x8x8xf32>
    %618 = vector.shape_cast %615 : vector<16x8xf32> to vector<2x8x8xf32>
    "tpu.trace_start"() <{level = 10 : i32, message = "bqd,bkd->bqk"}> : () -> ()
    %cst_266 = arith.constant dense<0.000000e+00> : vector<2x8x8xf32>
    %619 = tpu.matmul %616, %617, %cst_266 {dimension_numbers = #tpu.dot_dimension_numbers<[2], [2], [1], [1], [0, 0, 0, 1, 1, 1], [0], [0]>} : vector<2x8x8xf32>, vector<2x8x8xf32>, vector<2x8x8xf32> -> vector<2x8x8xf32>
    "tpu.trace_stop"() : () -> ()
    %cst_267 = arith.constant 0.353553385 : f32
    %620 = vector.broadcast %cst_267 : f32 to vector<2x8x8xf32>
    %621 = arith.mulf %619, %620 : vector<2x8x8xf32>
    %cst_268 = arith.constant -1.000000e+04 : f32
    %622 = vector.broadcast %cst_268 : f32 to vector<2x8x8xf32>
    %623 = arith.select %572, %621, %622 : vector<2x8x8xi1>, vector<2x8x8xf32>
    %cst_269 = arith.constant dense<0xFF800000> : vector<2x8xf32>
    %624 = vector.multi_reduction <maximumf>, %623, %cst_269 [2] : vector<2x8x8xf32> to vector<2x8xf32>
    %625 = vector.shape_cast %624 : vector<2x8xf32> to vector<2x8x1xf32>
    %626 = vector.broadcast %625 : vector<2x8x1xf32> to vector<2x8x8xf32>
    %627 = arith.subf %623, %626 : vector<2x8x8xf32>
    %628 = math.exp %627 : vector<2x8x8xf32>
    %cst_270 = arith.constant dense<0.000000e+00> : vector<2x8xf32>
    %629 = vector.multi_reduction <add>, %628, %cst_270 [2] : vector<2x8x8xf32> to vector<2x8xf32>
    %630 = vector.shape_cast %629 : vector<2x8xf32> to vector<2x8x1xf32>
    %631 = vector.broadcast %630 : vector<2x8x1xf32> to vector<2x8x8xf32>
    %632 = arith.divf %628, %631 : vector<2x8x8xf32>
    "tpu.trace_start"() <{level = 10 : i32, message = "bqk,bkd->bqd"}> : () -> ()
    %cst_271 = arith.constant dense<0.000000e+00> : vector<2x8x8xf32>
    %633 = tpu.matmul %632, %618, %cst_271 {dimension_numbers = #tpu.dot_dimension_numbers<[2], [1], [1], [2], [0, 0, 0, 1, 1, 2], [0], [0]>} : vector<2x8x8xf32>, vector<2x8x8xf32>, vector<2x8x8xf32> -> vector<2x8x8xf32>
    "tpu.trace_stop"() : () -> ()
    %634 = vector.shape_cast %633 : vector<2x8x8xf32> to vector<16x8xf32>
    %635 = vector.extract_strided_slice %592 {offsets = [0, 0, 0], sizes = [1, 8, 32], strides = [1, 1, 1]} : vector<4x8x32xf32> to vector<1x8x32xf32>
    %636 = vector.shape_cast %635 : vector<1x8x32xf32> to vector<8x32xf32>
    %cst_272 = arith.constant dense<0.000000e+00> : vector<16x32xf32>
    %637 = tpu.matmul %634, %636, %cst_272 {dimension_numbers = #tpu.dot_dimension_numbers<[1], [0], [0], [1], [0, 0, 1, 1], [], []>} : vector<16x8xf32>, vector<8x32xf32>, vector<16x32xf32> -> vector<16x32xf32>
    %638 = vector.extract_strided_slice %580 {offsets = [1, 0, 0], sizes = [1, 32, 8], strides = [1, 1, 1]} : vector<4x32x8xf32> to vector<1x32x8xf32>
    %639 = vector.shape_cast %638 : vector<1x32x8xf32> to vector<32x8xf32>
    %cst_273 = arith.constant dense<0.000000e+00> : vector<16x8xf32>
    %640 = tpu.matmul %561, %639, %cst_273 {dimension_numbers = #tpu.dot_dimension_numbers<[1], [0], [0], [1], [0, 0, 1, 1], [], []>} : vector<16x32xf32>, vector<32x8xf32>, vector<16x8xf32> -> vector<16x8xf32>
    %641 = vector.extract_strided_slice %582 {offsets = [1, 0, 0], sizes = [1, 1, 8], strides = [1, 1, 1]} : vector<4x1x8xf32> to vector<1x1x8xf32>
    %642 = vector.shape_cast %641 : vector<1x1x8xf32> to vector<1x8xf32>
    %643 = vector.broadcast %642 : vector<1x8xf32> to vector<16x8xf32>
    %644 = arith.addf %640, %643 : vector<16x8xf32>
    %645 = vector.extract_strided_slice %584 {offsets = [1, 0, 0], sizes = [1, 32, 8], strides = [1, 1, 1]} : vector<4x32x8xf32> to vector<1x32x8xf32>
    %646 = vector.shape_cast %645 : vector<1x32x8xf32> to vector<32x8xf32>
    %cst_274 = arith.constant dense<0.000000e+00> : vector<16x8xf32>
    %647 = tpu.matmul %561, %646, %cst_274 {dimension_numbers = #tpu.dot_dimension_numbers<[1], [0], [0], [1], [0, 0, 1, 1], [], []>} : vector<16x32xf32>, vector<32x8xf32>, vector<16x8xf32> -> vector<16x8xf32>
    %648 = vector.extract_strided_slice %586 {offsets = [1, 0, 0], sizes = [1, 1, 8], strides = [1, 1, 1]} : vector<4x1x8xf32> to vector<1x1x8xf32>
    %649 = vector.shape_cast %648 : vector<1x1x8xf32> to vector<1x8xf32>
    %650 = vector.broadcast %649 : vector<1x8xf32> to vector<16x8xf32>
    %651 = arith.addf %647, %650 : vector<16x8xf32>
    %652 = vector.extract_strided_slice %588 {offsets = [1, 0, 0], sizes = [1, 32, 8], strides = [1, 1, 1]} : vector<4x32x8xf32> to vector<1x32x8xf32>
    %653 = vector.shape_cast %652 : vector<1x32x8xf32> to vector<32x8xf32>
    %cst_275 = arith.constant dense<0.000000e+00> : vector<16x8xf32>
    %654 = tpu.matmul %561, %653, %cst_275 {dimension_numbers = #tpu.dot_dimension_numbers<[1], [0], [0], [1], [0, 0, 1, 1], [], []>} : vector<16x32xf32>, vector<32x8xf32>, vector<16x8xf32> -> vector<16x8xf32>
    %655 = vector.extract_strided_slice %590 {offsets = [1, 0, 0], sizes = [1, 1, 8], strides = [1, 1, 1]} : vector<4x1x8xf32> to vector<1x1x8xf32>
    %656 = vector.shape_cast %655 : vector<1x1x8xf32> to vector<1x8xf32>
    %657 = vector.broadcast %656 : vector<1x8xf32> to vector<16x8xf32>
    %658 = arith.addf %654, %657 : vector<16x8xf32>
    %659 = vector.shape_cast %644 : vector<16x8xf32> to vector<2x8x8xf32>
    %660 = vector.shape_cast %651 : vector<16x8xf32> to vector<2x8x8xf32>
    %661 = vector.shape_cast %658 : vector<16x8xf32> to vector<2x8x8xf32>
    "tpu.trace_start"() <{level = 10 : i32, message = "bqd,bkd->bqk"}> : () -> ()
    %cst_276 = arith.constant dense<0.000000e+00> : vector<2x8x8xf32>
    %662 = tpu.matmul %659, %660, %cst_276 {dimension_numbers = #tpu.dot_dimension_numbers<[2], [2], [1], [1], [0, 0, 0, 1, 1, 1], [0], [0]>} : vector<2x8x8xf32>, vector<2x8x8xf32>, vector<2x8x8xf32> -> vector<2x8x8xf32>
    "tpu.trace_stop"() : () -> ()
    %cst_277 = arith.constant 0.353553385 : f32
    %663 = vector.broadcast %cst_277 : f32 to vector<2x8x8xf32>
    %664 = arith.mulf %662, %663 : vector<2x8x8xf32>
    %cst_278 = arith.constant -1.000000e+04 : f32
    %665 = vector.broadcast %cst_278 : f32 to vector<2x8x8xf32>
    %666 = arith.select %572, %664, %665 : vector<2x8x8xi1>, vector<2x8x8xf32>
    %cst_279 = arith.constant dense<0xFF800000> : vector<2x8xf32>
    %667 = vector.multi_reduction <maximumf>, %666, %cst_279 [2] : vector<2x8x8xf32> to vector<2x8xf32>
    %668 = vector.shape_cast %667 : vector<2x8xf32> to vector<2x8x1xf32>
    %669 = vector.broadcast %668 : vector<2x8x1xf32> to vector<2x8x8xf32>
    %670 = arith.subf %666, %669 : vector<2x8x8xf32>
    %671 = math.exp %670 : vector<2x8x8xf32>
    %cst_280 = arith.constant dense<0.000000e+00> : vector<2x8xf32>
    %672 = vector.multi_reduction <add>, %671, %cst_280 [2] : vector<2x8x8xf32> to vector<2x8xf32>
    %673 = vector.shape_cast %672 : vector<2x8xf32> to vector<2x8x1xf32>
    %674 = vector.broadcast %673 : vector<2x8x1xf32> to vector<2x8x8xf32>
    %675 = arith.divf %671, %674 : vector<2x8x8xf32>
    "tpu.trace_start"() <{level = 10 : i32, message = "bqk,bkd->bqd"}> : () -> ()
    %cst_281 = arith.constant dense<0.000000e+00> : vector<2x8x8xf32>
    %676 = tpu.matmul %675, %661, %cst_281 {dimension_numbers = #tpu.dot_dimension_numbers<[2], [1], [1], [2], [0, 0, 0, 1, 1, 2], [0], [0]>} : vector<2x8x8xf32>, vector<2x8x8xf32>, vector<2x8x8xf32> -> vector<2x8x8xf32>
    "tpu.trace_stop"() : () -> ()
    %677 = vector.shape_cast %676 : vector<2x8x8xf32> to vector<16x8xf32>
    %678 = vector.extract_strided_slice %592 {offsets = [1, 0, 0], sizes = [1, 8, 32], strides = [1, 1, 1]} : vector<4x8x32xf32> to vector<1x8x32xf32>
    %679 = vector.shape_cast %678 : vector<1x8x32xf32> to vector<8x32xf32>
    %cst_282 = arith.constant dense<0.000000e+00> : vector<16x32xf32>
    %680 = tpu.matmul %677, %679, %cst_282 {dimension_numbers = #tpu.dot_dimension_numbers<[1], [0], [0], [1], [0, 0, 1, 1], [], []>} : vector<16x8xf32>, vector<8x32xf32>, vector<16x32xf32> -> vector<16x32xf32>
    %681 = arith.addf %637, %680 : vector<16x32xf32>
    %682 = vector.extract_strided_slice %580 {offsets = [2, 0, 0], sizes = [1, 32, 8], strides = [1, 1, 1]} : vector<4x32x8xf32> to vector<1x32x8xf32>
    %683 = vector.shape_cast %682 : vector<1x32x8xf32> to vector<32x8xf32>
    %cst_283 = arith.constant dense<0.000000e+00> : vector<16x8xf32>
    %684 = tpu.matmul %561, %683, %cst_283 {dimension_numbers = #tpu.dot_dimension_numbers<[1], [0], [0], [1], [0, 0, 1, 1], [], []>} : vector<16x32xf32>, vector<32x8xf32>, vector<16x8xf32> -> vector<16x8xf32>
    %685 = vector.extract_strided_slice %582 {offsets = [2, 0, 0], sizes = [1, 1, 8], strides = [1, 1, 1]} : vector<4x1x8xf32> to vector<1x1x8xf32>
    %686 = vector.shape_cast %685 : vector<1x1x8xf32> to vector<1x8xf32>
    %687 = vector.broadcast %686 : vector<1x8xf32> to vector<16x8xf32>
    %688 = arith.addf %684, %687 : vector<16x8xf32>
    %689 = vector.extract_strided_slice %584 {offsets = [2, 0, 0], sizes = [1, 32, 8], strides = [1, 1, 1]} : vector<4x32x8xf32> to vector<1x32x8xf32>
    %690 = vector.shape_cast %689 : vector<1x32x8xf32> to vector<32x8xf32>
    %cst_284 = arith.constant dense<0.000000e+00> : vector<16x8xf32>
    %691 = tpu.matmul %561, %690, %cst_284 {dimension_numbers = #tpu.dot_dimension_numbers<[1], [0], [0], [1], [0, 0, 1, 1], [], []>} : vector<16x32xf32>, vector<32x8xf32>, vector<16x8xf32> -> vector<16x8xf32>
    %692 = vector.extract_strided_slice %586 {offsets = [2, 0, 0], sizes = [1, 1, 8], strides = [1, 1, 1]} : vector<4x1x8xf32> to vector<1x1x8xf32>
    %693 = vector.shape_cast %692 : vector<1x1x8xf32> to vector<1x8xf32>
    %694 = vector.broadcast %693 : vector<1x8xf32> to vector<16x8xf32>
    %695 = arith.addf %691, %694 : vector<16x8xf32>
    %696 = vector.extract_strided_slice %588 {offsets = [2, 0, 0], sizes = [1, 32, 8], strides = [1, 1, 1]} : vector<4x32x8xf32> to vector<1x32x8xf32>
    %697 = vector.shape_cast %696 : vector<1x32x8xf32> to vector<32x8xf32>
    %cst_285 = arith.constant dense<0.000000e+00> : vector<16x8xf32>
    %698 = tpu.matmul %561, %697, %cst_285 {dimension_numbers = #tpu.dot_dimension_numbers<[1], [0], [0], [1], [0, 0, 1, 1], [], []>} : vector<16x32xf32>, vector<32x8xf32>, vector<16x8xf32> -> vector<16x8xf32>
    %699 = vector.extract_strided_slice %590 {offsets = [2, 0, 0], sizes = [1, 1, 8], strides = [1, 1, 1]} : vector<4x1x8xf32> to vector<1x1x8xf32>
    %700 = vector.shape_cast %699 : vector<1x1x8xf32> to vector<1x8xf32>
    %701 = vector.broadcast %700 : vector<1x8xf32> to vector<16x8xf32>
    %702 = arith.addf %698, %701 : vector<16x8xf32>
    %703 = vector.shape_cast %688 : vector<16x8xf32> to vector<2x8x8xf32>
    %704 = vector.shape_cast %695 : vector<16x8xf32> to vector<2x8x8xf32>
    %705 = vector.shape_cast %702 : vector<16x8xf32> to vector<2x8x8xf32>
    "tpu.trace_start"() <{level = 10 : i32, message = "bqd,bkd->bqk"}> : () -> ()
    %cst_286 = arith.constant dense<0.000000e+00> : vector<2x8x8xf32>
    %706 = tpu.matmul %703, %704, %cst_286 {dimension_numbers = #tpu.dot_dimension_numbers<[2], [2], [1], [1], [0, 0, 0, 1, 1, 1], [0], [0]>} : vector<2x8x8xf32>, vector<2x8x8xf32>, vector<2x8x8xf32> -> vector<2x8x8xf32>
    "tpu.trace_stop"() : () -> ()
    %cst_287 = arith.constant 0.353553385 : f32
    %707 = vector.broadcast %cst_287 : f32 to vector<2x8x8xf32>
    %708 = arith.mulf %706, %707 : vector<2x8x8xf32>
    %cst_288 = arith.constant -1.000000e+04 : f32
    %709 = vector.broadcast %cst_288 : f32 to vector<2x8x8xf32>
    %710 = arith.select %572, %708, %709 : vector<2x8x8xi1>, vector<2x8x8xf32>
    %cst_289 = arith.constant dense<0xFF800000> : vector<2x8xf32>
    %711 = vector.multi_reduction <maximumf>, %710, %cst_289 [2] : vector<2x8x8xf32> to vector<2x8xf32>
    %712 = vector.shape_cast %711 : vector<2x8xf32> to vector<2x8x1xf32>
    %713 = vector.broadcast %712 : vector<2x8x1xf32> to vector<2x8x8xf32>
    %714 = arith.subf %710, %713 : vector<2x8x8xf32>
    %715 = math.exp %714 : vector<2x8x8xf32>
    %cst_290 = arith.constant dense<0.000000e+00> : vector<2x8xf32>
    %716 = vector.multi_reduction <add>, %715, %cst_290 [2] : vector<2x8x8xf32> to vector<2x8xf32>
    %717 = vector.shape_cast %716 : vector<2x8xf32> to vector<2x8x1xf32>
    %718 = vector.broadcast %717 : vector<2x8x1xf32> to vector<2x8x8xf32>
    %719 = arith.divf %715, %718 : vector<2x8x8xf32>
    "tpu.trace_start"() <{level = 10 : i32, message = "bqk,bkd->bqd"}> : () -> ()
    %cst_291 = arith.constant dense<0.000000e+00> : vector<2x8x8xf32>
    %720 = tpu.matmul %719, %705, %cst_291 {dimension_numbers = #tpu.dot_dimension_numbers<[2], [1], [1], [2], [0, 0, 0, 1, 1, 2], [0], [0]>} : vector<2x8x8xf32>, vector<2x8x8xf32>, vector<2x8x8xf32> -> vector<2x8x8xf32>
    "tpu.trace_stop"() : () -> ()
    %721 = vector.shape_cast %720 : vector<2x8x8xf32> to vector<16x8xf32>
    %722 = vector.extract_strided_slice %592 {offsets = [2, 0, 0], sizes = [1, 8, 32], strides = [1, 1, 1]} : vector<4x8x32xf32> to vector<1x8x32xf32>
    %723 = vector.shape_cast %722 : vector<1x8x32xf32> to vector<8x32xf32>
    %cst_292 = arith.constant dense<0.000000e+00> : vector<16x32xf32>
    %724 = tpu.matmul %721, %723, %cst_292 {dimension_numbers = #tpu.dot_dimension_numbers<[1], [0], [0], [1], [0, 0, 1, 1], [], []>} : vector<16x8xf32>, vector<8x32xf32>, vector<16x32xf32> -> vector<16x32xf32>
    %725 = arith.addf %681, %724 : vector<16x32xf32>
    %726 = vector.extract_strided_slice %580 {offsets = [3, 0, 0], sizes = [1, 32, 8], strides = [1, 1, 1]} : vector<4x32x8xf32> to vector<1x32x8xf32>
    %727 = vector.shape_cast %726 : vector<1x32x8xf32> to vector<32x8xf32>
    %cst_293 = arith.constant dense<0.000000e+00> : vector<16x8xf32>
    %728 = tpu.matmul %561, %727, %cst_293 {dimension_numbers = #tpu.dot_dimension_numbers<[1], [0], [0], [1], [0, 0, 1, 1], [], []>} : vector<16x32xf32>, vector<32x8xf32>, vector<16x8xf32> -> vector<16x8xf32>
    %729 = vector.extract_strided_slice %582 {offsets = [3, 0, 0], sizes = [1, 1, 8], strides = [1, 1, 1]} : vector<4x1x8xf32> to vector<1x1x8xf32>
    %730 = vector.shape_cast %729 : vector<1x1x8xf32> to vector<1x8xf32>
    %731 = vector.broadcast %730 : vector<1x8xf32> to vector<16x8xf32>
    %732 = arith.addf %728, %731 : vector<16x8xf32>
    %733 = vector.extract_strided_slice %584 {offsets = [3, 0, 0], sizes = [1, 32, 8], strides = [1, 1, 1]} : vector<4x32x8xf32> to vector<1x32x8xf32>
    %734 = vector.shape_cast %733 : vector<1x32x8xf32> to vector<32x8xf32>
    %cst_294 = arith.constant dense<0.000000e+00> : vector<16x8xf32>
    %735 = tpu.matmul %561, %734, %cst_294 {dimension_numbers = #tpu.dot_dimension_numbers<[1], [0], [0], [1], [0, 0, 1, 1], [], []>} : vector<16x32xf32>, vector<32x8xf32>, vector<16x8xf32> -> vector<16x8xf32>
    %736 = vector.extract_strided_slice %586 {offsets = [3, 0, 0], sizes = [1, 1, 8], strides = [1, 1, 1]} : vector<4x1x8xf32> to vector<1x1x8xf32>
    %737 = vector.shape_cast %736 : vector<1x1x8xf32> to vector<1x8xf32>
    %738 = vector.broadcast %737 : vector<1x8xf32> to vector<16x8xf32>
    %739 = arith.addf %735, %738 : vector<16x8xf32>
    %740 = vector.extract_strided_slice %588 {offsets = [3, 0, 0], sizes = [1, 32, 8], strides = [1, 1, 1]} : vector<4x32x8xf32> to vector<1x32x8xf32>
    %741 = vector.shape_cast %740 : vector<1x32x8xf32> to vector<32x8xf32>
    %cst_295 = arith.constant dense<0.000000e+00> : vector<16x8xf32>
    %742 = tpu.matmul %561, %741, %cst_295 {dimension_numbers = #tpu.dot_dimension_numbers<[1], [0], [0], [1], [0, 0, 1, 1], [], []>} : vector<16x32xf32>, vector<32x8xf32>, vector<16x8xf32> -> vector<16x8xf32>
    %743 = vector.extract_strided_slice %590 {offsets = [3, 0, 0], sizes = [1, 1, 8], strides = [1, 1, 1]} : vector<4x1x8xf32> to vector<1x1x8xf32>
    %744 = vector.shape_cast %743 : vector<1x1x8xf32> to vector<1x8xf32>
    %745 = vector.broadcast %744 : vector<1x8xf32> to vector<16x8xf32>
    %746 = arith.addf %742, %745 : vector<16x8xf32>
    %747 = vector.shape_cast %732 : vector<16x8xf32> to vector<2x8x8xf32>
    %748 = vector.shape_cast %739 : vector<16x8xf32> to vector<2x8x8xf32>
    %749 = vector.shape_cast %746 : vector<16x8xf32> to vector<2x8x8xf32>
    "tpu.trace_start"() <{level = 10 : i32, message = "bqd,bkd->bqk"}> : () -> ()
    %cst_296 = arith.constant dense<0.000000e+00> : vector<2x8x8xf32>
    %750 = tpu.matmul %747, %748, %cst_296 {dimension_numbers = #tpu.dot_dimension_numbers<[2], [2], [1], [1], [0, 0, 0, 1, 1, 1], [0], [0]>} : vector<2x8x8xf32>, vector<2x8x8xf32>, vector<2x8x8xf32> -> vector<2x8x8xf32>
    "tpu.trace_stop"() : () -> ()
    %cst_297 = arith.constant 0.353553385 : f32
    %751 = vector.broadcast %cst_297 : f32 to vector<2x8x8xf32>
    %752 = arith.mulf %750, %751 : vector<2x8x8xf32>
    %cst_298 = arith.constant -1.000000e+04 : f32
    %753 = vector.broadcast %cst_298 : f32 to vector<2x8x8xf32>
    %754 = arith.select %572, %752, %753 : vector<2x8x8xi1>, vector<2x8x8xf32>
    %cst_299 = arith.constant dense<0xFF800000> : vector<2x8xf32>
    %755 = vector.multi_reduction <maximumf>, %754, %cst_299 [2] : vector<2x8x8xf32> to vector<2x8xf32>
    %756 = vector.shape_cast %755 : vector<2x8xf32> to vector<2x8x1xf32>
    %757 = vector.broadcast %756 : vector<2x8x1xf32> to vector<2x8x8xf32>
    %758 = arith.subf %754, %757 : vector<2x8x8xf32>
    %759 = math.exp %758 : vector<2x8x8xf32>
    %cst_300 = arith.constant dense<0.000000e+00> : vector<2x8xf32>
    %760 = vector.multi_reduction <add>, %759, %cst_300 [2] : vector<2x8x8xf32> to vector<2x8xf32>
    %761 = vector.shape_cast %760 : vector<2x8xf32> to vector<2x8x1xf32>
    %762 = vector.broadcast %761 : vector<2x8x1xf32> to vector<2x8x8xf32>
    %763 = arith.divf %759, %762 : vector<2x8x8xf32>
    "tpu.trace_start"() <{level = 10 : i32, message = "bqk,bkd->bqd"}> : () -> ()
    %cst_301 = arith.constant dense<0.000000e+00> : vector<2x8x8xf32>
    %764 = tpu.matmul %763, %749, %cst_301 {dimension_numbers = #tpu.dot_dimension_numbers<[2], [1], [1], [2], [0, 0, 0, 1, 1, 2], [0], [0]>} : vector<2x8x8xf32>, vector<2x8x8xf32>, vector<2x8x8xf32> -> vector<2x8x8xf32>
    "tpu.trace_stop"() : () -> ()
    %765 = vector.shape_cast %764 : vector<2x8x8xf32> to vector<16x8xf32>
    %766 = vector.extract_strided_slice %592 {offsets = [3, 0, 0], sizes = [1, 8, 32], strides = [1, 1, 1]} : vector<4x8x32xf32> to vector<1x8x32xf32>
    %767 = vector.shape_cast %766 : vector<1x8x32xf32> to vector<8x32xf32>
    %cst_302 = arith.constant dense<0.000000e+00> : vector<16x32xf32>
    %768 = tpu.matmul %765, %767, %cst_302 {dimension_numbers = #tpu.dot_dimension_numbers<[1], [0], [0], [1], [0, 0, 1, 1], [], []>} : vector<16x8xf32>, vector<8x32xf32>, vector<16x32xf32> -> vector<16x32xf32>
    %769 = arith.addf %725, %768 : vector<16x32xf32>
    %770 = vector.broadcast %594 : vector<1x32xf32> to vector<16x32xf32>
    %771 = arith.addf %769, %770 : vector<16x32xf32>
    %772 = arith.addf %771, %561 : vector<16x32xf32>
    %773 = vector.extract_strided_slice %574 {offsets = [0, 0, 0], sizes = [1, 1, 32], strides = [1, 1, 1]} : vector<2x1x32xf32> to vector<1x1x32xf32>
    %774 = vector.shape_cast %773 : vector<1x1x32xf32> to vector<1x32xf32>
    %775 = vector.extract_strided_slice %574 {offsets = [1, 0, 0], sizes = [1, 1, 32], strides = [1, 1, 1]} : vector<2x1x32xf32> to vector<1x1x32xf32>
    %776 = vector.shape_cast %775 : vector<1x1x32xf32> to vector<1x32xf32>
    %cst_303 = arith.constant dense<0.000000e+00> : vector<16xf32>
    %777 = vector.multi_reduction <add>, %772, %cst_303 [1] : vector<16x32xf32> to vector<16xf32>
    %778 = vector.shape_cast %777 : vector<16xf32> to vector<16x1xf32>
    %cst_304 = arith.constant 3.200000e+01 : f32
    %779 = vector.broadcast %cst_304 : f32 to vector<16x1xf32>
    %780 = arith.divf %778, %779 : vector<16x1xf32>
    %781 = vector.broadcast %780 : vector<16x1xf32> to vector<16x32xf32>
    %782 = arith.subf %772, %781 : vector<16x32xf32>
    %783 = arith.mulf %782, %782 : vector<16x32xf32>
    %cst_305 = arith.constant dense<0.000000e+00> : vector<16xf32>
    %784 = vector.multi_reduction <add>, %783, %cst_305 [1] : vector<16x32xf32> to vector<16xf32>
    %785 = vector.shape_cast %784 : vector<16xf32> to vector<16x1xf32>
    %cst_306 = arith.constant 3.200000e+01 : f32
    %786 = vector.broadcast %cst_306 : f32 to vector<16x1xf32>
    %787 = arith.divf %785, %786 : vector<16x1xf32>
    %788 = vector.broadcast %780 : vector<16x1xf32> to vector<16x32xf32>
    %789 = arith.subf %772, %788 : vector<16x32xf32>
    %cst_307 = arith.constant 9.99999974E-6 : f32
    %790 = vector.broadcast %cst_307 : f32 to vector<16x1xf32>
    %791 = arith.addf %787, %790 : vector<16x1xf32>
    %792 = math.rsqrt %791 : vector<16x1xf32>
    %793 = vector.broadcast %792 : vector<16x1xf32> to vector<16x32xf32>
    %794 = arith.mulf %789, %793 : vector<16x32xf32>
    %795 = vector.broadcast %774 : vector<1x32xf32> to vector<16x32xf32>
    %796 = arith.mulf %794, %795 : vector<16x32xf32>
    %797 = vector.broadcast %776 : vector<1x32xf32> to vector<16x32xf32>
    %798 = arith.addf %796, %797 : vector<16x32xf32>
    %c0_308 = arith.constant 0 : index
    %c0_309 = arith.constant 0 : index
    %c0_310 = arith.constant 0 : index
    %799 = vector.load %arg27[%c0_308, %c0_309, %c0_310] : memref<2x32x32xf32, #tpu.memory_space<vmem>>, vector<1x32x32xf32>
    %800 = vector.shape_cast %799 : vector<1x32x32xf32> to vector<32x32xf32>
    %cst_311 = arith.constant dense<0.000000e+00> : vector<2x32xf32>
    %801 = tpu.matmul %559, %800, %cst_311 {dimension_numbers = #tpu.dot_dimension_numbers<[1], [0], [0], [1], [0, 0, 1, 1], [], []>} : vector<2x32xf32>, vector<32x32xf32>, vector<2x32xf32> -> vector<2x32xf32>
    %c0_312 = arith.constant 0 : index
    %c0_313 = arith.constant 0 : index
    %c0_314 = arith.constant 0 : index
    %802 = vector.load %arg28[%c0_312, %c0_313, %c0_314] : memref<2x1x32xf32, #tpu.memory_space<vmem>>, vector<1x1x32xf32>
    %803 = vector.shape_cast %802 : vector<1x1x32xf32> to vector<1x32xf32>
    %804 = vector.broadcast %803 : vector<1x32xf32> to vector<2x32xf32>
    %805 = arith.addf %801, %804 : vector<2x32xf32>
    %c0_315 = arith.constant 0 : index
    %c0_316 = arith.constant 0 : index
    %c0_317 = arith.constant 0 : index
    %806 = vector.load %arg29[%c0_315, %c0_316, %c0_317] : memref<2x32x32xf32, #tpu.memory_space<vmem>>, vector<1x32x32xf32>
    %807 = vector.shape_cast %806 : vector<1x32x32xf32> to vector<32x32xf32>
    %cst_318 = arith.constant dense<0.000000e+00> : vector<2x32xf32>
    %808 = tpu.matmul %805, %807, %cst_318 {dimension_numbers = #tpu.dot_dimension_numbers<[1], [0], [0], [1], [0, 0, 1, 1], [], []>} : vector<2x32xf32>, vector<32x32xf32>, vector<2x32xf32> -> vector<2x32xf32>
    %c0_319 = arith.constant 0 : index
    %c0_320 = arith.constant 0 : index
    %c0_321 = arith.constant 0 : index
    %809 = vector.load %arg30[%c0_319, %c0_320, %c0_321] : memref<2x1x32xf32, #tpu.memory_space<vmem>>, vector<1x1x32xf32>
    %810 = vector.shape_cast %809 : vector<1x1x32xf32> to vector<1x32xf32>
    %811 = vector.broadcast %810 : vector<1x32xf32> to vector<2x32xf32>
    %812 = arith.addf %808, %811 : vector<2x32xf32>
    %813 = vector.shape_cast %798 : vector<16x32xf32> to vector<2x8x32xf32>
    %814 = vector.shape_cast %812 : vector<2x32xf32> to vector<2x1x32xf32>
    %815 = vector.broadcast %814 : vector<2x1x32xf32> to vector<2x8x32xf32>
    %816 = arith.addf %813, %815 : vector<2x8x32xf32>
    %817 = vector.shape_cast %816 : vector<2x8x32xf32> to vector<16x32xf32>
    %818 = vector.extract_strided_slice %576 {offsets = [0, 0, 0], sizes = [1, 1, 32], strides = [1, 1, 1]} : vector<2x1x32xf32> to vector<1x1x32xf32>
    %819 = vector.shape_cast %818 : vector<1x1x32xf32> to vector<1x32xf32>
    %820 = vector.extract_strided_slice %576 {offsets = [1, 0, 0], sizes = [1, 1, 32], strides = [1, 1, 1]} : vector<2x1x32xf32> to vector<1x1x32xf32>
    %821 = vector.shape_cast %820 : vector<1x1x32xf32> to vector<1x32xf32>
    %cst_322 = arith.constant dense<0.000000e+00> : vector<16xf32>
    %822 = vector.multi_reduction <add>, %817, %cst_322 [1] : vector<16x32xf32> to vector<16xf32>
    %823 = vector.shape_cast %822 : vector<16xf32> to vector<16x1xf32>
    %cst_323 = arith.constant 3.200000e+01 : f32
    %824 = vector.broadcast %cst_323 : f32 to vector<16x1xf32>
    %825 = arith.divf %823, %824 : vector<16x1xf32>
    %826 = vector.broadcast %825 : vector<16x1xf32> to vector<16x32xf32>
    %827 = arith.subf %817, %826 : vector<16x32xf32>
    %828 = arith.mulf %827, %827 : vector<16x32xf32>
    %cst_324 = arith.constant dense<0.000000e+00> : vector<16xf32>
    %829 = vector.multi_reduction <add>, %828, %cst_324 [1] : vector<16x32xf32> to vector<16xf32>
    %830 = vector.shape_cast %829 : vector<16xf32> to vector<16x1xf32>
    %cst_325 = arith.constant 3.200000e+01 : f32
    %831 = vector.broadcast %cst_325 : f32 to vector<16x1xf32>
    %832 = arith.divf %830, %831 : vector<16x1xf32>
    %833 = vector.broadcast %825 : vector<16x1xf32> to vector<16x32xf32>
    %834 = arith.subf %817, %833 : vector<16x32xf32>
    %cst_326 = arith.constant 9.99999974E-6 : f32
    %835 = vector.broadcast %cst_326 : f32 to vector<16x1xf32>
    %836 = arith.addf %832, %835 : vector<16x1xf32>
    %837 = math.rsqrt %836 : vector<16x1xf32>
    %838 = vector.broadcast %837 : vector<16x1xf32> to vector<16x32xf32>
    %839 = arith.mulf %834, %838 : vector<16x32xf32>
    %840 = vector.broadcast %819 : vector<1x32xf32> to vector<16x32xf32>
    %841 = arith.mulf %839, %840 : vector<16x32xf32>
    %842 = vector.broadcast %821 : vector<1x32xf32> to vector<16x32xf32>
    %843 = arith.addf %841, %842 : vector<16x32xf32>
    %c0_327 = arith.constant 0 : index
    %c0_328 = arith.constant 0 : index
    %c0_329 = arith.constant 0 : index
    %844 = vector.load %arg32[%c0_327, %c0_328, %c0_329] : memref<2x32x64xf32, #tpu.memory_space<vmem>>, vector<1x32x64xf32>
    %845 = vector.shape_cast %844 : vector<1x32x64xf32> to vector<32x64xf32>
    %cst_330 = arith.constant dense<0.000000e+00> : vector<16x64xf32>
    %846 = tpu.matmul %843, %845, %cst_330 {dimension_numbers = #tpu.dot_dimension_numbers<[1], [0], [0], [1], [0, 0, 1, 1], [], []>} : vector<16x32xf32>, vector<32x64xf32>, vector<16x64xf32> -> vector<16x64xf32>
    %c0_331 = arith.constant 0 : index
    %c0_332 = arith.constant 0 : index
    %c0_333 = arith.constant 0 : index
    %847 = vector.load %arg33[%c0_331, %c0_332, %c0_333] : memref<2x1x64xf32, #tpu.memory_space<vmem>>, vector<1x1x64xf32>
    %848 = vector.shape_cast %847 : vector<1x1x64xf32> to vector<1x64xf32>
    %849 = vector.broadcast %848 : vector<1x64xf32> to vector<16x64xf32>
    %850 = arith.addf %846, %849 : vector<16x64xf32>
    %cst_334 = arith.constant 0.000000e+00 : f32
    %851 = vector.broadcast %cst_334 : f32 to vector<16x64xf32>
    %852 = arith.maximumf %850, %851 : vector<16x64xf32>
    %c0_335 = arith.constant 0 : index
    %c0_336 = arith.constant 0 : index
    %c0_337 = arith.constant 0 : index
    %853 = vector.load %arg34[%c0_335, %c0_336, %c0_337] : memref<2x64x32xf32, #tpu.memory_space<vmem>>, vector<1x64x32xf32>
    %854 = vector.shape_cast %853 : vector<1x64x32xf32> to vector<64x32xf32>
    %cst_338 = arith.constant dense<0.000000e+00> : vector<16x32xf32>
    %855 = tpu.matmul %852, %854, %cst_338 {dimension_numbers = #tpu.dot_dimension_numbers<[1], [0], [0], [1], [0, 0, 1, 1], [], []>} : vector<16x64xf32>, vector<64x32xf32>, vector<16x32xf32> -> vector<16x32xf32>
    %c0_339 = arith.constant 0 : index
    %c0_340 = arith.constant 0 : index
    %c0_341 = arith.constant 0 : index
    %856 = vector.load %arg35[%c0_339, %c0_340, %c0_341] : memref<2x1x32xf32, #tpu.memory_space<vmem>>, vector<1x1x32xf32>
    %857 = vector.shape_cast %856 : vector<1x1x32xf32> to vector<1x32xf32>
    %858 = vector.broadcast %857 : vector<1x32xf32> to vector<16x32xf32>
    %859 = arith.addf %855, %858 : vector<16x32xf32>
    %860 = arith.addf %859, %843 : vector<16x32xf32>
    %861 = vector.extract_strided_slice %578 {offsets = [0, 0, 0], sizes = [1, 1, 32], strides = [1, 1, 1]} : vector<2x1x32xf32> to vector<1x1x32xf32>
    %862 = vector.shape_cast %861 : vector<1x1x32xf32> to vector<1x32xf32>
    %863 = vector.extract_strided_slice %578 {offsets = [1, 0, 0], sizes = [1, 1, 32], strides = [1, 1, 1]} : vector<2x1x32xf32> to vector<1x1x32xf32>
    %864 = vector.shape_cast %863 : vector<1x1x32xf32> to vector<1x32xf32>
    %cst_342 = arith.constant dense<0.000000e+00> : vector<16xf32>
    %865 = vector.multi_reduction <add>, %860, %cst_342 [1] : vector<16x32xf32> to vector<16xf32>
    %866 = vector.shape_cast %865 : vector<16xf32> to vector<16x1xf32>
    %cst_343 = arith.constant 3.200000e+01 : f32
    %867 = vector.broadcast %cst_343 : f32 to vector<16x1xf32>
    %868 = arith.divf %866, %867 : vector<16x1xf32>
    %869 = vector.broadcast %868 : vector<16x1xf32> to vector<16x32xf32>
    %870 = arith.subf %860, %869 : vector<16x32xf32>
    %871 = arith.mulf %870, %870 : vector<16x32xf32>
    %cst_344 = arith.constant dense<0.000000e+00> : vector<16xf32>
    %872 = vector.multi_reduction <add>, %871, %cst_344 [1] : vector<16x32xf32> to vector<16xf32>
    %873 = vector.shape_cast %872 : vector<16xf32> to vector<16x1xf32>
    %cst_345 = arith.constant 3.200000e+01 : f32
    %874 = vector.broadcast %cst_345 : f32 to vector<16x1xf32>
    %875 = arith.divf %873, %874 : vector<16x1xf32>
    %876 = vector.broadcast %868 : vector<16x1xf32> to vector<16x32xf32>
    %877 = arith.subf %860, %876 : vector<16x32xf32>
    %cst_346 = arith.constant 9.99999974E-6 : f32
    %878 = vector.broadcast %cst_346 : f32 to vector<16x1xf32>
    %879 = arith.addf %875, %878 : vector<16x1xf32>
    %880 = math.rsqrt %879 : vector<16x1xf32>
    %881 = vector.broadcast %880 : vector<16x1xf32> to vector<16x32xf32>
    %882 = arith.mulf %877, %881 : vector<16x32xf32>
    %883 = vector.broadcast %862 : vector<1x32xf32> to vector<16x32xf32>
    %884 = arith.mulf %882, %883 : vector<16x32xf32>
    %885 = vector.broadcast %864 : vector<1x32xf32> to vector<16x32xf32>
    %886 = arith.addf %884, %885 : vector<16x32xf32>
    %c1_347 = arith.constant 1 : index
    %c0_348 = arith.constant 0 : index
    %c0_349 = arith.constant 0 : index
    %c0_350 = arith.constant 0 : index
    %887 = vector.load %arg26[%c1_347, %c0_348, %c0_349, %c0_350] : memref<2x2x1x32xf32, #tpu.memory_space<vmem>>, vector<1x2x1x32xf32>
    %888 = vector.shape_cast %887 : vector<1x2x1x32xf32> to vector<2x1x32xf32>
    %c1_351 = arith.constant 1 : index
    %c0_352 = arith.constant 0 : index
    %c0_353 = arith.constant 0 : index
    %c0_354 = arith.constant 0 : index
    %889 = vector.load %arg31[%c1_351, %c0_352, %c0_353, %c0_354] : memref<2x2x1x32xf32, #tpu.memory_space<vmem>>, vector<1x2x1x32xf32>
    %890 = vector.shape_cast %889 : vector<1x2x1x32xf32> to vector<2x1x32xf32>
    %c1_355 = arith.constant 1 : index
    %c0_356 = arith.constant 0 : index
    %c0_357 = arith.constant 0 : index
    %c0_358 = arith.constant 0 : index
    %891 = vector.load %arg36[%c1_355, %c0_356, %c0_357, %c0_358] : memref<2x2x1x32xf32, #tpu.memory_space<vmem>>, vector<1x2x1x32xf32>
    %892 = vector.shape_cast %891 : vector<1x2x1x32xf32> to vector<2x1x32xf32>
    %c1_359 = arith.constant 1 : index
    %c0_360 = arith.constant 0 : index
    %c0_361 = arith.constant 0 : index
    %c0_362 = arith.constant 0 : index
    %893 = vector.load %arg18[%c1_359, %c0_360, %c0_361, %c0_362] : memref<2x4x32x8xf32, #tpu.memory_space<vmem>>, vector<1x4x32x8xf32>
    %894 = vector.shape_cast %893 : vector<1x4x32x8xf32> to vector<4x32x8xf32>
    %c1_363 = arith.constant 1 : index
    %c0_364 = arith.constant 0 : index
    %c0_365 = arith.constant 0 : index
    %c0_366 = arith.constant 0 : index
    %895 = vector.load %arg19[%c1_363, %c0_364, %c0_365, %c0_366] : memref<2x4x1x8xf32, #tpu.memory_space<vmem>>, vector<1x4x1x8xf32>
    %896 = vector.shape_cast %895 : vector<1x4x1x8xf32> to vector<4x1x8xf32>
    %c1_367 = arith.constant 1 : index
    %c0_368 = arith.constant 0 : index
    %c0_369 = arith.constant 0 : index
    %c0_370 = arith.constant 0 : index
    %897 = vector.load %arg20[%c1_367, %c0_368, %c0_369, %c0_370] : memref<2x4x32x8xf32, #tpu.memory_space<vmem>>, vector<1x4x32x8xf32>
    %898 = vector.shape_cast %897 : vector<1x4x32x8xf32> to vector<4x32x8xf32>
    %c1_371 = arith.constant 1 : index
    %c0_372 = arith.constant 0 : index
    %c0_373 = arith.constant 0 : index
    %c0_374 = arith.constant 0 : index
    %899 = vector.load %arg21[%c1_371, %c0_372, %c0_373, %c0_374] : memref<2x4x1x8xf32, #tpu.memory_space<vmem>>, vector<1x4x1x8xf32>
    %900 = vector.shape_cast %899 : vector<1x4x1x8xf32> to vector<4x1x8xf32>
    %c1_375 = arith.constant 1 : index
    %c0_376 = arith.constant 0 : index
    %c0_377 = arith.constant 0 : index
    %c0_378 = arith.constant 0 : index
    %901 = vector.load %arg22[%c1_375, %c0_376, %c0_377, %c0_378] : memref<2x4x32x8xf32, #tpu.memory_space<vmem>>, vector<1x4x32x8xf32>
    %902 = vector.shape_cast %901 : vector<1x4x32x8xf32> to vector<4x32x8xf32>
    %c1_379 = arith.constant 1 : index
    %c0_380 = arith.constant 0 : index
    %c0_381 = arith.constant 0 : index
    %c0_382 = arith.constant 0 : index
    %903 = vector.load %arg23[%c1_379, %c0_380, %c0_381, %c0_382] : memref<2x4x1x8xf32, #tpu.memory_space<vmem>>, vector<1x4x1x8xf32>
    %904 = vector.shape_cast %903 : vector<1x4x1x8xf32> to vector<4x1x8xf32>
    %c1_383 = arith.constant 1 : index
    %c0_384 = arith.constant 0 : index
    %c0_385 = arith.constant 0 : index
    %c0_386 = arith.constant 0 : index
    %905 = vector.load %arg24[%c1_383, %c0_384, %c0_385, %c0_386] : memref<2x4x8x32xf32, #tpu.memory_space<vmem>>, vector<1x4x8x32xf32>
    %906 = vector.shape_cast %905 : vector<1x4x8x32xf32> to vector<4x8x32xf32>
    %c1_387 = arith.constant 1 : index
    %c0_388 = arith.constant 0 : index
    %c0_389 = arith.constant 0 : index
    %907 = vector.load %arg25[%c1_387, %c0_388, %c0_389] : memref<2x1x32xf32, #tpu.memory_space<vmem>>, vector<1x1x32xf32>
    %908 = vector.shape_cast %907 : vector<1x1x32xf32> to vector<1x32xf32>
    %909 = vector.extract_strided_slice %894 {offsets = [0, 0, 0], sizes = [1, 32, 8], strides = [1, 1, 1]} : vector<4x32x8xf32> to vector<1x32x8xf32>
    %910 = vector.shape_cast %909 : vector<1x32x8xf32> to vector<32x8xf32>
    %cst_390 = arith.constant dense<0.000000e+00> : vector<16x8xf32>
    %911 = tpu.matmul %886, %910, %cst_390 {dimension_numbers = #tpu.dot_dimension_numbers<[1], [0], [0], [1], [0, 0, 1, 1], [], []>} : vector<16x32xf32>, vector<32x8xf32>, vector<16x8xf32> -> vector<16x8xf32>
    %912 = vector.extract_strided_slice %896 {offsets = [0, 0, 0], sizes = [1, 1, 8], strides = [1, 1, 1]} : vector<4x1x8xf32> to vector<1x1x8xf32>
    %913 = vector.shape_cast %912 : vector<1x1x8xf32> to vector<1x8xf32>
    %914 = vector.broadcast %913 : vector<1x8xf32> to vector<16x8xf32>
    %915 = arith.addf %911, %914 : vector<16x8xf32>
    %916 = vector.extract_strided_slice %898 {offsets = [0, 0, 0], sizes = [1, 32, 8], strides = [1, 1, 1]} : vector<4x32x8xf32> to vector<1x32x8xf32>
    %917 = vector.shape_cast %916 : vector<1x32x8xf32> to vector<32x8xf32>
    %cst_391 = arith.constant dense<0.000000e+00> : vector<16x8xf32>
    %918 = tpu.matmul %886, %917, %cst_391 {dimension_numbers = #tpu.dot_dimension_numbers<[1], [0], [0], [1], [0, 0, 1, 1], [], []>} : vector<16x32xf32>, vector<32x8xf32>, vector<16x8xf32> -> vector<16x8xf32>
    %919 = vector.extract_strided_slice %900 {offsets = [0, 0, 0], sizes = [1, 1, 8], strides = [1, 1, 1]} : vector<4x1x8xf32> to vector<1x1x8xf32>
    %920 = vector.shape_cast %919 : vector<1x1x8xf32> to vector<1x8xf32>
    %921 = vector.broadcast %920 : vector<1x8xf32> to vector<16x8xf32>
    %922 = arith.addf %918, %921 : vector<16x8xf32>
    %923 = vector.extract_strided_slice %902 {offsets = [0, 0, 0], sizes = [1, 32, 8], strides = [1, 1, 1]} : vector<4x32x8xf32> to vector<1x32x8xf32>
    %924 = vector.shape_cast %923 : vector<1x32x8xf32> to vector<32x8xf32>
    %cst_392 = arith.constant dense<0.000000e+00> : vector<16x8xf32>
    %925 = tpu.matmul %886, %924, %cst_392 {dimension_numbers = #tpu.dot_dimension_numbers<[1], [0], [0], [1], [0, 0, 1, 1], [], []>} : vector<16x32xf32>, vector<32x8xf32>, vector<16x8xf32> -> vector<16x8xf32>
    %926 = vector.extract_strided_slice %904 {offsets = [0, 0, 0], sizes = [1, 1, 8], strides = [1, 1, 1]} : vector<4x1x8xf32> to vector<1x1x8xf32>
    %927 = vector.shape_cast %926 : vector<1x1x8xf32> to vector<1x8xf32>
    %928 = vector.broadcast %927 : vector<1x8xf32> to vector<16x8xf32>
    %929 = arith.addf %925, %928 : vector<16x8xf32>
    %930 = vector.shape_cast %915 : vector<16x8xf32> to vector<2x8x8xf32>
    %931 = vector.shape_cast %922 : vector<16x8xf32> to vector<2x8x8xf32>
    %932 = vector.shape_cast %929 : vector<16x8xf32> to vector<2x8x8xf32>
    "tpu.trace_start"() <{level = 10 : i32, message = "bqd,bkd->bqk"}> : () -> ()
    %cst_393 = arith.constant dense<0.000000e+00> : vector<2x8x8xf32>
    %933 = tpu.matmul %930, %931, %cst_393 {dimension_numbers = #tpu.dot_dimension_numbers<[2], [2], [1], [1], [0, 0, 0, 1, 1, 1], [0], [0]>} : vector<2x8x8xf32>, vector<2x8x8xf32>, vector<2x8x8xf32> -> vector<2x8x8xf32>
    "tpu.trace_stop"() : () -> ()
    %cst_394 = arith.constant 0.353553385 : f32
    %934 = vector.broadcast %cst_394 : f32 to vector<2x8x8xf32>
    %935 = arith.mulf %933, %934 : vector<2x8x8xf32>
    %cst_395 = arith.constant -1.000000e+04 : f32
    %936 = vector.broadcast %cst_395 : f32 to vector<2x8x8xf32>
    %937 = arith.select %572, %935, %936 : vector<2x8x8xi1>, vector<2x8x8xf32>
    %cst_396 = arith.constant dense<0xFF800000> : vector<2x8xf32>
    %938 = vector.multi_reduction <maximumf>, %937, %cst_396 [2] : vector<2x8x8xf32> to vector<2x8xf32>
    %939 = vector.shape_cast %938 : vector<2x8xf32> to vector<2x8x1xf32>
    %940 = vector.broadcast %939 : vector<2x8x1xf32> to vector<2x8x8xf32>
    %941 = arith.subf %937, %940 : vector<2x8x8xf32>
    %942 = math.exp %941 : vector<2x8x8xf32>
    %cst_397 = arith.constant dense<0.000000e+00> : vector<2x8xf32>
    %943 = vector.multi_reduction <add>, %942, %cst_397 [2] : vector<2x8x8xf32> to vector<2x8xf32>
    %944 = vector.shape_cast %943 : vector<2x8xf32> to vector<2x8x1xf32>
    %945 = vector.broadcast %944 : vector<2x8x1xf32> to vector<2x8x8xf32>
    %946 = arith.divf %942, %945 : vector<2x8x8xf32>
    "tpu.trace_start"() <{level = 10 : i32, message = "bqk,bkd->bqd"}> : () -> ()
    %cst_398 = arith.constant dense<0.000000e+00> : vector<2x8x8xf32>
    %947 = tpu.matmul %946, %932, %cst_398 {dimension_numbers = #tpu.dot_dimension_numbers<[2], [1], [1], [2], [0, 0, 0, 1, 1, 2], [0], [0]>} : vector<2x8x8xf32>, vector<2x8x8xf32>, vector<2x8x8xf32> -> vector<2x8x8xf32>
    "tpu.trace_stop"() : () -> ()
    %948 = vector.shape_cast %947 : vector<2x8x8xf32> to vector<16x8xf32>
    %949 = vector.extract_strided_slice %906 {offsets = [0, 0, 0], sizes = [1, 8, 32], strides = [1, 1, 1]} : vector<4x8x32xf32> to vector<1x8x32xf32>
    %950 = vector.shape_cast %949 : vector<1x8x32xf32> to vector<8x32xf32>
    %cst_399 = arith.constant dense<0.000000e+00> : vector<16x32xf32>
    %951 = tpu.matmul %948, %950, %cst_399 {dimension_numbers = #tpu.dot_dimension_numbers<[1], [0], [0], [1], [0, 0, 1, 1], [], []>} : vector<16x8xf32>, vector<8x32xf32>, vector<16x32xf32> -> vector<16x32xf32>
    %952 = vector.extract_strided_slice %894 {offsets = [1, 0, 0], sizes = [1, 32, 8], strides = [1, 1, 1]} : vector<4x32x8xf32> to vector<1x32x8xf32>
    %953 = vector.shape_cast %952 : vector<1x32x8xf32> to vector<32x8xf32>
    %cst_400 = arith.constant dense<0.000000e+00> : vector<16x8xf32>
    %954 = tpu.matmul %886, %953, %cst_400 {dimension_numbers = #tpu.dot_dimension_numbers<[1], [0], [0], [1], [0, 0, 1, 1], [], []>} : vector<16x32xf32>, vector<32x8xf32>, vector<16x8xf32> -> vector<16x8xf32>
    %955 = vector.extract_strided_slice %896 {offsets = [1, 0, 0], sizes = [1, 1, 8], strides = [1, 1, 1]} : vector<4x1x8xf32> to vector<1x1x8xf32>
    %956 = vector.shape_cast %955 : vector<1x1x8xf32> to vector<1x8xf32>
    %957 = vector.broadcast %956 : vector<1x8xf32> to vector<16x8xf32>
    %958 = arith.addf %954, %957 : vector<16x8xf32>
    %959 = vector.extract_strided_slice %898 {offsets = [1, 0, 0], sizes = [1, 32, 8], strides = [1, 1, 1]} : vector<4x32x8xf32> to vector<1x32x8xf32>
    %960 = vector.shape_cast %959 : vector<1x32x8xf32> to vector<32x8xf32>
    %cst_401 = arith.constant dense<0.000000e+00> : vector<16x8xf32>
    %961 = tpu.matmul %886, %960, %cst_401 {dimension_numbers = #tpu.dot_dimension_numbers<[1], [0], [0], [1], [0, 0, 1, 1], [], []>} : vector<16x32xf32>, vector<32x8xf32>, vector<16x8xf32> -> vector<16x8xf32>
    %962 = vector.extract_strided_slice %900 {offsets = [1, 0, 0], sizes = [1, 1, 8], strides = [1, 1, 1]} : vector<4x1x8xf32> to vector<1x1x8xf32>
    %963 = vector.shape_cast %962 : vector<1x1x8xf32> to vector<1x8xf32>
    %964 = vector.broadcast %963 : vector<1x8xf32> to vector<16x8xf32>
    %965 = arith.addf %961, %964 : vector<16x8xf32>
    %966 = vector.extract_strided_slice %902 {offsets = [1, 0, 0], sizes = [1, 32, 8], strides = [1, 1, 1]} : vector<4x32x8xf32> to vector<1x32x8xf32>
    %967 = vector.shape_cast %966 : vector<1x32x8xf32> to vector<32x8xf32>
    %cst_402 = arith.constant dense<0.000000e+00> : vector<16x8xf32>
    %968 = tpu.matmul %886, %967, %cst_402 {dimension_numbers = #tpu.dot_dimension_numbers<[1], [0], [0], [1], [0, 0, 1, 1], [], []>} : vector<16x32xf32>, vector<32x8xf32>, vector<16x8xf32> -> vector<16x8xf32>
    %969 = vector.extract_strided_slice %904 {offsets = [1, 0, 0], sizes = [1, 1, 8], strides = [1, 1, 1]} : vector<4x1x8xf32> to vector<1x1x8xf32>
    %970 = vector.shape_cast %969 : vector<1x1x8xf32> to vector<1x8xf32>
    %971 = vector.broadcast %970 : vector<1x8xf32> to vector<16x8xf32>
    %972 = arith.addf %968, %971 : vector<16x8xf32>
    %973 = vector.shape_cast %958 : vector<16x8xf32> to vector<2x8x8xf32>
    %974 = vector.shape_cast %965 : vector<16x8xf32> to vector<2x8x8xf32>
    %975 = vector.shape_cast %972 : vector<16x8xf32> to vector<2x8x8xf32>
    "tpu.trace_start"() <{level = 10 : i32, message = "bqd,bkd->bqk"}> : () -> ()
    %cst_403 = arith.constant dense<0.000000e+00> : vector<2x8x8xf32>
    %976 = tpu.matmul %973, %974, %cst_403 {dimension_numbers = #tpu.dot_dimension_numbers<[2], [2], [1], [1], [0, 0, 0, 1, 1, 1], [0], [0]>} : vector<2x8x8xf32>, vector<2x8x8xf32>, vector<2x8x8xf32> -> vector<2x8x8xf32>
    "tpu.trace_stop"() : () -> ()
    %cst_404 = arith.constant 0.353553385 : f32
    %977 = vector.broadcast %cst_404 : f32 to vector<2x8x8xf32>
    %978 = arith.mulf %976, %977 : vector<2x8x8xf32>
    %cst_405 = arith.constant -1.000000e+04 : f32
    %979 = vector.broadcast %cst_405 : f32 to vector<2x8x8xf32>
    %980 = arith.select %572, %978, %979 : vector<2x8x8xi1>, vector<2x8x8xf32>
    %cst_406 = arith.constant dense<0xFF800000> : vector<2x8xf32>
    %981 = vector.multi_reduction <maximumf>, %980, %cst_406 [2] : vector<2x8x8xf32> to vector<2x8xf32>
    %982 = vector.shape_cast %981 : vector<2x8xf32> to vector<2x8x1xf32>
    %983 = vector.broadcast %982 : vector<2x8x1xf32> to vector<2x8x8xf32>
    %984 = arith.subf %980, %983 : vector<2x8x8xf32>
    %985 = math.exp %984 : vector<2x8x8xf32>
    %cst_407 = arith.constant dense<0.000000e+00> : vector<2x8xf32>
    %986 = vector.multi_reduction <add>, %985, %cst_407 [2] : vector<2x8x8xf32> to vector<2x8xf32>
    %987 = vector.shape_cast %986 : vector<2x8xf32> to vector<2x8x1xf32>
    %988 = vector.broadcast %987 : vector<2x8x1xf32> to vector<2x8x8xf32>
    %989 = arith.divf %985, %988 : vector<2x8x8xf32>
    "tpu.trace_start"() <{level = 10 : i32, message = "bqk,bkd->bqd"}> : () -> ()
    %cst_408 = arith.constant dense<0.000000e+00> : vector<2x8x8xf32>
    %990 = tpu.matmul %989, %975, %cst_408 {dimension_numbers = #tpu.dot_dimension_numbers<[2], [1], [1], [2], [0, 0, 0, 1, 1, 2], [0], [0]>} : vector<2x8x8xf32>, vector<2x8x8xf32>, vector<2x8x8xf32> -> vector<2x8x8xf32>
    "tpu.trace_stop"() : () -> ()
    %991 = vector.shape_cast %990 : vector<2x8x8xf32> to vector<16x8xf32>
    %992 = vector.extract_strided_slice %906 {offsets = [1, 0, 0], sizes = [1, 8, 32], strides = [1, 1, 1]} : vector<4x8x32xf32> to vector<1x8x32xf32>
    %993 = vector.shape_cast %992 : vector<1x8x32xf32> to vector<8x32xf32>
    %cst_409 = arith.constant dense<0.000000e+00> : vector<16x32xf32>
    %994 = tpu.matmul %991, %993, %cst_409 {dimension_numbers = #tpu.dot_dimension_numbers<[1], [0], [0], [1], [0, 0, 1, 1], [], []>} : vector<16x8xf32>, vector<8x32xf32>, vector<16x32xf32> -> vector<16x32xf32>
    %995 = arith.addf %951, %994 : vector<16x32xf32>
    %996 = vector.extract_strided_slice %894 {offsets = [2, 0, 0], sizes = [1, 32, 8], strides = [1, 1, 1]} : vector<4x32x8xf32> to vector<1x32x8xf32>
    %997 = vector.shape_cast %996 : vector<1x32x8xf32> to vector<32x8xf32>
    %cst_410 = arith.constant dense<0.000000e+00> : vector<16x8xf32>
    %998 = tpu.matmul %886, %997, %cst_410 {dimension_numbers = #tpu.dot_dimension_numbers<[1], [0], [0], [1], [0, 0, 1, 1], [], []>} : vector<16x32xf32>, vector<32x8xf32>, vector<16x8xf32> -> vector<16x8xf32>
    %999 = vector.extract_strided_slice %896 {offsets = [2, 0, 0], sizes = [1, 1, 8], strides = [1, 1, 1]} : vector<4x1x8xf32> to vector<1x1x8xf32>
    %1000 = vector.shape_cast %999 : vector<1x1x8xf32> to vector<1x8xf32>
    %1001 = vector.broadcast %1000 : vector<1x8xf32> to vector<16x8xf32>
    %1002 = arith.addf %998, %1001 : vector<16x8xf32>
    %1003 = vector.extract_strided_slice %898 {offsets = [2, 0, 0], sizes = [1, 32, 8], strides = [1, 1, 1]} : vector<4x32x8xf32> to vector<1x32x8xf32>
    %1004 = vector.shape_cast %1003 : vector<1x32x8xf32> to vector<32x8xf32>
    %cst_411 = arith.constant dense<0.000000e+00> : vector<16x8xf32>
    %1005 = tpu.matmul %886, %1004, %cst_411 {dimension_numbers = #tpu.dot_dimension_numbers<[1], [0], [0], [1], [0, 0, 1, 1], [], []>} : vector<16x32xf32>, vector<32x8xf32>, vector<16x8xf32> -> vector<16x8xf32>
    %1006 = vector.extract_strided_slice %900 {offsets = [2, 0, 0], sizes = [1, 1, 8], strides = [1, 1, 1]} : vector<4x1x8xf32> to vector<1x1x8xf32>
    %1007 = vector.shape_cast %1006 : vector<1x1x8xf32> to vector<1x8xf32>
    %1008 = vector.broadcast %1007 : vector<1x8xf32> to vector<16x8xf32>
    %1009 = arith.addf %1005, %1008 : vector<16x8xf32>
    %1010 = vector.extract_strided_slice %902 {offsets = [2, 0, 0], sizes = [1, 32, 8], strides = [1, 1, 1]} : vector<4x32x8xf32> to vector<1x32x8xf32>
    %1011 = vector.shape_cast %1010 : vector<1x32x8xf32> to vector<32x8xf32>
    %cst_412 = arith.constant dense<0.000000e+00> : vector<16x8xf32>
    %1012 = tpu.matmul %886, %1011, %cst_412 {dimension_numbers = #tpu.dot_dimension_numbers<[1], [0], [0], [1], [0, 0, 1, 1], [], []>} : vector<16x32xf32>, vector<32x8xf32>, vector<16x8xf32> -> vector<16x8xf32>
    %1013 = vector.extract_strided_slice %904 {offsets = [2, 0, 0], sizes = [1, 1, 8], strides = [1, 1, 1]} : vector<4x1x8xf32> to vector<1x1x8xf32>
    %1014 = vector.shape_cast %1013 : vector<1x1x8xf32> to vector<1x8xf32>
    %1015 = vector.broadcast %1014 : vector<1x8xf32> to vector<16x8xf32>
    %1016 = arith.addf %1012, %1015 : vector<16x8xf32>
    %1017 = vector.shape_cast %1002 : vector<16x8xf32> to vector<2x8x8xf32>
    %1018 = vector.shape_cast %1009 : vector<16x8xf32> to vector<2x8x8xf32>
    %1019 = vector.shape_cast %1016 : vector<16x8xf32> to vector<2x8x8xf32>
    "tpu.trace_start"() <{level = 10 : i32, message = "bqd,bkd->bqk"}> : () -> ()
    %cst_413 = arith.constant dense<0.000000e+00> : vector<2x8x8xf32>
    %1020 = tpu.matmul %1017, %1018, %cst_413 {dimension_numbers = #tpu.dot_dimension_numbers<[2], [2], [1], [1], [0, 0, 0, 1, 1, 1], [0], [0]>} : vector<2x8x8xf32>, vector<2x8x8xf32>, vector<2x8x8xf32> -> vector<2x8x8xf32>
    "tpu.trace_stop"() : () -> ()
    %cst_414 = arith.constant 0.353553385 : f32
    %1021 = vector.broadcast %cst_414 : f32 to vector<2x8x8xf32>
    %1022 = arith.mulf %1020, %1021 : vector<2x8x8xf32>
    %cst_415 = arith.constant -1.000000e+04 : f32
    %1023 = vector.broadcast %cst_415 : f32 to vector<2x8x8xf32>
    %1024 = arith.select %572, %1022, %1023 : vector<2x8x8xi1>, vector<2x8x8xf32>
    %cst_416 = arith.constant dense<0xFF800000> : vector<2x8xf32>
    %1025 = vector.multi_reduction <maximumf>, %1024, %cst_416 [2] : vector<2x8x8xf32> to vector<2x8xf32>
    %1026 = vector.shape_cast %1025 : vector<2x8xf32> to vector<2x8x1xf32>
    %1027 = vector.broadcast %1026 : vector<2x8x1xf32> to vector<2x8x8xf32>
    %1028 = arith.subf %1024, %1027 : vector<2x8x8xf32>
    %1029 = math.exp %1028 : vector<2x8x8xf32>
    %cst_417 = arith.constant dense<0.000000e+00> : vector<2x8xf32>
    %1030 = vector.multi_reduction <add>, %1029, %cst_417 [2] : vector<2x8x8xf32> to vector<2x8xf32>
    %1031 = vector.shape_cast %1030 : vector<2x8xf32> to vector<2x8x1xf32>
    %1032 = vector.broadcast %1031 : vector<2x8x1xf32> to vector<2x8x8xf32>
    %1033 = arith.divf %1029, %1032 : vector<2x8x8xf32>
    "tpu.trace_start"() <{level = 10 : i32, message = "bqk,bkd->bqd"}> : () -> ()
    %cst_418 = arith.constant dense<0.000000e+00> : vector<2x8x8xf32>
    %1034 = tpu.matmul %1033, %1019, %cst_418 {dimension_numbers = #tpu.dot_dimension_numbers<[2], [1], [1], [2], [0, 0, 0, 1, 1, 2], [0], [0]>} : vector<2x8x8xf32>, vector<2x8x8xf32>, vector<2x8x8xf32> -> vector<2x8x8xf32>
    "tpu.trace_stop"() : () -> ()
    %1035 = vector.shape_cast %1034 : vector<2x8x8xf32> to vector<16x8xf32>
    %1036 = vector.extract_strided_slice %906 {offsets = [2, 0, 0], sizes = [1, 8, 32], strides = [1, 1, 1]} : vector<4x8x32xf32> to vector<1x8x32xf32>
    %1037 = vector.shape_cast %1036 : vector<1x8x32xf32> to vector<8x32xf32>
    %cst_419 = arith.constant dense<0.000000e+00> : vector<16x32xf32>
    %1038 = tpu.matmul %1035, %1037, %cst_419 {dimension_numbers = #tpu.dot_dimension_numbers<[1], [0], [0], [1], [0, 0, 1, 1], [], []>} : vector<16x8xf32>, vector<8x32xf32>, vector<16x32xf32> -> vector<16x32xf32>
    %1039 = arith.addf %995, %1038 : vector<16x32xf32>
    %1040 = vector.extract_strided_slice %894 {offsets = [3, 0, 0], sizes = [1, 32, 8], strides = [1, 1, 1]} : vector<4x32x8xf32> to vector<1x32x8xf32>
    %1041 = vector.shape_cast %1040 : vector<1x32x8xf32> to vector<32x8xf32>
    %cst_420 = arith.constant dense<0.000000e+00> : vector<16x8xf32>
    %1042 = tpu.matmul %886, %1041, %cst_420 {dimension_numbers = #tpu.dot_dimension_numbers<[1], [0], [0], [1], [0, 0, 1, 1], [], []>} : vector<16x32xf32>, vector<32x8xf32>, vector<16x8xf32> -> vector<16x8xf32>
    %1043 = vector.extract_strided_slice %896 {offsets = [3, 0, 0], sizes = [1, 1, 8], strides = [1, 1, 1]} : vector<4x1x8xf32> to vector<1x1x8xf32>
    %1044 = vector.shape_cast %1043 : vector<1x1x8xf32> to vector<1x8xf32>
    %1045 = vector.broadcast %1044 : vector<1x8xf32> to vector<16x8xf32>
    %1046 = arith.addf %1042, %1045 : vector<16x8xf32>
    %1047 = vector.extract_strided_slice %898 {offsets = [3, 0, 0], sizes = [1, 32, 8], strides = [1, 1, 1]} : vector<4x32x8xf32> to vector<1x32x8xf32>
    %1048 = vector.shape_cast %1047 : vector<1x32x8xf32> to vector<32x8xf32>
    %cst_421 = arith.constant dense<0.000000e+00> : vector<16x8xf32>
    %1049 = tpu.matmul %886, %1048, %cst_421 {dimension_numbers = #tpu.dot_dimension_numbers<[1], [0], [0], [1], [0, 0, 1, 1], [], []>} : vector<16x32xf32>, vector<32x8xf32>, vector<16x8xf32> -> vector<16x8xf32>
    %1050 = vector.extract_strided_slice %900 {offsets = [3, 0, 0], sizes = [1, 1, 8], strides = [1, 1, 1]} : vector<4x1x8xf32> to vector<1x1x8xf32>
    %1051 = vector.shape_cast %1050 : vector<1x1x8xf32> to vector<1x8xf32>
    %1052 = vector.broadcast %1051 : vector<1x8xf32> to vector<16x8xf32>
    %1053 = arith.addf %1049, %1052 : vector<16x8xf32>
    %1054 = vector.extract_strided_slice %902 {offsets = [3, 0, 0], sizes = [1, 32, 8], strides = [1, 1, 1]} : vector<4x32x8xf32> to vector<1x32x8xf32>
    %1055 = vector.shape_cast %1054 : vector<1x32x8xf32> to vector<32x8xf32>
    %cst_422 = arith.constant dense<0.000000e+00> : vector<16x8xf32>
    %1056 = tpu.matmul %886, %1055, %cst_422 {dimension_numbers = #tpu.dot_dimension_numbers<[1], [0], [0], [1], [0, 0, 1, 1], [], []>} : vector<16x32xf32>, vector<32x8xf32>, vector<16x8xf32> -> vector<16x8xf32>
    %1057 = vector.extract_strided_slice %904 {offsets = [3, 0, 0], sizes = [1, 1, 8], strides = [1, 1, 1]} : vector<4x1x8xf32> to vector<1x1x8xf32>
    %1058 = vector.shape_cast %1057 : vector<1x1x8xf32> to vector<1x8xf32>
    %1059 = vector.broadcast %1058 : vector<1x8xf32> to vector<16x8xf32>
    %1060 = arith.addf %1056, %1059 : vector<16x8xf32>
    %1061 = vector.shape_cast %1046 : vector<16x8xf32> to vector<2x8x8xf32>
    %1062 = vector.shape_cast %1053 : vector<16x8xf32> to vector<2x8x8xf32>
    %1063 = vector.shape_cast %1060 : vector<16x8xf32> to vector<2x8x8xf32>
    "tpu.trace_start"() <{level = 10 : i32, message = "bqd,bkd->bqk"}> : () -> ()
    %cst_423 = arith.constant dense<0.000000e+00> : vector<2x8x8xf32>
    %1064 = tpu.matmul %1061, %1062, %cst_423 {dimension_numbers = #tpu.dot_dimension_numbers<[2], [2], [1], [1], [0, 0, 0, 1, 1, 1], [0], [0]>} : vector<2x8x8xf32>, vector<2x8x8xf32>, vector<2x8x8xf32> -> vector<2x8x8xf32>
    "tpu.trace_stop"() : () -> ()
    %cst_424 = arith.constant 0.353553385 : f32
    %1065 = vector.broadcast %cst_424 : f32 to vector<2x8x8xf32>
    %1066 = arith.mulf %1064, %1065 : vector<2x8x8xf32>
    %cst_425 = arith.constant -1.000000e+04 : f32
    %1067 = vector.broadcast %cst_425 : f32 to vector<2x8x8xf32>
    %1068 = arith.select %572, %1066, %1067 : vector<2x8x8xi1>, vector<2x8x8xf32>
    %cst_426 = arith.constant dense<0xFF800000> : vector<2x8xf32>
    %1069 = vector.multi_reduction <maximumf>, %1068, %cst_426 [2] : vector<2x8x8xf32> to vector<2x8xf32>
    %1070 = vector.shape_cast %1069 : vector<2x8xf32> to vector<2x8x1xf32>
    %1071 = vector.broadcast %1070 : vector<2x8x1xf32> to vector<2x8x8xf32>
    %1072 = arith.subf %1068, %1071 : vector<2x8x8xf32>
    %1073 = math.exp %1072 : vector<2x8x8xf32>
    %cst_427 = arith.constant dense<0.000000e+00> : vector<2x8xf32>
    %1074 = vector.multi_reduction <add>, %1073, %cst_427 [2] : vector<2x8x8xf32> to vector<2x8xf32>
    %1075 = vector.shape_cast %1074 : vector<2x8xf32> to vector<2x8x1xf32>
    %1076 = vector.broadcast %1075 : vector<2x8x1xf32> to vector<2x8x8xf32>
    %1077 = arith.divf %1073, %1076 : vector<2x8x8xf32>
    "tpu.trace_start"() <{level = 10 : i32, message = "bqk,bkd->bqd"}> : () -> ()
    %cst_428 = arith.constant dense<0.000000e+00> : vector<2x8x8xf32>
    %1078 = tpu.matmul %1077, %1063, %cst_428 {dimension_numbers = #tpu.dot_dimension_numbers<[2], [1], [1], [2], [0, 0, 0, 1, 1, 2], [0], [0]>} : vector<2x8x8xf32>, vector<2x8x8xf32>, vector<2x8x8xf32> -> vector<2x8x8xf32>
    "tpu.trace_stop"() : () -> ()
    %1079 = vector.shape_cast %1078 : vector<2x8x8xf32> to vector<16x8xf32>
    %1080 = vector.extract_strided_slice %906 {offsets = [3, 0, 0], sizes = [1, 8, 32], strides = [1, 1, 1]} : vector<4x8x32xf32> to vector<1x8x32xf32>
    %1081 = vector.shape_cast %1080 : vector<1x8x32xf32> to vector<8x32xf32>
    %cst_429 = arith.constant dense<0.000000e+00> : vector<16x32xf32>
    %1082 = tpu.matmul %1079, %1081, %cst_429 {dimension_numbers = #tpu.dot_dimension_numbers<[1], [0], [0], [1], [0, 0, 1, 1], [], []>} : vector<16x8xf32>, vector<8x32xf32>, vector<16x32xf32> -> vector<16x32xf32>
    %1083 = arith.addf %1039, %1082 : vector<16x32xf32>
    %1084 = vector.broadcast %908 : vector<1x32xf32> to vector<16x32xf32>
    %1085 = arith.addf %1083, %1084 : vector<16x32xf32>
    %1086 = arith.addf %1085, %886 : vector<16x32xf32>
    %1087 = vector.extract_strided_slice %888 {offsets = [0, 0, 0], sizes = [1, 1, 32], strides = [1, 1, 1]} : vector<2x1x32xf32> to vector<1x1x32xf32>
    %1088 = vector.shape_cast %1087 : vector<1x1x32xf32> to vector<1x32xf32>
    %1089 = vector.extract_strided_slice %888 {offsets = [1, 0, 0], sizes = [1, 1, 32], strides = [1, 1, 1]} : vector<2x1x32xf32> to vector<1x1x32xf32>
    %1090 = vector.shape_cast %1089 : vector<1x1x32xf32> to vector<1x32xf32>
    %cst_430 = arith.constant dense<0.000000e+00> : vector<16xf32>
    %1091 = vector.multi_reduction <add>, %1086, %cst_430 [1] : vector<16x32xf32> to vector<16xf32>
    %1092 = vector.shape_cast %1091 : vector<16xf32> to vector<16x1xf32>
    %cst_431 = arith.constant 3.200000e+01 : f32
    %1093 = vector.broadcast %cst_431 : f32 to vector<16x1xf32>
    %1094 = arith.divf %1092, %1093 : vector<16x1xf32>
    %1095 = vector.broadcast %1094 : vector<16x1xf32> to vector<16x32xf32>
    %1096 = arith.subf %1086, %1095 : vector<16x32xf32>
    %1097 = arith.mulf %1096, %1096 : vector<16x32xf32>
    %cst_432 = arith.constant dense<0.000000e+00> : vector<16xf32>
    %1098 = vector.multi_reduction <add>, %1097, %cst_432 [1] : vector<16x32xf32> to vector<16xf32>
    %1099 = vector.shape_cast %1098 : vector<16xf32> to vector<16x1xf32>
    %cst_433 = arith.constant 3.200000e+01 : f32
    %1100 = vector.broadcast %cst_433 : f32 to vector<16x1xf32>
    %1101 = arith.divf %1099, %1100 : vector<16x1xf32>
    %1102 = vector.broadcast %1094 : vector<16x1xf32> to vector<16x32xf32>
    %1103 = arith.subf %1086, %1102 : vector<16x32xf32>
    %cst_434 = arith.constant 9.99999974E-6 : f32
    %1104 = vector.broadcast %cst_434 : f32 to vector<16x1xf32>
    %1105 = arith.addf %1101, %1104 : vector<16x1xf32>
    %1106 = math.rsqrt %1105 : vector<16x1xf32>
    %1107 = vector.broadcast %1106 : vector<16x1xf32> to vector<16x32xf32>
    %1108 = arith.mulf %1103, %1107 : vector<16x32xf32>
    %1109 = vector.broadcast %1088 : vector<1x32xf32> to vector<16x32xf32>
    %1110 = arith.mulf %1108, %1109 : vector<16x32xf32>
    %1111 = vector.broadcast %1090 : vector<1x32xf32> to vector<16x32xf32>
    %1112 = arith.addf %1110, %1111 : vector<16x32xf32>
    %c1_435 = arith.constant 1 : index
    %c0_436 = arith.constant 0 : index
    %c0_437 = arith.constant 0 : index
    %1113 = vector.load %arg27[%c1_435, %c0_436, %c0_437] : memref<2x32x32xf32, #tpu.memory_space<vmem>>, vector<1x32x32xf32>
    %1114 = vector.shape_cast %1113 : vector<1x32x32xf32> to vector<32x32xf32>
    %cst_438 = arith.constant dense<0.000000e+00> : vector<2x32xf32>
    %1115 = tpu.matmul %559, %1114, %cst_438 {dimension_numbers = #tpu.dot_dimension_numbers<[1], [0], [0], [1], [0, 0, 1, 1], [], []>} : vector<2x32xf32>, vector<32x32xf32>, vector<2x32xf32> -> vector<2x32xf32>
    %c1_439 = arith.constant 1 : index
    %c0_440 = arith.constant 0 : index
    %c0_441 = arith.constant 0 : index
    %1116 = vector.load %arg28[%c1_439, %c0_440, %c0_441] : memref<2x1x32xf32, #tpu.memory_space<vmem>>, vector<1x1x32xf32>
    %1117 = vector.shape_cast %1116 : vector<1x1x32xf32> to vector<1x32xf32>
    %1118 = vector.broadcast %1117 : vector<1x32xf32> to vector<2x32xf32>
    %1119 = arith.addf %1115, %1118 : vector<2x32xf32>
    %c1_442 = arith.constant 1 : index
    %c0_443 = arith.constant 0 : index
    %c0_444 = arith.constant 0 : index
    %1120 = vector.load %arg29[%c1_442, %c0_443, %c0_444] : memref<2x32x32xf32, #tpu.memory_space<vmem>>, vector<1x32x32xf32>
    %1121 = vector.shape_cast %1120 : vector<1x32x32xf32> to vector<32x32xf32>
    %cst_445 = arith.constant dense<0.000000e+00> : vector<2x32xf32>
    %1122 = tpu.matmul %1119, %1121, %cst_445 {dimension_numbers = #tpu.dot_dimension_numbers<[1], [0], [0], [1], [0, 0, 1, 1], [], []>} : vector<2x32xf32>, vector<32x32xf32>, vector<2x32xf32> -> vector<2x32xf32>
    %c1_446 = arith.constant 1 : index
    %c0_447 = arith.constant 0 : index
    %c0_448 = arith.constant 0 : index
    %1123 = vector.load %arg30[%c1_446, %c0_447, %c0_448] : memref<2x1x32xf32, #tpu.memory_space<vmem>>, vector<1x1x32xf32>
    %1124 = vector.shape_cast %1123 : vector<1x1x32xf32> to vector<1x32xf32>
    %1125 = vector.broadcast %1124 : vector<1x32xf32> to vector<2x32xf32>
    %1126 = arith.addf %1122, %1125 : vector<2x32xf32>
    %1127 = vector.shape_cast %1112 : vector<16x32xf32> to vector<2x8x32xf32>
    %1128 = vector.shape_cast %1126 : vector<2x32xf32> to vector<2x1x32xf32>
    %1129 = vector.broadcast %1128 : vector<2x1x32xf32> to vector<2x8x32xf32>
    %1130 = arith.addf %1127, %1129 : vector<2x8x32xf32>
    %1131 = vector.shape_cast %1130 : vector<2x8x32xf32> to vector<16x32xf32>
    %1132 = vector.extract_strided_slice %890 {offsets = [0, 0, 0], sizes = [1, 1, 32], strides = [1, 1, 1]} : vector<2x1x32xf32> to vector<1x1x32xf32>
    %1133 = vector.shape_cast %1132 : vector<1x1x32xf32> to vector<1x32xf32>
    %1134 = vector.extract_strided_slice %890 {offsets = [1, 0, 0], sizes = [1, 1, 32], strides = [1, 1, 1]} : vector<2x1x32xf32> to vector<1x1x32xf32>
    %1135 = vector.shape_cast %1134 : vector<1x1x32xf32> to vector<1x32xf32>
    %cst_449 = arith.constant dense<0.000000e+00> : vector<16xf32>
    %1136 = vector.multi_reduction <add>, %1131, %cst_449 [1] : vector<16x32xf32> to vector<16xf32>
    %1137 = vector.shape_cast %1136 : vector<16xf32> to vector<16x1xf32>
    %cst_450 = arith.constant 3.200000e+01 : f32
    %1138 = vector.broadcast %cst_450 : f32 to vector<16x1xf32>
    %1139 = arith.divf %1137, %1138 : vector<16x1xf32>
    %1140 = vector.broadcast %1139 : vector<16x1xf32> to vector<16x32xf32>
    %1141 = arith.subf %1131, %1140 : vector<16x32xf32>
    %1142 = arith.mulf %1141, %1141 : vector<16x32xf32>
    %cst_451 = arith.constant dense<0.000000e+00> : vector<16xf32>
    %1143 = vector.multi_reduction <add>, %1142, %cst_451 [1] : vector<16x32xf32> to vector<16xf32>
    %1144 = vector.shape_cast %1143 : vector<16xf32> to vector<16x1xf32>
    %cst_452 = arith.constant 3.200000e+01 : f32
    %1145 = vector.broadcast %cst_452 : f32 to vector<16x1xf32>
    %1146 = arith.divf %1144, %1145 : vector<16x1xf32>
    %1147 = vector.broadcast %1139 : vector<16x1xf32> to vector<16x32xf32>
    %1148 = arith.subf %1131, %1147 : vector<16x32xf32>
    %cst_453 = arith.constant 9.99999974E-6 : f32
    %1149 = vector.broadcast %cst_453 : f32 to vector<16x1xf32>
    %1150 = arith.addf %1146, %1149 : vector<16x1xf32>
    %1151 = math.rsqrt %1150 : vector<16x1xf32>
    %1152 = vector.broadcast %1151 : vector<16x1xf32> to vector<16x32xf32>
    %1153 = arith.mulf %1148, %1152 : vector<16x32xf32>
    %1154 = vector.broadcast %1133 : vector<1x32xf32> to vector<16x32xf32>
    %1155 = arith.mulf %1153, %1154 : vector<16x32xf32>
    %1156 = vector.broadcast %1135 : vector<1x32xf32> to vector<16x32xf32>
    %1157 = arith.addf %1155, %1156 : vector<16x32xf32>
    %c1_454 = arith.constant 1 : index
    %c0_455 = arith.constant 0 : index
    %c0_456 = arith.constant 0 : index
    %1158 = vector.load %arg32[%c1_454, %c0_455, %c0_456] : memref<2x32x64xf32, #tpu.memory_space<vmem>>, vector<1x32x64xf32>
    %1159 = vector.shape_cast %1158 : vector<1x32x64xf32> to vector<32x64xf32>
    %cst_457 = arith.constant dense<0.000000e+00> : vector<16x64xf32>
    %1160 = tpu.matmul %1157, %1159, %cst_457 {dimension_numbers = #tpu.dot_dimension_numbers<[1], [0], [0], [1], [0, 0, 1, 1], [], []>} : vector<16x32xf32>, vector<32x64xf32>, vector<16x64xf32> -> vector<16x64xf32>
    %c1_458 = arith.constant 1 : index
    %c0_459 = arith.constant 0 : index
    %c0_460 = arith.constant 0 : index
    %1161 = vector.load %arg33[%c1_458, %c0_459, %c0_460] : memref<2x1x64xf32, #tpu.memory_space<vmem>>, vector<1x1x64xf32>
    %1162 = vector.shape_cast %1161 : vector<1x1x64xf32> to vector<1x64xf32>
    %1163 = vector.broadcast %1162 : vector<1x64xf32> to vector<16x64xf32>
    %1164 = arith.addf %1160, %1163 : vector<16x64xf32>
    %cst_461 = arith.constant 0.000000e+00 : f32
    %1165 = vector.broadcast %cst_461 : f32 to vector<16x64xf32>
    %1166 = arith.maximumf %1164, %1165 : vector<16x64xf32>
    %c1_462 = arith.constant 1 : index
    %c0_463 = arith.constant 0 : index
    %c0_464 = arith.constant 0 : index
    %1167 = vector.load %arg34[%c1_462, %c0_463, %c0_464] : memref<2x64x32xf32, #tpu.memory_space<vmem>>, vector<1x64x32xf32>
    %1168 = vector.shape_cast %1167 : vector<1x64x32xf32> to vector<64x32xf32>
    %cst_465 = arith.constant dense<0.000000e+00> : vector<16x32xf32>
    %1169 = tpu.matmul %1166, %1168, %cst_465 {dimension_numbers = #tpu.dot_dimension_numbers<[1], [0], [0], [1], [0, 0, 1, 1], [], []>} : vector<16x64xf32>, vector<64x32xf32>, vector<16x32xf32> -> vector<16x32xf32>
    %c1_466 = arith.constant 1 : index
    %c0_467 = arith.constant 0 : index
    %c0_468 = arith.constant 0 : index
    %1170 = vector.load %arg35[%c1_466, %c0_467, %c0_468] : memref<2x1x32xf32, #tpu.memory_space<vmem>>, vector<1x1x32xf32>
    %1171 = vector.shape_cast %1170 : vector<1x1x32xf32> to vector<1x32xf32>
    %1172 = vector.broadcast %1171 : vector<1x32xf32> to vector<16x32xf32>
    %1173 = arith.addf %1169, %1172 : vector<16x32xf32>
    %1174 = arith.addf %1173, %1157 : vector<16x32xf32>
    %1175 = vector.extract_strided_slice %892 {offsets = [0, 0, 0], sizes = [1, 1, 32], strides = [1, 1, 1]} : vector<2x1x32xf32> to vector<1x1x32xf32>
    %1176 = vector.shape_cast %1175 : vector<1x1x32xf32> to vector<1x32xf32>
    %1177 = vector.extract_strided_slice %892 {offsets = [1, 0, 0], sizes = [1, 1, 32], strides = [1, 1, 1]} : vector<2x1x32xf32> to vector<1x1x32xf32>
    %1178 = vector.shape_cast %1177 : vector<1x1x32xf32> to vector<1x32xf32>
    %cst_469 = arith.constant dense<0.000000e+00> : vector<16xf32>
    %1179 = vector.multi_reduction <add>, %1174, %cst_469 [1] : vector<16x32xf32> to vector<16xf32>
    %1180 = vector.shape_cast %1179 : vector<16xf32> to vector<16x1xf32>
    %cst_470 = arith.constant 3.200000e+01 : f32
    %1181 = vector.broadcast %cst_470 : f32 to vector<16x1xf32>
    %1182 = arith.divf %1180, %1181 : vector<16x1xf32>
    %1183 = vector.broadcast %1182 : vector<16x1xf32> to vector<16x32xf32>
    %1184 = arith.subf %1174, %1183 : vector<16x32xf32>
    %1185 = arith.mulf %1184, %1184 : vector<16x32xf32>
    %cst_471 = arith.constant dense<0.000000e+00> : vector<16xf32>
    %1186 = vector.multi_reduction <add>, %1185, %cst_471 [1] : vector<16x32xf32> to vector<16xf32>
    %1187 = vector.shape_cast %1186 : vector<16xf32> to vector<16x1xf32>
    %cst_472 = arith.constant 3.200000e+01 : f32
    %1188 = vector.broadcast %cst_472 : f32 to vector<16x1xf32>
    %1189 = arith.divf %1187, %1188 : vector<16x1xf32>
    %1190 = vector.broadcast %1182 : vector<16x1xf32> to vector<16x32xf32>
    %1191 = arith.subf %1174, %1190 : vector<16x32xf32>
    %cst_473 = arith.constant 9.99999974E-6 : f32
    %1192 = vector.broadcast %cst_473 : f32 to vector<16x1xf32>
    %1193 = arith.addf %1189, %1192 : vector<16x1xf32>
    %1194 = math.rsqrt %1193 : vector<16x1xf32>
    %1195 = vector.broadcast %1194 : vector<16x1xf32> to vector<16x32xf32>
    %1196 = arith.mulf %1191, %1195 : vector<16x32xf32>
    %1197 = vector.broadcast %1176 : vector<1x32xf32> to vector<16x32xf32>
    %1198 = arith.mulf %1196, %1197 : vector<16x32xf32>
    %1199 = vector.broadcast %1178 : vector<1x32xf32> to vector<16x32xf32>
    %1200 = arith.addf %1198, %1199 : vector<16x32xf32>
    %c0_474 = arith.constant 0 : index
    %c0_475 = arith.constant 0 : index
    %1201 = vector.load %arg37[%c0_474, %c0_475] : memref<32x128xf32, #tpu.memory_space<vmem>>, vector<32x128xf32>
    %cst_476 = arith.constant dense<0.000000e+00> : vector<16x128xf32>
    %1202 = tpu.matmul %1200, %1201, %cst_476 {dimension_numbers = #tpu.dot_dimension_numbers<[1], [0], [0], [1], [0, 0, 1, 1], [], []>} : vector<16x32xf32>, vector<32x128xf32>, vector<16x128xf32> -> vector<16x128xf32>
    %c0_477 = arith.constant 0 : index
    %c0_478 = arith.constant 0 : index
    %1203 = vector.load %arg38[%c0_477, %c0_478] : memref<1x128xf32, #tpu.memory_space<vmem>>, vector<1x128xf32>
    %1204 = vector.broadcast %1203 : vector<1x128xf32> to vector<16x128xf32>
    %1205 = arith.addf %1202, %1204 : vector<16x128xf32>
    %1206 = vector.shape_cast %1205 : vector<16x128xf32> to vector<2x8x128xf32>
    %c0_479 = arith.constant 0 : index
    %c0_480 = arith.constant 0 : index
    %c0_481 = arith.constant 0 : index
    %1207 = vector.load %arg39[%c0_479, %c0_480, %c0_481] : memref<2x8x128xf32, #tpu.memory_space<vmem>>, vector<2x8x128xf32>
    tpu.vector_store %arg39[%c0_479, %c0_480, %c0_481], %1206 {strides = array<i32>} : memref<2x8x128xf32, #tpu.memory_space<vmem>>, vector<2x8x128xf32>,
    return
  }
}

</mosaic_0001>

<bundles_post_ra>
// kernel: transformer_discrete_forward.1
= control target key start
LH: loop header
LB: loop body
LE: loop exit
PB: predicated region body
PF: predicated region fallthrough
CT: control target
= control target key end

     0   :  { %s15758_s6 = smov 1   ;;  %s15759_s10 = smov 2   ;;  %s17231_s0 = inlined_call_operand.smem [shape: u32[41], index: -1, kind: input, shape index: {}] }
   0x1   :  { %s15817_s5 = sld [smem:[%s17231_s0]]   ;;  %s15760_s14 = smov 3  }
   0x2   :  { %s15822_s9 = sld [smem:[%s17231_s0 + %s15758_s6]]   ;;  %s15761_s18 = smov 4  }
   0x3   :  { %s15827_s13 = sld [smem:[%s17231_s0 + %s15759_s10]]   ;;  %s15762_s22 = smov 5  }
   0x4   :  { %s15832_s17 = sld [smem:[%s17231_s0 + %s15760_s14]]   ;;  %s15763_s26 = smov 6  }
   0x5   :  { %s15837_s21 = sld [smem:[%s17231_s0 + %s15761_s18]]   ;;  %s15764_s30 = smov 7  }
   0x6   :  { %s15842_s25 = sld [smem:[%s17231_s0 + %s15762_s22]]   ;;  %s15765_s4 = smov 8  }
   0x7   :  { %s15847_s29 = sld [smem:[%s17231_s0 + %s15763_s26]]   ;;  %s15766_s10 = smov 9  }
   0x8   :  { %17254 = sst [smem:[#allocation8_spill]] %s15822_s9  ;;  %s15767_s15 = smov 10  }
   0x9   :  { %s15852_s3 = sld [smem:[%s17231_s0 + %s15764_s30]]   ;;  %s15768_s20 = smov 11  }
   0xa   :  { %17255 = sst [smem:[#allocation9_spill]] %s15832_s17  ;;  %s15769_s26 = smov 12  }
   0xb   :  { %s15857_s8 = sld [smem:[%s17231_s0 + %s15765_s4]]   ;;  %s15770_s1 = smov 13  }
   0xc   :  { %s15862_s14 = sld [smem:[%s17231_s0 + %s15766_s10]]   ;;  %s15771_s7 = smov 14  }
   0xd   :  { %s15867_s19 = sld [smem:[%s17231_s0 + %s15767_s15]]   ;;  %s15772_s15 = smov 15  }
   0xe   :  { %s15872_s24 = sld [smem:[%s17231_s0 + %s15768_s20]]   ;;  %s15773_s22 = smov 16  }
   0xf   :  { %s15877_s30 = sld [smem:[%s17231_s0 + %s15769_s26]]   ;;  %s15774_s28 = smov 17  }
  0x10   :  { %s15882_s6 = sld [smem:[%s17231_s0 + %s15770_s1]]  }
  0x11   :  { %s15887_s12 = sld [smem:[%s17231_s0 + %s15771_s7]]   ;;  %s15775_s7 = smov 18  }
  0x12   :  { %s15892_s20 = sld [smem:[%s17231_s0 + %s15772_s15]]   ;;  %s15776_s15 = smov 19  }
  0x13   :  { %s15897_s27 = sld [smem:[%s17231_s0 + %s15773_s22]]   ;;  %s15777_s22 = smov 20  }
  0x14   :  { %s15902_s4 = sld [smem:[%s17231_s0 + %s15774_s28]]   ;;  %s15778_s28 = smov 21  }
  0x15   :  { %s15907_s17 = sld [smem:[%s17231_s0 + %s15775_s7]]   ;;  %s15779_s7 = smov 22  }
  0x16   :  { %s15912_s9 = sld [smem:[%s17231_s0 + %s15776_s15]]   ;;  %s15780_s15 = smov 23  }
  0x19   :  { %17256 = sst [smem:[#allocation10_spill]] %s15897_s27 }
  0x1a   :  { %17257 = sst [smem:[#allocation11_spill]] %s15902_s4 }
  0x1b   :  { %17258 = sst [smem:[#allocation12_spill]] %s15907_s17 }
  0x1c   :  { %17259 = sst [smem:[#allocation13_spill]] %s15912_s9 }
  0x1d   :  { %s15917_s27 = sld [smem:[%s17231_s0 + %s15777_s22]]   ;;  %s15781_s22 = smov 24  }
  0x1e   :  { %s15922_s4 = sld [smem:[%s17231_s0 + %s15778_s28]]   ;;  %s15782_s28 = smov 25  }
  0x1f   :  { %s15927_s17 = sld [smem:[%s17231_s0 + %s15779_s7]]   ;;  %s15783_s7 = smov 26  }
  0x20   :  { %s15932_s9 = sld [smem:[%s17231_s0 + %s15780_s15]]   ;;  %s15784_s15 = smov 27  }
  0x23   :  { %17260 = sst [smem:[#allocation14_spill]] %s15917_s27 }
  0x24   :  { %17261 = sst [smem:[#allocation15_spill]] %s15922_s4 }
  0x25   :  { %17262 = sst [smem:[#allocation16_spill]] %s15927_s17 }
  0x26   :  { %17263 = sst [smem:[#allocation17_spill]] %s15932_s9 }
  0x27   :  { %s15937_s27 = sld [smem:[%s17231_s0 + %s15781_s22]]   ;;  %s15785_s22 = smov 28  }
  0x28   :  { %s15942_s4 = sld [smem:[%s17231_s0 + %s15782_s28]]   ;;  %s15786_s28 = smov 29  }
  0x29   :  { %s15947_s17 = sld [smem:[%s17231_s0 + %s15783_s7]]   ;;  %s15787_s7 = smov 30  }
  0x2a   :  { %s15952_s9 = sld [smem:[%s17231_s0 + %s15784_s15]]   ;;  %s15788_s15 = smov 31  }
  0x2d   :  { %17264 = sst [smem:[#allocation18_spill]] %s15937_s27 }
  0x2e   :  { %17265 = sst [smem:[#allocation19_spill]] %s15942_s4 }
  0x2f   :  { %17266 = sst [smem:[#allocation20_spill]] %s15947_s17 }
  0x30   :  { %17267 = sst [smem:[#allocation21_spill]] %s15952_s9 }
  0x31   :  { %s15957_s27 = sld [smem:[%s17231_s0 + %s15785_s22]]   ;;  %s15789_s22 = smov 32  }
  0x32   :  { %s15962_s4 = sld [smem:[%s17231_s0 + %s15786_s28]]   ;;  %s15790_s28 = smov 33  }
  0x33   :  { %s15967_s17 = sld [smem:[%s17231_s0 + %s15787_s7]]   ;;  %s15791_s7 = smov 34  }
  0x34   :  { %s15972_s9 = sld [smem:[%s17231_s0 + %s15788_s15]]   ;;  %s15792_s15 = smov 35  }
  0x37   :  { %17268 = sst [smem:[#allocation22_spill]] %s15957_s27 }
  0x38   :  { %17269 = sst [smem:[#allocation23_spill]] %s15962_s4 }
  0x39   :  { %17270 = sst [smem:[#allocation24_spill]] %s15967_s17 }
  0x3a   :  { %17271 = sst [smem:[#allocation25_spill]] %s15972_s9 }
  0x3b   :  { %s15977_s27 = sld [smem:[%s17231_s0 + %s15789_s22]]   ;;  %s15793_s22 = smov 36  }
  0x3c   :  { %s15982_s4 = sld [smem:[%s17231_s0 + %s15790_s28]]   ;;  %s15794_s28 = smov 37  }
  0x3d   :  { %s15987_s17 = sld [smem:[%s17231_s0 + %s15791_s7]]   ;;  %s15795_s7 = smov 38  }
  0x3e   :  { %s15992_s9 = sld [smem:[%s17231_s0 + %s15792_s15]]   ;;  %s15796_s15 = smov 39  }
  0x41   :  { %17272 = sst [smem:[#allocation26_spill]] %s15977_s27 }
  0x42   :  { %17273 = sst [smem:[#allocation27_spill]] %s15982_s4 }
  0x43   :  { %17274 = sst [smem:[#allocation28_spill]] %s15987_s17 }
  0x44   :  { %17275 = sst [smem:[#allocation29_spill]] %s15992_s9 }
  0x45   :  { %s15997_s27 = sld [smem:[%s17231_s0 + %s15793_s22]]   ;;  %s15797_s22 = smov 40  }
  0x46   :  { %s16002_s4 = sld [smem:[%s17231_s0 + %s15794_s28]]  }
  0x47   :  { %s16007_s17 = sld [smem:[%s17231_s0 + %s15795_s7]]  }
  0x48   :  { %s16012_s9 = sld [smem:[%s17231_s0 + %s15796_s15]]  }
  0x4b   :  { %17276 = sst [smem:[#allocation30_spill]] %s15997_s27 }
  0x4c   :  { %s16017_s27 = sld [smem:[%s17231_s0 + %s15797_s22]]  }
  0x4d   :  { %87 = vsyncpa [#allocation3], 0  ;;  %v220_v0 = vld [vmem:[%s15847_s29] sm:$0xff]  ;;  %v221_v1 = vld [vmem:[%s15847_s29 + $0x8] sm:$0xff]  ;;  %vm271_vm0 = vcmask 261120  }
  0x4e   :  { %v200_v2 = vld [vmem:[%s15837_s21] sm:$0xff]  ;;  %v14961_v3 = vpack.c.bf16 %v221_v1, %v220_v0  ;;  %v201_v4 = vld [vmem:[%s15837_s21 + $0x8] sm:$0xff]  ;;  %v222_v5 = vld [vmem:[%s15847_s29 + $0x10] sm:$0xff] }
  0x4f   :  { %v223_v6 = vld [vmem:[%s15847_s29 + $0x18] sm:$0xff]  ;;  %v14953_v7 = vpack.c.bf16 %v201_v4, %v200_v2  ;;  %v202_v9 = vld [vmem:[%s15837_s21 + $0x10] sm:$0xff]  ;;  %v16028_v11 = vld [vmem:[%s15817_s5] sm:$0xff] }
  0x50   :  { %v14965_v8 = vpack.c.bf16 %v223_v6, %v222_v5  ;;  %v203_v10 = vld [vmem:[%s15837_s21 + $0x18] sm:$0xff]  ;;  %14962 = vmatprep.subr.bf16.mxu1 %v14961_v3  ;;  %13869 = vmatprep.mubr.msk.f32.mxu1 %vm271_vm0, %v16028_v11 }
  0x51   :  { %v14957_v12 = vpack.c.bf16 %v203_v10, %v202_v9 }
  0x52   :  { %88 = vsyncpa [#allocation5], 0  ;;  %14964 = vmatpush3.bf16.msra.mxu1 %v14961_v3  ;;  %14954 = vmatprep.subr.bf16.mxu0 %v14953_v7  ;;  %v16035_v13 = vld [vmem:[%s15817_s5 + $0x8] sm:$0xff]  ;;  %v15798_v14 = vmov 0.0   ;;  %vm15799_vm1 = vmmov 0   ;;  %vm515_vm2 = vcmask 64512   ;;  %v175_v33 = vlaneseq }
  0x53   :  { %14956 = vmatpush3.bf16.msra.mxu0 %v14953_v7  ;;  %14966 = vmatprep.subr.bf16.mxu1 %v14965_v8  ;;  %v12790_v15 = vld [vmem:[%s15852_s3] ss:$0 sm:$0xff]  ;;  %v241_v26 = vld [vmem:[%s15857_s8 + $0x8] sm:$0xff]  ;;  %v242_v27 = vld [vmem:[%s15857_s8 + $0x10] sm:$0xff]  ;;  %v15800_v31 = vmov 1966171168  }
  0x54   :  { %14958 = vmatprep.subr.bf16.mxu0 %v14957_v12  ;;  %13858 = vmatprep.mubr.msk.f32.mxu0 %vm271_vm0, %v16028_v11  ;;  %v12787_v17 = vld [vmem:[%s15842_s25] ss:$0 sm:$0xff]  ;;  %v243_v29 = vld [vmem:[%s15857_s8 + $0x18] sm:$0xff]  ;;  %v173_v32 = vunpack.c.l.s4 %v15800_v31  ;;  %v16068_v36 = vshrl.u32 %v175_v33, 7  ;;  %v15801_v38 = vmov 0   ;;  %s17281_s0 = sld [smem:[#allocation10_spill]] }
  0x55   :  { %v240_v25 = vld [vmem:[%s15857_s8] sm:$0xff]  ;;  %v14973_v30 = vpack.c.bf16 %v243_v29, %v242_v27  ;;  %v227_v29 = vld [vmem:[%s15847_s29 + $0x38] sm:$0xff]  ;;  %vm3043_vm8 = vcmask 523264   ;;  %s17282_s5 = sld [smem:[#allocation11_spill]]  ;;  %s17300_s28 = sld [smem:[#allocation24_spill]] }
  0x56   :  { %14968 = vmatpush3.bf16.msra.mxu1 %v14965_v8  ;;  %v14969_v28 = vpack.c.bf16 %v241_v26, %v240_v25  ;;  %v169_v34 = vld [vmem:[%s15827_s13] sm:$0x3]  ;;  %v174_v35 = vunpack.c.0.s8 %v173_v32  ;;  %v16078_v44 = vsub.s32 0, %v16068_v36  ;;  %s17283_s13 = sld [smem:[#allocation12_spill]]  ;;  %s17302_s2 = sld [smem:[#allocation26_spill]] }
  0x57   :  { %14960 = vmatpush3.bf16.msra.mxu0 %v14957_v12  ;;  %13883 = vmatprep.subr.mxu1 %v15798_v14  ;;  %vm170_vm3 = vcmp.ne.f32.partialorder %v169_v34, 0.0  ;;  %v12793_v8 = vld [vmem:[%s15862_s14] ss:$0 sm:$0xff]  ;;  %s17301_s1 = sld [smem:[#allocation20_spill]]  ;;  %s17304_s10 = sld [smem:[#allocation25_spill]] }
  0x58   :  { %14970 = vmatprep.subr.bf16.mxu0 %v14969_v28  ;;  %v16071_v37 = vsub.s32 %v174_v35, %v16068_v36  ;;  %v171_v39 = vsel %vm170_vm3, 1, %v15801_v38  ;;  %s17303_s7 = sld [smem:[#allocation28_spill]]  ;;  %s17305_s11 = sld [smem:[#allocation27_spill]] }
  0x59   :  { %13870 = vmatmul.mubr.msk.f32.vlgmr.msra.gmra.mrb[0].mxu1 %vm271_vm0, %v16035_v13  ;;  %s17306_s15 = sld [smem:[#allocation29_spill]]  ;;  %s17307_s16 = sld [smem:[#allocation30_spill]] }
  0x5a   :  { %13859 = vmatmul.mubr.msk.f32.vlgmr.msra.gmra.mrb[0].mxu0 %vm271_vm0, %v16035_v13  ;;  %13885 = vmatprep.mubr.msk.f32.mxu1 %vm15799_vm1, %v15798_v14  ;;  %v178_v40 = vrot.slane %v171_v39, %v16071_v37 }
  0x5b   :  { %13880 = vmatprep.mubr.msk.f32.mxu0 %vm271_vm0, %v16028_v11  ;;  %14972 = vmatpush3.bf16.msra.mxu0 %v14969_v28  ;;  %v226_v28 = vld [vmem:[%s15847_s29 + $0x30] sm:$0xff] }
  0x5c   :  { %14974 = vmatprep.subr.bf16.mxu0 %v14973_v30  ;;  %v186_v41 = vrot.slane %v178_v40, %v16071_v37  ;;  %v179_v42 = vcombine.high %v178_v40, %v178_v40  ;;  %v14989_v32 = vpack.c.bf16 %v227_v29, %v226_v28 }
  0x5e   :  { %vm194_vm4 = vcmp.ne.s32.totalorder %v186_v41, 0  ;;  %v193_v43 = vrot.slane %v179_v42, %v16071_v37 }
  0x5f   :  { %14976 = vmatpush3.bf16.msra.mxu0 %v14973_v30  ;;  %v670_v45 = vsel %vm194_vm4, 1, %v15801_v38  ;;  %vm6140_vm4 = vcmask 253952  }
  0x60   :  { %vm195_vm5 = vcmp.ne.s32.totalorder %v193_v43, 0  ;;  %v675_v46 = vrot.slane %v670_v45, %v16078_v44  ;;  %v12805_v43 = vld [vmem:[%s15852_s3 + $0x1] ss:$0 sm:$0xff] }
  0x61   :  { %v671_v47 = vsel %vm195_vm5, 1, %v15801_v38  ;;  %vm8932_vm5 = vcmask 1041409  }
  0x62   :  { %13881 = vmatmul.mubr.msk.f32.vlgmr.msra.gmra.mrb[2].mxu0 %vm271_vm0, %v16035_v13  ;;  %vm16083_vm6 = vcmp.eq.s32.totalorder %v675_v46, 1  ;;  %v679_v50 = vrot.slane %v671_v47, %v16078_v44  ;;  %v12802_v46 = vld [vmem:[%s15842_s25 + $0x1] ss:$0 sm:$0xff] }
  0x63   :  { %13911 = vmatprep.mubr.msk.f32.mxu0 %vm271_vm0, %v16028_v11 }
  0x64   :  { %vm16091_vm7 = vcmp.eq.s32.totalorder %v679_v50, 1 }
 0x12c   :  { %v13871_v16 = vpop.f32.mrb[0].mxu1 }
 0x12d   :  { %v425_v18 = vpop.f32.mrb[1].mxu1  ;;  %v13860_v19 = vpop.f32.mrb[0].mxu0  ;;  %v431_v23 = vadd.f32 %v13871_v16, %v12790_v15  ;;  %v205_v16 = vld [vmem:[%s15837_s21 + $0x28] sm:$0xff] }
 0x12e   :  { %v426_v20 = vadd.f32 %v12790_v15, %v425_v18  ;;  %v344_v21 = vpop.f32.mrb[1].mxu0  ;;  %v350_v24 = vadd.f32 %v13860_v19, %v12787_v17  ;;  %v204_v15 = vld [vmem:[%s15837_s21 + $0x20] sm:$0xff]  ;;  %v206_v18 = vld [vmem:[%s15837_s21 + $0x30] sm:$0xff]  ;;  %v207_v19 = vld [vmem:[%s15837_s21 + $0x38] sm:$0xff] }
 0x12f   :  { %v345_v22 = vadd.f32 %v12787_v17, %v344_v21  ;;  %v14977_v17 = vpack.c.bf16 %v205_v16, %v204_v15 }
 0x130   :  { %13884 = vmatpush3.xpose.msk.msra.mxu1 %vm515_vm2, %v426_v20  ;;  %v14981_v20 = vpack.c.bf16 %v207_v19, %v206_v18 }
 0x131   :  { %13888 = vmatprep.subr.mxu1 %v15798_v14  ;;  %14978 = vmatprep.subr.bf16.mxu0 %v14977_v17 }
 0x132   :  { %14980 = vmatpush3.bf16.msra.mxu0 %v14977_v17 }
 0x133   :  { %13886 = vmatmul.mubr.msk.f32.vlgmr.msra.gmra.mrb[2].mxu1 %vm515_vm2, %v345_v22  ;;  %14982 = vmatprep.subr.bf16.mxu0 %v14981_v20 }
 0x134   :  { %13889 = vmatpush3.xpose.msk.msra.mxu1 %vm515_vm2, %v431_v23  ;;  %13890 = vmatprep.mubr.msk.f32.mxu1 %vm15799_vm1, %v15798_v14  ;;  %v224_v23 = vld [vmem:[%s15847_s29 + $0x20] sm:$0xff] }
 0x135   :  { %13893 = vmatprep.subr.mxu1 %v15798_v14  ;;  %v13882_v7 = vpop.f32.mrb[2].mxu0 }
 0x136   :  { %v512_v9 = vadd.f32 %v13882_v7, %v12793_v8  ;;  %v506_v10 = vpop.f32.mrb[3].mxu0  ;;  %14984 = vmatpush3.bf16.msra.mxu0 %v14981_v20  ;;  %v12808_v20 = vld [vmem:[%s15862_s14 + $0x1] ss:$0 sm:$0xff] }
 0x137   :  { %13891 = vmatmul.mubr.msk.f32.vlgmr.msra.gmra.mrb[4].mxu1 %vm515_vm2, %v350_v24  ;;  %v507_v12 = vadd.f32 %v12793_v8, %v506_v10  ;;  %v225_v24 = vld [vmem:[%s15847_s29 + $0x28] sm:$0xff] }
 0x138   :  { %13895 = vmatprep.mubr.msk.f32.mxu1 %vm15799_vm1, %v15798_v14  ;;  %v14985_v27 = vpack.c.bf16 %v225_v24, %v224_v23 }
 0x139   :  { %13894 = vmatpush3.msra.mxu1 %v507_v12  ;;  %13912 = vmatmul.mubr.msk.f32.vlgmr.msra.gmra.mrb[4].mxu0 %vm271_vm0, %v16035_v13 }
 0x13a   :  { %13898 = vmatprep.subr.mxu1 %v15798_v14  ;;  %13933 = vmatprep.mubr.msk.f32.mxu0 %vm271_vm0, %v16028_v11 }
 0x206   :  { %v588_v48 = vpop.f32.mrb[2].mxu1 }
 0x207   :  { %v668_v51 = vmul.f32 0.35355338, %v588_v48  ;;  %v13887_v52 = vpop.f32.mrb[3].mxu1 }
 0x209   :  { %v682_v53 = vsel %vm16083_vm6, %v668_v51, -10000.0 }
 0x20a   :  { %v664_v54 = vpop.f32.mrb[4].mxu1  ;;  %v684_v55 = vsel %vm515_vm2, %v682_v53, -inf }
 0x20b   :  { %v669_v57 = vmul.f32 0.35355338, %v664_v54  ;;  %685 = vmax.xlane.f32.xlu0 %v684_v55  ;;  %v13892_v58 = vpop.f32.mrb[5].mxu1  ;;  %v245_v54 = vld [vmem:[%s15857_s8 + $0x28] sm:$0xff]  ;;  %v246_v55 = vld [vmem:[%s15857_s8 + $0x30] sm:$0xff] }
 0x20c   :  { %v13913_v34 = vpop.f32.mrb[4].mxu0  ;;  %v247_v58 = vld [vmem:[%s15857_s8 + $0x38] sm:$0xff] }
 0x20d   :  { %v683_v59 = vsel %vm16091_vm7, %v669_v57, -10000.0  ;;  %v924_v35 = vpop.f32.mrb[5].mxu0  ;;  %v930_v52 = vadd.f32 %v13913_v34, %v12802_v46  ;;  %v209_v34 = vld [vmem:[%s15837_s21 + $0x48] sm:$0xff] }
 0x20e   :  { %v687_v60 = vsel %vm515_vm2, %v683_v59, -inf  ;;  %v925_v50 = vadd.f32 %v12802_v46, %v924_v35  ;;  %v249_v46 = vld [vmem:[%s15857_s8 + $0x48] sm:$0xff] }
 0x20f   :  { %688 = vmax.xlane.f32.xlu0 %v687_v60 }
 0x298   :  { %v686_v61 = vpop.xlane.xlu0 %685 }
 0x299   :  { %v690_v62 = vsub.f32 %v682_v53, %v686_v61  ;;  %v244_v53 = vld [vmem:[%s15857_s8 + $0x20] sm:$0xff] }
 0x29a   :  { %v14993_v57 = vpack.c.bf16 %v245_v54, %v244_v53  ;;  %v228_v53 = vld [vmem:[%s15847_s29 + $0x40] sm:$0xff]  ;;  %v229_v54 = vld [vmem:[%s15847_s29 + $0x48] sm:$0xff] }
 0x29b   :  { %v692_v63 = vmul.f32 1.442695, %v690_v62 }
 0x29c   :  { %v689_v0 = vpop.xlane.xlu0 %688  ;;  %14994 = vmatprep.subr.bf16.mxu0 %v14993_v57 }
 0x29d   :  { %15540 = vpow2.f32 %v692_v63  ;;  %v691_v1 = vsub.f32 %v683_v59, %v689_v0  ;;  %v14997_v59 = vpack.c.bf16 %v247_v58, %v246_v55  ;;  %14996 = vmatpush3.bf16.msra.mxu0 %v14993_v57  ;;  %v15009_v57 = vpack.c.bf16 %v229_v54, %v228_v53  ;;  %v212_v53 = vld [vmem:[%s15837_s21 + $0x60] sm:$0xff]  ;;  %v213_v54 = vld [vmem:[%s15837_s21 + $0x68] sm:$0xff] }
 0x29f   :  { %v694_v2 = vmul.f32 1.442695, %v691_v1  ;;  %14998 = vmatprep.subr.bf16.mxu0 %v14997_v59 }
 0x2a1   :  { %15542 = vpow2.f32 %v694_v2  ;;  %15000 = vmatpush3.bf16.msra.mxu0 %v14997_v59 }
 0x2a2   :  { %13946 = vmatprep.subr.mxu0 %v15798_v14 }
 0x2a4   :  { %13934 = vmatmul.mubr.msk.f32.vlgmr.msra.gmra.mrb[6].mxu0 %vm271_vm0, %v16035_v13 }
 0x2a5   :  { %13948 = vmatprep.mubr.msk.f32.mxu0 %vm15799_vm1, %v15798_v14 }
 0x2a7   :  { %v15541_v3 = vpop.eup %15540 }
 0x2a8   :  { %v696_v4 = vsel %vm515_vm2, %v15541_v3, 0.0 }
 0x2a9   :  { %697 = vadd.xlane.f32.xlu1 %v696_v4 }
 0x2ab   :  { %v15543_v5 = vpop.eup %15542 }
 0x2ac   :  { %v699_v6 = vsel %vm515_vm2, %v15543_v5, 0.0 }
 0x2ad   :  { %700 = vadd.xlane.f32.xlu1 %v699_v6 }
 0x336   :  { %v698_v21 = vpop.xlane.xlu1 %697 }
 0x337   :  { %15544 = vrcp.f32 %v698_v21 }
 0x33a   :  { %v701_v22 = vpop.xlane.xlu1 %700 }
 0x33b   :  { %15546 = vrcp.f32 %v701_v22 }
 0x341   :  { %v15545_v25 = vpop.eup %15544 }
 0x342   :  { %v703_v26 = vmul.f32 %v15545_v25, %v15541_v3 }
 0x344   :  { %13896 = vmatmul.mubr.msk.f32.vlgmr.msra.gmra.mrb[6].mxu1 %vm515_vm2, %v703_v26 }
 0x345   :  { %v15547_v30 = vpop.eup %15546  ;;  %13899 = vmatpush3.msra.mxu1 %v512_v9  ;;  %13900 = vmatprep.mubr.msk.f32.mxu1 %vm15799_vm1, %v15798_v14 }
 0x346   :  { %14986 = vmatprep.subr.bf16.mxu1 %v14985_v27  ;;  %v705_v31 = vmul.f32 %v15547_v30, %v15543_v5  ;;  %v261_v30 = vld [vmem:[%s15867_s19 + $0x8] sm:$0xff] }
 0x348   :  { %13901 = vmatmul.mubr.msk.f32.vlgmr.msra.gmra.mrb[8].mxu1 %vm515_vm2, %v705_v31  ;;  %v260_v31 = vld [vmem:[%s15867_s19] sm:$0xff] }
 0x349   :  { %14988 = vmatpush3.bf16.msra.mxu1 %v14985_v27  ;;  %13922 = vmatprep.mubr.msk.f32.mxu1 %vm271_vm0, %v16028_v11 }
 0x34a   :  { %14990 = vmatprep.subr.bf16.mxu1 %v14989_v32 }
 0x34d   :  { %14992 = vmatpush3.bf16.msra.mxu1 %v14989_v32  ;;  %v208_v32 = vld [vmem:[%s15837_s21 + $0x40] sm:$0xff] }
 0x34e   :  { %13936 = vmatprep.subr.mxu1 %v15798_v14  ;;  %v15001_v35 = vpack.c.bf16 %v209_v34, %v208_v32 }
 0x350   :  { %13923 = vmatmul.mubr.msk.f32.vlgmr.msra.gmra.mrb[10].mxu1 %vm271_vm0, %v16035_v13 }
 0x351   :  { %13938 = vmatprep.mubr.msk.f32.mxu1 %vm15799_vm1, %v15798_v14 }
 0x377   :  { %v13935_v19 = vpop.f32.mrb[6].mxu0 }
 0x378   :  { %v1086_v21 = vpop.f32.mrb[7].mxu0  ;;  %v1092_v23 = vadd.f32 %v13935_v19, %v12808_v20 }
 0x379   :  { %v1087_v22 = vadd.f32 %v12808_v20, %v1086_v21 }
 0x37b   :  { %13947 = vmatpush3.msra.mxu0 %v1087_v22 }
 0x37c   :  { %13956 = vmatprep.subr.mxu0 %v261_v30 }
 0x417   :  { %v16125_v39 = vpop.f32.mrb[6].mxu1 }
 0x418   :  { %v13897_v40 = vpop.f32.mrb[7].mxu1 }
 0x419   :  { %v210_v40 = vld [vmem:[%s15837_s21 + $0x50] sm:$0xff] }
 0x41b   :  { %v16127_v41 = vpop.f32.mrb[8].mxu1 }
 0x41c   :  { %v13902_v42 = vpop.f32.mrb[9].mxu1 }
 0x41d   :  { %v211_v42 = vld [vmem:[%s15837_s21 + $0x58] sm:$0xff] }
 0x423   :  { %v13924_v45 = vpop.f32.mrb[10].mxu1 }
 0x424   :  { %v1005_v47 = vpop.f32.mrb[11].mxu1  ;;  %v1011_v51 = vadd.f32 %v13924_v45, %v12805_v43  ;;  %v248_v45 = vld [vmem:[%s15857_s8 + $0x40] sm:$0xff] }
 0x425   :  { %v1006_v48 = vadd.f32 %v12805_v43, %v1005_v47  ;;  %v15005_v43 = vpack.c.bf16 %v211_v42, %v210_v40  ;;  %v250_v47 = vld [vmem:[%s15857_s8 + $0x50] sm:$0xff] }
 0x426   :  { %v262_v40 = vld [vmem:[%s15867_s19 + $0x10] sm:$0xff] }
 0x427   :  { %13937 = vmatpush3.xpose.msk.msra.mxu1 %vm515_vm2, %v1006_v48  ;;  %v15017_v48 = vpack.c.bf16 %v249_v46, %v248_v45 }
 0x428   :  { %13941 = vmatprep.subr.mxu1 %v15798_v14 }
 0x42a   :  { %13939 = vmatmul.mubr.msk.f32.vlgmr.msra.gmra.mrb[12].mxu1 %vm515_vm2, %v925_v50  ;;  %v251_v50 = vld [vmem:[%s15857_s8 + $0x58] sm:$0xff] }
 0x42b   :  { %13942 = vmatpush3.xpose.msk.msra.mxu1 %vm515_vm2, %v1011_v51  ;;  %13943 = vmatprep.mubr.msk.f32.mxu1 %vm15799_vm1, %v15798_v14  ;;  %v15021_v51 = vpack.c.bf16 %v251_v50, %v250_v47  ;;  %v232_v50 = vld [vmem:[%s15847_s29 + $0x60] sm:$0xff] }
 0x42c   :  { %13951 = vmatprep.subr.mxu1 %v15798_v14 }
 0x42e   :  { %13944 = vmatmul.mubr.msk.f32.vlgmr.msra.gmra.mrb[14].mxu1 %vm515_vm2, %v930_v52 }
 0x42f   :  { %13953 = vmatprep.mubr.msk.f32.mxu1 %vm15799_vm1, %v15798_v14  ;;  %13952 = vmatpush3.msra.mxu1 %v1092_v23 }
 0x430   :  { %15002 = vmatprep.subr.bf16.mxu1 %v15001_v35 }
 0x4fd   :  { %v1167_v60 = vpop.f32.mrb[12].mxu1 }
 0x4fe   :  { %v1247_v61 = vmul.f32 0.35355338, %v1167_v60  ;;  %v13940_v62 = vpop.f32.mrb[13].mxu1  ;;  %v230_v60 = vld [vmem:[%s15847_s29 + $0x50] sm:$0xff] }
 0x500   :  { %v1249_v63 = vsel %vm16083_vm6, %v1247_v61, -10000.0  ;;  %v231_v61 = vld [vmem:[%s15847_s29 + $0x58] sm:$0xff] }
 0x501   :  { %v1243_v0 = vpop.f32.mrb[14].mxu1  ;;  %v1251_v1 = vsel %vm515_vm2, %v1249_v63, -inf  ;;  %v15013_v62 = vpack.c.bf16 %v231_v61, %v230_v60  ;;  %v234_v60 = vld [vmem:[%s15847_s29 + $0x70] sm:$0xff]  ;;  %v235_v61 = vld [vmem:[%s15847_s29 + $0x78] sm:$0xff] }
 0x502   :  { %v1248_v2 = vmul.f32 0.35355338, %v1243_v0  ;;  %1252 = vmax.xlane.f32.xlu0 %v1251_v1  ;;  %v13945_v3 = vpop.f32.mrb[15].mxu1 }
 0x504   :  { %v1250_v4 = vsel %vm16091_vm7, %v1248_v2, -10000.0  ;;  %v12824_v2 = vld [vmem:[%s15852_s3 + $0x2] ss:$0 sm:$0xff] }
 0x505   :  { %v1254_v5 = vsel %vm515_vm2, %v1250_v4, -inf }
 0x506   :  { %1255 = vmax.xlane.f32.xlu1 %v1254_v5 }
 0x58f   :  { %v1253_v6 = vpop.xlane.xlu0 %1252 }
 0x590   :  { %v1257_v7 = vsub.f32 %v1249_v63, %v1253_v6 }
 0x592   :  { %v1259_v8 = vmul.f32 1.442695, %v1257_v7 }
 0x593   :  { %v1256_v9 = vpop.xlane.xlu1 %1255 }
 0x594   :  { %15548 = vpow2.f32 %v1259_v8  ;;  %v1258_v10 = vsub.f32 %v1250_v4, %v1256_v9  ;;  %v12827_v4 = vld [vmem:[%s15862_s14 + $0x2] ss:$0 sm:$0xff] }
 0x596   :  { %v1261_v12 = vmul.f32 1.442695, %v1258_v10 }
 0x598   :  { %15550 = vpow2.f32 %v1261_v12 }
 0x59e   :  { %v15549_v15 = vpop.eup %15548 }
 0x59f   :  { %v1263_v16 = vsel %vm515_vm2, %v15549_v15, 0.0 }
 0x5a0   :  { %1264 = vadd.xlane.f32.xlu0 %v1263_v16 }
 0x5a2   :  { %v15551_v17 = vpop.eup %15550 }
 0x5a3   :  { %v1266_v18 = vsel %vm515_vm2, %v15551_v17, 0.0 }
 0x5a4   :  { %1267 = vadd.xlane.f32.xlu1 %v1266_v18 }
 0x62d   :  { %v1265_v24 = vpop.xlane.xlu0 %1264 }
 0x62e   :  { %15552 = vrcp.f32 %v1265_v24 }
 0x631   :  { %v1268_v25 = vpop.xlane.xlu1 %1267 }
 0x632   :  { %15554 = vrcp.f32 %v1268_v25 }
 0x638   :  { %v15553_v26 = vpop.eup %15552 }
 0x639   :  { %v1270_v27 = vmul.f32 %v15553_v26, %v15549_v15 }
 0x63b   :  { %13949 = vmatmul.mubr.msk.f32.vlgmr.msra.gmra.mrb[8].mxu0 %vm515_vm2, %v1270_v27 }
 0x63c   :  { %v15555_v28 = vpop.eup %15554  ;;  %13957 = vmatpush3.msra.mxu0 %v261_v30 }
 0x63d   :  { %v1272_v29 = vmul.f32 %v15555_v28, %v15551_v17  ;;  %13961 = vmatprep.subr.mxu0 %v260_v31 }
 0x63f   :  { %13954 = vmatmul.mubr.msk.f32.vlgmr.msra.gmra.mrb[16].mxu1 %vm515_vm2, %v1272_v29 }
 0x640   :  { %13974 = vmatprep.mubr.msk.f32.mxu1 %vm271_vm0, %v16028_v11  ;;  %15004 = vmatpush3.bf16.msra.mxu1 %v15001_v35 }
 0x641   :  { %15006 = vmatprep.subr.bf16.mxu1 %v15005_v43 }
 0x644   :  { %15008 = vmatpush3.bf16.msra.mxu1 %v15005_v43 }
 0x645   :  { %15018 = vmatprep.subr.bf16.mxu1 %v15017_v48 }
 0x647   :  { %13975 = vmatmul.mubr.msk.f32.vlgmr.msra.gmra.mrb[18].mxu1 %vm271_vm0, %v16035_v13 }
 0x648   :  { %13996 = vmatprep.mubr.msk.f32.mxu1 %vm271_vm0, %v16028_v11  ;;  %15020 = vmatpush3.bf16.msra.mxu1 %v15017_v48 }
 0x649   :  { %15022 = vmatprep.subr.bf16.mxu1 %v15021_v51 }
 0x64c   :  { %15024 = vmatpush3.bf16.msra.mxu1 %v15021_v51  ;;  %v233_v51 = vld [vmem:[%s15847_s29 + $0x68] sm:$0xff] }
 0x64d   :  { %14004 = vmatprep.subr.mxu1 %v15798_v14 }
 0x64f   :  { %13997 = vmatmul.mubr.msk.f32.vlgmr.msra.gmra.mrb[20].mxu1 %vm271_vm0, %v16035_v13 }
 0x650   :  { %14006 = vmatprep.mubr.msk.f32.mxu1 %vm15799_vm1, %v15798_v14 }
 0x70e   :  { %v1342_v52 = vpop.f32.mrb[8].mxu0 }
 0x70f   :  { %v13950_v55 = vpop.f32.mrb[9].mxu0  ;;  %13958 = vmatprep.mubr.msk.f32.mxu0 %vm515_vm2, %v1342_v52  ;;  %v15033_v52 = vpack.c.bf16 %v233_v51, %v232_v50 }
 0x710   :  { %v15025_v55 = vpack.c.bf16 %v213_v54, %v212_v53 }
 0x712   :  { %v1415_v58 = vpop.f32.mrb[16].mxu1 }
 0x713   :  { %v13955_v59 = vpop.f32.mrb[17].mxu1  ;;  %13959 = vmatmul.mubr.msk.f32.vlgmr.msra.gmra.mrb[10].mxu0 %vm515_vm2, %v1415_v58  ;;  %v215_v58 = vld [vmem:[%s15837_s21 + $0x78] sm:$0xff] }
 0x714   :  { %13962 = vmatpush3.msra.mxu0 %v260_v31  ;;  %13963 = vmatprep.mubr.msk.f32.mxu0 %vm515_vm2, %v16125_v39 }
 0x715   :  { %15010 = vmatprep.subr.bf16.mxu0 %v15009_v57 }
 0x71a   :  { %v13976_v39 = vpop.f32.mrb[18].mxu1 }
 0x71b   :  { %13964 = vmatmul.mubr.msk.f32.vlgmr.msra.gmra.mrb[10].mxu0 %vm515_vm2, %v16127_v41  ;;  %v1653_v63 = vpop.f32.mrb[19].mxu1  ;;  %v12821_v41 = vld [vmem:[%s15842_s25 + $0x2] ss:$0 sm:$0xff] }
 0x71c   :  { %15012 = vmatpush3.bf16.msra.mxu0 %v15009_v57  ;;  %13985 = vmatprep.mubr.msk.f32.mxu0 %vm271_vm0, %v16028_v11  ;;  %v1659_v8 = vadd.f32 %v13976_v39, %v12821_v41  ;;  %v1654_v9 = vadd.f32 %v12821_v41, %v1653_v63  ;;  %v214_v57 = vld [vmem:[%s15837_s21 + $0x70] sm:$0xff] }
 0x71d   :  { %15014 = vmatprep.subr.bf16.mxu0 %v15013_v62  ;;  %v15029_v59 = vpack.c.bf16 %v215_v58, %v214_v57 }
 0x720   :  { %15016 = vmatpush3.bf16.msra.mxu0 %v15013_v62 }
 0x721   :  { %13999 = vmatprep.subr.mxu0 %v15798_v14 }
 0x722   :  { %v13998_v0 = vpop.f32.mrb[20].mxu1 }
 0x723   :  { %13986 = vmatmul.mubr.msk.f32.vlgmr.msra.gmra.mrb[12].mxu0 %vm271_vm0, %v16035_v13  ;;  %v1815_v1 = vpop.f32.mrb[21].mxu1  ;;  %v1821_v10 = vadd.f32 %v13998_v0, %v12827_v4  ;;  %v15037_v0 = vpack.c.bf16 %v235_v61, %v234_v60  ;;  %v263_v60 = vld [vmem:[%s15867_s19 + $0x18] sm:$0xff] }
 0x724   :  { %14001 = vmatprep.mubr.msk.f32.mxu0 %vm15799_vm1, %v15798_v14  ;;  %v1816_v12 = vadd.f32 %v12827_v4, %v1815_v1 }
 0x7f6   :  { %v13987_v3 = vpop.f32.mrb[12].mxu0 }
 0x7f7   :  { %v1740_v5 = vadd.f32 %v13987_v3, %v12824_v2  ;;  %v1734_v6 = vpop.f32.mrb[13].mxu0  ;;  %v12841_v3 = vld [vmem:[%s15852_s3 + $0x3] ss:$0 sm:$0xff] }
 0x7f8   :  { %v1735_v7 = vadd.f32 %v12824_v2, %v1734_v6 }
 0x7f9   :  { %14005 = vmatpush3.xpose.msk.msra.mxu1 %vm515_vm2, %v1740_v5  ;;  %v12838_v5 = vld [vmem:[%s15842_s25 + $0x3] ss:$0 sm:$0xff] }
 0x7fa   :  { %14000 = vmatpush3.xpose.msk.msra.mxu0 %vm515_vm2, %v1735_v7  ;;  %14014 = vmatprep.subr.mxu1 %v15798_v14 }
 0x7fb   :  { %14009 = vmatprep.subr.mxu0 %v15798_v14 }
 0x7fc   :  { %14007 = vmatmul.mubr.msk.f32.vlgmr.msra.gmra.mrb[22].mxu1 %vm515_vm2, %v1659_v8 }
 0x7fd   :  { %14002 = vmatmul.mubr.msk.f32.vlgmr.msra.gmra.mrb[14].mxu0 %vm515_vm2, %v1654_v9  ;;  %14015 = vmatpush3.msra.mxu1 %v1821_v10 }
 0x7fe   :  { %14010 = vmatpush3.msra.mxu0 %v1816_v12  ;;  %14016 = vmatprep.mubr.msk.f32.mxu1 %vm15799_vm1, %v15798_v14  ;;  %v252_v12 = vld [vmem:[%s15857_s8 + $0x60] sm:$0xff] }
 0x7ff   :  { %14011 = vmatprep.mubr.msk.f32.mxu0 %vm15799_vm1, %v15798_v14  ;;  %14019 = vmatprep.subr.mxu0 %v262_v40 }
 0x800   :  { %15026 = vmatprep.subr.bf16.mxu1 %v15025_v55 }
 0x8cf   :  { %v1972_v15 = vpop.f32.mrb[22].mxu1 }
 0x8d0   :  { %v1977_v16 = vmul.f32 0.35355338, %v1972_v15  ;;  %v1896_v17 = vpop.f32.mrb[14].mxu0  ;;  %v14008_v18 = vpop.f32.mrb[23].mxu1  ;;  %v253_v15 = vld [vmem:[%s15857_s8 + $0x68] sm:$0xff] }
 0x8d1   :  { %v1976_v19 = vmul.f32 0.35355338, %v1896_v17  ;;  %v14003_v20 = vpop.f32.mrb[15].mxu0  ;;  %v15041_v17 = vpack.c.bf16 %v253_v15, %v252_v12  ;;  %v255_v18 = vld [vmem:[%s15857_s8 + $0x78] sm:$0xff] }
 0x8d2   :  { %v1979_v21 = vsel %vm16091_vm7, %v1977_v16, -10000.0  ;;  %v254_v16 = vld [vmem:[%s15857_s8 + $0x70] sm:$0xff] }
 0x8d3   :  { %v1983_v22 = vsel %vm515_vm2, %v1979_v21, -inf  ;;  %v1978_v23 = vsel %vm16083_vm6, %v1976_v19, -10000.0  ;;  %v15045_v19 = vpack.c.bf16 %v255_v18, %v254_v16 }
 0x8d4   :  { %1984 = vmax.xlane.f32.xlu1 %v1983_v22  ;;  %v1980_v24 = vsel %vm515_vm2, %v1978_v23, -inf }
 0x8d5   :  { %1981 = vmax.xlane.f32.xlu0 %v1980_v24 }
 0x961   :  { %v1985_v25 = vpop.xlane.xlu1 %1984 }
 0x962   :  { %v1987_v26 = vsub.f32 %v1979_v21, %v1985_v25  ;;  %v1982_v27 = vpop.xlane.xlu0 %1981 }
 0x963   :  { %v1986_v28 = vsub.f32 %v1978_v23, %v1982_v27 }
 0x964   :  { %v1990_v29 = vmul.f32 1.442695, %v1987_v26 }
 0x965   :  { %v1988_v30 = vmul.f32 1.442695, %v1986_v28 }
 0x966   :  { %15556 = vpow2.f32 %v1990_v29 }
 0x967   :  { %15558 = vpow2.f32 %v1988_v30 }
 0x970   :  { %v15557_v31 = vpop.eup %15556 }
 0x971   :  { %v15559_v32 = vpop.eup %15558  ;;  %v1995_v34 = vsel %vm515_vm2, %v15557_v31, 0.0 }
 0x972   :  { %1996 = vadd.xlane.f32.xlu1 %v1995_v34  ;;  %v1992_v35 = vsel %vm515_vm2, %v15559_v32, 0.0 }
 0x973   :  { %1993 = vadd.xlane.f32.xlu0 %v1992_v35 }
 0x9ff   :  { %v1997_v42 = vpop.xlane.xlu1 %1996 }
 0xa00   :  { %15560 = vrcp.f32 %v1997_v42  ;;  %v1994_v43 = vpop.xlane.xlu0 %1993 }
 0xa01   :  { %15562 = vrcp.f32 %v1994_v43 }
 0xa0a   :  { %v15561_v45 = vpop.eup %15560 }
 0xa0b   :  { %v15563_v46 = vpop.eup %15562  ;;  %v2001_v47 = vmul.f32 %v15561_v45, %v15557_v31 }
 0xa0c   :  { %v1999_v48 = vmul.f32 %v15563_v46, %v15559_v32 }
 0xa0d   :  { %14017 = vmatmul.mubr.msk.f32.vlgmr.msra.gmra.mrb[24].mxu1 %vm515_vm2, %v2001_v47 }
 0xa0e   :  { %14012 = vmatmul.mubr.msk.f32.vlgmr.msra.gmra.mrb[16].mxu0 %vm515_vm2, %v1999_v48  ;;  %14032 = vmatprep.mubr.msk.f32.mxu1 %vm271_vm0, %v16028_v11  ;;  %v12844_v48 = vld [vmem:[%s15862_s14 + $0x3] ss:$0 sm:$0xff] }
 0xa0f   :  { %14020 = vmatpush3.msra.mxu0 %v262_v40  ;;  %15028 = vmatpush3.bf16.msra.mxu1 %v15025_v55 }
 0xa10   :  { %15034 = vmatprep.subr.bf16.mxu0 %v15033_v52  ;;  %15030 = vmatprep.subr.bf16.mxu1 %v15029_v59 }
 0xa13   :  { %15032 = vmatpush3.bf16.msra.mxu1 %v15029_v59 }
 0xa14   :  { %15042 = vmatprep.subr.bf16.mxu1 %v15041_v17 }
 0xa16   :  { %14033 = vmatmul.mubr.msk.f32.vlgmr.msra.gmra.mrb[26].mxu1 %vm271_vm0, %v16035_v13 }
 0xa17   :  { %14054 = vmatprep.mubr.msk.f32.mxu1 %vm271_vm0, %v16028_v11  ;;  %15044 = vmatpush3.bf16.msra.mxu1 %v15041_v17 }
 0xa18   :  { %15046 = vmatprep.subr.bf16.mxu1 %v15045_v19 }
 0xa1b   :  { %15048 = vmatpush3.bf16.msra.mxu1 %v15045_v19  ;;  %v2934_v19 = vld [vmem:[%s15882_s6] sm:$0xff] }
 0xa1c   :  { %14067 = vmatprep.subr.mxu1 %v15798_v14 }
 0xa1e   :  { %14055 = vmatmul.mubr.msk.f32.vlgmr.msra.gmra.mrb[28].mxu1 %vm271_vm0, %v16035_v13 }
 0xa1f   :  { %14069 = vmatprep.mubr.msk.f32.mxu1 %vm15799_vm1, %v15798_v14 }
 0xae0   :  { %v2144_v62 = vpop.f32.mrb[24].mxu1 }
 0xae1   :  { %v2071_v39 = vpop.f32.mrb[16].mxu0  ;;  %v14018_v63 = vpop.f32.mrb[25].mxu1 }
 0xae2   :  { %v14013_v1 = vpop.f32.mrb[17].mxu0  ;;  %14021 = vmatprep.mubr.msk.f32.mxu0 %vm515_vm2, %v2071_v39 }
 0xae3   :  { %14022 = vmatmul.mubr.msk.f32.vlgmr.msra.gmra.mrb[10].mxu0 %vm515_vm2, %v2144_v62 }
 0xae4   :  { %15036 = vmatpush3.bf16.msra.mxu0 %v15033_v52  ;;  %14043 = vmatprep.mubr.msk.f32.mxu0 %vm271_vm0, %v16028_v11 }
 0xae5   :  { %15038 = vmatprep.subr.bf16.mxu0 %v15037_v0 }
 0xae8   :  { %15040 = vmatpush3.bf16.msra.mxu0 %v15037_v0  ;;  %v12855_v0 = vld [vmem:[%s15872_s24] ss:$0 sm:$0xff] }
 0xae9   :  { %14057 = vmatprep.subr.mxu0 %v15798_v14  ;;  %v14034_v2 = vpop.f32.mrb[26].mxu1 }
 0xaea   :  { %v2303_v41 = vpop.f32.mrb[27].mxu1  ;;  %v2309_v10 = vadd.f32 %v14034_v2, %v12838_v5 }
 0xaeb   :  { %14044 = vmatmul.mubr.msk.f32.vlgmr.msra.gmra.mrb[18].mxu0 %vm271_vm0, %v16035_v13  ;;  %v2304_v8 = vadd.f32 %v12838_v5, %v2303_v41 }
 0xaec   :  { %14059 = vmatprep.mubr.msk.f32.mxu0 %vm15799_vm1, %v15798_v14 }
 0xaf1   :  { %v14056_v47 = vpop.f32.mrb[28].mxu1 }
 0xaf2   :  { %v2465_v50 = vpop.f32.mrb[29].mxu1  ;;  %v2471_v52 = vadd.f32 %v14056_v47, %v12844_v48 }
 0xaf3   :  { %v2466_v51 = vadd.f32 %v12844_v48, %v2465_v50  ;;  %v12856_v48 = vld [vmem:[%s15877_s30] ss:$0 sm:$0xff] }
 0xaf5   :  { %14068 = vmatpush3.msra.mxu1 %v2466_v51 }
 0xbbe   :  { %v14045_v4 = vpop.f32.mrb[18].mxu0 }
 0xbbf   :  { %v2384_v6 = vpop.f32.mrb[19].mxu0  ;;  %v2390_v9 = vadd.f32 %v14045_v4, %v12841_v3 }
 0xbc0   :  { %v2385_v7 = vadd.f32 %v12841_v3, %v2384_v6 }
 0xbc2   :  { %14058 = vmatpush3.xpose.msk.msra.mxu0 %vm515_vm2, %v2385_v7 }
 0xbc3   :  { %14062 = vmatprep.subr.mxu0 %v15798_v14 }
 0xbc5   :  { %14060 = vmatmul.mubr.msk.f32.vlgmr.msra.gmra.mrb[20].mxu0 %vm515_vm2, %v2304_v8 }
 0xbc6   :  { %14063 = vmatpush3.xpose.msk.msra.mxu0 %vm515_vm2, %v2390_v9  ;;  %14064 = vmatprep.mubr.msk.f32.mxu0 %vm15799_vm1, %v15798_v14 }
 0xbc7   :  { %14072 = vmatprep.subr.mxu0 %v15798_v14 }
 0xbc9   :  { %14065 = vmatmul.mubr.msk.f32.vlgmr.msra.gmra.mrb[22].mxu0 %vm515_vm2, %v2309_v10 }
 0xbca   :  { %14074 = vmatprep.mubr.msk.f32.mxu0 %vm15799_vm1, %v15798_v14  ;;  %14073 = vmatpush3.msra.mxu0 %v2471_v52 }
 0xbcb   :  { %14077 = vmatprep.subr.mxu0 %v263_v60 }
 0xc98   :  { %v2546_v20 = vpop.f32.mrb[20].mxu0 }
 0xc99   :  { %v2626_v21 = vmul.f32 0.35355338, %v2546_v20  ;;  %v14061_v22 = vpop.f32.mrb[21].mxu0  ;;  %v2935_v20 = vld [vmem:[%s15882_s6 + $0x8] sm:$0xff] }
 0xc9a   :  { %v2936_v22 = vld [vmem:[%s15882_s6 + $0x10] sm:$0xff] }
 0xc9b   :  { %v2628_v23 = vsel %vm16083_vm6, %v2626_v21, -10000.0  ;;  %v15049_v21 = vpack.c.bf16 %v2935_v20, %v2934_v19 }
 0xc9c   :  { %v2622_v24 = vpop.f32.mrb[22].mxu0  ;;  %v2630_v25 = vsel %vm515_vm2, %v2628_v23, -inf }
 0xc9d   :  { %v2627_v26 = vmul.f32 0.35355338, %v2622_v24  ;;  %2631 = vmax.xlane.f32.xlu0 %v2630_v25  ;;  %v14066_v27 = vpop.f32.mrb[23].mxu0  ;;  %15050 = vmatprep.subr.bf16.mxu1 %v15049_v21  ;;  %v3028_v25 = vld [vmem:[%s15892_s20] sm:$0xff] }
 0xc9e   :  { %v3030_v27 = vld [vmem:[%s15892_s20 + $0x10] sm:$0xff] }
 0xc9f   :  { %v2629_v28 = vsel %vm16091_vm7, %v2627_v26, -10000.0  ;;  %v3029_v26 = vld [vmem:[%s15892_s20 + $0x8] sm:$0xff] }
 0xca0   :  { %v2633_v29 = vsel %vm515_vm2, %v2629_v28, -inf }
 0xca1   :  { %2634 = vmax.xlane.f32.xlu1 %v2633_v29  ;;  %v3031_v29 = vld [vmem:[%s15892_s20 + $0x18] sm:$0xff] }
 0xd2a   :  { %v2632_v30 = vpop.xlane.xlu0 %2631 }
 0xd2b   :  { %v2636_v31 = vsub.f32 %v2628_v23, %v2632_v30  ;;  %v2937_v23 = vld [vmem:[%s15882_s6 + $0x18] sm:$0xff]  ;;  %v15061_v30 = vpack.c.bf16 %v3031_v29, %v3030_v27  ;;  %v12911_v27 = vld [vmem:[%s15857_s8 + $0x88] sm:$0xff]  ;;  %v12872_v29 = vld [vmem:[%s15837_s21 + $0x90] sm:$0xff] }
 0xd2c   :  { %v15053_v24 = vpack.c.bf16 %v2937_v23, %v2936_v22  ;;  %v12870_v23 = vld [vmem:[%s15837_s21 + $0x80] sm:$0xff] }
 0xd2d   :  { %v2638_v32 = vmul.f32 1.442695, %v2636_v31  ;;  %v3032_v31 = vld [vmem:[%s15892_s20 + $0x20] sm:$0xff] }
 0xd2e   :  { %v2635_v34 = vpop.xlane.xlu1 %2634 }
 0xd2f   :  { %15564 = vpow2.f32 %v2638_v32  ;;  %v2637_v35 = vsub.f32 %v2629_v28, %v2635_v34  ;;  %v15057_v28 = vpack.c.bf16 %v3029_v26, %v3028_v25  ;;  %v3033_v32 = vld [vmem:[%s15892_s20 + $0x28] sm:$0xff]  ;;  %v12910_v26 = vld [vmem:[%s15857_s8 + $0x80] sm:$0xff] }
 0xd30   :  { %v15065_v34 = vpack.c.bf16 %v3033_v32, %v3032_v31  ;;  %v12912_v32 = vld [vmem:[%s15857_s8 + $0x90] sm:$0xff] }
 0xd31   :  { %v2640_v40 = vmul.f32 1.442695, %v2637_v35 }
 0xd33   :  { %15566 = vpow2.f32 %v2640_v40 }
 0xd39   :  { %v15565_v42 = vpop.eup %15564 }
 0xd3a   :  { %v2642_v43 = vsel %vm515_vm2, %v15565_v42, 0.0 }
 0xd3b   :  { %2643 = vadd.xlane.f32.xlu0 %v2642_v43 }
 0xd3d   :  { %v15567_v45 = vpop.eup %15566 }
 0xd3e   :  { %v2645_v46 = vsel %vm515_vm2, %v15567_v45, 0.0 }
 0xd3f   :  { %2646 = vadd.xlane.f32.xlu1 %v2645_v46 }
 0xdc8   :  { %v2644_v53 = vpop.xlane.xlu0 %2643 }
 0xdc9   :  { %15568 = vrcp.f32 %v2644_v53  ;;  %v12857_v53 = vld [vmem:[%s15877_s30 + $0x1] ss:$0 sm:$0xff] }
 0xdcc   :  { %v2647_v54 = vpop.xlane.xlu1 %2646 }
 0xdcd   :  { %15570 = vrcp.f32 %v2647_v54 }
 0xdd3   :  { %v15569_v55 = vpop.eup %15568 }
 0xdd4   :  { %v2649_v57 = vmul.f32 %v15569_v55, %v15565_v42 }
 0xdd6   :  { %14070 = vmatmul.mubr.msk.f32.vlgmr.msra.gmra.mrb[30].mxu1 %vm515_vm2, %v2649_v57 }
 0xdd7   :  { %v15571_v58 = vpop.eup %15570  ;;  %15052 = vmatpush3.bf16.msra.mxu1 %v15049_v21 }
 0xdd8   :  { %v2651_v59 = vmul.f32 %v15571_v58, %v15567_v45  ;;  %15054 = vmatprep.subr.bf16.mxu1 %v15053_v24 }
 0xdda   :  { %14075 = vmatmul.mubr.msk.f32.vlgmr.msra.gmra.mrb[24].mxu0 %vm515_vm2, %v2651_v59  ;;  %v3034_v59 = vld [vmem:[%s15892_s20 + $0x30] sm:$0xff] }
 0xddb   :  { %14078 = vmatpush3.msra.mxu0 %v263_v60  ;;  %15056 = vmatpush3.bf16.msra.mxu1 %v15053_v24  ;;  %v3035_v60 = vld [vmem:[%s15892_s20 + $0x38] sm:$0xff]  ;;  %v12871_v24 = vld [vmem:[%s15837_s21 + $0x88] sm:$0xff] }
 0xddc   :  { %15058 = vmatprep.subr.bf16.mxu0 %v15057_v28  ;;  %v15073_v25 = vpack.c.bf16 %v12871_v24, %v12870_v23 }
 0xdde   :  { %15074 = vmatprep.subr.bf16.mxu1 %v15073_v25 }
 0xea9   :  { %v2721_v61 = vpop.f32.mrb[30].mxu1 }
 0xeaa   :  { %v14071_v62 = vpop.f32.mrb[31].mxu1  ;;  %14079 = vmatprep.mubr.msk.f32.mxu0 %vm515_vm2, %v2721_v61  ;;  %v15069_v61 = vpack.c.bf16 %v3035_v60, %v3034_v59 }
 0xeab   :  { %v12858_v62 = vld [vmem:[%s15887_s12] ss:$0 sm:$0xff] }
 0xead   :  { %v2794_v39 = vpop.f32.mrb[24].mxu0 }
 0xeae   :  { %v14076_v63 = vpop.f32.mrb[25].mxu0  ;;  %14080 = vmatmul.mubr.msk.f32.vlgmr.msra.gmra.mrb[10].mxu0 %vm515_vm2, %v2794_v39 }
 0xeaf   :  { %15060 = vmatpush3.bf16.msra.mxu0 %v15057_v28  ;;  %v15089_v28 = vpack.c.bf16 %v12911_v27, %v12910_v26 }
 0xeb0   :  { %15062 = vmatprep.subr.bf16.mxu0 %v15061_v30 }
 0xeb3   :  { %15064 = vmatpush3.bf16.msra.mxu0 %v15061_v30  ;;  %v12873_v30 = vld [vmem:[%s15837_s21 + $0x98] sm:$0xff] }
 0xeb4   :  { %15066 = vmatprep.subr.bf16.mxu0 %v15065_v34  ;;  %v15077_v31 = vpack.c.bf16 %v12873_v30, %v12872_v29 }
 0xeb7   :  { %15068 = vmatpush3.bf16.msra.mxu0 %v15065_v34  ;;  %v12913_v34 = vld [vmem:[%s15857_s8 + $0x98] sm:$0xff] }
 0xeb8   :  { %15070 = vmatprep.subr.bf16.mxu0 %v15069_v61 }
 0xebb   :  { %15072 = vmatpush3.bf16.msra.mxu0 %v15069_v61  ;;  %v12892_v61 = vld [vmem:[%s15847_s29 + $0x90] sm:$0xff] }
 0xebc   :  { %15090 = vmatprep.subr.bf16.mxu0 %v15089_v28 }
 0xf81   :  { %v14081_v1 = vpop.f32.mrb[10].mxu0 }
 0xf82   :  { %v2888_v2 = vadd.f32 %v14081_v1, %v12855_v0  ;;  %v2870_v41 = vpop.f32.mrb[11].mxu0 }
 0xf83   :  { %v2887_v3 = vadd.f32 %v12855_v0, %v2870_v41 }
 0xf84   :  { %v2890_v4 = vadd.f32 %v2888_v2, %v16035_v13 }
 0xf85   :  { %v2889_v5 = vadd.f32 %v2887_v3, %v16028_v11  ;;  %v12861_v3 = vld [vmem:[%s17281_s0] ss:$0 sm:$0xff] }
 0xf86   :  { %v2894_v6 = vsel %vm271_vm0, %v2890_v4, 0.0 }
 0xf87   :  { %2895 = vadd.xlane.f32.xlu1 %v2894_v6  ;;  %v2891_v7 = vsel %vm271_vm0, %v2889_v5, 0.0 }
 0xf88   :  { %2892 = vadd.xlane.f32.xlu0 %v2891_v7 }
0x1014   :  { %v2896_v8 = vpop.xlane.xlu1 %2895 }
0x1015   :  { %v2899_v9 = vmul.f32 0.03125, %v2896_v8  ;;  %v2893_v10 = vpop.xlane.xlu0 %2892 }
0x1016   :  { %v2898_v12 = vmul.f32 0.03125, %v2893_v10 }
0x1017   :  { %v2901_v15 = vsub.f32 %v2890_v4, %v2899_v9 }
0x1018   :  { %v2900_v16 = vsub.f32 %v2889_v5, %v2898_v12 }
0x1019   :  { %v2903_v17 = vmul.f32 %v2901_v15, %v2901_v15 }
0x101a   :  { %v2902_v13 = vmul.f32 %v2900_v16, %v2900_v16 }
0x101b   :  { %v2907_v11 = vsel %vm271_vm0, %v2903_v17, 0.0 }
0x101c   :  { %2908 = vadd.xlane.f32.xlu1 %v2907_v11  ;;  %v2904_v18 = vsel %vm271_vm0, %v2902_v13, 0.0 }
0x101d   :  { %2905 = vadd.xlane.f32.xlu0 %v2904_v18 }
0x10a9   :  { %v2909_v35 = vpop.xlane.xlu1 %2908 }
0x10aa   :  { %v2911_v40 = vmul.f32 0.03125, %v2909_v35  ;;  %v2906_v42 = vpop.xlane.xlu0 %2905  ;;  %v15093_v35 = vpack.c.bf16 %v12913_v34, %v12912_v32 }
0x10ab   :  { %v2910_v43 = vmul.f32 0.03125, %v2906_v42  ;;  %v12891_v42 = vld [vmem:[%s15847_s29 + $0x88] sm:$0xff] }
0x10ac   :  { %v2913_v45 = vadd.f32 1e-05, %v2911_v40  ;;  %v12890_v40 = vld [vmem:[%s15847_s29 + $0x80] sm:$0xff] }
0x10ad   :  { %v2912_v46 = vadd.f32 1e-05, %v2910_v43  ;;  %v15081_v43 = vpack.c.bf16 %v12891_v42, %v12890_v40  ;;  %v12874_v42 = vld [vmem:[%s15837_s21 + $0xa0] sm:$0xff] }
0x10ae   :  { %15572 = vrsqrt.f32 %v2913_v45 }
0x10af   :  { %15574 = vrsqrt.f32 %v2912_v46 }
0x10b8   :  { %v15573_v47 = vpop.eup %15572 }
0x10b9   :  { %v15575_v50 = vpop.eup %15574  ;;  %v2917_v51 = vmul.f32 %v15573_v47, %v2901_v15 }
0x10ba   :  { %v2916_v52 = vmul.f32 %v15575_v50, %v2900_v16 }
0x10bb   :  { %v2925_v54 = vmul.f32 %v12856_v48, %v2917_v51 }
0x10bc   :  { %v2924_v55 = vmul.f32 %v12856_v48, %v2916_v52 }
0x10bd   :  { %v2933_v58 = vadd.f32 %v12857_v53, %v2925_v54 }
0x10be   :  { %v2932_v57 = vadd.f32 %v12857_v53, %v2924_v55  ;;  %v12864_v53 = vld [vmem:[%s17282_s5] ss:$0 sm:$0xff] }
0x10c0   :  { %14090 = vmatprep.mubr.msk.f32.mxu1 %vm271_vm0, %v2932_v57 }
0x10c1   :  { %14091 = vmatmul.mubr.msk.f32.vlgmr.msra.gmra.mrb[32].mxu1 %vm271_vm0, %v2933_v58 }
0x10c2   :  { %15076 = vmatpush3.bf16.msra.mxu1 %v15073_v25 }
0x10c3   :  { %15078 = vmatprep.subr.bf16.mxu1 %v15077_v31 }
0x10c6   :  { %15080 = vmatpush3.bf16.msra.mxu1 %v15077_v31 }
0x10c7   :  { %15082 = vmatprep.subr.bf16.mxu1 %v15081_v43 }
0x1194   :  { %v14092_v39 = vpop.f32.mrb[32].mxu1 }
0x1195   :  { %v3023_v63 = vadd.f32 %v14092_v39, %v12858_v62  ;;  %v3017_v0 = vpop.f32.mrb[33].mxu1 }
0x1196   :  { %v3018_v1 = vadd.f32 %v12858_v62, %v3017_v0  ;;  %v12893_v62 = vld [vmem:[%s15847_s29 + $0x98] sm:$0xff] }
0x1197   :  { %v3027_v41 = vmax.f32 %v3023_v63, 0.0  ;;  %v15085_v0 = vpack.c.bf16 %v12893_v62, %v12892_v61  ;;  %v12915_v61 = vld [vmem:[%s15857_s8 + $0xa8] sm:$0xff] }
0x1198   :  { %v3026_v2 = vmax.f32 %v3018_v1, 0.0  ;;  %v12941_v1 = vld [vmem:[%s15862_s14 + $0x4] ss:$0 sm:$0xff] }
0x119a   :  { %14109 = vmatprep.mubr.msk.f32.mxu0 %vm3043_vm8, %v3026_v2 }
0x119b   :  { %14110 = vmatmul.mubr.msk.f32.vlgmr.msra.gmra.mrb[26].mxu0 %vm3043_vm8, %v3027_v41 }
0x119c   :  { %15092 = vmatpush3.bf16.msra.mxu0 %v15089_v28 }
0x119d   :  { %15094 = vmatprep.subr.bf16.mxu0 %v15093_v35 }
0x11a0   :  { %15096 = vmatpush3.bf16.msra.mxu0 %v15093_v35 }
0x11a1   :  { %14155 = vmatprep.subr.mxu0 %v15798_v14 }
0x126e   :  { %v14111_v4 = vpop.f32.mrb[26].mxu0 }
0x126f   :  { %v3122_v5 = vadd.f32 %v14111_v4, %v12861_v3  ;;  %v3116_v6 = vpop.f32.mrb[27].mxu0 }
0x1270   :  { %v3117_v7 = vadd.f32 %v12861_v3, %v3116_v6  ;;  %v12938_v6 = vld [vmem:[%s15852_s3 + $0x4] ss:$0 sm:$0xff] }
0x1271   :  { %v3126_v8 = vadd.f32 %v3122_v5, %v2933_v58  ;;  %v12865_v58 = vld [vmem:[%s17282_s5 + $0x1] ss:$0 sm:$0xff] }
0x1272   :  { %v3125_v9 = vadd.f32 %v3117_v7, %v2932_v57 }
0x1273   :  { %v3130_v10 = vsel %vm271_vm0, %v3126_v8, 0.0 }
0x1274   :  { %3131 = vadd.xlane.f32.xlu1 %v3130_v10  ;;  %v3127_v12 = vsel %vm271_vm0, %v3125_v9, 0.0 }
0x1275   :  { %3128 = vadd.xlane.f32.xlu0 %v3127_v12 }
0x1301   :  { %v3132_v15 = vpop.xlane.xlu1 %3131 }
0x1302   :  { %v3134_v16 = vmul.f32 0.03125, %v3132_v15  ;;  %v3129_v17 = vpop.xlane.xlu0 %3128 }
0x1303   :  { %v3133_v13 = vmul.f32 0.03125, %v3129_v17 }
0x1304   :  { %v3136_v11 = vsub.f32 %v3126_v8, %v3134_v16 }
0x1305   :  { %v3135_v18 = vsub.f32 %v3125_v9, %v3133_v13  ;;  %v12935_v9 = vld [vmem:[%s15842_s25 + $0x4] ss:$0 sm:$0xff] }
0x1306   :  { %v3138_v19 = vmul.f32 %v3136_v11, %v3136_v11 }
0x1307   :  { %v3137_v20 = vmul.f32 %v3135_v18, %v3135_v18 }
0x1308   :  { %v3142_v21 = vsel %vm271_vm0, %v3138_v19, 0.0 }
0x1309   :  { %3143 = vadd.xlane.f32.xlu1 %v3142_v21  ;;  %v3139_v22 = vsel %vm271_vm0, %v3137_v20, 0.0 }
0x130a   :  { %3140 = vadd.xlane.f32.xlu0 %v3139_v22 }
0x1396   :  { %v3144_v45 = vpop.xlane.xlu1 %3143 }
0x1397   :  { %v3146_v46 = vmul.f32 0.03125, %v3144_v45  ;;  %v3141_v47 = vpop.xlane.xlu0 %3140 }
0x1398   :  { %v3145_v48 = vmul.f32 0.03125, %v3141_v47  ;;  %v12895_v47 = vld [vmem:[%s15847_s29 + $0xa8] sm:$0xff] }
0x1399   :  { %v3148_v50 = vadd.f32 1e-05, %v3146_v46  ;;  %v12894_v46 = vld [vmem:[%s15847_s29 + $0xa0] sm:$0xff] }
0x139a   :  { %v3147_v51 = vadd.f32 1e-05, %v3145_v48  ;;  %v15105_v48 = vpack.c.bf16 %v12895_v47, %v12894_v46 }
0x139b   :  { %15576 = vrsqrt.f32 %v3148_v50 }
0x139c   :  { %15578 = vrsqrt.f32 %v3147_v51 }
0x13a5   :  { %v15577_v52 = vpop.eup %15576 }
0x13a6   :  { %v15579_v54 = vpop.eup %15578  ;;  %v3152_v55 = vmul.f32 %v15577_v52, %v3136_v11  ;;  %v12876_v52 = vld [vmem:[%s15837_s21 + $0xb0] sm:$0xff] }
0x13a7   :  { %v3151_v57 = vmul.f32 %v15579_v54, %v3135_v18 }
0x13a8   :  { %v3160_v59 = vmul.f32 %v12864_v53, %v3152_v55 }
0x13a9   :  { %v3159_v60 = vmul.f32 %v12864_v53, %v3151_v57  ;;  %v12877_v53 = vld [vmem:[%s15837_s21 + $0xb8] sm:$0xff] }
0x13aa   :  { %v16329_v63 = vadd.f32 %v12865_v58, %v3160_v59  ;;  %v15101_v57 = vpack.c.bf16 %v12877_v53, %v12876_v52  ;;  %v12897_v59 = vld [vmem:[%s15847_s29 + $0xb8] sm:$0xff]  ;;  %v12878_v53 = vld [vmem:[%s15837_s21 + $0xc0] sm:$0xff] }
0x13ab   :  { %v16327_v39 = vadd.f32 %v12865_v58, %v3159_v60  ;;  %v12896_v58 = vld [vmem:[%s15847_s29 + $0xb0] sm:$0xff]  ;;  %v12914_v60 = vld [vmem:[%s15857_s8 + $0xa0] sm:$0xff] }
0x13ad   :  { %14120 = vmatprep.mubr.msk.f32.mxu1 %vm271_vm0, %v16327_v39  ;;  %14142 = vmatprep.mubr.msk.f32.mxu0 %vm271_vm0, %v16327_v39 }
0x13ae   :  { %14121 = vmatmul.mubr.msk.f32.vlgmr.msra.gmra.mrb[34].mxu1 %vm271_vm0, %v16329_v63  ;;  %14143 = vmatmul.mubr.msk.f32.vlgmr.msra.gmra.mrb[28].mxu0 %vm271_vm0, %v16329_v63 }
0x13af   :  { %15084 = vmatpush3.bf16.msra.mxu1 %v15081_v43  ;;  %14131 = vmatprep.mubr.msk.f32.mxu1 %vm271_vm0, %v16327_v39  ;;  %v12875_v43 = vld [vmem:[%s15837_s21 + $0xa8] sm:$0xff] }
0x13b0   :  { %15086 = vmatprep.subr.bf16.mxu1 %v15085_v0  ;;  %14157 = vmatprep.mubr.msk.f32.mxu0 %vm15799_vm1, %v15798_v14  ;;  %v15097_v45 = vpack.c.bf16 %v12875_v43, %v12874_v42 }
0x13b3   :  { %15088 = vmatpush3.bf16.msra.mxu1 %v15085_v0 }
0x13b4   :  { %14145 = vmatprep.subr.mxu1 %v15798_v14 }
0x13b6   :  { %14132 = vmatmul.mubr.msk.f32.vlgmr.msra.gmra.mrb[36].mxu1 %vm271_vm0, %v16329_v63 }
0x13b7   :  { %14147 = vmatprep.mubr.msk.f32.mxu1 %vm15799_vm1, %v15798_v14 }
0x1481   :  { %v14122_v2 = vpop.f32.mrb[34].mxu1  ;;  %v14144_v41 = vpop.f32.mrb[28].mxu0 }
0x1482   :  { %v3326_v3 = vpop.f32.mrb[35].mxu1  ;;  %v3488_v4 = vpop.f32.mrb[29].mxu0  ;;  %v3332_v16 = vadd.f32 %v14122_v2, %v12935_v9  ;;  %v3494_v17 = vadd.f32 %v14144_v41, %v12941_v1  ;;  %v15113_v2 = vpack.c.bf16 %v12915_v61, %v12914_v60  ;;  %v12916_v41 = vld [vmem:[%s15857_s8 + $0xb0] sm:$0xff] }
0x1483   :  { %v3489_v5 = vadd.f32 %v12941_v1, %v3488_v4  ;;  %v3327_v12 = vadd.f32 %v12935_v9, %v3326_v3  ;;  %v15109_v1 = vpack.c.bf16 %v12897_v59, %v12896_v58  ;;  %v12917_v3 = vld [vmem:[%s15857_s8 + $0xb8] sm:$0xff]  ;;  %v12880_v61 = vld [vmem:[%s15837_s21 + $0xd0] sm:$0xff] }
0x1484   :  { %v15117_v4 = vpack.c.bf16 %v12917_v3, %v12916_v41  ;;  %v12918_v41 = vld [vmem:[%s15857_s8 + $0xc0] sm:$0xff]  ;;  %v12919_v3 = vld [vmem:[%s15857_s8 + $0xc8] sm:$0xff] }
0x1485   :  { %14156 = vmatpush3.msra.mxu0 %v3489_v5 }
0x1486   :  { %15098 = vmatprep.subr.bf16.mxu0 %v15097_v45 }
0x1489   :  { %v14133_v7 = vpop.f32.mrb[36].mxu1 }
0x148a   :  { %v3407_v8 = vpop.f32.mrb[37].mxu1  ;;  %v3413_v15 = vadd.f32 %v14133_v7, %v12938_v6 }
0x148b   :  { %v3408_v10 = vadd.f32 %v12938_v6, %v3407_v8 }
0x148d   :  { %14146 = vmatpush3.xpose.msk.msra.mxu1 %vm515_vm2, %v3408_v10 }
0x148e   :  { %14150 = vmatprep.subr.mxu1 %v15798_v14 }
0x1490   :  { %14148 = vmatmul.mubr.msk.f32.vlgmr.msra.gmra.mrb[38].mxu1 %vm515_vm2, %v3327_v12  ;;  %v12953_v12 = vld [vmem:[%s15852_s3 + $0x5] ss:$0 sm:$0xff] }
0x1491   :  { %14151 = vmatpush3.xpose.msk.msra.mxu1 %vm515_vm2, %v3413_v15  ;;  %14152 = vmatprep.mubr.msk.f32.mxu1 %vm15799_vm1, %v15798_v14 }
0x1492   :  { %14160 = vmatprep.subr.mxu1 %v15798_v14 }
0x1494   :  { %14153 = vmatmul.mubr.msk.f32.vlgmr.msra.gmra.mrb[40].mxu1 %vm515_vm2, %v3332_v16 }
0x1495   :  { %14161 = vmatpush3.msra.mxu1 %v3494_v17  ;;  %14162 = vmatprep.mubr.msk.f32.mxu1 %vm15799_vm1, %v15798_v14  ;;  %v12950_v17 = vld [vmem:[%s15842_s25 + $0x5] ss:$0 sm:$0xff] }
0x1496   :  { %15106 = vmatprep.subr.bf16.mxu1 %v15105_v48 }
0x1563   :  { %v3569_v13 = vpop.f32.mrb[38].mxu1 }
0x1564   :  { %v3649_v11 = vmul.f32 0.35355338, %v3569_v13  ;;  %v14149_v18 = vpop.f32.mrb[39].mxu1 }
0x1566   :  { %v3651_v19 = vsel %vm16083_vm6, %v3649_v11, -10000.0  ;;  %v12956_v11 = vld [vmem:[%s15862_s14 + $0x5] ss:$0 sm:$0xff] }
0x1567   :  { %v3645_v20 = vpop.f32.mrb[40].mxu1  ;;  %v3653_v21 = vsel %vm515_vm2, %v3651_v19, -inf }
0x1568   :  { %v3650_v22 = vmul.f32 0.35355338, %v3645_v20  ;;  %3654 = vmax.xlane.f32.xlu1 %v3653_v21  ;;  %v14154_v23 = vpop.f32.mrb[41].mxu1 }
0x156a   :  { %v3652_v24 = vsel %vm16091_vm7, %v3650_v22, -10000.0 }
0x156b   :  { %v3656_v25 = vsel %vm515_vm2, %v3652_v24, -inf }
0x156c   :  { %3657 = vmax.xlane.f32.xlu0 %v3656_v25 }
0x15f5   :  { %v3655_v26 = vpop.xlane.xlu1 %3654 }
0x15f6   :  { %v3659_v27 = vsub.f32 %v3651_v19, %v3655_v26 }
0x15f8   :  { %v3661_v28 = vmul.f32 1.442695, %v3659_v27 }
0x15f9   :  { %v3658_v29 = vpop.xlane.xlu0 %3657 }
0x15fa   :  { %15580 = vpow2.f32 %v3661_v28  ;;  %v3660_v30 = vsub.f32 %v3652_v24, %v3658_v29 }
0x15fc   :  { %v3663_v31 = vmul.f32 1.442695, %v3660_v30 }
0x15fe   :  { %15582 = vpow2.f32 %v3663_v31 }
0x1604   :  { %v15581_v32 = vpop.eup %15580 }
0x1605   :  { %v3665_v34 = vsel %vm515_vm2, %v15581_v32, 0.0 }
0x1606   :  { %3666 = vadd.xlane.f32.xlu1 %v3665_v34 }
0x1608   :  { %v15583_v35 = vpop.eup %15582 }
0x1609   :  { %v3668_v40 = vsel %vm515_vm2, %v15583_v35, 0.0 }
0x160a   :  { %3669 = vadd.xlane.f32.xlu0 %v3668_v40 }
0x1693   :  { %v3667_v50 = vpop.xlane.xlu1 %3666 }
0x1694   :  { %15584 = vrcp.f32 %v3667_v50 }
0x1697   :  { %v3670_v51 = vpop.xlane.xlu0 %3669 }
0x1698   :  { %15586 = vrcp.f32 %v3670_v51 }
0x169e   :  { %v15585_v54 = vpop.eup %15584 }
0x169f   :  { %v3672_v55 = vmul.f32 %v15585_v54, %v15581_v32  ;;  %v12879_v54 = vld [vmem:[%s15837_s21 + $0xc8] sm:$0xff] }
0x16a1   :  { %14158 = vmatmul.mubr.msk.f32.vlgmr.msra.gmra.mrb[30].mxu0 %vm515_vm2, %v3672_v55  ;;  %v15121_v55 = vpack.c.bf16 %v12879_v54, %v12878_v53 }
0x16a2   :  { %v15587_v62 = vpop.eup %15586  ;;  %15100 = vmatpush3.bf16.msra.mxu0 %v15097_v45  ;;  %14173 = vmatprep.mubr.msk.f32.mxu0 %vm271_vm0, %v16327_v39 }
0x16a3   :  { %v3674_v0 = vmul.f32 %v15587_v62, %v15583_v35  ;;  %15102 = vmatprep.subr.bf16.mxu0 %v15101_v57  ;;  %v12881_v62 = vld [vmem:[%s15837_s21 + $0xd8] sm:$0xff] }
0x16a5   :  { %14163 = vmatmul.mubr.msk.f32.vlgmr.msra.gmra.mrb[42].mxu1 %vm515_vm2, %v3674_v0 }
0x16a6   :  { %15104 = vmatpush3.bf16.msra.mxu0 %v15101_v57  ;;  %15108 = vmatpush3.bf16.msra.mxu1 %v15105_v48 }
0x16a7   :  { %14184 = vmatprep.mubr.msk.f32.mxu1 %vm271_vm0, %v16327_v39  ;;  %15110 = vmatprep.subr.bf16.mxu1 %v15109_v1 }
0x16a8   :  { %15114 = vmatprep.subr.bf16.mxu0 %v15113_v2 }
0x16a9   :  { %14174 = vmatmul.mubr.msk.f32.vlgmr.msra.gmra.mrb[32].mxu0 %vm271_vm0, %v16329_v63 }
0x16aa   :  { %15112 = vmatpush3.bf16.msra.mxu1 %v15109_v1  ;;  %15116 = vmatpush3.bf16.msra.mxu0 %v15113_v2  ;;  %v15125_v2 = vpack.c.bf16 %v12881_v62, %v12880_v61 }
0x16ab   :  { %14195 = vmatprep.mubr.msk.f32.mxu0 %vm271_vm0, %v16327_v39  ;;  %15118 = vmatprep.subr.bf16.mxu0 %v15117_v4 }
0x16ac   :  { %14198 = vmatprep.subr.mxu1 %v15798_v14 }
0x16ad   :  { %14185 = vmatmul.mubr.msk.f32.vlgmr.msra.gmra.mrb[44].mxu1 %vm271_vm0, %v16329_v63 }
0x16ae   :  { %15120 = vmatpush3.bf16.msra.mxu0 %v15117_v4  ;;  %14200 = vmatprep.mubr.msk.f32.mxu1 %vm15799_vm1, %v15798_v14  ;;  %v15137_v4 = vpack.c.bf16 %v12919_v3, %v12918_v41  ;;  %v12883_v41 = vld [vmem:[%s15837_s21 + $0xe8] sm:$0xff] }
0x16af   :  { %14208 = vmatprep.subr.mxu0 %v15798_v14 }
0x16b1   :  { %14196 = vmatmul.mubr.msk.f32.vlgmr.msra.gmra.mrb[34].mxu0 %vm271_vm0, %v16329_v63 }
0x16b2   :  { %14210 = vmatprep.mubr.msk.f32.mxu0 %vm15799_vm1, %v15798_v14 }
0x1774   :  { %v16401_v5 = vpop.f32.mrb[30].mxu0 }
0x1775   :  { %v14159_v6 = vpop.f32.mrb[31].mxu0 }
0x1776   :  { %v12920_v6 = vld [vmem:[%s15857_s8 + $0xd0] sm:$0xff] }
0x1778   :  { %v16403_v7 = vpop.f32.mrb[42].mxu1 }
0x1779   :  { %v14164_v8 = vpop.f32.mrb[43].mxu1 }
0x177a   :  { %v12921_v8 = vld [vmem:[%s15857_s8 + $0xd8] sm:$0xff] }
0x177c   :  { %v14175_v9 = vpop.f32.mrb[32].mxu0 }
0x177d   :  { %v3893_v10 = vpop.f32.mrb[33].mxu0  ;;  %v3899_v23 = vadd.f32 %v14175_v9, %v12950_v17  ;;  %v15141_v9 = vpack.c.bf16 %v12921_v8, %v12920_v6 }
0x177e   :  { %v3894_v19 = vadd.f32 %v12950_v17, %v3893_v10  ;;  %v12931_v10 = vld [vmem:[%s15867_s19 + $0x28] sm:$0xff] }
0x177f   :  { %v12899_v17 = vld [vmem:[%s15847_s29 + $0xc8] sm:$0xff] }
0x1780   :  { %v14186_v15 = vpop.f32.mrb[44].mxu1 }
0x1781   :  { %v3974_v16 = vpop.f32.mrb[45].mxu1  ;;  %v3980_v21 = vadd.f32 %v14186_v15, %v12953_v12 }
0x1782   :  { %v3975_v13 = vadd.f32 %v12953_v12, %v3974_v16  ;;  %v12930_v12 = vld [vmem:[%s15867_s19 + $0x20] sm:$0xff] }
0x1783   :  { %v12898_v16 = vld [vmem:[%s15847_s29 + $0xc0] sm:$0xff] }
0x1784   :  { %v14197_v18 = vpop.f32.mrb[34].mxu0  ;;  %14199 = vmatpush3.xpose.msk.msra.mxu1 %vm515_vm2, %v3975_v13 }
0x1785   :  { %v4055_v20 = vpop.f32.mrb[35].mxu0  ;;  %14203 = vmatprep.subr.mxu1 %v15798_v14  ;;  %v4061_v24 = vadd.f32 %v14197_v18, %v12956_v11 }
0x1786   :  { %v4056_v22 = vadd.f32 %v12956_v11, %v4055_v20  ;;  %v15129_v11 = vpack.c.bf16 %v12899_v17, %v12898_v16  ;;  %v12900_v20 = vld [vmem:[%s15847_s29 + $0xd0] sm:$0xff] }
0x1787   :  { %14201 = vmatmul.mubr.msk.f32.vlgmr.msra.gmra.mrb[46].mxu1 %vm515_vm2, %v3894_v19 }
0x1788   :  { %14204 = vmatpush3.xpose.msk.msra.mxu1 %vm515_vm2, %v3980_v21  ;;  %14209 = vmatpush3.msra.mxu0 %v4056_v22  ;;  %v12901_v21 = vld [vmem:[%s15847_s29 + $0xd8] sm:$0xff] }
0x1789   :  { %14205 = vmatprep.mubr.msk.f32.mxu1 %vm15799_vm1, %v15798_v14  ;;  %14213 = vmatprep.subr.mxu1 %v15798_v14  ;;  %v15133_v22 = vpack.c.bf16 %v12901_v21, %v12900_v20  ;;  %v12924_v20 = vld [vmem:[%s15857_s8 + $0xf0] sm:$0xff]  ;;  %v12925_v21 = vld [vmem:[%s15857_s8 + $0xf8] sm:$0xff] }
0x178a   :  { %14218 = vmatprep.subr.mxu0 %v12931_v10 }
0x178b   :  { %14206 = vmatmul.mubr.msk.f32.vlgmr.msra.gmra.mrb[48].mxu1 %vm515_vm2, %v3899_v23 }
0x178c   :  { %14214 = vmatpush3.msra.mxu1 %v4061_v24  ;;  %14215 = vmatprep.mubr.msk.f32.mxu1 %vm15799_vm1, %v15798_v14 }
0x178d   :  { %15122 = vmatprep.subr.bf16.mxu1 %v15121_v55 }
0x185a   :  { %v4136_v25 = vpop.f32.mrb[46].mxu1 }
0x185b   :  { %v4216_v26 = vmul.f32 0.35355338, %v4136_v25  ;;  %v14202_v27 = vpop.f32.mrb[47].mxu1 }
0x185d   :  { %v4218_v28 = vsel %vm16083_vm6, %v4216_v26, -10000.0  ;;  %v12972_v26 = vld [vmem:[%s15852_s3 + $0x6] ss:$0 sm:$0xff] }
0x185e   :  { %v4212_v29 = vpop.f32.mrb[48].mxu1  ;;  %v4220_v30 = vsel %vm515_vm2, %v4218_v28, -inf }
0x185f   :  { %v4217_v31 = vmul.f32 0.35355338, %v4212_v29  ;;  %4221 = vmax.xlane.f32.xlu0 %v4220_v30  ;;  %v14207_v32 = vpop.f32.mrb[49].mxu1  ;;  %v12975_v30 = vld [vmem:[%s15862_s14 + $0x6] ss:$0 sm:$0xff] }
0x1861   :  { %v4219_v34 = vsel %vm16091_vm7, %v4217_v31, -10000.0 }
0x1862   :  { %v4223_v35 = vsel %vm515_vm2, %v4219_v34, -inf }
0x1863   :  { %4224 = vmax.xlane.f32.xlu1 %v4223_v35 }
0x18ec   :  { %v4222_v40 = vpop.xlane.xlu0 %4221 }
0x18ed   :  { %v4226_v42 = vsub.f32 %v4218_v28, %v4222_v40  ;;  %v12969_v28 = vld [vmem:[%s15842_s25 + $0x6] ss:$0 sm:$0xff] }
0x18ef   :  { %v4228_v43 = vmul.f32 1.442695, %v4226_v42 }
0x18f0   :  { %v4225_v45 = vpop.xlane.xlu1 %4224 }
0x18f1   :  { %15588 = vpow2.f32 %v4228_v43  ;;  %v4227_v46 = vsub.f32 %v4219_v34, %v4225_v45 }
0x18f3   :  { %v4230_v47 = vmul.f32 1.442695, %v4227_v46 }
0x18f5   :  { %15590 = vpow2.f32 %v4230_v47 }
0x18fb   :  { %v15589_v48 = vpop.eup %15588 }
0x18fc   :  { %v4232_v50 = vsel %vm515_vm2, %v15589_v48, 0.0 }
0x18fd   :  { %4233 = vadd.xlane.f32.xlu0 %v4232_v50 }
0x18ff   :  { %v15591_v51 = vpop.eup %15590 }
0x1900   :  { %v4235_v52 = vsel %vm515_vm2, %v15591_v51, 0.0 }
0x1901   :  { %4236 = vadd.xlane.f32.xlu1 %v4235_v52 }
0x198a   :  { %v4234_v57 = vpop.xlane.xlu0 %4233 }
0x198b   :  { %15592 = vrcp.f32 %v4234_v57 }
0x198e   :  { %v4237_v58 = vpop.xlane.xlu1 %4236 }
0x198f   :  { %15594 = vrcp.f32 %v4237_v58 }
0x1995   :  { %v15593_v59 = vpop.eup %15592 }
0x1996   :  { %v4239_v60 = vmul.f32 %v15593_v59, %v15589_v48 }
0x1998   :  { %14211 = vmatmul.mubr.msk.f32.vlgmr.msra.gmra.mrb[36].mxu0 %vm515_vm2, %v4239_v60 }
0x1999   :  { %v15595_v0 = vpop.eup %15594  ;;  %14219 = vmatpush3.msra.mxu0 %v12931_v10  ;;  %v12885_v10 = vld [vmem:[%s15837_s21 + $0xf8] sm:$0xff] }
0x199a   :  { %v4241_v1 = vmul.f32 %v15595_v0, %v15591_v51  ;;  %14223 = vmatprep.subr.mxu0 %v12930_v12 }
0x199c   :  { %14216 = vmatmul.mubr.msk.f32.vlgmr.msra.gmra.mrb[50].mxu1 %vm515_vm2, %v4241_v1 }
0x199d   :  { %15124 = vmatpush3.bf16.msra.mxu1 %v15121_v55  ;;  %14236 = vmatprep.mubr.msk.f32.mxu1 %vm271_vm0, %v16327_v39 }
0x199e   :  { %15126 = vmatprep.subr.bf16.mxu1 %v15125_v2 }
0x19a1   :  { %15128 = vmatpush3.bf16.msra.mxu1 %v15125_v2  ;;  %v12882_v2 = vld [vmem:[%s15837_s21 + $0xe0] sm:$0xff] }
0x19a2   :  { %15138 = vmatprep.subr.bf16.mxu1 %v15137_v4  ;;  %v15145_v3 = vpack.c.bf16 %v12883_v41, %v12882_v2 }
0x19a4   :  { %14237 = vmatmul.mubr.msk.f32.vlgmr.msra.gmra.mrb[52].mxu1 %vm271_vm0, %v16329_v63 }
0x19a5   :  { %15140 = vmatpush3.bf16.msra.mxu1 %v15137_v4  ;;  %14258 = vmatprep.mubr.msk.f32.mxu1 %vm271_vm0, %v16327_v39  ;;  %v12932_v4 = vld [vmem:[%s15867_s19 + $0x30] sm:$0xff] }
0x19a6   :  { %15142 = vmatprep.subr.bf16.mxu1 %v15141_v9 }
0x19a9   :  { %15144 = vmatpush3.bf16.msra.mxu1 %v15141_v9  ;;  %v12884_v9 = vld [vmem:[%s15837_s21 + $0xf0] sm:$0xff]  ;;  %s17284_s21 = sld [smem:[#allocation8_spill]] }
0x19aa   :  { %14266 = vmatprep.subr.mxu1 %v15798_v14  ;;  %v15149_v17 = vpack.c.bf16 %v12885_v10, %v12884_v9 }
0x19ac   :  { %14259 = vmatmul.mubr.msk.f32.vlgmr.msra.gmra.mrb[54].mxu1 %vm271_vm0, %v16329_v63 }
0x19ad   :  { %14268 = vmatprep.mubr.msk.f32.mxu1 %vm15799_vm1, %v15798_v14 }
0x1a6b   :  { %v4311_v15 = vpop.f32.mrb[36].mxu0 }
0x1a6c   :  { %v14212_v13 = vpop.f32.mrb[37].mxu0  ;;  %14220 = vmatprep.mubr.msk.f32.mxu0 %vm515_vm2, %v4311_v15 }
0x1a6f   :  { %v4384_v18 = vpop.f32.mrb[50].mxu1 }
0x1a70   :  { %v14217_v19 = vpop.f32.mrb[51].mxu1  ;;  %14221 = vmatmul.mubr.msk.f32.vlgmr.msra.gmra.mrb[38].mxu0 %vm515_vm2, %v4384_v18  ;;  %v12923_v18 = vld [vmem:[%s15857_s8 + $0xe8] sm:$0xff] }
0x1a71   :  { %14224 = vmatpush3.msra.mxu0 %v12930_v12  ;;  %14225 = vmatprep.mubr.msk.f32.mxu0 %vm515_vm2, %v16401_v5 }
0x1a72   :  { %15130 = vmatprep.subr.bf16.mxu0 %v15129_v11 }
0x1a77   :  { %v14238_v23 = vpop.f32.mrb[52].mxu1 }
0x1a78   :  { %v4622_v24 = vpop.f32.mrb[53].mxu1  ;;  %14226 = vmatmul.mubr.msk.f32.vlgmr.msra.gmra.mrb[38].mxu0 %vm515_vm2, %v16403_v7  ;;  %v4628_v32 = vadd.f32 %v14238_v23, %v12969_v28  ;;  %v12902_v23 = vld [vmem:[%s15847_s29 + $0xe0] sm:$0xff] }
0x1a79   :  { %15132 = vmatpush3.bf16.msra.mxu0 %v15129_v11  ;;  %14247 = vmatprep.mubr.msk.f32.mxu0 %vm271_vm0, %v16327_v39  ;;  %v4623_v34 = vadd.f32 %v12969_v28, %v4622_v24  ;;  %v12922_v11 = vld [vmem:[%s15857_s8 + $0xe0] sm:$0xff]  ;;  %v12903_v24 = vld [vmem:[%s15847_s29 + $0xe8] sm:$0xff]  ;;  %s17288_s8 = sld [smem:[#allocation16_spill]] }
0x1a7a   :  { %15134 = vmatprep.subr.bf16.mxu0 %v15133_v22  ;;  %v15161_v19 = vpack.c.bf16 %v12923_v18, %v12922_v11  ;;  %v12933_v18 = vld [vmem:[%s15867_s19 + $0x38] sm:$0xff]  ;;  %s17294_s19 = sld [smem:[#allocation17_spill]] }
0x1a7d   :  { %15136 = vmatpush3.bf16.msra.mxu0 %v15133_v22  ;;  %v15165_v22 = vpack.c.bf16 %v12925_v21, %v12924_v20 }
0x1a7e   :  { %14261 = vmatprep.subr.mxu0 %v15798_v14 }
0x1a7f   :  { %v14260_v5 = vpop.f32.mrb[54].mxu1 }
0x1a80   :  { %14248 = vmatmul.mubr.msk.f32.vlgmr.msra.gmra.mrb[40].mxu0 %vm271_vm0, %v16329_v63  ;;  %v4784_v25 = vpop.f32.mrb[55].mxu1  ;;  %v4790_v35 = vadd.f32 %v14260_v5, %v12975_v30  ;;  %v15153_v5 = vpack.c.bf16 %v12903_v24, %v12902_v23  ;;  %v13003_v23 = vld [vmem:[%s15872_s24 + $0x1] ss:$0 sm:$0xff]  ;;  %s17295_s24 = sld [smem:[#allocation18_spill]] }
0x1a81   :  { %14263 = vmatprep.mubr.msk.f32.mxu0 %vm15799_vm1, %v15798_v14  ;;  %v4785_v40 = vadd.f32 %v12975_v30, %v4784_v25  ;;  %v12904_v25 = vld [vmem:[%s15847_s29 + $0xf0] sm:$0xff] }
0x1b53   :  { %v14249_v27 = vpop.f32.mrb[40].mxu0 }
0x1b54   :  { %v4709_v7 = vadd.f32 %v14249_v27, %v12972_v26  ;;  %v4703_v29 = vpop.f32.mrb[41].mxu0 }
0x1b55   :  { %v4704_v31 = vadd.f32 %v12972_v26, %v4703_v29  ;;  %v12905_v26 = vld [vmem:[%s15847_s29 + $0xf8] sm:$0xff]  ;;  %s17286_s29 = sld [smem:[#allocation15_spill]] }
0x1b56   :  { %14267 = vmatpush3.xpose.msk.msra.mxu1 %vm515_vm2, %v4709_v7  ;;  %v15157_v29 = vpack.c.bf16 %v12905_v26, %v12904_v25 }
0x1b57   :  { %14262 = vmatpush3.xpose.msk.msra.mxu0 %vm515_vm2, %v4704_v31  ;;  %14276 = vmatprep.subr.mxu1 %v15798_v14 }
0x1b58   :  { %14271 = vmatprep.subr.mxu0 %v15798_v14 }
0x1b59   :  { %14269 = vmatmul.mubr.msk.f32.vlgmr.msra.gmra.mrb[56].mxu1 %vm515_vm2, %v4628_v32 }
0x1b5a   :  { %14264 = vmatmul.mubr.msk.f32.vlgmr.msra.gmra.mrb[42].mxu0 %vm515_vm2, %v4623_v34  ;;  %14277 = vmatpush3.msra.mxu1 %v4790_v35  ;;  %v12992_v34 = vld [vmem:[%s15862_s14 + $0x7] ss:$0 sm:$0xff]  ;;  %s17289_s14 = sld [smem:[#allocation9_spill]] }
0x1b5b   :  { %14272 = vmatpush3.msra.mxu0 %v4785_v40  ;;  %14278 = vmatprep.mubr.msk.f32.mxu1 %vm15799_vm1, %v15798_v14 }
0x1b5c   :  { %14273 = vmatprep.mubr.msk.f32.mxu0 %vm15799_vm1, %v15798_v14  ;;  %15146 = vmatprep.subr.bf16.mxu1 %v15145_v3 }
0x1b5d   :  { %14281 = vmatprep.subr.mxu0 %v12932_v4 }
0x1c2c   :  { %v4941_v42 = vpop.f32.mrb[56].mxu1 }
0x1c2d   :  { %v4946_v43 = vmul.f32 0.35355338, %v4941_v42  ;;  %v4865_v45 = vpop.f32.mrb[42].mxu0  ;;  %v14270_v46 = vpop.f32.mrb[57].mxu1 }
0x1c2e   :  { %v4945_v47 = vmul.f32 0.35355338, %v4865_v45  ;;  %v14265_v48 = vpop.f32.mrb[43].mxu0  ;;  %v12989_v45 = vld [vmem:[%s15852_s3 + $0x7] ss:$0 sm:$0xff]  ;;  %s17287_s3 = sld [smem:[#allocation13_spill]] }
0x1c2f   :  { %v4948_v50 = vsel %vm16091_vm7, %v4946_v43, -10000.0  ;;  %v12986_v48 = vld [vmem:[%s15842_s25 + $0x7] ss:$0 sm:$0xff]  ;;  %s17285_s25 = sld [smem:[#allocation14_spill]] }
0x1c30   :  { %v4952_v51 = vsel %vm515_vm2, %v4948_v50, -inf  ;;  %v4947_v52 = vsel %vm16083_vm6, %v4945_v47, -10000.0 }
0x1c31   :  { %4953 = vmax.xlane.f32.xlu1 %v4952_v51  ;;  %v4949_v53 = vsel %vm515_vm2, %v4947_v52, -inf }
0x1c32   :  { %4950 = vmax.xlane.f32.xlu0 %v4949_v53 }
0x1cbe   :  { %v4954_v54 = vpop.xlane.xlu1 %4953 }
0x1cbf   :  { %v4956_v55 = vsub.f32 %v4948_v50, %v4954_v54  ;;  %v4951_v57 = vpop.xlane.xlu0 %4950 }
0x1cc0   :  { %v4955_v58 = vsub.f32 %v4947_v52, %v4951_v57 }
0x1cc1   :  { %v4959_v59 = vmul.f32 1.442695, %v4956_v55 }
0x1cc2   :  { %v4957_v60 = vmul.f32 1.442695, %v4955_v58 }
0x1cc3   :  { %15596 = vpow2.f32 %v4959_v59 }
0x1cc4   :  { %15598 = vpow2.f32 %v4957_v60 }
0x1ccd   :  { %v15597_v61 = vpop.eup %15596 }
0x1cce   :  { %v15599_v62 = vpop.eup %15598  ;;  %v4964_v0 = vsel %vm515_vm2, %v15597_v61, 0.0 }
0x1ccf   :  { %4965 = vadd.xlane.f32.xlu1 %v4964_v0  ;;  %v4961_v1 = vsel %vm515_vm2, %v15599_v62, 0.0 }
0x1cd0   :  { %4962 = vadd.xlane.f32.xlu0 %v4961_v1 }
0x1d5c   :  { %v4966_v6 = vpop.xlane.xlu1 %4965 }
0x1d5d   :  { %15600 = vrcp.f32 %v4966_v6  ;;  %v4963_v8 = vpop.xlane.xlu0 %4962 }
0x1d5e   :  { %15602 = vrcp.f32 %v4963_v8 }
0x1d67   :  { %v15601_v12 = vpop.eup %15600 }
0x1d68   :  { %v15603_v15 = vpop.eup %15602  ;;  %v4970_v16 = vmul.f32 %v15601_v12, %v15597_v61 }
0x1d69   :  { %v4968_v13 = vmul.f32 %v15603_v15, %v15599_v62 }
0x1d6a   :  { %14279 = vmatmul.mubr.msk.f32.vlgmr.msra.gmra.mrb[58].mxu1 %vm515_vm2, %v4970_v16 }
0x1d6b   :  { %15148 = vmatpush3.bf16.msra.mxu1 %v15145_v3  ;;  %14274 = vmatmul.mubr.msk.f32.vlgmr.msra.gmra.mrb[44].mxu0 %vm515_vm2, %v4968_v13 }
0x1d6c   :  { %14294 = vmatprep.mubr.msk.f32.mxu1 %vm271_vm0, %v16327_v39  ;;  %15150 = vmatprep.subr.bf16.mxu1 %v15149_v17 }
0x1d6d   :  { %14282 = vmatpush3.msra.mxu0 %v12932_v4 }
0x1d6e   :  { %15154 = vmatprep.subr.bf16.mxu0 %v15153_v5 }
0x1d6f   :  { %15152 = vmatpush3.bf16.msra.mxu1 %v15149_v17 }
0x1d70   :  { %15162 = vmatprep.subr.bf16.mxu1 %v15161_v19 }
0x1d72   :  { %14295 = vmatmul.mubr.msk.f32.vlgmr.msra.gmra.mrb[60].mxu1 %vm271_vm0, %v16329_v63 }
0x1d73   :  { %15164 = vmatpush3.bf16.msra.mxu1 %v15161_v19  ;;  %14316 = vmatprep.mubr.msk.f32.mxu1 %vm271_vm0, %v16327_v39 }
0x1d74   :  { %15166 = vmatprep.subr.bf16.mxu1 %v15165_v22 }
0x1d77   :  { %15168 = vmatpush3.bf16.msra.mxu1 %v15165_v22 }
0x1d78   :  { %14329 = vmatprep.subr.mxu1 %v15798_v14 }
0x1d7a   :  { %14317 = vmatmul.mubr.msk.f32.vlgmr.msra.gmra.mrb[62].mxu1 %vm271_vm0, %v16329_v63 }
0x1d7b   :  { %14331 = vmatprep.mubr.msk.f32.mxu1 %vm15799_vm1, %v15798_v14 }
0x1e3d   :  { %v5113_v27 = vpop.f32.mrb[58].mxu1 }
0x1e3e   :  { %v5040_v28 = vpop.f32.mrb[44].mxu0  ;;  %v14280_v7 = vpop.f32.mrb[59].mxu1 }
0x1e3f   :  { %v14275_v30 = vpop.f32.mrb[45].mxu0  ;;  %14283 = vmatprep.mubr.msk.f32.mxu0 %vm515_vm2, %v5040_v28 }
0x1e40   :  { %14284 = vmatmul.mubr.msk.f32.vlgmr.msra.gmra.mrb[38].mxu0 %vm515_vm2, %v5113_v27 }
0x1e41   :  { %15156 = vmatpush3.bf16.msra.mxu0 %v15153_v5  ;;  %14305 = vmatprep.mubr.msk.f32.mxu0 %vm271_vm0, %v16327_v39 }
0x1e42   :  { %15158 = vmatprep.subr.bf16.mxu0 %v15157_v29 }
0x1e45   :  { %v14296_v31 = vpop.f32.mrb[60].mxu1  ;;  %15160 = vmatpush3.bf16.msra.mxu0 %v15157_v29 }
0x1e46   :  { %v5272_v32 = vpop.f32.mrb[61].mxu1  ;;  %14319 = vmatprep.subr.mxu0 %v15798_v14  ;;  %v5278_v53 = vadd.f32 %v14296_v31, %v12986_v48 }
0x1e47   :  { %v5273_v51 = vadd.f32 %v12986_v48, %v5272_v32  ;;  %v13008_v48 = vld [vmem:[%s15882_s6 + $0x30] sm:$0xff] }
0x1e48   :  { %14306 = vmatmul.mubr.msk.f32.vlgmr.msra.gmra.mrb[46].mxu0 %vm271_vm0, %v16329_v63 }
0x1e49   :  { %14321 = vmatprep.mubr.msk.f32.mxu0 %vm15799_vm1, %v15798_v14 }
0x1e4d   :  { %v14318_v35 = vpop.f32.mrb[62].mxu1 }
0x1e4e   :  { %v5440_v40 = vadd.f32 %v14318_v35, %v12992_v34  ;;  %v5434_v42 = vpop.f32.mrb[63].mxu1 }
0x1e4f   :  { %v5435_v43 = vadd.f32 %v12992_v34, %v5434_v42 }
0x1e51   :  { %14330 = vmatpush3.msra.mxu1 %v5435_v43 }
0x1f1b   :  { %v14307_v46 = vpop.f32.mrb[46].mxu0 }
0x1f1c   :  { %v5353_v47 = vpop.f32.mrb[47].mxu0  ;;  %v5359_v52 = vadd.f32 %v14307_v46, %v12989_v45  ;;  %v13007_v46 = vld [vmem:[%s15882_s6 + $0x28] sm:$0xff] }
0x1f1d   :  { %v5354_v50 = vadd.f32 %v12989_v45, %v5353_v47  ;;  %v13006_v45 = vld [vmem:[%s15882_s6 + $0x20] sm:$0xff] }
0x1f1e   :  { %v15169_v47 = vpack.c.bf16 %v13007_v46, %v13006_v45 }
0x1f1f   :  { %14320 = vmatpush3.xpose.msk.msra.mxu0 %vm515_vm2, %v5354_v50  ;;  %v13009_v50 = vld [vmem:[%s15882_s6 + $0x38] sm:$0xff]  ;;  %s17297_s6 = sld [smem:[#allocation23_spill]] }
0x1f20   :  { %14324 = vmatprep.subr.mxu0 %v15798_v14  ;;  %15170 = vmatprep.subr.bf16.mxu1 %v15169_v47 }
0x1f22   :  { %14322 = vmatmul.mubr.msk.f32.vlgmr.msra.gmra.mrb[48].mxu0 %vm515_vm2, %v5273_v51  ;;  %v15173_v51 = vpack.c.bf16 %v13009_v50, %v13008_v48 }
0x1f23   :  { %14325 = vmatpush3.xpose.msk.msra.mxu0 %vm515_vm2, %v5359_v52  ;;  %14326 = vmatprep.mubr.msk.f32.mxu0 %vm15799_vm1, %v15798_v14  ;;  %v6199_v52 = vld [vmem:[%s17283_s13] sm:$0xff] }
0x1f24   :  { %14334 = vmatprep.subr.mxu0 %v15798_v14 }
0x1f26   :  { %14327 = vmatmul.mubr.msk.f32.vlgmr.msra.gmra.mrb[50].mxu0 %vm515_vm2, %v5278_v53  ;;  %v6200_v53 = vld [vmem:[%s17283_s13 + $0x8] sm:$0xff] }
0x1f27   :  { %14335 = vmatpush3.msra.mxu0 %v5440_v40  ;;  %14336 = vmatprep.mubr.msk.f32.mxu0 %vm15799_vm1, %v15798_v14 }
0x1f28   :  { %14339 = vmatprep.subr.mxu0 %v12933_v18 }
0x1ff5   :  { %v5515_v54 = vpop.f32.mrb[48].mxu0 }
0x1ff6   :  { %v5595_v55 = vmul.f32 0.35355338, %v5515_v54  ;;  %v14323_v57 = vpop.f32.mrb[49].mxu0  ;;  %v15193_v54 = vpack.c.bf16 %v6200_v53, %v6199_v52  ;;  %v6239_v53 = vld [vmem:[%s17288_s8] sm:$0xff] }
0x1ff7   :  { %v13015_v57 = vld [vmem:[%s15892_s20 + $0x48] sm:$0xff] }
0x1ff8   :  { %v5597_v58 = vsel %vm16083_vm6, %v5595_v55, -10000.0  ;;  %v13014_v55 = vld [vmem:[%s15892_s20 + $0x40] sm:$0xff] }
0x1ff9   :  { %v5591_v59 = vpop.f32.mrb[50].mxu0  ;;  %v5599_v60 = vsel %vm515_vm2, %v5597_v58, -inf }
0x1ffa   :  { %v5596_v61 = vmul.f32 0.35355338, %v5591_v59  ;;  %5600 = vmax.xlane.f32.xlu0 %v5599_v60  ;;  %v14328_v62 = vpop.f32.mrb[51].mxu0  ;;  %v15177_v59 = vpack.c.bf16 %v13015_v57, %v13014_v55  ;;  %v13017_v60 = vld [vmem:[%s15892_s20 + $0x58] sm:$0xff]  ;;  %v6241_v55 = vld [vmem:[%s17288_s8 + $0x10] sm:$0xff] }
0x1ffb   :  { %v13018_v62 = vld [vmem:[%s15892_s20 + $0x60] sm:$0xff] }
0x1ffc   :  { %v5598_v0 = vsel %vm16091_vm7, %v5596_v61, -10000.0 }
0x1ffd   :  { %v5602_v1 = vsel %vm515_vm2, %v5598_v0, -inf }
0x1ffe   :  { %5603 = vmax.xlane.f32.xlu1 %v5602_v1 }
0x2087   :  { %v5601_v2 = vpop.xlane.xlu0 %5600 }
0x2088   :  { %v5605_v41 = vsub.f32 %v5597_v58, %v5601_v2  ;;  %v13016_v58 = vld [vmem:[%s15892_s20 + $0x50] sm:$0xff] }
0x2089   :  { %v15181_v61 = vpack.c.bf16 %v13017_v60, %v13016_v58  ;;  %v6242_v58 = vld [vmem:[%s17288_s8 + $0x18] sm:$0xff]  ;;  %v6145_v60 = vld [vmem:[%s17289_s14] sm:$0x3] }
0x208a   :  { %v5607_v3 = vmul.f32 1.442695, %v5605_v41  ;;  %vm6146_vm9 = vcmp.ne.f32.partialorder %v6145_v60, 0.0 }
0x208b   :  { %v5604_v4 = vpop.xlane.xlu1 %5603 }
0x208c   :  { %15604 = vpow2.f32 %v5607_v3  ;;  %v5606_v6 = vsub.f32 %v5598_v0, %v5604_v4  ;;  %v13019_v0 = vld [vmem:[%s15892_s20 + $0x68] sm:$0xff] }
0x208d   :  { %v15185_v1 = vpack.c.bf16 %v13019_v0, %v13018_v62 }
0x208e   :  { %v5609_v49 = vmul.f32 1.442695, %v5606_v6 }
0x2090   :  { %15606 = vpow2.f32 %v5609_v49 }
0x2096   :  { %v15605_v8 = vpop.eup %15604 }
0x2097   :  { %v5611_v9 = vsel %vm515_vm2, %v15605_v8, 0.0 }
0x2098   :  { %5612 = vadd.xlane.f32.xlu0 %v5611_v9  ;;  %v13004_v9 = vld [vmem:[%s15877_s30 + $0x2] ss:$0 sm:$0xff] }
0x209a   :  { %v15607_v10 = vpop.eup %15606 }
0x209b   :  { %v5614_v56 = vsel %vm515_vm2, %v15607_v10, 0.0 }
0x209c   :  { %5615 = vadd.xlane.f32.xlu1 %v5614_v56 }
0x2125   :  { %v5613_v12 = vpop.xlane.xlu0 %5612 }
0x2126   :  { %15608 = vrcp.f32 %v5613_v12 }
0x2129   :  { %v5616_v15 = vpop.xlane.xlu1 %5615 }
0x212a   :  { %15610 = vrcp.f32 %v5616_v15  ;;  %v13005_v15 = vld [vmem:[%s15877_s30 + $0x3] ss:$0 sm:$0xff]  ;;  %s17296_s30 = sld [smem:[#allocation21_spill]] }
0x2130   :  { %v15609_v16 = vpop.eup %15608 }
0x2131   :  { %v5618_v17 = vmul.f32 %v15609_v16, %v15605_v8 }
0x2133   :  { %14332 = vmatmul.mubr.msk.f32.vlgmr.msra.gmra.mrb[64].mxu1 %vm515_vm2, %v5618_v17 }
0x2134   :  { %v15611_v13 = vpop.eup %15610  ;;  %15172 = vmatpush3.bf16.msra.mxu1 %v15169_v47  ;;  %v13028_v47 = vld [vmem:[%s17287_s3] ss:$0 sm:$0xff] }
0x2135   :  { %v5620_v11 = vmul.f32 %v15611_v13, %v15607_v10  ;;  %15174 = vmatprep.subr.bf16.mxu1 %v15173_v51  ;;  %v6201_v13 = vld [vmem:[%s17283_s13 + $0x10] sm:$0xff] }
0x2137   :  { %14337 = vmatmul.mubr.msk.f32.vlgmr.msra.gmra.mrb[52].mxu0 %vm515_vm2, %v5620_v11  ;;  %v6202_v11 = vld [vmem:[%s17283_s13 + $0x18] sm:$0xff] }
0x2138   :  { %14340 = vmatpush3.msra.mxu0 %v12933_v18  ;;  %15176 = vmatpush3.bf16.msra.mxu1 %v15173_v51 }
0x2139   :  { %15194 = vmatprep.subr.bf16.mxu1 %v15193_v54  ;;  %15178 = vmatprep.subr.bf16.mxu0 %v15177_v59 }
0x2206   :  { %v5690_v19 = vpop.f32.mrb[64].mxu1 }
0x2207   :  { %v14333_v20 = vpop.f32.mrb[65].mxu1  ;;  %14341 = vmatprep.mubr.msk.f32.mxu0 %vm515_vm2, %v5690_v19 }
0x2208   :  { %v15197_v20 = vpack.c.bf16 %v6202_v11, %v6201_v13 }
0x220a   :  { %v5763_v21 = vpop.f32.mrb[52].mxu0 }
0x220b   :  { %v14338_v22 = vpop.f32.mrb[53].mxu0  ;;  %14342 = vmatmul.mubr.msk.f32.vlgmr.msra.gmra.mrb[38].mxu0 %vm515_vm2, %v5763_v21  ;;  %v16576_v21 = vld [vmem:[%s17284_s21] sm:$0xff] }
0x220c   :  { %15180 = vmatpush3.bf16.msra.mxu0 %v15177_v59  ;;  %v6219_v22 = vld [vmem:[%s17285_s25] sm:$0xff]  ;;  %v15213_v59 = vpack.c.bf16 %v6242_v58, %v6241_v55  ;;  %v6225_v55 = vld [vmem:[%s17285_s25 + $0x30] sm:$0xff] }
0x220d   :  { %15182 = vmatprep.subr.bf16.mxu0 %v15181_v61 }
0x2210   :  { %15184 = vmatpush3.bf16.msra.mxu0 %v15181_v61  ;;  %v6147_v61 = vsel %vm6146_vm9, 1, %v15801_v38 }
0x2211   :  { %15186 = vmatprep.subr.bf16.mxu0 %v15185_v1  ;;  %v6154_v62 = vrot.slane %v6147_v61, %v16071_v37 }
0x2213   :  { %v6162_v0 = vrot.slane %v6154_v62, %v16071_v37 }
0x2214   :  { %15188 = vmatpush3.bf16.msra.mxu0 %v15185_v1  ;;  %v6155_v1 = vcombine.high %v6154_v62, %v6154_v62 }
0x2215   :  { %vm6170_vm10 = vcmp.ne.s32.totalorder %v6162_v0, 0 }
0x22de   :  { %v14343_v24 = vpop.f32.mrb[38].mxu0 }
0x22df   :  { %v5857_v5 = vadd.f32 %v14343_v24, %v13003_v23  ;;  %v5839_v25 = vpop.f32.mrb[39].mxu0 }
0x22e0   :  { %v5856_v26 = vadd.f32 %v13003_v23, %v5839_v25  ;;  %v6220_v23 = vld [vmem:[%s17285_s25 + $0x8] sm:$0xff]  ;;  %v6222_v25 = vld [vmem:[%s17285_s25 + $0x18] sm:$0xff] }
0x22e1   :  { %v5859_v27 = vadd.f32 %v5857_v5, %v16329_v63  ;;  %v15201_v24 = vpack.c.bf16 %v6220_v23, %v6219_v22  ;;  %v6221_v5 = vld [vmem:[%s17285_s25 + $0x10] sm:$0xff] }
0x22e2   :  { %v5858_v28 = vadd.f32 %v5856_v26, %v16327_v39  ;;  %v16589_v26 = vld [vmem:[%s17284_s21 + $0x8] sm:$0xff] }
0x22e3   :  { %v5863_v7 = vsel %vm271_vm0, %v5859_v27, 0.0 }
0x22e4   :  { %5864 = vadd.xlane.f32.xlu1 %v5863_v7  ;;  %v5860_v29 = vsel %vm271_vm0, %v5858_v28, 0.0  ;;  %v13021_v7 = vld [vmem:[%s15892_s20 + $0x78] sm:$0xff] }
0x22e5   :  { %5861 = vadd.xlane.f32.xlu0 %v5860_v29 }
0x2371   :  { %v5865_v30 = vpop.xlane.xlu1 %5864 }
0x2372   :  { %v5867_v31 = vmul.f32 0.03125, %v5865_v30  ;;  %v5862_v32 = vpop.xlane.xlu0 %5861  ;;  %v13011_v30 = vld [vmem:[%s15887_s12 + $0x1] ss:$0 sm:$0xff]  ;;  %s17298_s12 = sld [smem:[#allocation22_spill]] }
0x2373   :  { %v5866_v34 = vmul.f32 0.03125, %v5862_v32 }
0x2374   :  { %v5869_v35 = vsub.f32 %v5859_v27, %v5867_v31  ;;  %v15205_v27 = vpack.c.bf16 %v6222_v25, %v6221_v5 }
0x2375   :  { %v5868_v40 = vsub.f32 %v5858_v28, %v5866_v34  ;;  %v13020_v28 = vld [vmem:[%s15892_s20 + $0x70] sm:$0xff]  ;;  %s17299_s20 = sld [smem:[#allocation19_spill]] }
0x2376   :  { %v5871_v42 = vmul.f32 %v5869_v35, %v5869_v35  ;;  %v15189_v29 = vpack.c.bf16 %v13021_v7, %v13020_v28 }
0x2377   :  { %v5870_v63 = vmul.f32 %v5868_v40, %v5868_v40 }
0x2378   :  { %v5875_v39 = vsel %vm271_vm0, %v5871_v42, 0.0  ;;  %15190 = vmatprep.subr.bf16.mxu0 %v15189_v29 }
0x2379   :  { %5876 = vadd.xlane.f32.xlu1 %v5875_v39  ;;  %v5872_v43 = vsel %vm271_vm0, %v5870_v63, 0.0  ;;  %15192 = vmatpush3.bf16.msra.mxu0 %v15189_v29 }
0x237a   :  { %5873 = vadd.xlane.f32.xlu0 %v5872_v43  ;;  %v13031_v43 = vld [vmem:[%s17286_s29] ss:$0 sm:$0xff] }
0x2406   :  { %v5877_v2 = vpop.xlane.xlu1 %5876 }
0x2407   :  { %v5879_v41 = vmul.f32 0.03125, %v5877_v2  ;;  %v5874_v3 = vpop.xlane.xlu0 %5873 }
0x2408   :  { %v5878_v4 = vmul.f32 0.03125, %v5874_v3  ;;  %v6169_v3 = vrot.slane %v6155_v1, %v16071_v37 }
0x2409   :  { %v5881_v6 = vadd.f32 1e-05, %v5879_v41 }
0x240a   :  { %v5880_v49 = vadd.f32 1e-05, %v5878_v4  ;;  %v6179_v4 = vsel %vm6170_vm10, 1, %v15801_v38  ;;  %vm6171_vm11 = vcmp.ne.s32.totalorder %v6169_v3, 0 }
0x240b   :  { %15612 = vrsqrt.f32 %v5881_v6  ;;  %v6175_v6 = vand.u32 127, %v175_v33 }
0x240c   :  { %15614 = vrsqrt.f32 %v5880_v49  ;;  %v6184_v49 = vrot.slane %v6179_v4, %v16078_v44 }
0x240d   :  { %vm6176_vm12 = vcmp.le.s32.totalorder %v6175_v6, %v16068_v36  ;;  %v13046_v6 = vld [vmem:[%s17286_s29 + $0x1] ss:$0 sm:$0xff] }
0x240e   :  { %vm6189_vm13 = vcmp.eq.s32.totalorder %v6184_v49, 1 }
0x240f   :  { %vm16643_vm14 = vmand %vm6176_vm12, %vm6189_vm13 }
0x2415   :  { %v15613_v8 = vpop.eup %15612 }
0x2416   :  { %v15615_v10 = vpop.eup %15614  ;;  %v5885_v56 = vmul.f32 %v15613_v8, %v5869_v35  ;;  %v6180_v8 = vsel %vm6171_vm11, 1, %v15801_v38 }
0x2417   :  { %v5884_v12 = vmul.f32 %v15615_v10, %v5868_v40 }
0x2418   :  { %v5893_v16 = vmul.f32 %v13004_v9, %v5885_v56 }
0x2419   :  { %v5892_v17 = vmul.f32 %v13004_v9, %v5884_v12  ;;  %v6188_v9 = vrot.slane %v6180_v8, %v16078_v44  ;;  %v13043_v8 = vld [vmem:[%s17287_s3 + $0x1] ss:$0 sm:$0xff] }
0x241a   :  { %v16573_v19 = vadd.f32 %v13005_v15, %v5893_v16 }
0x241b   :  { %v16571_v18 = vadd.f32 %v13005_v15, %v5892_v17  ;;  %vm6190_vm15 = vcmp.eq.s32.totalorder %v6188_v9, 1 }
0x241c   :  { %vm16650_vm3 = vmand %vm6176_vm12, %vm6190_vm15 }
0x241d   :  { %14352 = vmatprep.mubr.msk.f32.mxu1 %vm271_vm0, %v16571_v18 }
0x241e   :  { %14353 = vmatmul.mubr.msk.f32.vlgmr.msra.gmra.mrb[66].mxu1 %vm271_vm0, %v16573_v19 }
0x241f   :  { %15196 = vmatpush3.bf16.msra.mxu1 %v15193_v54  ;;  %14382 = vmatprep.mubr.msk.f32.mxu1 %vm271_vm0, %v16576_v21  ;;  %v6240_v54 = vld [vmem:[%s17288_s8 + $0x8] sm:$0xff] }
0x2420   :  { %15198 = vmatprep.subr.bf16.mxu1 %v15197_v20  ;;  %v15209_v57 = vpack.c.bf16 %v6240_v54, %v6239_v53 }
0x2422   :  { %15210 = vmatprep.subr.bf16.mxu0 %v15209_v57 }
0x2423   :  { %15200 = vmatpush3.bf16.msra.mxu1 %v15197_v20 }
0x2424   :  { %15202 = vmatprep.subr.bf16.mxu1 %v15201_v24 }
0x2426   :  { %14383 = vmatmul.mubr.msk.f32.vlgmr.msra.gmra.mrb[68].mxu1 %vm271_vm0, %v16589_v26 }
0x2427   :  { %15204 = vmatpush3.bf16.msra.mxu1 %v15201_v24  ;;  %14393 = vmatprep.mubr.msk.f32.mxu1 %vm271_vm0, %v16576_v21 }
0x2428   :  { %15206 = vmatprep.subr.bf16.mxu1 %v15205_v27 }
0x242b   :  { %15208 = vmatpush3.bf16.msra.mxu1 %v15205_v27 }
0x242c   :  { %14407 = vmatprep.subr.mxu1 %v15798_v14 }
0x242e   :  { %14394 = vmatmul.mubr.msk.f32.vlgmr.msra.gmra.mrb[70].mxu1 %vm271_vm0, %v16589_v26 }
0x242f   :  { %14409 = vmatprep.mubr.msk.f32.mxu1 %vm15799_vm1, %v15798_v14 }
0x24f1   :  { %v14354_v31 = vpop.f32.mrb[66].mxu1 }
0x24f2   :  { %v5993_v32 = vadd.f32 %v14354_v31, %v13011_v30  ;;  %v5987_v34 = vpop.f32.mrb[67].mxu1 }
0x24f3   :  { %v5988_v35 = vadd.f32 %v13011_v30, %v5987_v34 }
0x24f4   :  { %v5997_v42 = vmax.f32 %v5993_v32, 0.0  ;;  %v13034_v32 = vld [vmem:[%s17294_s19] ss:$0 sm:$0xff] }
0x24f5   :  { %v5996_v40 = vmax.f32 %v5988_v35, 0.0 }
0x24f7   :  { %14371 = vmatprep.mubr.msk.f32.mxu0 %vm3043_vm8, %v5996_v40 }
0x24f8   :  { %14372 = vmatmul.mubr.msk.f32.vlgmr.msra.gmra.mrb[54].mxu0 %vm3043_vm8, %v5997_v42  ;;  %v6223_v42 = vld [vmem:[%s17285_s25 + $0x20] sm:$0xff] }
0x24f9   :  { %v14384_v63 = vpop.f32.mrb[68].mxu1  ;;  %14404 = vmatprep.mubr.msk.f32.mxu0 %vm271_vm0, %v16576_v21  ;;  %15212 = vmatpush3.bf16.msra.mxu0 %v15209_v57  ;;  %v6226_v57 = vld [vmem:[%s17285_s25 + $0x38] sm:$0xff] }
0x24fa   :  { %v6342_v39 = vpop.f32.mrb[69].mxu1  ;;  %v6348_v52 = vadd.f32 %v14384_v63, %v13028_v47  ;;  %15214 = vmatprep.subr.bf16.mxu0 %v15213_v59  ;;  %v6224_v63 = vld [vmem:[%s17285_s25 + $0x28] sm:$0xff]  ;;  %v15229_v60 = vpack.c.bf16 %v6226_v57, %v6225_v55 }
0x24fb   :  { %v6343_v50 = vadd.f32 %v13028_v47, %v6342_v39  ;;  %v15225_v39 = vpack.c.bf16 %v6224_v63, %v6223_v42 }
0x24fd   :  { %15216 = vmatpush3.bf16.msra.mxu0 %v15213_v59 }
0x24fe   :  { %14417 = vmatprep.subr.mxu0 %v15798_v14 }
0x2500   :  { %14405 = vmatmul.mubr.msk.f32.vlgmr.msra.gmra.mrb[56].mxu0 %vm271_vm0, %v16589_v26 }
0x2501   :  { %v14395_v45 = vpop.f32.mrb[70].mxu1  ;;  %14419 = vmatprep.mubr.msk.f32.mxu0 %vm15799_vm1, %v15798_v14 }
0x2502   :  { %v6423_v46 = vpop.f32.mrb[71].mxu1  ;;  %v6429_v51 = vadd.f32 %v14395_v45, %v13031_v43  ;;  %v6204_v45 = vld [vmem:[%s17283_s13 + $0x28] sm:$0xff] }
0x2503   :  { %v6424_v48 = vadd.f32 %v13031_v43, %v6423_v46  ;;  %v6203_v43 = vld [vmem:[%s17283_s13 + $0x20] sm:$0xff] }
0x2504   :  { %v15217_v46 = vpack.c.bf16 %v6204_v45, %v6203_v43 }
0x2505   :  { %14408 = vmatpush3.xpose.msk.msra.mxu1 %vm515_vm2, %v6424_v48 }
0x2506   :  { %14412 = vmatprep.subr.mxu1 %v15798_v14 }
0x2508   :  { %14410 = vmatmul.mubr.msk.f32.vlgmr.msra.gmra.mrb[72].mxu1 %vm515_vm2, %v6343_v50  ;;  %v6205_v50 = vld [vmem:[%s17283_s13 + $0x30] sm:$0xff] }
0x2509   :  { %14413 = vmatpush3.xpose.msk.msra.mxu1 %vm515_vm2, %v6429_v51  ;;  %14414 = vmatprep.mubr.msk.f32.mxu1 %vm15799_vm1, %v15798_v14  ;;  %v6206_v51 = vld [vmem:[%s17283_s13 + $0x38] sm:$0xff] }
0x250a   :  { %14422 = vmatprep.subr.mxu1 %v15798_v14  ;;  %v15221_v54 = vpack.c.bf16 %v6206_v51, %v6205_v50 }
0x250c   :  { %14415 = vmatmul.mubr.msk.f32.vlgmr.msra.gmra.mrb[74].mxu1 %vm515_vm2, %v6348_v52 }
0x250d   :  { %14424 = vmatprep.mubr.msk.f32.mxu1 %vm15799_vm1, %v15798_v14 }
0x25cb   :  { %v16632_v2 = vpop.f32.mrb[54].mxu0 }
0x25cc   :  { %v16634_v41 = vpop.f32.mrb[55].mxu0 }
0x25d3   :  { %v14406_v31 = vpop.f32.mrb[56].mxu0 }
0x25d4   :  { %v6504_v34 = vpop.f32.mrb[57].mxu0  ;;  %v6510_v40 = vadd.f32 %v14406_v31, %v13034_v32 }
0x25d5   :  { %v6505_v35 = vadd.f32 %v13034_v32, %v6504_v34 }
0x25d6   :  { %14423 = vmatpush3.msra.mxu1 %v6510_v40 }
0x25d7   :  { %14418 = vmatpush3.msra.mxu0 %v6505_v35  ;;  %15226 = vmatprep.subr.bf16.mxu1 %v15225_v39 }
0x25d8   :  { %15218 = vmatprep.subr.bf16.mxu0 %v15217_v46 }
0x25db   :  { %v6585_v10 = vpop.f32.mrb[72].mxu1 }
0x25dc   :  { %v6665_v12 = vmul.f32 0.35355338, %v6585_v10  ;;  %v14411_v15 = vpop.f32.mrb[73].mxu1 }
0x25de   :  { %v6667_v33 = vsel %vm16643_vm14, %v6665_v12, -10000.0 }
0x25df   :  { %v6661_v16 = vpop.f32.mrb[74].mxu1  ;;  %v6669_v17 = vsel %vm515_vm2, %v6667_v33, -inf }
0x25e0   :  { %v6666_v36 = vmul.f32 0.35355338, %v6661_v16  ;;  %6670 = vmax.xlane.f32.xlu1 %v6669_v17  ;;  %v14416_v13 = vpop.f32.mrb[75].mxu1  ;;  %v6243_v16 = vld [vmem:[%s17288_s8 + $0x20] sm:$0xff]  ;;  %v6244_v17 = vld [vmem:[%s17288_s8 + $0x28] sm:$0xff] }
0x25e1   :  { %v15233_v13 = vpack.c.bf16 %v6244_v17, %v6243_v16  ;;  %v6227_v17 = vld [vmem:[%s17285_s25 + $0x40] sm:$0xff] }
0x25e2   :  { %v6668_v11 = vsel %vm16650_vm3, %v6666_v36, -10000.0  ;;  %v6245_v36 = vld [vmem:[%s17288_s8 + $0x30] sm:$0xff] }
0x25e3   :  { %v6672_v20 = vsel %vm515_vm2, %v6668_v11, -inf }
0x25e4   :  { %6673 = vmax.xlane.f32.xlu0 %v6672_v20 }
0x266d   :  { %v6671_v22 = vpop.xlane.xlu1 %6670 }
0x266e   :  { %v6675_v23 = vsub.f32 %v6667_v33, %v6671_v22 }
0x2670   :  { %v6677_v24 = vmul.f32 1.442695, %v6675_v23 }
0x2671   :  { %v6674_v5 = vpop.xlane.xlu0 %6673 }
0x2672   :  { %15616 = vpow2.f32 %v6677_v24  ;;  %v6676_v25 = vsub.f32 %v6668_v11, %v6674_v5  ;;  %v6246_v11 = vld [vmem:[%s17288_s8 + $0x38] sm:$0xff] }
0x2673   :  { %v15237_v20 = vpack.c.bf16 %v6246_v11, %v6245_v36  ;;  %v6228_v36 = vld [vmem:[%s17285_s25 + $0x48] sm:$0xff] }
0x2674   :  { %v6679_v27 = vmul.f32 1.442695, %v6676_v25  ;;  %v15249_v11 = vpack.c.bf16 %v6228_v36, %v6227_v17  ;;  %v6211_v36 = vld [vmem:[%s17283_s13 + $0x60] sm:$0xff] }
0x2676   :  { %15618 = vpow2.f32 %v6679_v27 }
0x267c   :  { %v15617_v28 = vpop.eup %15616 }
0x267d   :  { %v6681_v7 = vsel %vm515_vm2, %v15617_v28, 0.0 }
0x267e   :  { %6682 = vadd.xlane.f32.xlu1 %v6681_v7 }
0x2680   :  { %v15619_v29 = vpop.eup %15618 }
0x2681   :  { %v6684_v30 = vsel %vm515_vm2, %v15619_v29, 0.0 }
0x2682   :  { %6685 = vadd.xlane.f32.xlu0 %v6684_v30 }
0x270b   :  { %v6683_v47 = vpop.xlane.xlu1 %6682 }
0x270c   :  { %15620 = vrcp.f32 %v6683_v47  ;;  %v13049_v47 = vld [vmem:[%s17294_s19 + $0x1] ss:$0 sm:$0xff] }
0x270f   :  { %v6686_v48 = vpop.xlane.xlu0 %6685 }
0x2710   :  { %15622 = vrcp.f32 %v6686_v48 }
0x2716   :  { %v15621_v52 = vpop.eup %15620 }
0x2717   :  { %v6688_v53 = vmul.f32 %v15621_v52, %v15617_v28 }
0x2719   :  { %14420 = vmatmul.mubr.msk.f32.vlgmr.msra.gmra.mrb[58].mxu0 %vm515_vm2, %v6688_v53 }
0x271a   :  { %v15623_v58 = vpop.eup %15622  ;;  %15220 = vmatpush3.bf16.msra.mxu0 %v15217_v46  ;;  %14435 = vmatprep.mubr.msk.f32.mxu0 %vm271_vm0, %v16576_v21 }
0x271b   :  { %v6690_v59 = vmul.f32 %v15623_v58, %v15619_v29  ;;  %15222 = vmatprep.subr.bf16.mxu0 %v15221_v54 }
0x271d   :  { %14425 = vmatmul.mubr.msk.f32.vlgmr.msra.gmra.mrb[76].mxu1 %vm515_vm2, %v6690_v59  ;;  %v6260_v59 = vld [vmem:[%s17295_s24 + $0x8] sm:$0xff] }
0x271e   :  { %15228 = vmatpush3.bf16.msra.mxu1 %v15225_v39  ;;  %15224 = vmatpush3.bf16.msra.mxu0 %v15221_v54 }
0x271f   :  { %15230 = vmatprep.subr.bf16.mxu1 %v15229_v60  ;;  %14446 = vmatprep.mubr.msk.f32.mxu1 %vm271_vm0, %v16576_v21 }
0x2720   :  { %15234 = vmatprep.subr.bf16.mxu0 %v15233_v13 }
0x2721   :  { %14436 = vmatmul.mubr.msk.f32.vlgmr.msra.gmra.mrb[60].mxu0 %vm271_vm0, %v16589_v26 }
0x2722   :  { %15232 = vmatpush3.bf16.msra.mxu1 %v15229_v60  ;;  %14457 = vmatprep.mubr.msk.f32.mxu0 %vm271_vm0, %v16576_v21  ;;  %v6259_v60 = vld [vmem:[%s17295_s24] sm:$0xff] }
0x2723   :  { %14460 = vmatprep.subr.mxu1 %v15798_v14  ;;  %15236 = vmatpush3.bf16.msra.mxu0 %v15233_v13 }
0x2724   :  { %15238 = vmatprep.subr.bf16.mxu0 %v15237_v20 }
0x2725   :  { %14447 = vmatmul.mubr.msk.f32.vlgmr.msra.gmra.mrb[78].mxu1 %vm271_vm0, %v16589_v26 }
0x2726   :  { %14462 = vmatprep.mubr.msk.f32.mxu1 %vm15799_vm1, %v15798_v14 }
0x2727   :  { %15240 = vmatpush3.bf16.msra.mxu0 %v15237_v20 }
0x2728   :  { %14470 = vmatprep.subr.mxu0 %v15798_v14 }
0x272a   :  { %14458 = vmatmul.mubr.msk.f32.vlgmr.msra.gmra.mrb[62].mxu0 %vm271_vm0, %v16589_v26 }
0x272b   :  { %14472 = vmatprep.mubr.msk.f32.mxu0 %vm15799_vm1, %v15798_v14 }
0x27ec   :  { %v16683_v61 = vpop.f32.mrb[58].mxu0 }
0x27ed   :  { %v14421_v62 = vpop.f32.mrb[59].mxu0 }
0x27ee   :  { %v6207_v62 = vld [vmem:[%s17283_s13 + $0x40] sm:$0xff] }
0x27f0   :  { %v16685_v0 = vpop.f32.mrb[76].mxu1 }
0x27f1   :  { %v14426_v1 = vpop.f32.mrb[77].mxu1 }
0x27f2   :  { %v6208_v1 = vld [vmem:[%s17283_s13 + $0x48] sm:$0xff] }
0x27f4   :  { %v14437_v3 = vpop.f32.mrb[60].mxu0 }
0x27f5   :  { %v6909_v4 = vpop.f32.mrb[61].mxu0  ;;  %v6915_v33 = vadd.f32 %v14437_v3, %v13043_v8  ;;  %v15241_v3 = vpack.c.bf16 %v6208_v1, %v6207_v62 }
0x27f6   :  { %v6910_v12 = vadd.f32 %v13043_v8, %v6909_v4  ;;  %v6209_v4 = vld [vmem:[%s17283_s13 + $0x50] sm:$0xff]  ;;  %v6247_v8 = vld [vmem:[%s17288_s8 + $0x40] sm:$0xff] }
0x27f8   :  { %v14448_v49 = vpop.f32.mrb[78].mxu1 }
0x27f9   :  { %v6990_v9 = vpop.f32.mrb[79].mxu1  ;;  %v6996_v15 = vadd.f32 %v14448_v49, %v13046_v6 }
0x27fa   :  { %v6991_v10 = vadd.f32 %v13046_v6, %v6990_v9  ;;  %v6210_v6 = vld [vmem:[%s17283_s13 + $0x58] sm:$0xff]  ;;  %v6248_v9 = vld [vmem:[%s17288_s8 + $0x48] sm:$0xff] }
0x27fb   :  { %v15245_v49 = vpack.c.bf16 %v6210_v6, %v6209_v4  ;;  %v6261_v6 = vld [vmem:[%s17295_s24 + $0x10] sm:$0xff] }
0x27fc   :  { %14461 = vmatpush3.xpose.msk.msra.mxu1 %vm515_vm2, %v6991_v10  ;;  %v6249_v10 = vld [vmem:[%s17288_s8 + $0x50] sm:$0xff] }
0x27fd   :  { %14465 = vmatprep.subr.mxu1 %v15798_v14  ;;  %v14459_v46 = vpop.f32.mrb[62].mxu0 }
0x27fe   :  { %v7071_v48 = vpop.f32.mrb[63].mxu0  ;;  %v7077_v51 = vadd.f32 %v14459_v46, %v13049_v47 }
0x27ff   :  { %14463 = vmatmul.mubr.msk.f32.vlgmr.msra.gmra.mrb[80].mxu1 %vm515_vm2, %v6910_v12  ;;  %v7072_v50 = vadd.f32 %v13049_v47, %v7071_v48  ;;  %v15257_v12 = vpack.c.bf16 %v6248_v9, %v6247_v8 }
0x2800   :  { %14466 = vmatpush3.xpose.msk.msra.mxu1 %vm515_vm2, %v6996_v15  ;;  %14467 = vmatprep.mubr.msk.f32.mxu1 %vm15799_vm1, %v15798_v14  ;;  %v6250_v15 = vld [vmem:[%s17288_s8 + $0x58] sm:$0xff] }
0x2801   :  { %14475 = vmatprep.subr.mxu1 %v15798_v14  ;;  %14471 = vmatpush3.msra.mxu0 %v7072_v50 }
0x2802   :  { %14480 = vmatprep.subr.mxu0 %v6260_v59 }
0x2803   :  { %14468 = vmatmul.mubr.msk.f32.vlgmr.msra.gmra.mrb[82].mxu1 %vm515_vm2, %v6915_v33  ;;  %v15261_v33 = vpack.c.bf16 %v6250_v15, %v6249_v10 }
0x2804   :  { %14477 = vmatprep.mubr.msk.f32.mxu1 %vm15799_vm1, %v15798_v14  ;;  %14476 = vmatpush3.msra.mxu1 %v7077_v51 }
0x2805   :  { %15242 = vmatprep.subr.bf16.mxu1 %v15241_v3 }
0x28d2   :  { %v7152_v22 = vpop.f32.mrb[80].mxu1 }
0x28d3   :  { %v7232_v23 = vmul.f32 0.35355338, %v7152_v22  ;;  %v14464_v24 = vpop.f32.mrb[81].mxu1 }
0x28d4   :  { %v6230_v24 = vld [vmem:[%s17285_s25 + $0x58] sm:$0xff] }
0x28d5   :  { %v7234_v5 = vsel %vm16643_vm14, %v7232_v23, -10000.0  ;;  %v6229_v23 = vld [vmem:[%s17285_s25 + $0x50] sm:$0xff] }
0x28d6   :  { %v7228_v25 = vpop.f32.mrb[82].mxu1  ;;  %v7236_v27 = vsel %vm515_vm2, %v7234_v5, -inf }
0x28d7   :  { %v7233_v28 = vmul.f32 0.35355338, %v7228_v25  ;;  %7237 = vmax.xlane.f32.xlu0 %v7236_v27  ;;  %v14469_v7 = vpop.f32.mrb[83].mxu1 }
0x28d8   :  { %v13065_v7 = vld [vmem:[%s17286_s29 + $0x2] ss:$0 sm:$0xff] }
0x28d9   :  { %v7235_v29 = vsel %vm16650_vm3, %v7233_v28, -10000.0 }
0x28da   :  { %v7239_v30 = vsel %vm515_vm2, %v7235_v29, -inf }
0x28db   :  { %7240 = vmax.xlane.f32.xlu1 %v7239_v30  ;;  %v13068_v30 = vld [vmem:[%s17294_s19 + $0x2] ss:$0 sm:$0xff] }
0x2964   :  { %v7238_v31 = vpop.xlane.xlu0 %7237 }
0x2965   :  { %v7242_v32 = vsub.f32 %v7234_v5, %v7238_v31  ;;  %v15253_v5 = vpack.c.bf16 %v6230_v24, %v6229_v23  ;;  %v6233_v24 = vld [vmem:[%s17285_s25 + $0x70] sm:$0xff] }
0x2967   :  { %v7244_v34 = vmul.f32 1.442695, %v7242_v32 }
0x2968   :  { %v7241_v35 = vpop.xlane.xlu1 %7240 }
0x2969   :  { %15624 = vpow2.f32 %v7244_v34  ;;  %v7243_v40 = vsub.f32 %v7235_v29, %v7241_v35 }
0x296b   :  { %v7246_v42 = vmul.f32 1.442695, %v7243_v40 }
0x296d   :  { %15626 = vpow2.f32 %v7246_v42 }
0x2973   :  { %v15625_v63 = vpop.eup %15624 }
0x2974   :  { %v7248_v39 = vsel %vm515_vm2, %v15625_v63, 0.0 }
0x2975   :  { %7249 = vadd.xlane.f32.xlu0 %v7248_v39 }
0x2977   :  { %v15627_v43 = vpop.eup %15626 }
0x2978   :  { %v7251_v45 = vsel %vm515_vm2, %v15627_v43, 0.0 }
0x2979   :  { %7252 = vadd.xlane.f32.xlu1 %v7251_v45 }
0x2a02   :  { %v7250_v52 = vpop.xlane.xlu0 %7249 }
0x2a03   :  { %15628 = vrcp.f32 %v7250_v52 }
0x2a06   :  { %v7253_v53 = vpop.xlane.xlu1 %7252 }
0x2a07   :  { %15630 = vrcp.f32 %v7253_v53 }
0x2a0d   :  { %v15629_v54 = vpop.eup %15628 }
0x2a0e   :  { %v7255_v55 = vmul.f32 %v15629_v54, %v15625_v63 }
0x2a10   :  { %14473 = vmatmul.mubr.msk.f32.vlgmr.msra.gmra.mrb[64].mxu0 %vm515_vm2, %v7255_v55 }
0x2a11   :  { %v15631_v57 = vpop.eup %15630  ;;  %14481 = vmatpush3.msra.mxu0 %v6260_v59 }
0x2a12   :  { %v7257_v58 = vmul.f32 %v15631_v57, %v15627_v43  ;;  %14485 = vmatprep.subr.mxu0 %v6259_v60 }
0x2a14   :  { %14478 = vmatmul.mubr.msk.f32.vlgmr.msra.gmra.mrb[84].mxu1 %vm515_vm2, %v7257_v58 }
0x2a15   :  { %14498 = vmatprep.mubr.msk.f32.mxu1 %vm271_vm0, %v16576_v21  ;;  %15244 = vmatpush3.bf16.msra.mxu1 %v15241_v3 }
0x2a16   :  { %15246 = vmatprep.subr.bf16.mxu1 %v15245_v49 }
0x2a19   :  { %15248 = vmatpush3.bf16.msra.mxu1 %v15245_v49 }
0x2a1a   :  { %15258 = vmatprep.subr.bf16.mxu1 %v15257_v12 }
0x2a1c   :  { %14499 = vmatmul.mubr.msk.f32.vlgmr.msra.gmra.mrb[86].mxu1 %vm271_vm0, %v16589_v26 }
0x2a1d   :  { %14520 = vmatprep.mubr.msk.f32.mxu1 %vm271_vm0, %v16576_v21  ;;  %15260 = vmatpush3.bf16.msra.mxu1 %v15257_v12 }
0x2a1e   :  { %15262 = vmatprep.subr.bf16.mxu1 %v15261_v33 }
0x2a21   :  { %15264 = vmatpush3.bf16.msra.mxu1 %v15261_v33  ;;  %v6231_v33 = vld [vmem:[%s17285_s25 + $0x60] sm:$0xff] }
0x2a22   :  { %14528 = vmatprep.subr.mxu1 %v15798_v14 }
0x2a24   :  { %14521 = vmatmul.mubr.msk.f32.vlgmr.msra.gmra.mrb[88].mxu1 %vm271_vm0, %v16589_v26 }
0x2a25   :  { %14530 = vmatprep.mubr.msk.f32.mxu1 %vm15799_vm1, %v15798_v14 }
0x2ae3   :  { %v7327_v16 = vpop.f32.mrb[64].mxu0 }
0x2ae4   :  { %v14474_v13 = vpop.f32.mrb[65].mxu0  ;;  %14482 = vmatprep.mubr.msk.f32.mxu0 %vm515_vm2, %v7327_v16  ;;  %v6232_v16 = vld [vmem:[%s17285_s25 + $0x68] sm:$0xff] }
0x2ae5   :  { %v15273_v17 = vpack.c.bf16 %v6232_v16, %v6231_v33  ;;  %v6212_v13 = vld [vmem:[%s17283_s13 + $0x68] sm:$0xff] }
0x2ae7   :  { %v7400_v20 = vpop.f32.mrb[84].mxu1 }
0x2ae8   :  { %v14479_v22 = vpop.f32.mrb[85].mxu1  ;;  %14483 = vmatmul.mubr.msk.f32.vlgmr.msra.gmra.mrb[66].mxu0 %vm515_vm2, %v7400_v20  ;;  %v6213_v20 = vld [vmem:[%s17283_s13 + $0x70] sm:$0xff] }
0x2ae9   :  { %14486 = vmatpush3.msra.mxu0 %v6259_v60  ;;  %14487 = vmatprep.mubr.msk.f32.mxu0 %vm515_vm2, %v16683_v61  ;;  %v6214_v22 = vld [vmem:[%s17283_s13 + $0x78] sm:$0xff] }
0x2aea   :  { %15250 = vmatprep.subr.bf16.mxu0 %v15249_v11  ;;  %v15269_v23 = vpack.c.bf16 %v6214_v22, %v6213_v20 }
0x2aef   :  { %v14500_v61 = vpop.f32.mrb[86].mxu1 }
0x2af0   :  { %14488 = vmatmul.mubr.msk.f32.vlgmr.msra.gmra.mrb[66].mxu0 %vm515_vm2, %v16685_v0  ;;  %v7638_v25 = vpop.f32.mrb[87].mxu1  ;;  %v13062_v0 = vld [vmem:[%s17287_s3 + $0x2] ss:$0 sm:$0xff] }
0x2af1   :  { %15252 = vmatpush3.bf16.msra.mxu0 %v15249_v11  ;;  %14509 = vmatprep.mubr.msk.f32.mxu0 %vm271_vm0, %v16576_v21  ;;  %v7644_v35 = vadd.f32 %v14500_v61, %v13062_v0  ;;  %v7639_v40 = vadd.f32 %v13062_v0, %v7638_v25  ;;  %v15265_v11 = vpack.c.bf16 %v6212_v13, %v6211_v36  ;;  %v13085_v13 = vld [vmem:[%s17294_s19 + $0x3] ss:$0 sm:$0xff] }
0x2af2   :  { %15254 = vmatprep.subr.bf16.mxu0 %v15253_v5 }
0x2af5   :  { %15256 = vmatpush3.bf16.msra.mxu0 %v15253_v5  ;;  %v6234_v5 = vld [vmem:[%s17285_s25 + $0x78] sm:$0xff] }
0x2af6   :  { %14523 = vmatprep.subr.mxu0 %v15798_v14 }
0x2af7   :  { %v14522_v27 = vpop.f32.mrb[88].mxu1 }
0x2af8   :  { %14510 = vmatmul.mubr.msk.f32.vlgmr.msra.gmra.mrb[68].mxu0 %vm271_vm0, %v16589_v26  ;;  %v7800_v28 = vpop.f32.mrb[89].mxu1  ;;  %v7806_v42 = vadd.f32 %v14522_v27, %v13068_v30 }
0x2af9   :  { %14525 = vmatprep.mubr.msk.f32.mxu0 %vm15799_vm1, %v15798_v14  ;;  %v7801_v63 = vadd.f32 %v13068_v30, %v7800_v28  ;;  %v15277_v28 = vpack.c.bf16 %v6234_v5, %v6233_v24  ;;  %v13082_v30 = vld [vmem:[%s17286_s29 + $0x3] ss:$0 sm:$0xff] }
0x2bcb   :  { %v14511_v29 = vpop.f32.mrb[68].mxu0 }
0x2bcc   :  { %v7725_v31 = vadd.f32 %v14511_v29, %v13065_v7  ;;  %v7719_v32 = vpop.f32.mrb[69].mxu0 }
0x2bcd   :  { %v7720_v34 = vadd.f32 %v13065_v7, %v7719_v32  ;;  %v13079_v32 = vld [vmem:[%s17287_s3 + $0x3] ss:$0 sm:$0xff] }
0x2bce   :  { %14529 = vmatpush3.xpose.msk.msra.mxu1 %vm515_vm2, %v7725_v31 }
0x2bcf   :  { %14524 = vmatpush3.xpose.msk.msra.mxu0 %vm515_vm2, %v7720_v34  ;;  %14538 = vmatprep.subr.mxu1 %v15798_v14 }
0x2bd0   :  { %14533 = vmatprep.subr.mxu0 %v15798_v14 }
0x2bd1   :  { %14531 = vmatmul.mubr.msk.f32.vlgmr.msra.gmra.mrb[90].mxu1 %vm515_vm2, %v7644_v35 }
0x2bd2   :  { %14526 = vmatmul.mubr.msk.f32.vlgmr.msra.gmra.mrb[70].mxu0 %vm515_vm2, %v7639_v40  ;;  %14539 = vmatpush3.msra.mxu1 %v7806_v42 }
0x2bd3   :  { %14534 = vmatpush3.msra.mxu0 %v7801_v63  ;;  %14540 = vmatprep.mubr.msk.f32.mxu1 %vm15799_vm1, %v15798_v14  ;;  %v6251_v63 = vld [vmem:[%s17288_s8 + $0x60] sm:$0xff] }
0x2bd4   :  { %14535 = vmatprep.mubr.msk.f32.mxu0 %vm15799_vm1, %v15798_v14  ;;  %14543 = vmatprep.subr.mxu0 %v6261_v6 }
0x2bd5   :  { %15266 = vmatprep.subr.bf16.mxu1 %v15265_v11 }
0x2ca4   :  { %v7957_v39 = vpop.f32.mrb[90].mxu1 }
0x2ca5   :  { %v7962_v43 = vmul.f32 0.35355338, %v7957_v39  ;;  %v7881_v45 = vpop.f32.mrb[70].mxu0  ;;  %v14532_v46 = vpop.f32.mrb[91].mxu1  ;;  %v6252_v39 = vld [vmem:[%s17288_s8 + $0x68] sm:$0xff] }
0x2ca6   :  { %v7961_v47 = vmul.f32 0.35355338, %v7881_v45  ;;  %v14527_v48 = vpop.f32.mrb[71].mxu0  ;;  %v15281_v45 = vpack.c.bf16 %v6252_v39, %v6251_v63  ;;  %v6254_v46 = vld [vmem:[%s17288_s8 + $0x78] sm:$0xff] }
0x2ca7   :  { %v7964_v50 = vsel %vm16650_vm3, %v7962_v43, -10000.0  ;;  %v6253_v43 = vld [vmem:[%s17288_s8 + $0x70] sm:$0xff]  ;;  %v8921_v63 = vld [vmem:[%s17296_s30 + $0x18] sm:$0xff] }
0x2ca8   :  { %v7968_v51 = vsel %vm515_vm2, %v7964_v50, -inf  ;;  %v7963_v52 = vsel %vm16643_vm14, %v7961_v47, -10000.0  ;;  %v15285_v47 = vpack.c.bf16 %v6254_v46, %v6253_v43  ;;  %v6262_v43 = vld [vmem:[%s17295_s24 + $0x18] sm:$0xff] }
0x2ca9   :  { %7969 = vmax.xlane.f32.xlu1 %v7968_v51  ;;  %v7965_v53 = vsel %vm515_vm2, %v7963_v52, -inf }
0x2caa   :  { %7966 = vmax.xlane.f32.xlu0 %v7965_v53 }
0x2d36   :  { %v7970_v54 = vpop.xlane.xlu1 %7969 }
0x2d37   :  { %v7972_v55 = vsub.f32 %v7964_v50, %v7970_v54  ;;  %v7967_v57 = vpop.xlane.xlu0 %7966 }
0x2d38   :  { %v7971_v58 = vsub.f32 %v7963_v52, %v7967_v57 }
0x2d39   :  { %v7975_v59 = vmul.f32 1.442695, %v7972_v55 }
0x2d3a   :  { %v7973_v60 = vmul.f32 1.442695, %v7971_v58 }
0x2d3b   :  { %15632 = vpow2.f32 %v7975_v59 }
0x2d3c   :  { %15634 = vpow2.f32 %v7973_v60 }
0x2d45   :  { %v15633_v62 = vpop.eup %15632 }
0x2d46   :  { %v15635_v1 = vpop.eup %15634  ;;  %v7980_v3 = vsel %vm515_vm2, %v15633_v62, 0.0 }
0x2d47   :  { %7981 = vadd.xlane.f32.xlu1 %v7980_v3  ;;  %v7977_v4 = vsel %vm515_vm2, %v15635_v1, 0.0 }
0x2d48   :  { %7978 = vadd.xlane.f32.xlu0 %v7977_v4 }
0x2dd4   :  { %v7982_v49 = vpop.xlane.xlu1 %7981 }
0x2dd5   :  { %15636 = vrcp.f32 %v7982_v49  ;;  %v7979_v8 = vpop.xlane.xlu0 %7978 }
0x2dd6   :  { %15638 = vrcp.f32 %v7979_v8 }
0x2ddf   :  { %v15637_v9 = vpop.eup %15636 }
0x2de0   :  { %v15639_v10 = vpop.eup %15638  ;;  %v7986_v12 = vmul.f32 %v15637_v9, %v15633_v62 }
0x2de1   :  { %v7984_v15 = vmul.f32 %v15639_v10, %v15635_v1 }
0x2de2   :  { %14541 = vmatmul.mubr.msk.f32.vlgmr.msra.gmra.mrb[92].mxu1 %vm515_vm2, %v7986_v12 }
0x2de3   :  { %14536 = vmatmul.mubr.msk.f32.vlgmr.msra.gmra.mrb[72].mxu0 %vm515_vm2, %v7984_v15  ;;  %14556 = vmatprep.mubr.msk.f32.mxu1 %vm271_vm0, %v16576_v21 }
0x2de4   :  { %14544 = vmatpush3.msra.mxu0 %v6261_v6  ;;  %15268 = vmatpush3.bf16.msra.mxu1 %v15265_v11  ;;  %v13023_v6 = vld [vmem:[%s17281_s0 + $0x1] ss:$0 sm:$0xff] }
0x2de5   :  { %15274 = vmatprep.subr.bf16.mxu0 %v15273_v17  ;;  %15270 = vmatprep.subr.bf16.mxu1 %v15269_v23  ;;  %v6093_v49 = vadd.f32 %v16632_v2, %v13023_v6  ;;  %v6088_v9 = vadd.f32 %v13023_v6, %v16634_v41  ;;  %v9007_v6 = vld [vmem:[%s17297_s6 + $0x8] sm:$0xff] }
0x2de7   :  { %v6097_v12 = vadd.f32 %v6093_v49, %v16573_v19 }
0x2de8   :  { %15272 = vmatpush3.bf16.msra.mxu1 %v15269_v23 }
0x2de9   :  { %15282 = vmatprep.subr.bf16.mxu1 %v15281_v45  ;;  %v6101_v33 = vsel %vm271_vm0, %v6097_v12, 0.0 }
0x2deb   :  { %14557 = vmatmul.mubr.msk.f32.vlgmr.msra.gmra.mrb[94].mxu1 %vm271_vm0, %v16589_v26 }
0x2dec   :  { %14578 = vmatprep.mubr.msk.f32.mxu1 %vm271_vm0, %v16576_v21  ;;  %15284 = vmatpush3.bf16.msra.mxu1 %v15281_v45 }
0x2ded   :  { %15286 = vmatprep.subr.bf16.mxu1 %v15285_v47 }
0x2df0   :  { %15288 = vmatpush3.bf16.msra.mxu1 %v15285_v47 }
0x2df1   :  { %14591 = vmatprep.subr.mxu1 %v15798_v14 }
0x2df3   :  { %14579 = vmatmul.mubr.msk.f32.vlgmr.msra.gmra.mrb[96].mxu1 %vm271_vm0, %v16589_v26 }
0x2df4   :  { %14593 = vmatprep.mubr.msk.f32.mxu1 %vm15799_vm1, %v15798_v14 }
0x2eb5   :  { %v8129_v61 = vpop.f32.mrb[92].mxu1 }
0x2eb6   :  { %v8056_v25 = vpop.f32.mrb[72].mxu0  ;;  %v14542_v27 = vpop.f32.mrb[93].mxu1 }
0x2eb7   :  { %v14537_v7 = vpop.f32.mrb[73].mxu0  ;;  %14545 = vmatprep.mubr.msk.f32.mxu0 %vm515_vm2, %v8056_v25 }
0x2eb8   :  { %14546 = vmatmul.mubr.msk.f32.vlgmr.msra.gmra.mrb[66].mxu0 %vm515_vm2, %v8129_v61 }
0x2eb9   :  { %15276 = vmatpush3.bf16.msra.mxu0 %v15273_v17  ;;  %14567 = vmatprep.mubr.msk.f32.mxu0 %vm271_vm0, %v16576_v21  ;;  %v6096_v17 = vadd.f32 %v6088_v9, %v16571_v18 }
0x2eba   :  { %15278 = vmatprep.subr.bf16.mxu0 %v15277_v28 }
0x2ebb   :  { %v6098_v36 = vsel %vm271_vm0, %v6096_v17, 0.0 }
0x2ebd   :  { %15280 = vmatpush3.bf16.msra.mxu0 %v15277_v28 }
0x2ebe   :  { %14581 = vmatprep.subr.mxu0 %v15798_v14  ;;  %v14558_v0 = vpop.f32.mrb[94].mxu1 }
0x2ebf   :  { %v8288_v29 = vpop.f32.mrb[95].mxu1  ;;  %v8294_v42 = vadd.f32 %v14558_v0, %v13079_v32 }
0x2ec0   :  { %14568 = vmatmul.mubr.msk.f32.vlgmr.msra.gmra.mrb[74].mxu0 %vm271_vm0, %v16589_v26  ;;  %v8289_v35 = vadd.f32 %v13079_v32, %v8288_v29 }
0x2ec1   :  { %14583 = vmatprep.mubr.msk.f32.mxu0 %vm15799_vm1, %v15798_v14 }
0x2ec6   :  { %v14580_v2 = vpop.f32.mrb[96].mxu1 }
0x2ec7   :  { %v8450_v41 = vpop.f32.mrb[97].mxu1  ;;  %v8456_v20 = vadd.f32 %v14580_v2, %v13085_v13 }
0x2ec8   :  { %v8451_v11 = vadd.f32 %v13085_v13, %v8450_v41  ;;  %v13096_v41 = vld [vmem:[%s17299_s20] ss:$0 sm:$0xff] }
0x2eca   :  { %14592 = vmatpush3.msra.mxu1 %v8451_v11 }
0x2f93   :  { %v14569_v31 = vpop.f32.mrb[74].mxu0 }
0x2f94   :  { %v8369_v34 = vpop.f32.mrb[75].mxu0  ;;  %v8375_v40 = vadd.f32 %v14569_v31, %v13082_v30 }
0x2f95   :  { %v8370_v21 = vadd.f32 %v13082_v30, %v8369_v34  ;;  %v8918_v34 = vld [vmem:[%s17296_s30] sm:$0xff] }
0x2f97   :  { %14582 = vmatpush3.xpose.msk.msra.mxu0 %vm515_vm2, %v8370_v21  ;;  %v8919_v21 = vld [vmem:[%s17296_s30 + $0x8] sm:$0xff] }
0x2f98   :  { %14586 = vmatprep.subr.mxu0 %v15798_v14 }
0x2f9a   :  { %14584 = vmatmul.mubr.msk.f32.vlgmr.msra.gmra.mrb[76].mxu0 %vm515_vm2, %v8289_v35  ;;  %v15290_v35 = vpack.c.bf16 %v8919_v21, %v8918_v34 }
0x2f9b   :  { %14587 = vmatpush3.xpose.msk.msra.mxu0 %vm515_vm2, %v8375_v40  ;;  %14588 = vmatprep.mubr.msk.f32.mxu0 %vm15799_vm1, %v15798_v14  ;;  %v15802_v40 = vmov 0.0|0.0  }
0x2f9c   :  { %14596 = vmatprep.subr.mxu0 %v15798_v14  ;;  %15289 = vmatprep.subr.bf16.mxu1 %v15802_v40 }
0x2f9e   :  { %14589 = vmatmul.mubr.msk.f32.vlgmr.msra.gmra.mrb[78].mxu0 %vm515_vm2, %v8294_v42  ;;  %v8920_v42 = vld [vmem:[%s17296_s30 + $0x10] sm:$0xff] }
0x2f9f   :  { %14598 = vmatprep.mubr.msk.f32.mxu0 %vm15799_vm1, %v15798_v14  ;;  %14597 = vmatpush3.msra.mxu0 %v8456_v20  ;;  %v15293_v39 = vpack.c.bf16 %v8921_v63, %v8920_v42 }
0x2fa0   :  { %14601 = vmatprep.subr.mxu0 %v6262_v43 }
0x306d   :  { %v8531_v48 = vpop.f32.mrb[76].mxu0 }
0x306e   :  { %v8611_v50 = vmul.f32 0.35355338, %v8531_v48  ;;  %v14585_v51 = vpop.f32.mrb[77].mxu0 }
0x3070   :  { %v8613_v52 = vsel %vm16643_vm14, %v8611_v50, -10000.0 }
0x3071   :  { %v8607_v53 = vpop.f32.mrb[78].mxu0  ;;  %v8615_v54 = vsel %vm515_vm2, %v8613_v52, -inf }
0x3072   :  { %v8612_v55 = vmul.f32 0.35355338, %v8607_v53  ;;  %8616 = vmax.xlane.f32.xlu0 %v8615_v54  ;;  %v14590_v57 = vpop.f32.mrb[79].mxu0  ;;  %v13026_v53 = vld [vmem:[%s17282_s5 + $0x2] ss:$0 sm:$0xff] }
0x3074   :  { %v8614_v58 = vsel %vm16650_vm3, %v8612_v55, -10000.0  ;;  %v13027_v55 = vld [vmem:[%s17282_s5 + $0x3] ss:$0 sm:$0xff] }
0x3075   :  { %v8618_v26 = vsel %vm515_vm2, %v8614_v58, -inf }
0x3076   :  { %8619 = vmax.xlane.f32.xlu1 %v8618_v26 }
0x30ff   :  { %v8617_v59 = vpop.xlane.xlu0 %8616 }
0x3100   :  { %v8621_v60 = vsub.f32 %v8613_v52, %v8617_v59 }
0x3102   :  { %v8623_v62 = vmul.f32 1.442695, %v8621_v60 }
0x3103   :  { %v8620_v1 = vpop.xlane.xlu1 %8619 }
0x3104   :  { %15640 = vpow2.f32 %v8623_v62  ;;  %v8622_v3 = vsub.f32 %v8614_v58, %v8620_v1 }
0x3106   :  { %v8625_v4 = vmul.f32 1.442695, %v8622_v3 }
0x3108   :  { %15642 = vpow2.f32 %v8625_v4  ;;  %v9006_v4 = vld [vmem:[%s17297_s6] sm:$0xff] }
0x3109   :  { %v15296_v9 = vpack.c.bf16 %v9007_v6, %v9006_v4 }
0x310e   :  { %v15641_v8 = vpop.eup %15640 }
0x310f   :  { %v8627_v10 = vsel %vm515_vm2, %v15641_v8, 0.0 }
0x3110   :  { %8628 = vadd.xlane.f32.xlu0 %v8627_v10 }
0x3112   :  { %v15643_v15 = vpop.eup %15642 }
0x3113   :  { %v8630_v16 = vsel %vm515_vm2, %v15643_v15, 0.0 }
0x3114   :  { %6102 = vadd.xlane.f32.xlu0 %v6101_v33  ;;  %8631 = vadd.xlane.f32.xlu1 %v8630_v16  ;;  %v9009_v33 = vld [vmem:[%s17297_s6 + $0x18] sm:$0xff] }
0x3118   :  { %6099 = vadd.xlane.f32.xlu1 %v6098_v36 }
0x319d   :  { %v8629_v19 = vpop.xlane.xlu0 %8628 }
0x319e   :  { %15644 = vrcp.f32 %v8629_v19 }
0x31a1   :  { %v6103_v22 = vpop.xlane.xlu0 %6102  ;;  %v8632_v23 = vpop.xlane.xlu1 %8631 }
0x31a2   :  { %v6105_v24 = vmul.f32 0.03125, %v6103_v22  ;;  %15646 = vrcp.f32 %v8632_v23  ;;  %v15708_v23 = vld [vmem:[%s17284_s21 + $0x8] sm:$0xff] }
0x31a4   :  { %v6107_v5 = vsub.f32 %v6097_v12, %v6105_v24 }
0x31a5   :  { %v6100_v18 = vpop.xlane.xlu1 %6099 }
0x31a6   :  { %v6104_v61 = vmul.f32 0.03125, %v6100_v18  ;;  %v6109_v25 = vmul.f32 %v6107_v5, %v6107_v5 }
0x31a8   :  { %v15645_v27 = vpop.eup %15644  ;;  %v6106_v28 = vsub.f32 %v6096_v17, %v6104_v61  ;;  %v6113_v7 = vsel %vm271_vm0, %v6109_v25, 0.0  ;;  %v13099_v17 = vld [vmem:[%s17298_s12] ss:$0 sm:$0xff] }
0x31a9   :  { %v8634_v0 = vmul.f32 %v15645_v27, %v15641_v8  ;;  %6114 = vadd.xlane.f32.xlu0 %v6113_v7 }
0x31aa   :  { %v6108_v29 = vmul.f32 %v6106_v28, %v6106_v28 }
0x31ab   :  { %14594 = vmatmul.mubr.msk.f32.vlgmr.msra.gmra.mrb[98].mxu1 %vm515_vm2, %v8634_v0 }
0x31ac   :  { %v15647_v30 = vpop.eup %15646  ;;  %v6110_v31 = vsel %vm271_vm0, %v6108_v29, 0.0  ;;  %14614 = vmatprep.mubr.msk.f32.mxu1 %vm15799_vm1, %v15798_v14  ;;  %15291 = vmatpush3.bf16.msra.mxu1 %v15290_v35 }
0x31ad   :  { %v8636_v32 = vmul.f32 %v15647_v30, %v15643_v15  ;;  %6111 = vadd.xlane.f32.xlu1 %v6110_v31  ;;  %15292 = vmatprep.subr.bf16.mxu1 %v15802_v40  ;;  %v9008_v15 = vld [vmem:[%s17297_s6 + $0x10] sm:$0xff] }
0x31ae   :  { %v15299_v16 = vpack.c.bf16 %v9009_v33, %v9008_v15 }
0x31af   :  { %14599 = vmatmul.mubr.msk.f32.vlgmr.msra.gmra.mrb[80].mxu0 %vm515_vm2, %v8636_v32 }
0x31b0   :  { %15294 = vmatpush3.bf16.msra.mxu1 %v15293_v39  ;;  %14602 = vmatpush3.msra.mxu0 %v6262_v43  ;;  %v13101_v39 = vld [vmem:[%s17300_s28] ss:$0 sm:$0xff] }
0x31b1   :  { %15295 = vmatprep.subr.bf16.mxu0 %v15802_v40 }
0x3236   :  { %v6115_v45 = vpop.xlane.xlu0 %6114 }
0x3237   :  { %v6117_v46 = vmul.f32 0.03125, %v6115_v45 }
0x3239   :  { %v6119_v47 = vadd.f32 1e-05, %v6117_v46 }
0x323a   :  { %v6112_v48 = vpop.xlane.xlu1 %6111 }
0x323b   :  { %15648 = vrsqrt.f32 %v6119_v47  ;;  %v6116_v50 = vmul.f32 0.03125, %v6112_v48 }
0x323d   :  { %v6118_v51 = vadd.f32 1e-05, %v6116_v50 }
0x323f   :  { %15650 = vrsqrt.f32 %v6118_v51 }
0x3245   :  { %v15649_v52 = vpop.eup %15648 }
0x3246   :  { %v6123_v54 = vmul.f32 %v15649_v52, %v6107_v5  ;;  %v15709_v5 = vld [vmem:[%s17284_s21] sm:$0xff] }
0x3248   :  { %v6131_v57 = vmul.f32 %v13026_v53, %v6123_v54  ;;  %v13097_v54 = vld [vmem:[%s17301_s1] ss:$0 sm:$0xff] }
0x3249   :  { %v15651_v58 = vpop.eup %15650 }
0x324a   :  { %v6122_v26 = vmul.f32 %v15651_v58, %v6106_v28  ;;  %v6139_v59 = vadd.f32 %v13027_v55, %v6131_v57 }
0x324c   :  { %v6130_v60 = vmul.f32 %v13026_v53, %v6122_v26  ;;  %6142 = vst.msk [vmem:[#allocation4 + $0x1] sm:$0x1] %vm6140_vm4, %v6139_v59  ;;  %v8931_v1 = vrot.slane %v6139_v59, 7  ;;  %v13098_v59 = vld [vmem:[%s17301_s1 + $0x1] ss:$0 sm:$0xff] }
0x324e   :  { %v6138_v62 = vadd.f32 %v13027_v55, %v6130_v60 }
0x3250   :  { %v16857_v3 = vsel %vm8932_vm5, %v8931_v1, %v6138_v62  ;;  %6141 = vst.msk [vmem:[#allocation4] sm:$0x1] %vm6140_vm4, %v6138_v62 }
0x3251   :  { %14615 = vmatmul.mubr.msk.f32.vlgmr.msra.gmra.mrb[100].mxu1 %vm271_vm0, %v16857_v3 }
0x327e   :  { %v8706_v49 = vpop.f32.mrb[98].mxu1 }
0x327f   :  { %v14595_v8 = vpop.f32.mrb[99].mxu1  ;;  %14603 = vmatprep.mubr.msk.f32.mxu0 %vm515_vm2, %v8706_v49 }
0x3282   :  { %v8779_v10 = vpop.f32.mrb[80].mxu0 }
0x3283   :  { %v14600_v12 = vpop.f32.mrb[81].mxu0  ;;  %14604 = vmatmul.mubr.msk.f32.vlgmr.msra.gmra.mrb[66].mxu0 %vm515_vm2, %v8779_v10 }
0x3284   :  { %15297 = vmatpush3.bf16.msra.mxu0 %v15296_v9  ;;  %14625 = vmatprep.mubr.msk.f32.mxu0 %vm15799_vm1, %v15798_v14 }
0x3285   :  { %15298 = vmatprep.subr.bf16.mxu0 %v15802_v40 }
0x3288   :  { %15300 = vmatpush3.bf16.msra.mxu0 %v15299_v16 }
0x3324   :  { %v9002_v36 = vpop.f32.mrb[100].mxu1 }
0x3325   :  { %v9003_v2 = vadd.f32 %v13099_v17, %v9002_v36  ;;  %v14616_v13 = vpop.f32.mrb[101].mxu1 }
0x3327   :  { %14626 = vmatmul.mubr.msk.f32.vlgmr.msra.gmra.mrb[82].mxu0 %vm271_vm0, %v9003_v2 }
0x3356   :  { %v14605_v11 = vpop.f32.mrb[66].mxu0 }
0x3357   :  { %v8873_v20 = vadd.f32 %v14605_v11, %v13096_v41  ;;  %v8855_v19 = vpop.f32.mrb[67].mxu0 }
0x3358   :  { %v8872_v22 = vadd.f32 %v13096_v41, %v8855_v19 }
0x3359   :  { %v8875_v24 = vadd.f32 %v15708_v23, %v8873_v20  ;;  %v9168_v23 = vld [vmem:[%s17302_s2 + $0x8] sm:$0xff] }
0x335a   :  { %v8874_v18 = vadd.f32 %v15709_v5, %v8872_v22  ;;  %v9167_v22 = vld [vmem:[%s17302_s2] sm:$0xff]  ;;  %v9169_v5 = vld [vmem:[%s17302_s2 + $0x10] sm:$0xff] }
0x335b   :  { %v8879_v61 = vsel %vm271_vm0, %v8875_v24, 0.0 }
0x335c   :  { %8880 = vadd.xlane.f32.xlu1 %v8879_v61  ;;  %v8876_v25 = vsel %vm271_vm0, %v8874_v18, 0.0 }
0x335d   :  { %8877 = vadd.xlane.f32.xlu0 %v8876_v25  ;;  %v9261_v25 = vld [vmem:[%s17303_s7] sm:$0xff] }
0x33e9   :  { %v8881_v27 = vpop.xlane.xlu1 %8880 }
0x33ea   :  { %v8883_v28 = vmul.f32 0.03125, %v8881_v27  ;;  %v8878_v7 = vpop.xlane.xlu0 %8877  ;;  %v9262_v27 = vld [vmem:[%s17303_s7 + $0x8] sm:$0xff] }
0x33eb   :  { %v8882_v0 = vmul.f32 0.03125, %v8878_v7  ;;  %v15309_v7 = vpack.c.bf16 %v9262_v27, %v9261_v25  ;;  %v13159_v25 = vld [vmem:[%s17288_s8 + $0x80] sm:$0xff]  ;;  %v13160_v27 = vld [vmem:[%s17288_s8 + $0x88] sm:$0xff] }
0x33ec   :  { %v8885_v29 = vsub.f32 %v8875_v24, %v8883_v28  ;;  %v15301_v24 = vpack.c.bf16 %v9168_v23, %v9167_v22  ;;  %v9263_v28 = vld [vmem:[%s17303_s7 + $0x10] sm:$0xff] }
0x33ed   :  { %v8884_v30 = vsub.f32 %v8874_v18, %v8882_v0  ;;  %v9170_v18 = vld [vmem:[%s17302_s2 + $0x18] sm:$0xff]  ;;  %15310 = vmatprep.subr.bf16.mxu0 %v15309_v7 }
0x33ee   :  { %v8887_v31 = vmul.f32 %v8885_v29, %v8885_v29  ;;  %15302 = vmatprep.subr.bf16.mxu1 %v15301_v24  ;;  %v15305_v61 = vpack.c.bf16 %v9170_v18, %v9169_v5  ;;  %v9264_v0 = vld [vmem:[%s17303_s7 + $0x18] sm:$0xff]  ;;  %15312 = vmatpush3.bf16.msra.mxu0 %v15309_v7  ;;  %v13119_v5 = vld [vmem:[%s17283_s13 + $0x80] sm:$0xff]  ;;  %v13120_v18 = vld [vmem:[%s17283_s13 + $0x88] sm:$0xff] }
0x33ef   :  { %v8886_v32 = vmul.f32 %v8884_v30, %v8884_v30  ;;  %15304 = vmatpush3.bf16.msra.mxu1 %v15301_v24  ;;  %v13121_v7 = vld [vmem:[%s17283_s13 + $0x90] sm:$0xff] }
0x33f0   :  { %v8891_v34 = vsel %vm271_vm0, %v8887_v31, 0.0  ;;  %15306 = vmatprep.subr.bf16.mxu1 %v15305_v61  ;;  %v9266_v31 = vld [vmem:[%s17303_s7 + $0x28] sm:$0xff] }
0x33f1   :  { %8892 = vadd.xlane.f32.xlu1 %v8891_v34  ;;  %v8888_v21 = vsel %vm271_vm0, %v8886_v32, 0.0 }
0x33f2   :  { %8889 = vadd.xlane.f32.xlu0 %v8888_v21 }
0x33f3   :  { %15308 = vmatpush3.bf16.msra.mxu1 %v15305_v61  ;;  %v15325_v61 = vpack.c.bf16 %v13120_v18, %v13119_v5 }
0x33f5   :  { %15326 = vmatprep.subr.bf16.mxu1 %v15325_v61 }
0x33fa   :  { %v9086_v35 = vpop.f32.mrb[82].mxu0 }
0x33fb   :  { %v14627_v42 = vpop.f32.mrb[83].mxu0  ;;  %v9087_v48 = vadd.f32 %v13101_v39, %v9086_v35 }
0x33fd   :  { %v9097_v51 = vrot.slane %v9087_v48, %v16071_v37 }
0x33ff   :  { %v9098_v52 = vcombine.high %v9097_v51, %v9097_v51  ;;  %v9105_v26 = vrot.slane %v9097_v51, %v16071_v37 }
0x3401   :  { %v9112_v58 = vrot.slane %v9098_v52, %v16071_v37  ;;  %v9116_v8 = vrot.slane %v9105_v26, %v16078_v44  ;;  %v13105_v26 = vld [vmem:[%s17305_s11] ss:$0 sm:$0xff] }
0x3403   :  { %v9120_v6 = vrot.slane %v9112_v58, %v16078_v44 }
0x347e   :  { %v8893_v63 = vpop.xlane.xlu1 %8892 }
0x347f   :  { %v8895_v43 = vmul.f32 0.03125, %v8893_v63  ;;  %v8890_v45 = vpop.xlane.xlu0 %8889 }
0x3480   :  { %v8894_v46 = vmul.f32 0.03125, %v8890_v45  ;;  %v13103_v45 = vld [vmem:[%s17304_s10] ss:$0 sm:$0xff] }
0x3481   :  { %v8897_v47 = vadd.f32 1e-05, %v8895_v43 }
0x3482   :  { %v8896_v50 = vadd.f32 1e-05, %v8894_v46 }
0x3483   :  { %15652 = vrsqrt.f32 %v8897_v47 }
0x3484   :  { %15654 = vrsqrt.f32 %v8896_v50  ;;  %v13104_v50 = vld [vmem:[%s17304_s10 + $0x1] ss:$0 sm:$0xff] }
0x348d   :  { %v15653_v53 = vpop.eup %15652 }
0x348e   :  { %v15655_v55 = vpop.eup %15654  ;;  %v8901_v57 = vmul.f32 %v15653_v53, %v8885_v29  ;;  %v15313_v29 = vpack.c.bf16 %v9264_v0, %v9263_v28  ;;  %v15341_v28 = vpack.c.bf16 %v13160_v27, %v13159_v25  ;;  %v13122_v0 = vld [vmem:[%s17283_s13 + $0x98] sm:$0xff] }
0x348f   :  { %v8900_v60 = vmul.f32 %v15655_v55, %v8884_v30  ;;  %v9265_v30 = vld [vmem:[%s17303_s7 + $0x20] sm:$0xff]  ;;  %v9267_v55 = vld [vmem:[%s17303_s7 + $0x30] sm:$0xff] }
0x3490   :  { %v8909_v62 = vmul.f32 %v13097_v54, %v8901_v57  ;;  %15314 = vmatprep.subr.bf16.mxu0 %v15313_v29  ;;  %v15317_v32 = vpack.c.bf16 %v9266_v31, %v9265_v30  ;;  %v9268_v57 = vld [vmem:[%s17303_s7 + $0x38] sm:$0xff]  ;;  %v13161_v30 = vld [vmem:[%s17288_s8 + $0x90] sm:$0xff] }
0x3491   :  { %v8908_v1 = vmul.f32 %v13097_v54, %v8900_v60  ;;  %15316 = vmatpush3.bf16.msra.mxu0 %v15313_v29  ;;  %v15321_v58 = vpack.c.bf16 %v9268_v57, %v9267_v55  ;;  %v15329_v29 = vpack.c.bf16 %v13122_v0, %v13121_v7  ;;  %v13162_v31 = vld [vmem:[%s17288_s8 + $0x98] sm:$0xff]  ;;  %v13141_v57 = vld [vmem:[%s17285_s25 + $0x90] sm:$0xff] }
0x3492   :  { %v8917_v4 = vadd.f32 %v13098_v59, %v8909_v62  ;;  %15318 = vmatprep.subr.bf16.mxu0 %v15317_v32 }
0x3493   :  { %v8916_v49 = vadd.f32 %v13098_v59, %v8908_v1 }
0x3494   :  { %v9124_v9 = vadd.f32 %v9120_v6, %v8917_v4 }
0x3495   :  { %v9123_v10 = vadd.f32 %v9116_v8, %v8916_v49  ;;  %15320 = vmatpush3.bf16.msra.mxu0 %v15317_v32  ;;  %v13108_v49 = vld [vmem:[%s17306_s15] ss:$0 sm:$0xff]  ;;  %v15345_v32 = vpack.c.bf16 %v13162_v31, %v13161_v30 }
0x3496   :  { %v9128_v12 = vsel %vm271_vm0, %v9124_v9, 0.0  ;;  %15322 = vmatprep.subr.bf16.mxu0 %v15321_v58 }
0x3497   :  { %9129 = vadd.xlane.f32.xlu1 %v9128_v12  ;;  %v9125_v15 = vsel %vm271_vm0, %v9123_v10, 0.0 }
0x3498   :  { %9126 = vadd.xlane.f32.xlu0 %v9125_v15 }
0x3499   :  { %15324 = vmatpush3.bf16.msra.mxu0 %v15321_v58  ;;  %v13142_v58 = vld [vmem:[%s17285_s25 + $0x98] sm:$0xff] }
0x349a   :  { %15342 = vmatprep.subr.bf16.mxu0 %v15341_v28 }
0x3524   :  { %v9130_v33 = vpop.xlane.xlu1 %9129 }
0x3525   :  { %v9132_v16 = vmul.f32 0.03125, %v9130_v33  ;;  %v9127_v17 = vpop.xlane.xlu0 %9126 }
0x3526   :  { %v9131_v36 = vmul.f32 0.03125, %v9127_v17 }
0x3527   :  { %v9134_v2 = vsub.f32 %v9124_v9, %v9132_v16 }
0x3528   :  { %v9133_v13 = vsub.f32 %v9123_v10, %v9131_v36 }
0x3529   :  { %v9136_v41 = vmul.f32 %v9134_v2, %v9134_v2 }
0x352a   :  { %v9135_v11 = vmul.f32 %v9133_v13, %v9133_v13 }
0x352b   :  { %v9140_v20 = vsel %vm271_vm0, %v9136_v41, 0.0 }
0x352c   :  { %9141 = vadd.xlane.f32.xlu1 %v9140_v20  ;;  %v9137_v19 = vsel %vm271_vm0, %v9135_v11, 0.0 }
0x352d   :  { %9138 = vadd.xlane.f32.xlu0 %v9137_v19 }
0x35b9   :  { %v9142_v34 = vpop.xlane.xlu1 %9141 }
0x35ba   :  { %v9144_v21 = vmul.f32 0.03125, %v9142_v34  ;;  %v9139_v35 = vpop.xlane.xlu0 %9138  ;;  %v13139_v34 = vld [vmem:[%s17285_s25 + $0x80] sm:$0xff] }
0x35bb   :  { %v9143_v42 = vmul.f32 0.03125, %v9139_v35 }
0x35bc   :  { %v9146_v63 = vadd.f32 1e-05, %v9144_v21  ;;  %v13140_v21 = vld [vmem:[%s17285_s25 + $0x88] sm:$0xff] }
0x35bd   :  { %v9145_v39 = vadd.f32 1e-05, %v9143_v42  ;;  %v15333_v35 = vpack.c.bf16 %v13140_v21, %v13139_v34  ;;  %v13123_v34 = vld [vmem:[%s17283_s13 + $0xa0] sm:$0xff]  ;;  %v13124_v21 = vld [vmem:[%s17283_s13 + $0xa8] sm:$0xff] }
0x35be   :  { %15656 = vrsqrt.f32 %v9146_v63 }
0x35bf   :  { %15658 = vrsqrt.f32 %v9145_v39 }
0x35c8   :  { %v15657_v43 = vpop.eup %15656 }
0x35c9   :  { %v15659_v46 = vpop.eup %15658  ;;  %v9150_v47 = vmul.f32 %v15657_v43, %v9134_v2 }
0x35ca   :  { %v9149_v48 = vmul.f32 %v15659_v46, %v9133_v13 }
0x35cb   :  { %v9158_v51 = vmul.f32 %v13103_v45, %v9150_v47 }
0x35cc   :  { %v9157_v52 = vmul.f32 %v13103_v45, %v9149_v48  ;;  %v13111_v48 = vld [vmem:[%s17307_s16] ss:$0 sm:$0xff] }
0x35cd   :  { %v9166_v54 = vadd.f32 %v13104_v50, %v9158_v51 }
0x35ce   :  { %v9165_v53 = vadd.f32 %v13104_v50, %v9157_v52 }
0x35d0   :  { %14636 = vmatprep.mubr.msk.f32.mxu1 %vm271_vm0, %v9165_v53 }
0x35d1   :  { %14637 = vmatmul.mubr.msk.f32.vlgmr.msra.gmra.mrb[102].mxu1 %vm271_vm0, %v9166_v54 }
0x35d2   :  { %15328 = vmatpush3.bf16.msra.mxu1 %v15325_v61 }
0x35d3   :  { %15330 = vmatprep.subr.bf16.mxu1 %v15329_v29 }
0x35d6   :  { %15332 = vmatpush3.bf16.msra.mxu1 %v15329_v29 }
0x35d7   :  { %15334 = vmatprep.subr.bf16.mxu1 %v15333_v35 }
0x36a4   :  { %v14638_v59 = vpop.f32.mrb[102].mxu1 }
0x36a5   :  { %v9256_v60 = vadd.f32 %v14638_v59, %v13105_v26  ;;  %v9250_v62 = vpop.f32.mrb[103].mxu1 }
0x36a6   :  { %v9251_v1 = vadd.f32 %v13105_v26, %v9250_v62  ;;  %v13190_v62 = vld [vmem:[%s17294_s19 + $0x4] ss:$0 sm:$0xff] }
0x36a7   :  { %v9260_v6 = vmax.f32 %v9256_v60, 0.0  ;;  %v15337_v60 = vpack.c.bf16 %v13142_v58, %v13141_v57 }
0x36a8   :  { %v9259_v4 = vmax.f32 %v9251_v1, 0.0 }
0x36aa   :  { %14655 = vmatprep.mubr.msk.f32.mxu0 %vm3043_vm8, %v9259_v4 }
0x36ab   :  { %14656 = vmatmul.mubr.msk.f32.vlgmr.msra.gmra.mrb[84].mxu0 %vm3043_vm8, %v9260_v6 }
0x36ac   :  { %15344 = vmatpush3.bf16.msra.mxu0 %v15341_v28 }
0x36ad   :  { %15346 = vmatprep.subr.bf16.mxu0 %v15345_v32 }
0x36b0   :  { %15348 = vmatpush3.bf16.msra.mxu0 %v15345_v32 }
0x36b1   :  { %14701 = vmatprep.subr.mxu0 %v15798_v14 }
0x377e   :  { %v14657_v8 = vpop.f32.mrb[84].mxu0 }
0x377f   :  { %v9354_v9 = vadd.f32 %v14657_v8, %v13108_v49  ;;  %v9348_v10 = vpop.f32.mrb[85].mxu0 }
0x3780   :  { %v9349_v12 = vadd.f32 %v13108_v49, %v9348_v10 }
0x3781   :  { %v9358_v15 = vadd.f32 %v9354_v9, %v9166_v54  ;;  %v13187_v9 = vld [vmem:[%s17286_s29 + $0x4] ss:$0 sm:$0xff] }
0x3782   :  { %v9357_v33 = vadd.f32 %v9349_v12, %v9165_v53  ;;  %v13112_v53 = vld [vmem:[%s17307_s16 + $0x1] ss:$0 sm:$0xff] }
0x3783   :  { %v9362_v16 = vsel %vm271_vm0, %v9358_v15, 0.0 }
0x3784   :  { %9363 = vadd.xlane.f32.xlu1 %v9362_v16  ;;  %v9359_v17 = vsel %vm271_vm0, %v9357_v33, 0.0 }
0x3785   :  { %9360 = vadd.xlane.f32.xlu0 %v9359_v17 }
0x3811   :  { %v9364_v36 = vpop.xlane.xlu1 %9363 }
0x3812   :  { %v9366_v2 = vmul.f32 0.03125, %v9364_v36  ;;  %v9361_v13 = vpop.xlane.xlu0 %9360 }
0x3813   :  { %v9365_v41 = vmul.f32 0.03125, %v9361_v13 }
0x3814   :  { %v9368_v11 = vsub.f32 %v9358_v15, %v9366_v2  ;;  %v13184_v15 = vld [vmem:[%s17287_s3 + $0x4] ss:$0 sm:$0xff] }
0x3815   :  { %v9367_v20 = vsub.f32 %v9357_v33, %v9365_v41 }
0x3816   :  { %v9370_v19 = vmul.f32 %v9368_v11, %v9368_v11 }
0x3817   :  { %v9369_v22 = vmul.f32 %v9367_v20, %v9367_v20 }
0x3818   :  { %v9374_v23 = vsel %vm271_vm0, %v9370_v19, 0.0 }
0x3819   :  { %9375 = vadd.xlane.f32.xlu1 %v9374_v23  ;;  %v9371_v24 = vsel %vm271_vm0, %v9369_v22, 0.0 }
0x381a   :  { %9372 = vadd.xlane.f32.xlu0 %v9371_v24 }
0x38a6   :  { %v9376_v42 = vpop.xlane.xlu1 %9375 }
0x38a7   :  { %v9378_v63 = vmul.f32 0.03125, %v9376_v42  ;;  %v9373_v39 = vpop.xlane.xlu0 %9372  ;;  %v13143_v42 = vld [vmem:[%s17285_s25 + $0xa0] sm:$0xff] }
0x38a8   :  { %v9377_v43 = vmul.f32 0.03125, %v9373_v39 }
0x38a9   :  { %v9380_v45 = vadd.f32 1e-05, %v9378_v63  ;;  %v13144_v63 = vld [vmem:[%s17285_s25 + $0xa8] sm:$0xff] }
0x38aa   :  { %v9379_v46 = vadd.f32 1e-05, %v9377_v43  ;;  %v15357_v39 = vpack.c.bf16 %v13144_v63, %v13143_v42 }
0x38ab   :  { %15660 = vrsqrt.f32 %v9380_v45 }
0x38ac   :  { %15662 = vrsqrt.f32 %v9379_v46  ;;  %v13125_v46 = vld [vmem:[%s17283_s13 + $0xb0] sm:$0xff] }
0x38b5   :  { %v15661_v47 = vpop.eup %15660 }
0x38b6   :  { %v15663_v50 = vpop.eup %15662  ;;  %v9384_v51 = vmul.f32 %v15661_v47, %v9368_v11  ;;  %v13126_v47 = vld [vmem:[%s17283_s13 + $0xb8] sm:$0xff] }
0x38b7   :  { %v9383_v52 = vmul.f32 %v15663_v50, %v9367_v20 }
0x38b8   :  { %v9392_v54 = vmul.f32 %v13111_v48, %v9384_v51  ;;  %v15353_v51 = vpack.c.bf16 %v13126_v47, %v13125_v46  ;;  %v13127_v46 = vld [vmem:[%s17283_s13 + $0xc0] sm:$0xff]  ;;  %v13128_v47 = vld [vmem:[%s17283_s13 + $0xc8] sm:$0xff] }
0x38b9   :  { %v9391_v55 = vmul.f32 %v13111_v48, %v9383_v52  ;;  %v13145_v52 = vld [vmem:[%s17285_s25 + $0xb0] sm:$0xff] }
0x38ba   :  { %v16932_v59 = vadd.f32 %v13112_v53, %v9392_v54  ;;  %v13163_v54 = vld [vmem:[%s17288_s8 + $0xa0] sm:$0xff] }
0x38bb   :  { %v16930_v26 = vadd.f32 %v13112_v53, %v9391_v55  ;;  %v13146_v53 = vld [vmem:[%s17285_s25 + $0xb8] sm:$0xff]  ;;  %v13164_v55 = vld [vmem:[%s17288_s8 + $0xa8] sm:$0xff] }
0x38bd   :  { %14666 = vmatprep.mubr.msk.f32.mxu1 %vm271_vm0, %v16930_v26  ;;  %14688 = vmatprep.mubr.msk.f32.mxu0 %vm271_vm0, %v16930_v26 }
0x38be   :  { %14667 = vmatmul.mubr.msk.f32.vlgmr.msra.gmra.mrb[104].mxu1 %vm271_vm0, %v16932_v59  ;;  %14689 = vmatmul.mubr.msk.f32.vlgmr.msra.gmra.mrb[86].mxu0 %vm271_vm0, %v16932_v59 }
0x38bf   :  { %15336 = vmatpush3.bf16.msra.mxu1 %v15333_v35  ;;  %14677 = vmatprep.mubr.msk.f32.mxu1 %vm271_vm0, %v16930_v26  ;;  %v15349_v35 = vpack.c.bf16 %v13124_v21, %v13123_v34 }
0x38c0   :  { %15338 = vmatprep.subr.bf16.mxu1 %v15337_v60  ;;  %14703 = vmatprep.mubr.msk.f32.mxu0 %vm15799_vm1, %v15798_v14 }
0x38c3   :  { %15340 = vmatpush3.bf16.msra.mxu1 %v15337_v60  ;;  %v15361_v60 = vpack.c.bf16 %v13146_v53, %v13145_v52 }
0x38c4   :  { %14691 = vmatprep.subr.mxu1 %v15798_v14 }
0x38c6   :  { %14678 = vmatmul.mubr.msk.f32.vlgmr.msra.gmra.mrb[106].mxu1 %vm271_vm0, %v16932_v59 }
0x38c7   :  { %14693 = vmatprep.mubr.msk.f32.mxu1 %vm15799_vm1, %v15798_v14 }
0x3991   :  { %v14668_v1 = vpop.f32.mrb[104].mxu1  ;;  %v14690_v4 = vpop.f32.mrb[86].mxu0 }
0x3992   :  { %v9561_v6 = vpop.f32.mrb[105].mxu1  ;;  %v9723_v49 = vpop.f32.mrb[87].mxu0  ;;  %v9567_v36 = vadd.f32 %v14668_v1, %v13184_v15  ;;  %v9729_v2 = vadd.f32 %v14690_v4, %v13190_v62  ;;  %v13165_v1 = vld [vmem:[%s17288_s8 + $0xb0] sm:$0xff]  ;;  %v13166_v4 = vld [vmem:[%s17288_s8 + $0xb8] sm:$0xff] }
0x3993   :  { %v9724_v8 = vadd.f32 %v13190_v62, %v9723_v49  ;;  %v9562_v16 = vadd.f32 %v13184_v15, %v9561_v6  ;;  %v15365_v62 = vpack.c.bf16 %v13164_v55, %v13163_v54  ;;  %v15369_v6 = vpack.c.bf16 %v13166_v4, %v13165_v1  ;;  %v13129_v54 = vld [vmem:[%s17283_s13 + $0xd0] sm:$0xff]  ;;  %v13130_v55 = vld [vmem:[%s17283_s13 + $0xd8] sm:$0xff]  ;;  %v13168_v1 = vld [vmem:[%s17288_s8 + $0xc8] sm:$0xff] }
0x3995   :  { %14702 = vmatpush3.msra.mxu0 %v9724_v8 }
0x3996   :  { %15350 = vmatprep.subr.bf16.mxu0 %v15349_v35 }
0x3999   :  { %v14679_v10 = vpop.f32.mrb[106].mxu1 }
0x399a   :  { %v9642_v12 = vpop.f32.mrb[107].mxu1  ;;  %v9648_v17 = vadd.f32 %v14679_v10, %v13187_v9 }
0x399b   :  { %v9643_v33 = vadd.f32 %v13187_v9, %v9642_v12 }
0x399d   :  { %14692 = vmatpush3.xpose.msk.msra.mxu1 %vm515_vm2, %v9643_v33  ;;  %v13202_v33 = vld [vmem:[%s17286_s29 + $0x5] ss:$0 sm:$0xff] }
0x399e   :  { %14696 = vmatprep.subr.mxu1 %v15798_v14 }
0x39a0   :  { %14694 = vmatmul.mubr.msk.f32.vlgmr.msra.gmra.mrb[108].mxu1 %vm515_vm2, %v9562_v16 }
0x39a1   :  { %14697 = vmatpush3.xpose.msk.msra.mxu1 %vm515_vm2, %v9648_v17  ;;  %14698 = vmatprep.mubr.msk.f32.mxu1 %vm15799_vm1, %v15798_v14 }
0x39a2   :  { %14706 = vmatprep.subr.mxu1 %v15798_v14 }
0x39a4   :  { %14699 = vmatmul.mubr.msk.f32.vlgmr.msra.gmra.mrb[110].mxu1 %vm515_vm2, %v9567_v36  ;;  %v13199_v36 = vld [vmem:[%s17287_s3 + $0x5] ss:$0 sm:$0xff] }
0x39a5   :  { %14707 = vmatpush3.msra.mxu1 %v9729_v2  ;;  %14708 = vmatprep.mubr.msk.f32.mxu1 %vm15799_vm1, %v15798_v14 }
0x39a6   :  { %15358 = vmatprep.subr.bf16.mxu1 %v15357_v39 }
0x3a73   :  { %v9804_v13 = vpop.f32.mrb[108].mxu1 }
0x3a74   :  { %v9884_v41 = vmul.f32 0.35355338, %v9804_v13  ;;  %v14695_v11 = vpop.f32.mrb[109].mxu1  ;;  %v13205_v13 = vld [vmem:[%s17294_s19 + $0x5] ss:$0 sm:$0xff] }
0x3a76   :  { %v9886_v20 = vsel %vm16643_vm14, %v9884_v41, -10000.0 }
0x3a77   :  { %v9880_v19 = vpop.f32.mrb[110].mxu1  ;;  %v9888_v22 = vsel %vm515_vm2, %v9886_v20, -inf }
0x3a78   :  { %v9885_v23 = vmul.f32 0.35355338, %v9880_v19  ;;  %9889 = vmax.xlane.f32.xlu1 %v9888_v22  ;;  %v14700_v24 = vpop.f32.mrb[111].mxu1 }
0x3a7a   :  { %v9887_v5 = vsel %vm16650_vm3, %v9885_v23, -10000.0 }
0x3a7b   :  { %v9891_v18 = vsel %vm515_vm2, %v9887_v5, -inf }
0x3a7c   :  { %9892 = vmax.xlane.f32.xlu0 %v9891_v18 }
0x3b05   :  { %v9890_v61 = vpop.xlane.xlu1 %9889 }
0x3b06   :  { %v9894_v25 = vsub.f32 %v9886_v20, %v9890_v61 }
0x3b08   :  { %v9896_v27 = vmul.f32 1.442695, %v9894_v25 }
0x3b09   :  { %v9893_v28 = vpop.xlane.xlu0 %9892 }
0x3b0a   :  { %15664 = vpow2.f32 %v9896_v27  ;;  %v9895_v7 = vsub.f32 %v9887_v5, %v9893_v28 }
0x3b0c   :  { %v9898_v0 = vmul.f32 1.442695, %v9895_v7 }
0x3b0e   :  { %15666 = vpow2.f32 %v9898_v0 }
0x3b14   :  { %v15665_v29 = vpop.eup %15664 }
0x3b15   :  { %v9900_v30 = vsel %vm515_vm2, %v15665_v29, 0.0 }
0x3b16   :  { %9901 = vadd.xlane.f32.xlu1 %v9900_v30 }
0x3b18   :  { %v15667_v31 = vpop.eup %15666 }
0x3b19   :  { %v9903_v32 = vsel %vm515_vm2, %v15667_v31, 0.0 }
0x3b1a   :  { %9904 = vadd.xlane.f32.xlu0 %v9903_v32 }
0x3ba3   :  { %v9902_v43 = vpop.xlane.xlu1 %9901 }
0x3ba4   :  { %15668 = vrcp.f32 %v9902_v43 }
0x3ba7   :  { %v9905_v45 = vpop.xlane.xlu0 %9904 }
0x3ba8   :  { %15670 = vrcp.f32 %v9905_v45 }
0x3bae   :  { %v15669_v48 = vpop.eup %15668 }
0x3baf   :  { %v9907_v50 = vmul.f32 %v15669_v48, %v15665_v29  ;;  %v15373_v48 = vpack.c.bf16 %v13128_v47, %v13127_v46 }
0x3bb1   :  { %14704 = vmatmul.mubr.msk.f32.vlgmr.msra.gmra.mrb[88].mxu0 %vm515_vm2, %v9907_v50 }
0x3bb2   :  { %v15671_v57 = vpop.eup %15670  ;;  %15352 = vmatpush3.bf16.msra.mxu0 %v15349_v35  ;;  %14719 = vmatprep.mubr.msk.f32.mxu0 %vm271_vm0, %v16930_v26 }
0x3bb3   :  { %v9909_v58 = vmul.f32 %v15671_v57, %v15667_v31  ;;  %15354 = vmatprep.subr.bf16.mxu0 %v15353_v51 }
0x3bb5   :  { %14709 = vmatmul.mubr.msk.f32.vlgmr.msra.gmra.mrb[112].mxu1 %vm515_vm2, %v9909_v58 }
0x3bb6   :  { %15356 = vmatpush3.bf16.msra.mxu0 %v15353_v51  ;;  %15360 = vmatpush3.bf16.msra.mxu1 %v15357_v39 }
0x3bb7   :  { %14730 = vmatprep.mubr.msk.f32.mxu1 %vm271_vm0, %v16930_v26  ;;  %15362 = vmatprep.subr.bf16.mxu1 %v15361_v60 }
0x3bb8   :  { %15366 = vmatprep.subr.bf16.mxu0 %v15365_v62 }
0x3bb9   :  { %14720 = vmatmul.mubr.msk.f32.vlgmr.msra.gmra.mrb[90].mxu0 %vm271_vm0, %v16932_v59 }
0x3bba   :  { %15364 = vmatpush3.bf16.msra.mxu1 %v15361_v60  ;;  %15368 = vmatpush3.bf16.msra.mxu0 %v15365_v62  ;;  %v15377_v60 = vpack.c.bf16 %v13130_v55, %v13129_v54  ;;  %v13167_v62 = vld [vmem:[%s17288_s8 + $0xc0] sm:$0xff] }
0x3bbb   :  { %14741 = vmatprep.mubr.msk.f32.mxu0 %vm271_vm0, %v16930_v26  ;;  %15370 = vmatprep.subr.bf16.mxu0 %v15369_v6  ;;  %v15389_v4 = vpack.c.bf16 %v13168_v1, %v13167_v62  ;;  %v13181_v1 = vld [vmem:[%s17295_s24 + $0x30] sm:$0xff] }
0x3bbc   :  { %14744 = vmatprep.subr.mxu1 %v15798_v14 }
0x3bbd   :  { %14731 = vmatmul.mubr.msk.f32.vlgmr.msra.gmra.mrb[114].mxu1 %vm271_vm0, %v16932_v59 }
0x3bbe   :  { %15372 = vmatpush3.bf16.msra.mxu0 %v15369_v6  ;;  %14746 = vmatprep.mubr.msk.f32.mxu1 %vm15799_vm1, %v15798_v14  ;;  %v13169_v6 = vld [vmem:[%s17288_s8 + $0xd0] sm:$0xff] }
0x3bbf   :  { %14754 = vmatprep.subr.mxu0 %v15798_v14 }
0x3bc1   :  { %14742 = vmatmul.mubr.msk.f32.vlgmr.msra.gmra.mrb[92].mxu0 %vm271_vm0, %v16932_v59 }
0x3bc2   :  { %14756 = vmatprep.mubr.msk.f32.mxu0 %vm15799_vm1, %v15798_v14 }
0x3c84   :  { %v17004_v49 = vpop.f32.mrb[88].mxu0 }
0x3c85   :  { %v14705_v8 = vpop.f32.mrb[89].mxu0 }
0x3c86   :  { %v13170_v8 = vld [vmem:[%s17288_s8 + $0xd8] sm:$0xff] }
0x3c88   :  { %v17006_v9 = vpop.f32.mrb[112].mxu1 }
0x3c89   :  { %v14710_v10 = vpop.f32.mrb[113].mxu1 }
0x3c8a   :  { %v15393_v10 = vpack.c.bf16 %v13170_v8, %v13169_v6  ;;  %v13133_v8 = vld [vmem:[%s17283_s13 + $0xf0] sm:$0xff] }
0x3c8c   :  { %v14721_v12 = vpop.f32.mrb[90].mxu0 }
0x3c8d   :  { %v10128_v15 = vpop.f32.mrb[91].mxu0  ;;  %v10134_v23 = vadd.f32 %v14721_v12, %v13199_v36  ;;  %v13180_v12 = vld [vmem:[%s17295_s24 + $0x28] sm:$0xff] }
0x3c8e   :  { %v10129_v11 = vadd.f32 %v13199_v36, %v10128_v15  ;;  %v13179_v15 = vld [vmem:[%s17295_s24 + $0x20] sm:$0xff] }
0x3c90   :  { %v14732_v16 = vpop.f32.mrb[114].mxu1 }
0x3c91   :  { %v10209_v17 = vpop.f32.mrb[115].mxu1  ;;  %v10215_v19 = vadd.f32 %v14732_v16, %v13202_v33  ;;  %v13147_v16 = vld [vmem:[%s17285_s25 + $0xc0] sm:$0xff] }
0x3c92   :  { %v10210_v2 = vadd.f32 %v13202_v33, %v10209_v17  ;;  %v13148_v17 = vld [vmem:[%s17285_s25 + $0xc8] sm:$0xff] }
0x3c94   :  { %v14743_v41 = vpop.f32.mrb[92].mxu0  ;;  %14745 = vmatpush3.xpose.msk.msra.mxu1 %vm515_vm2, %v10210_v2  ;;  %v15381_v2 = vpack.c.bf16 %v13148_v17, %v13147_v16 }
0x3c95   :  { %v10290_v20 = vpop.f32.mrb[93].mxu0  ;;  %14749 = vmatprep.subr.mxu1 %v15798_v14  ;;  %v10296_v24 = vadd.f32 %v14743_v41, %v13205_v13 }
0x3c96   :  { %v10291_v22 = vadd.f32 %v13205_v13, %v10290_v20  ;;  %v13150_v20 = vld [vmem:[%s17285_s25 + $0xd8] sm:$0xff] }
0x3c97   :  { %14747 = vmatmul.mubr.msk.f32.vlgmr.msra.gmra.mrb[116].mxu1 %vm515_vm2, %v10129_v11  ;;  %v13149_v11 = vld [vmem:[%s17285_s25 + $0xd0] sm:$0xff] }
0x3c98   :  { %14750 = vmatpush3.xpose.msk.msra.mxu1 %vm515_vm2, %v10215_v19  ;;  %14755 = vmatpush3.msra.mxu0 %v10291_v22  ;;  %v15385_v19 = vpack.c.bf16 %v13150_v20, %v13149_v11  ;;  %v13174_v11 = vld [vmem:[%s17288_s8 + $0xf8] sm:$0xff] }
0x3c99   :  { %14751 = vmatprep.mubr.msk.f32.mxu1 %vm15799_vm1, %v15798_v14  ;;  %14759 = vmatprep.subr.mxu1 %v15798_v14 }
0x3c9a   :  { %14764 = vmatprep.subr.mxu0 %v13180_v12 }
0x3c9b   :  { %14752 = vmatmul.mubr.msk.f32.vlgmr.msra.gmra.mrb[118].mxu1 %vm515_vm2, %v10134_v23 }
0x3c9c   :  { %14760 = vmatpush3.msra.mxu1 %v10296_v24  ;;  %14761 = vmatprep.mubr.msk.f32.mxu1 %vm15799_vm1, %v15798_v14 }
0x3c9d   :  { %15374 = vmatprep.subr.bf16.mxu1 %v15373_v48 }
0x3d6a   :  { %v10371_v5 = vpop.f32.mrb[116].mxu1 }
0x3d6b   :  { %v10451_v18 = vmul.f32 0.35355338, %v10371_v5  ;;  %v14748_v61 = vpop.f32.mrb[117].mxu1  ;;  %v13221_v5 = vld [vmem:[%s17286_s29 + $0x6] ss:$0 sm:$0xff] }
0x3d6c   :  { %v13218_v61 = vld [vmem:[%s17287_s3 + $0x6] ss:$0 sm:$0xff] }
0x3d6d   :  { %v10453_v25 = vsel %vm16643_vm14, %v10451_v18, -10000.0 }
0x3d6e   :  { %v10447_v27 = vpop.f32.mrb[118].mxu1  ;;  %v10455_v28 = vsel %vm515_vm2, %v10453_v25, -inf }
0x3d6f   :  { %v10452_v7 = vmul.f32 0.35355338, %v10447_v27  ;;  %10456 = vmax.xlane.f32.xlu0 %v10455_v28  ;;  %v14753_v0 = vpop.f32.mrb[119].mxu1  ;;  %v13224_v27 = vld [vmem:[%s17294_s19 + $0x6] ss:$0 sm:$0xff] }
0x3d71   :  { %v10454_v29 = vsel %vm16650_vm3, %v10452_v7, -10000.0 }
0x3d72   :  { %v10458_v30 = vsel %vm515_vm2, %v10454_v29, -inf }
0x3d73   :  { %10459 = vmax.xlane.f32.xlu1 %v10458_v30 }
0x3dfc   :  { %v10457_v31 = vpop.xlane.xlu0 %10456 }
0x3dfd   :  { %v10461_v32 = vsub.f32 %v10453_v25, %v10457_v31 }
0x3dff   :  { %v10463_v34 = vmul.f32 1.442695, %v10461_v32 }
0x3e00   :  { %v10460_v21 = vpop.xlane.xlu1 %10459 }
0x3e01   :  { %15672 = vpow2.f32 %v10463_v34  ;;  %v10462_v35 = vsub.f32 %v10454_v29, %v10460_v21 }
0x3e03   :  { %v10465_v42 = vmul.f32 1.442695, %v10462_v35 }
0x3e05   :  { %15674 = vpow2.f32 %v10465_v42 }
0x3e0b   :  { %v15673_v63 = vpop.eup %15672 }
0x3e0c   :  { %v10467_v39 = vsel %vm515_vm2, %v15673_v63, 0.0 }
0x3e0d   :  { %10468 = vadd.xlane.f32.xlu0 %v10467_v39 }
0x3e0f   :  { %v15675_v43 = vpop.eup %15674 }
0x3e10   :  { %v10470_v45 = vsel %vm515_vm2, %v15675_v43, 0.0 }
0x3e11   :  { %10471 = vadd.xlane.f32.xlu1 %v10470_v45 }
0x3e9a   :  { %v10469_v50 = vpop.xlane.xlu0 %10468 }
0x3e9b   :  { %15676 = vrcp.f32 %v10469_v50 }
0x3e9e   :  { %v10472_v51 = vpop.xlane.xlu1 %10471 }
0x3e9f   :  { %15678 = vrcp.f32 %v10472_v51 }
0x3ea5   :  { %v15677_v52 = vpop.eup %15676 }
0x3ea6   :  { %v10474_v53 = vmul.f32 %v15677_v52, %v15673_v63 }
0x3ea8   :  { %14757 = vmatmul.mubr.msk.f32.vlgmr.msra.gmra.mrb[94].mxu0 %vm515_vm2, %v10474_v53 }
0x3ea9   :  { %v15679_v57 = vpop.eup %15678  ;;  %14765 = vmatpush3.msra.mxu0 %v13180_v12 }
0x3eaa   :  { %v10476_v58 = vmul.f32 %v15679_v57, %v15675_v43  ;;  %14769 = vmatprep.subr.mxu0 %v13179_v15 }
0x3eac   :  { %14762 = vmatmul.mubr.msk.f32.vlgmr.msra.gmra.mrb[120].mxu1 %vm515_vm2, %v10476_v58  ;;  %v13131_v58 = vld [vmem:[%s17283_s13 + $0xe0] sm:$0xff] }
0x3ead   :  { %15376 = vmatpush3.bf16.msra.mxu1 %v15373_v48  ;;  %14782 = vmatprep.mubr.msk.f32.mxu1 %vm271_vm0, %v16930_v26 }
0x3eae   :  { %15378 = vmatprep.subr.bf16.mxu1 %v15377_v60 }
0x3eb1   :  { %15380 = vmatpush3.bf16.msra.mxu1 %v15377_v60  ;;  %v13132_v60 = vld [vmem:[%s17283_s13 + $0xe8] sm:$0xff] }
0x3eb2   :  { %15390 = vmatprep.subr.bf16.mxu1 %v15389_v4  ;;  %v15397_v62 = vpack.c.bf16 %v13132_v60, %v13131_v58 }
0x3eb4   :  { %14783 = vmatmul.mubr.msk.f32.vlgmr.msra.gmra.mrb[122].mxu1 %vm271_vm0, %v16932_v59 }
0x3eb5   :  { %15392 = vmatpush3.bf16.msra.mxu1 %v15389_v4  ;;  %14804 = vmatprep.mubr.msk.f32.mxu1 %vm271_vm0, %v16930_v26 }
0x3eb6   :  { %15394 = vmatprep.subr.bf16.mxu1 %v15393_v10 }
0x3eb9   :  { %15396 = vmatpush3.bf16.msra.mxu1 %v15393_v10  ;;  %v13134_v10 = vld [vmem:[%s17283_s13 + $0xf8] sm:$0xff] }
0x3eba   :  { %14812 = vmatprep.subr.mxu1 %v15798_v14  ;;  %v15401_v16 = vpack.c.bf16 %v13134_v10, %v13133_v8 }
0x3ebc   :  { %14805 = vmatmul.mubr.msk.f32.vlgmr.msra.gmra.mrb[124].mxu1 %vm271_vm0, %v16932_v59 }
0x3ebd   :  { %14814 = vmatprep.mubr.msk.f32.mxu1 %vm15799_vm1, %v15798_v14 }
0x3f7b   :  { %v10546_v33 = vpop.f32.mrb[94].mxu0 }
0x3f7c   :  { %v14758_v36 = vpop.f32.mrb[95].mxu0  ;;  %14766 = vmatprep.mubr.msk.f32.mxu0 %vm515_vm2, %v10546_v33 }
0x3f7d   :  { %v13171_v36 = vld [vmem:[%s17288_s8 + $0xe0] sm:$0xff] }
0x3f7f   :  { %v10619_v13 = vpop.f32.mrb[120].mxu1 }
0x3f80   :  { %v14763_v41 = vpop.f32.mrb[121].mxu1  ;;  %14767 = vmatmul.mubr.msk.f32.vlgmr.msra.gmra.mrb[96].mxu0 %vm515_vm2, %v10619_v13 }
0x3f81   :  { %14770 = vmatpush3.msra.mxu0 %v13179_v15  ;;  %14771 = vmatprep.mubr.msk.f32.mxu0 %vm515_vm2, %v17004_v49  ;;  %v13173_v41 = vld [vmem:[%s17288_s8 + $0xf0] sm:$0xff] }
0x3f82   :  { %15382 = vmatprep.subr.bf16.mxu0 %v15381_v2  ;;  %v15417_v20 = vpack.c.bf16 %v13174_v11, %v13173_v41 }
0x3f87   :  { %v14784_v22 = vpop.f32.mrb[122].mxu1 }
0x3f88   :  { %v10857_v23 = vpop.f32.mrb[123].mxu1  ;;  %14772 = vmatmul.mubr.msk.f32.vlgmr.msra.gmra.mrb[96].mxu0 %vm515_vm2, %v17006_v9  ;;  %v10863_v7 = vadd.f32 %v14784_v22, %v13218_v61  ;;  %v13152_v22 = vld [vmem:[%s17285_s25 + $0xe8] sm:$0xff] }
0x3f89   :  { %15384 = vmatpush3.bf16.msra.mxu0 %v15381_v2  ;;  %14793 = vmatprep.mubr.msk.f32.mxu0 %vm271_vm0, %v16930_v26  ;;  %v10858_v0 = vadd.f32 %v13218_v61, %v10857_v23  ;;  %v13172_v2 = vld [vmem:[%s17288_s8 + $0xe8] sm:$0xff] }
0x3f8a   :  { %15386 = vmatprep.subr.bf16.mxu0 %v15385_v19  ;;  %v15413_v13 = vpack.c.bf16 %v13172_v2, %v13171_v36  ;;  %v13257_v2 = vld [vmem:[%s17296_s30 + $0x30] sm:$0xff] }
0x3f8d   :  { %15388 = vmatpush3.bf16.msra.mxu0 %v15385_v19  ;;  %v13151_v19 = vld [vmem:[%s17285_s25 + $0xe0] sm:$0xff] }
0x3f8e   :  { %14807 = vmatprep.subr.mxu0 %v15798_v14  ;;  %v15405_v23 = vpack.c.bf16 %v13152_v22, %v13151_v19  ;;  %v13182_v19 = vld [vmem:[%s17295_s24 + $0x38] sm:$0xff]  ;;  %v13262_v22 = vld [vmem:[%s17297_s6 + $0x20] sm:$0xff] }
0x3f8f   :  { %v14806_v49 = vpop.f32.mrb[124].mxu1 }
0x3f90   :  { %14794 = vmatmul.mubr.msk.f32.vlgmr.msra.gmra.mrb[98].mxu0 %vm271_vm0, %v16932_v59  ;;  %v11019_v24 = vpop.f32.mrb[125].mxu1  ;;  %v11025_v29 = vadd.f32 %v14806_v49, %v13224_v27  ;;  %v13153_v49 = vld [vmem:[%s17285_s25 + $0xf0] sm:$0xff] }
0x3f91   :  { %14809 = vmatprep.mubr.msk.f32.mxu0 %vm15799_vm1, %v15798_v14  ;;  %v11020_v30 = vadd.f32 %v13224_v27, %v11019_v24  ;;  %v13154_v24 = vld [vmem:[%s17285_s25 + $0xf8] sm:$0xff] }
0x4063   :  { %v14795_v18 = vpop.f32.mrb[98].mxu0 }
0x4064   :  { %v10944_v9 = vadd.f32 %v14795_v18, %v13221_v5  ;;  %v10938_v25 = vpop.f32.mrb[99].mxu0 }
0x4065   :  { %v10939_v28 = vadd.f32 %v13221_v5, %v10938_v25 }
0x4066   :  { %14813 = vmatpush3.xpose.msk.msra.mxu1 %vm515_vm2, %v10944_v9  ;;  %v15409_v9 = vpack.c.bf16 %v13154_v24, %v13153_v49 }
0x4067   :  { %14808 = vmatpush3.xpose.msk.msra.mxu0 %vm515_vm2, %v10939_v28  ;;  %14822 = vmatprep.subr.mxu1 %v15798_v14 }
0x4068   :  { %14817 = vmatprep.subr.mxu0 %v15798_v14 }
0x4069   :  { %14815 = vmatmul.mubr.msk.f32.vlgmr.msra.gmra.mrb[126].mxu1 %vm515_vm2, %v10863_v7  ;;  %v13241_v7 = vld [vmem:[%s17294_s19 + $0x7] ss:$0 sm:$0xff] }
0x406a   :  { %14810 = vmatmul.mubr.msk.f32.vlgmr.msra.gmra.mrb[100].mxu0 %vm515_vm2, %v10858_v0  ;;  %14823 = vmatpush3.msra.mxu1 %v11025_v29 }
0x406b   :  { %14818 = vmatpush3.msra.mxu0 %v11020_v30  ;;  %14824 = vmatprep.mubr.msk.f32.mxu1 %vm15799_vm1, %v15798_v14 }
0x406c   :  { %14819 = vmatprep.mubr.msk.f32.mxu0 %vm15799_vm1, %v15798_v14  ;;  %15398 = vmatprep.subr.bf16.mxu1 %v15397_v62 }
0x406d   :  { %14827 = vmatprep.subr.mxu0 %v13181_v1 }
0x413c   :  { %v11176_v31 = vpop.f32.mrb[126].mxu1 }
0x413d   :  { %v11181_v32 = vmul.f32 0.35355338, %v11176_v31  ;;  %v11100_v34 = vpop.f32.mrb[100].mxu0  ;;  %v14816_v21 = vpop.f32.mrb[127].mxu1 }
0x413e   :  { %v11180_v35 = vmul.f32 0.35355338, %v11100_v34  ;;  %v14811_v42 = vpop.f32.mrb[101].mxu0 }
0x413f   :  { %v11183_v63 = vsel %vm16650_vm3, %v11181_v32, -10000.0  ;;  %v13238_v32 = vld [vmem:[%s17286_s29 + $0x7] ss:$0 sm:$0xff] }
0x4140   :  { %v11187_v39 = vsel %vm515_vm2, %v11183_v63, -inf  ;;  %v11182_v43 = vsel %vm16643_vm14, %v11180_v35, -10000.0  ;;  %v13235_v35 = vld [vmem:[%s17287_s3 + $0x7] ss:$0 sm:$0xff] }
0x4141   :  { %11188 = vmax.xlane.f32.xlu1 %v11187_v39  ;;  %v11184_v45 = vsel %vm515_vm2, %v11182_v43, -inf }
0x4142   :  { %11185 = vmax.xlane.f32.xlu0 %v11184_v45 }
0x41ce   :  { %v11189_v46 = vpop.xlane.xlu1 %11188 }
0x41cf   :  { %v11191_v47 = vsub.f32 %v11183_v63, %v11189_v46  ;;  %v11186_v48 = vpop.xlane.xlu0 %11185 }
0x41d0   :  { %v11190_v50 = vsub.f32 %v11182_v43, %v11186_v48 }
0x41d1   :  { %v11194_v51 = vmul.f32 1.442695, %v11191_v47 }
0x41d2   :  { %v11192_v52 = vmul.f32 1.442695, %v11190_v50 }
0x41d3   :  { %15680 = vpow2.f32 %v11194_v51 }
0x41d4   :  { %15682 = vpow2.f32 %v11192_v52 }
0x41dd   :  { %v15681_v53 = vpop.eup %15680 }
0x41de   :  { %v15683_v54 = vpop.eup %15682  ;;  %v11199_v55 = vsel %vm515_vm2, %v15681_v53, 0.0 }
0x41df   :  { %11200 = vadd.xlane.f32.xlu1 %v11199_v55  ;;  %v11196_v57 = vsel %vm515_vm2, %v15683_v54, 0.0 }
0x41e0   :  { %11197 = vadd.xlane.f32.xlu0 %v11196_v57 }
0x426c   :  { %v11201_v4 = vpop.xlane.xlu1 %11200 }
0x426d   :  { %15684 = vrcp.f32 %v11201_v4  ;;  %v11198_v6 = vpop.xlane.xlu0 %11197 }
0x426e   :  { %15686 = vrcp.f32 %v11198_v6 }
0x4277   :  { %v15685_v12 = vpop.eup %15684 }
0x4278   :  { %v15687_v15 = vpop.eup %15686  ;;  %v11205_v33 = vmul.f32 %v15685_v12, %v15681_v53 }
0x4279   :  { %v11203_v17 = vmul.f32 %v15687_v15, %v15683_v54  ;;  %v13255_v15 = vld [vmem:[%s17296_s30 + $0x20] sm:$0xff] }
0x427a   :  { %14825 = vmatmul.mubr.msk.f32.vlgmr.msra.gmra.mrb[128].mxu1 %vm515_vm2, %v11205_v33  ;;  %v13256_v33 = vld [vmem:[%s17296_s30 + $0x28] sm:$0xff] }
0x427b   :  { %15400 = vmatpush3.bf16.msra.mxu1 %v15397_v62  ;;  %14820 = vmatmul.mubr.msk.f32.vlgmr.msra.gmra.mrb[102].mxu0 %vm515_vm2, %v11203_v17  ;;  %v15422_v17 = vpack.c.bf16 %v13256_v33, %v13255_v15  ;;  %v13254_v15 = vld [vmem:[%s17301_s1 + $0x3] ss:$0 sm:$0xff] }
0x427c   :  { %14840 = vmatprep.mubr.msk.f32.mxu1 %vm271_vm0, %v16930_v26  ;;  %15402 = vmatprep.subr.bf16.mxu1 %v15401_v16 }
0x427d   :  { %14828 = vmatpush3.msra.mxu0 %v13181_v1 }
0x427e   :  { %15406 = vmatprep.subr.bf16.mxu0 %v15405_v23 }
0x427f   :  { %15404 = vmatpush3.bf16.msra.mxu1 %v15401_v16 }
0x4280   :  { %15414 = vmatprep.subr.bf16.mxu1 %v15413_v13 }
0x4282   :  { %14841 = vmatmul.mubr.msk.f32.vlgmr.msra.gmra.mrb[130].mxu1 %vm271_vm0, %v16932_v59 }
0x4283   :  { %15416 = vmatpush3.bf16.msra.mxu1 %v15413_v13  ;;  %14862 = vmatprep.mubr.msk.f32.mxu1 %vm271_vm0, %v16930_v26  ;;  %v13258_v13 = vld [vmem:[%s17296_s30 + $0x38] sm:$0xff] }
0x4284   :  { %15418 = vmatprep.subr.bf16.mxu1 %v15417_v20  ;;  %v15425_v11 = vpack.c.bf16 %v13258_v13, %v13257_v2 }
0x4287   :  { %15420 = vmatpush3.bf16.msra.mxu1 %v15417_v20 }
0x4288   :  { %14875 = vmatprep.subr.mxu1 %v15798_v14 }
0x428a   :  { %14863 = vmatmul.mubr.msk.f32.vlgmr.msra.gmra.mrb[132].mxu1 %vm271_vm0, %v16932_v59 }
0x428b   :  { %14877 = vmatprep.mubr.msk.f32.mxu1 %vm15799_vm1, %v15798_v14 }
0x434d   :  { %v11348_v5 = vpop.f32.mrb[128].mxu1 }
0x434e   :  { %v11275_v18 = vpop.f32.mrb[102].mxu0  ;;  %v14826_v61 = vpop.f32.mrb[129].mxu1 }
0x434f   :  { %v14821_v25 = vpop.f32.mrb[103].mxu0  ;;  %14829 = vmatprep.mubr.msk.f32.mxu0 %vm515_vm2, %v11275_v18  ;;  %v13264_v18 = vld [vmem:[%s17297_s6 + $0x30] sm:$0xff]  ;;  %v13265_v61 = vld [vmem:[%s17297_s6 + $0x38] sm:$0xff] }
0x4350   :  { %14830 = vmatmul.mubr.msk.f32.vlgmr.msra.gmra.mrb[96].mxu0 %vm515_vm2, %v11348_v5 }
0x4351   :  { %15408 = vmatpush3.bf16.msra.mxu0 %v15405_v23  ;;  %14851 = vmatprep.mubr.msk.f32.mxu0 %vm271_vm0, %v16930_v26  ;;  %v13263_v23 = vld [vmem:[%s17297_s6 + $0x28] sm:$0xff] }
0x4352   :  { %15410 = vmatprep.subr.bf16.mxu0 %v15409_v9  ;;  %v15428_v5 = vpack.c.bf16 %v13263_v23, %v13262_v22 }
0x4355   :  { %v14842_v27 = vpop.f32.mrb[130].mxu1  ;;  %15412 = vmatpush3.bf16.msra.mxu0 %v15409_v9 }
0x4356   :  { %v11507_v28 = vpop.f32.mrb[131].mxu1  ;;  %14865 = vmatprep.subr.mxu0 %v15798_v14  ;;  %v11513_v43 = vadd.f32 %v14842_v27, %v13235_v35  ;;  %v13260_v27 = vld [vmem:[%s17298_s12 + $0x1] ss:$0 sm:$0xff] }
0x4357   :  { %v11508_v63 = vadd.f32 %v13235_v35, %v11507_v28 }
0x4358   :  { %14852 = vmatmul.mubr.msk.f32.vlgmr.msra.gmra.mrb[104].mxu0 %vm271_vm0, %v16932_v59 }
0x4359   :  { %14867 = vmatprep.mubr.msk.f32.mxu0 %vm15799_vm1, %v15798_v14 }
0x435d   :  { %v14864_v0 = vpop.f32.mrb[132].mxu1 }
0x435e   :  { %v11675_v29 = vadd.f32 %v14864_v0, %v13241_v7  ;;  %v11669_v30 = vpop.f32.mrb[133].mxu1 }
0x435f   :  { %v11670_v31 = vadd.f32 %v13241_v7, %v11669_v30 }
0x4361   :  { %14876 = vmatpush3.msra.mxu1 %v11670_v31 }
0x4362   :  { %15421 = vmatprep.subr.bf16.mxu1 %v15802_v40 }
0x442b   :  { %v14853_v34 = vpop.f32.mrb[104].mxu0 }
0x442c   :  { %v11588_v21 = vpop.f32.mrb[105].mxu0  ;;  %v11594_v39 = vadd.f32 %v14853_v34, %v13238_v32 }
0x442d   :  { %v11589_v42 = vadd.f32 %v13238_v32, %v11588_v21 }
0x442f   :  { %14866 = vmatpush3.xpose.msk.msra.mxu0 %vm515_vm2, %v11589_v42 }
0x4430   :  { %14870 = vmatprep.subr.mxu0 %v15798_v14 }
0x4432   :  { %14868 = vmatmul.mubr.msk.f32.vlgmr.msra.gmra.mrb[106].mxu0 %vm515_vm2, %v11508_v63 }
0x4433   :  { %14871 = vmatpush3.xpose.msk.msra.mxu0 %vm515_vm2, %v11594_v39  ;;  %14872 = vmatprep.mubr.msk.f32.mxu0 %vm15799_vm1, %v15798_v14 }
0x4434   :  { %14880 = vmatprep.subr.mxu0 %v15798_v14 }
0x4436   :  { %14873 = vmatmul.mubr.msk.f32.vlgmr.msra.gmra.mrb[108].mxu0 %vm515_vm2, %v11513_v43 }
0x4437   :  { %14881 = vmatpush3.msra.mxu0 %v11675_v29  ;;  %14882 = vmatprep.mubr.msk.f32.mxu0 %vm15799_vm1, %v15798_v14  ;;  %v13252_v29 = vld [vmem:[%s17299_s20 + $0x1] ss:$0 sm:$0xff] }
0x4438   :  { %14885 = vmatprep.subr.mxu0 %v13182_v19 }
0x4505   :  { %v11750_v45 = vpop.f32.mrb[106].mxu0 }
0x4506   :  { %v11830_v46 = vmul.f32 0.35355338, %v11750_v45  ;;  %v14869_v47 = vpop.f32.mrb[107].mxu0 }
0x4508   :  { %v11832_v48 = vsel %vm16643_vm14, %v11830_v46, -10000.0 }
0x4509   :  { %v11826_v50 = vpop.f32.mrb[108].mxu0  ;;  %v11834_v51 = vsel %vm515_vm2, %v11832_v48, -inf }
0x450a   :  { %v11831_v52 = vmul.f32 0.35355338, %v11826_v50  ;;  %11835 = vmax.xlane.f32.xlu0 %v11834_v51  ;;  %v14874_v53 = vpop.f32.mrb[109].mxu0 }
0x450b   :  { %v13267_v53 = vld [vmem:[%s17300_s28 + $0x1] ss:$0 sm:$0xff] }
0x450c   :  { %v11833_v54 = vsel %vm16650_vm3, %v11831_v52, -10000.0 }
0x450d   :  { %v11837_v55 = vsel %vm515_vm2, %v11833_v54, -inf }
0x450e   :  { %11838 = vmax.xlane.f32.xlu1 %v11837_v55 }
0x4597   :  { %v11836_v57 = vpop.xlane.xlu0 %11835 }
0x4598   :  { %v11840_v58 = vsub.f32 %v11832_v48, %v11836_v57 }
0x459a   :  { %v11842_v60 = vmul.f32 1.442695, %v11840_v58 }
0x459b   :  { %v11839_v62 = vpop.xlane.xlu1 %11838 }
0x459c   :  { %15688 = vpow2.f32 %v11842_v60  ;;  %v11841_v56 = vsub.f32 %v11833_v54, %v11839_v62 }
0x459e   :  { %v11844_v1 = vmul.f32 1.442695, %v11841_v56 }
0x45a0   :  { %15690 = vpow2.f32 %v11844_v1 }
0x45a6   :  { %v15689_v4 = vpop.eup %15688 }
0x45a7   :  { %v11846_v6 = vsel %vm515_vm2, %v15689_v4, 0.0 }
0x45a8   :  { %11847 = vadd.xlane.f32.xlu0 %v11846_v6  ;;  %v13253_v6 = vld [vmem:[%s17301_s1 + $0x2] ss:$0 sm:$0xff] }
0x45aa   :  { %v15691_v38 = vpop.eup %15690 }
0x45ab   :  { %v11849_v8 = vsel %vm515_vm2, %v15691_v38, 0.0 }
0x45ac   :  { %11850 = vadd.xlane.f32.xlu1 %v11849_v8 }
0x4635   :  { %v11848_v10 = vpop.xlane.xlu0 %11847 }
0x4636   :  { %15692 = vrcp.f32 %v11848_v10 }
0x4639   :  { %v11851_v12 = vpop.xlane.xlu1 %11850 }
0x463a   :  { %15694 = vrcp.f32 %v11851_v12 }
0x4640   :  { %v15693_v16 = vpop.eup %15692 }
0x4641   :  { %v11853_v36 = vmul.f32 %v15693_v16, %v15689_v4 }
0x4643   :  { %14878 = vmatmul.mubr.msk.f32.vlgmr.msra.gmra.mrb[134].mxu1 %vm515_vm2, %v11853_v36 }
0x4644   :  { %v15695_v41 = vpop.eup %15694  ;;  %15423 = vmatpush3.bf16.msra.mxu1 %v15422_v17  ;;  %14898 = vmatprep.mubr.msk.f32.mxu1 %vm15799_vm1, %v15798_v14 }
0x4645   :  { %v11855_v20 = vmul.f32 %v15695_v41, %v15691_v38  ;;  %15424 = vmatprep.subr.bf16.mxu1 %v15802_v40 }
0x4647   :  { %14883 = vmatmul.mubr.msk.f32.vlgmr.msra.gmra.mrb[110].mxu0 %vm515_vm2, %v11855_v20 }
0x4648   :  { %15426 = vmatpush3.bf16.msra.mxu1 %v15425_v11  ;;  %14886 = vmatpush3.msra.mxu0 %v13182_v19 }
0x4649   :  { %15427 = vmatprep.subr.bf16.mxu0 %v15802_v40 }
0x464b   :  { %14899 = vmatmul.mubr.msk.f32.vlgmr.msra.gmra.mrb[136].mxu1 %vm271_vm0, %v16857_v3  ;;  %v15431_v3 = vpack.c.bf16 %v13265_v61, %v13264_v18 }
0x4716   :  { %v11925_v49 = vpop.f32.mrb[134].mxu1 }
0x4717   :  { %v14879_v24 = vpop.f32.mrb[135].mxu1  ;;  %14887 = vmatprep.mubr.msk.f32.mxu0 %vm515_vm2, %v11925_v49 }
0x471a   :  { %v11998_v9 = vpop.f32.mrb[110].mxu0 }
0x471b   :  { %v14884_v25 = vpop.f32.mrb[111].mxu0  ;;  %14888 = vmatmul.mubr.msk.f32.vlgmr.msra.gmra.mrb[96].mxu0 %vm515_vm2, %v11998_v9 }
0x471c   :  { %15429 = vmatpush3.bf16.msra.mxu0 %v15428_v5  ;;  %14909 = vmatprep.mubr.msk.f32.mxu0 %vm15799_vm1, %v15798_v14 }
0x471d   :  { %15430 = vmatprep.subr.bf16.mxu0 %v15802_v40 }
0x471e   :  { %v12216_v28 = vpop.f32.mrb[136].mxu1 }
0x471f   :  { %v14900_v7 = vpop.f32.mrb[137].mxu1  ;;  %v12217_v0 = vadd.f32 %v13260_v27, %v12216_v28  ;;  %v13272_v27 = vld [vmem:[%s17302_s2 + $0x28] sm:$0xff] }
0x4720   :  { %15432 = vmatpush3.bf16.msra.mxu0 %v15431_v3  ;;  %v13271_v3 = vld [vmem:[%s17302_s2 + $0x20] sm:$0xff]  ;;  %v13273_v7 = vld [vmem:[%s17302_s2 + $0x30] sm:$0xff] }
0x4721   :  { %v15433_v28 = vpack.c.bf16 %v13272_v27, %v13271_v3  ;;  %v12624_v3 = vld [vmem:[%s16002_s4 + $0x18] sm:$0xff] }
0x4723   :  { %14910 = vmatmul.mubr.msk.f32.vlgmr.msra.gmra.mrb[112].mxu0 %vm271_vm0, %v12217_v0  ;;  %v13274_v0 = vld [vmem:[%s17302_s2 + $0x38] sm:$0xff]  ;;  %15434 = vmatprep.subr.bf16.mxu1 %v15433_v28 }
0x4724   :  { %15436 = vmatpush3.bf16.msra.mxu1 %v15433_v28 }
0x47ee   :  { %v14889_v30 = vpop.f32.mrb[96].mxu0 }
0x47ef   :  { %v12092_v31 = vadd.f32 %v14889_v30, %v13252_v29  ;;  %v12074_v32 = vpop.f32.mrb[97].mxu0  ;;  %v13279_v30 = vld [vmem:[%s17303_s7 + $0x40] sm:$0xff] }
0x47f0   :  { %v12091_v34 = vadd.f32 %v13252_v29, %v12074_v32  ;;  %v15437_v29 = vpack.c.bf16 %v13274_v0, %v13273_v7  ;;  %v13281_v32 = vld [vmem:[%s17303_s7 + $0x50] sm:$0xff] }
0x47f1   :  { %v12094_v21 = vadd.f32 %v12092_v31, %v16932_v59  ;;  %v13280_v31 = vld [vmem:[%s17303_s7 + $0x48] sm:$0xff] }
0x47f2   :  { %v12093_v35 = vadd.f32 %v12091_v34, %v16930_v26  ;;  %15438 = vmatprep.subr.bf16.mxu1 %v15437_v29  ;;  %v15441_v34 = vpack.c.bf16 %v13280_v31, %v13279_v30 }
0x47f3   :  { %v12098_v14 = vsel %vm271_vm0, %v12094_v21, 0.0  ;;  %15440 = vmatpush3.bf16.msra.mxu1 %v15437_v29 }
0x47f4   :  { %12099 = vadd.xlane.f32.xlu1 %v12098_v14  ;;  %v12095_v40 = vsel %vm271_vm0, %v12093_v35, 0.0  ;;  %v13283_v14 = vld [vmem:[%s17303_s7 + $0x60] sm:$0xff]  ;;  %15442 = vmatprep.subr.bf16.mxu0 %v15441_v34 }
0x47f5   :  { %12096 = vadd.xlane.f32.xlu0 %v12095_v40  ;;  %v13284_v40 = vld [vmem:[%s17303_s7 + $0x68] sm:$0xff]  ;;  %15444 = vmatpush3.bf16.msra.mxu0 %v15441_v34  ;;  %v13291_v34 = vld [vmem:[%s17307_s16 + $0x2] ss:$0 sm:$0xff] }
0x47f6   :  { %v12302_v42 = vpop.f32.mrb[112].mxu0 }
0x47f7   :  { %v14911_v63 = vpop.f32.mrb[113].mxu0  ;;  %v12303_v60 = vadd.f32 %v13267_v53, %v12302_v42  ;;  %v15449_v42 = vpack.c.bf16 %v13284_v40, %v13283_v14  ;;  %v13292_v40 = vld [vmem:[%s17307_s16 + $0x3] ss:$0 sm:$0xff] }
0x47f9   :  { %v12313_v56 = vrot.slane %v12303_v60, %v16071_v37  ;;  %v13286_v60 = vld [vmem:[%s17303_s7 + $0x78] sm:$0xff] }
0x47fb   :  { %v12314_v1 = vcombine.high %v12313_v56, %v12313_v56  ;;  %v12321_v12 = vrot.slane %v12313_v56, %v16071_v37  ;;  %v13276_v56 = vld [vmem:[%s17305_s11 + $0x1] ss:$0 sm:$0xff] }
0x47fd   :  { %v12328_v10 = vrot.slane %v12314_v1, %v16071_v37  ;;  %v12332_v41 = vrot.slane %v12321_v12, %v16078_v44  ;;  %v13288_v12 = vld [vmem:[%s17306_s15 + $0x1] ss:$0 sm:$0xff] }
0x47ff   :  { %v12336_v2 = vrot.slane %v12328_v10, %v16078_v44 }
0x4881   :  { %v12100_v39 = vpop.xlane.xlu1 %12099 }
0x4882   :  { %v12102_v43 = vmul.f32 0.03125, %v12100_v39  ;;  %v12097_v45 = vpop.xlane.xlu0 %12096 }
0x4883   :  { %v12101_v46 = vmul.f32 0.03125, %v12097_v45 }
0x4884   :  { %v12104_v47 = vsub.f32 %v12094_v21, %v12102_v43  ;;  %v13282_v21 = vld [vmem:[%s17303_s7 + $0x58] sm:$0xff] }
0x4885   :  { %v12103_v48 = vsub.f32 %v12093_v35, %v12101_v46  ;;  %v15445_v35 = vpack.c.bf16 %v13282_v21, %v13281_v32 }
0x4886   :  { %v12106_v50 = vmul.f32 %v12104_v47, %v12104_v47 }
0x4887   :  { %v12105_v51 = vmul.f32 %v12103_v48, %v12103_v48  ;;  %15446 = vmatprep.subr.bf16.mxu0 %v15445_v35 }
0x4888   :  { %v12110_v59 = vsel %vm271_vm0, %v12106_v50, 0.0  ;;  %15448 = vmatpush3.bf16.msra.mxu0 %v15445_v35  ;;  %v13269_v50 = vld [vmem:[%s17304_s10 + $0x2] ss:$0 sm:$0xff] }
0x4889   :  { %12111 = vadd.xlane.f32.xlu1 %v12110_v59  ;;  %v12107_v26 = vsel %vm271_vm0, %v12105_v51, 0.0  ;;  %15450 = vmatprep.subr.bf16.mxu0 %v15449_v42 }
0x488a   :  { %12108 = vadd.xlane.f32.xlu0 %v12107_v26 }
0x488c   :  { %15452 = vmatpush3.bf16.msra.mxu0 %v15449_v42 }
0x4916   :  { %v12112_v52 = vpop.xlane.xlu1 %12111 }
0x4917   :  { %v12114_v54 = vmul.f32 0.03125, %v12112_v52  ;;  %v12109_v55 = vpop.xlane.xlu0 %12108  ;;  %v13270_v52 = vld [vmem:[%s17304_s10 + $0x3] ss:$0 sm:$0xff] }
0x4918   :  { %v12113_v57 = vmul.f32 0.03125, %v12109_v55 }
0x4919   :  { %v12116_v58 = vadd.f32 1e-05, %v12114_v54 }
0x491a   :  { %v12115_v62 = vadd.f32 1e-05, %v12113_v57 }
0x491b   :  { %15696 = vrsqrt.f32 %v12116_v58  ;;  %v13285_v58 = vld [vmem:[%s17303_s7 + $0x70] sm:$0xff] }
0x491c   :  { %15698 = vrsqrt.f32 %v12115_v62  ;;  %v15453_v62 = vpack.c.bf16 %v13286_v60, %v13285_v58 }
0x491e   :  { %15454 = vmatprep.subr.bf16.mxu0 %v15453_v62 }
0x491f   :  { %15456 = vmatpush3.bf16.msra.mxu0 %v15453_v62 }
0x4925   :  { %v15697_v4 = vpop.eup %15696 }
0x4926   :  { %v15699_v38 = vpop.eup %15698  ;;  %v12120_v8 = vmul.f32 %v15697_v4, %v12104_v47 }
0x4927   :  { %v12119_v33 = vmul.f32 %v15699_v38, %v12103_v48 }
0x4928   :  { %v12128_v16 = vmul.f32 %v13253_v6, %v12120_v8 }
0x4929   :  { %v12127_v17 = vmul.f32 %v13253_v6, %v12119_v33 }
0x492a   :  { %v12136_v36 = vadd.f32 %v13254_v15, %v12128_v16 }
0x492b   :  { %v12135_v13 = vadd.f32 %v13254_v15, %v12127_v17 }
0x492c   :  { %v12340_v11 = vadd.f32 %v12336_v2, %v12136_v36 }
0x492d   :  { %v12339_v20 = vadd.f32 %v12332_v41, %v12135_v13 }
0x492e   :  { %v12344_v19 = vsel %vm271_vm0, %v12340_v11, 0.0 }
0x492f   :  { %12345 = vadd.xlane.f32.xlu1 %v12344_v19  ;;  %v12341_v22 = vsel %vm271_vm0, %v12339_v20, 0.0 }
0x4930   :  { %12342 = vadd.xlane.f32.xlu0 %v12341_v22 }
0x49bc   :  { %v12346_v37 = vpop.xlane.xlu1 %12345 }
0x49bd   :  { %v12348_v23 = vmul.f32 0.03125, %v12346_v37  ;;  %v12343_v49 = vpop.xlane.xlu0 %12342 }
0x49be   :  { %v12347_v24 = vmul.f32 0.03125, %v12343_v49 }
0x49bf   :  { %v12350_v5 = vsub.f32 %v12340_v11, %v12348_v23 }
0x49c0   :  { %v12349_v18 = vsub.f32 %v12339_v20, %v12347_v24 }
0x49c1   :  { %v12352_v61 = vmul.f32 %v12350_v5, %v12350_v5 }
0x49c2   :  { %v12351_v44 = vmul.f32 %v12349_v18, %v12349_v18 }
0x49c3   :  { %v12356_v9 = vsel %vm271_vm0, %v12352_v61, 0.0  ;;  %v12621_v61 = vld [vmem:[%s16002_s4] sm:$0xff] }
0x49c4   :  { %12357 = vadd.xlane.f32.xlu1 %v12356_v9  ;;  %v12353_v25 = vsel %vm271_vm0, %v12351_v44, 0.0  ;;  %v12622_v44 = vld [vmem:[%s16002_s4 + $0x8] sm:$0xff] }
0x49c5   :  { %12354 = vadd.xlane.f32.xlu0 %v12353_v25  ;;  %v15457_v9 = vpack.c.bf16 %v12622_v44, %v12621_v61  ;;  %v12623_v25 = vld [vmem:[%s16002_s4 + $0x10] sm:$0xff]  ;;  %s15803_s4 = smov [#allocation4]  }
0x49c6   :  { %v15461_v27 = vpack.c.bf16 %v12624_v3, %v12623_v25  ;;  %s12732_s18 = sshll.u32 %s15803_s4, 4  ;;  %s12733_s18 = int_to_ptr.vmem [resolvable:$true] %s12732_s18 }
0x49c7   :  { %15458 = vmatprep.subr.bf16.mxu1 %v15457_v9  ;;  %s15710_s22 = scalar_lea.vmem %s12733_s18, 32  ;;  %p15715_p1 = scmp.lt.s32.totalorder %s12733_s18, %s12733_s18 }
0x49c8   :  { %p15711_p0 = scmp.ne.s32.totalorder %s12733_s18, %s15710_s22  ;;  %p15716_p2 = scmp.lt.s32.totalorder %s15710_s22, %s15710_s22 }
0x49ca   :  { %p15717_p3 = por %p15716_p2, %p15715_p1 }
0x49cc   :  { %p15718_p4 = pnand %p15717_p3, %p15711_p0 }
0x4a51   :  { %v12358_v63 = vpop.xlane.xlu1 %12357 }
0x4a52   :  { %v12360_v39 = vmul.f32 0.03125, %v12358_v63  ;;  %v12355_v43 = vpop.xlane.xlu0 %12354 }
0x4a53   :  { %v12359_v45 = vmul.f32 0.03125, %v12355_v43 }
0x4a54   :  { %v12362_v46 = vadd.f32 1e-05, %v12360_v39 }
0x4a55   :  { %v12361_v47 = vadd.f32 1e-05, %v12359_v45 }
0x4a56   :  { %15700 = vrsqrt.f32 %v12362_v46 }
0x4a57   :  { %15702 = vrsqrt.f32 %v12361_v47 }
0x4a60   :  { %v15701_v48 = vpop.eup %15700 }
0x4a61   :  { %v15703_v51 = vpop.eup %15702  ;;  %v12366_v59 = vmul.f32 %v15701_v48, %v12350_v5 }
0x4a62   :  { %v12365_v26 = vmul.f32 %v15703_v51, %v12349_v18 }
0x4a63   :  { %v12374_v53 = vmul.f32 %v13269_v50, %v12366_v59 }
0x4a64   :  { %v12373_v54 = vmul.f32 %v13269_v50, %v12365_v26 }
0x4a65   :  { %v12382_v57 = vadd.f32 %v13270_v52, %v12374_v53 }
0x4a66   :  { %v12381_v55 = vadd.f32 %v13270_v52, %v12373_v54 }
0x4a68   :  { %14920 = vmatprep.mubr.msk.f32.mxu1 %vm271_vm0, %v12381_v55 }
0x4a69   :  { %14921 = vmatmul.mubr.msk.f32.vlgmr.msra.gmra.mrb[138].mxu1 %vm271_vm0, %v12382_v57 }
0x4a6a   :  { %15460 = vmatpush3.bf16.msra.mxu1 %v15457_v9 }
0x4a6b   :  { %15462 = vmatprep.subr.bf16.mxu1 %v15461_v27 }
0x4a6e   :  { %15464 = vmatpush3.bf16.msra.mxu1 %v15461_v27 }
0x4b3c   :  { %v14922_v1 = vpop.f32.mrb[138].mxu1 }
0x4b3d   :  { %v12474_v4 = vadd.f32 %v14922_v1, %v13276_v56  ;;  %v12468_v6 = vpop.f32.mrb[139].mxu1 }
0x4b3e   :  { %v12469_v38 = vadd.f32 %v13276_v56, %v12468_v6 }
0x4b3f   :  { %v12478_v10 = vmax.f32 %v12474_v4, 0.0 }
0x4b40   :  { %v12477_v8 = vmax.f32 %v12469_v38, 0.0 }
0x4b42   :  { %14939 = vmatprep.mubr.msk.f32.mxu0 %vm3043_vm8, %v12477_v8 }
0x4b43   :  { %14940 = vmatmul.mubr.msk.f32.vlgmr.msra.gmra.mrb[114].mxu0 %vm3043_vm8, %v12478_v10 }
0x4c16   :  { %v14941_v15 = vpop.f32.mrb[114].mxu0 }
0x4c17   :  { %v12574_v33 = vadd.f32 %v14941_v15, %v13288_v12  ;;  %v12568_v16 = vpop.f32.mrb[115].mxu0 }
0x4c18   :  { %v12569_v17 = vadd.f32 %v13288_v12, %v12568_v16 }
0x4c19   :  { %v12578_v36 = vadd.f32 %v12574_v33, %v12382_v57 }
0x4c1a   :  { %v12577_v2 = vadd.f32 %v12569_v17, %v12381_v55 }
0x4c1b   :  { %v12582_v13 = vsel %vm271_vm0, %v12578_v36, 0.0 }
0x4c1c   :  { %12583 = vadd.xlane.f32.xlu1 %v12582_v13  ;;  %v12579_v41 = vsel %vm271_vm0, %v12577_v2, 0.0 }
0x4c1d   :  { %12580 = vadd.xlane.f32.xlu0 %v12579_v41 }
0x4ca9   :  { %v12584_v11 = vpop.xlane.xlu1 %12583 }
0x4caa   :  { %v12586_v20 = vmul.f32 0.03125, %v12584_v11  ;;  %v12581_v19 = vpop.xlane.xlu0 %12580 }
0x4cab   :  { %v12585_v22 = vmul.f32 0.03125, %v12581_v19 }
0x4cac   :  { %v12588_v37 = vsub.f32 %v12578_v36, %v12586_v20 }
0x4cad   :  { %v12587_v23 = vsub.f32 %v12577_v2, %v12585_v22 }
0x4cae   :  { %v12590_v49 = vmul.f32 %v12588_v37, %v12588_v37 }
0x4caf   :  { %v12589_v24 = vmul.f32 %v12587_v23, %v12587_v23 }
0x4cb0   :  { %v12594_v5 = vsel %vm271_vm0, %v12590_v49, 0.0 }
0x4cb1   :  { %12595 = vadd.xlane.f32.xlu1 %v12594_v5  ;;  %v12591_v18 = vsel %vm271_vm0, %v12589_v24, 0.0 }
0x4cb2   :  { %12592 = vadd.xlane.f32.xlu0 %v12591_v18 }
0x4d3e   :  { %v12596_v28 = vpop.xlane.xlu1 %12595 }
0x4d3f   :  { %v12598_v7 = vmul.f32 0.03125, %v12596_v28  ;;  %v12593_v0 = vpop.xlane.xlu0 %12592 }
0x4d40   :  { %v12597_v29 = vmul.f32 0.03125, %v12593_v0 }
0x4d41   :  { %v12600_v30 = vadd.f32 1e-05, %v12598_v7 }
0x4d42   :  { %v12599_v31 = vadd.f32 1e-05, %v12597_v29 }
0x4d43   :  { %15704 = vrsqrt.f32 %v12600_v30 }
0x4d44   :  { %15706 = vrsqrt.f32 %v12599_v31 }
0x4d4d   :  { %v15705_v32 = vpop.eup %15704 }
0x4d4e   :  { %v15707_v21 = vpop.eup %15706  ;;  %v12604_v35 = vmul.f32 %v15705_v32, %v12588_v37 }
0x4d4f   :  { %v12603_v14 = vmul.f32 %v15707_v21, %v12587_v23 }
0x4d50   :  { %v12612_v42 = vmul.f32 %v13291_v34, %v12604_v35 }
0x4d51   :  { %v12611_v63 = vmul.f32 %v13291_v34, %v12603_v14 }
0x4d52   :  { %v12620_v43 = vadd.f32 %v13292_v40, %v12612_v42 }
0x4d53   :  { %v12619_v39 = vadd.f32 %v13292_v40, %v12611_v63 }
0x4d55   :  { %14950 = vmatprep.mubr.msk.f32.mxu1 %vm271_vm0, %v12619_v39 }
0x4d56   :  { %14951 = vmatmul.mubr.msk.f32.vlgmr.msra.gmra.mrb[140].mxu1 %vm271_vm0, %v12620_v43 }
0x4d57   :  { %15721 = shalt.err (!%p15718_p4)
}
0x4d58   :  { %s15722_s23 = scalar_lea.hbm %s16017_s27, 32 }
0x4d59   :  { %p15723_p5 = scmp.ne.s32.totalorder %s16017_s27, %s15722_s23  ;;  %p15726_p6 = scmp.lt.u32.totalorder %s15722_s23, %s16017_s27 }
0x4d5b   :  { %p15728_p7 = pnand %p15726_p6, %p15723_p5 }
0x4d5d   :  { %15731 = shalt.err (!%p15728_p7)
}
0x4d5e   :  { %s15804_s26 = smov 16   ;;  %s15805_s0 = smov 1   ;;  %v13293_v45 = vld [vmem:[%s16007_s17] ss:$0 sm:$0xff] }
0x4d5f   :  { %12738 = dma.vmem_to_hbm [thread:$0]  %s12733_s18, 32, %s16017_s27, [#allocation5], %s15804_s26, %s15804_s26, %s15805_s0  }
0x4d60   :  { %s15806_s5 = smov [#allocation2]  }
0x4d61   :  { %s12720_s13 = sshll.u32 %s15806_s5, 4  ;;  %s12721_s13 = int_to_ptr.vmem [resolvable:$true] %s12720_s13 }
0x4d62   :  { %s15732_s21 = scalar_lea.vmem %s12721_s13, 256  ;;  %p15737_p9 = scmp.lt.s32.totalorder %s12721_s13, %s12721_s13 }
0x4d63   :  { %p15733_p8 = scmp.ne.s32.totalorder %s12721_s13, %s15732_s21  ;;  %p15738_p10 = scmp.lt.s32.totalorder %s15732_s21, %s15732_s21 }
0x4d65   :  { %p15739_p11 = por %p15738_p10, %p15737_p9 }
0x4d67   :  { %p15740_p12 = pnand %p15739_p11, %p15733_p8 }
0x4e29   :  { %v14952_v46 = vpop.f32.mrb[140].mxu1 }
0x4e2a   :  { %v12710_v47 = vadd.f32 %v14952_v46, %v13293_v45  ;;  %v12704_v48 = vpop.f32.mrb[141].mxu1 }
0x4e2b   :  { %v12705_v50 = vadd.f32 %v13293_v45, %v12704_v48 }
0x4e2c   :  { %12714 = vst [vmem:[#allocation2 + $0x8] sm:$0xff] %v12710_v47 }
0x4e2d   :  { %12713 = vst [vmem:[#allocation2] sm:$0xff] %v12705_v50 }
0x4e2e   :  { %15743 = shalt.err (!%p15740_p12)
}
0x4e2f   :  { %s15744_s17 = scalar_lea.hbm %s16012_s9, 256 }
0x4e30   :  { %p15745_p13 = scmp.ne.s32.totalorder %s16012_s9, %s15744_s17  ;;  %p15748_p0 = scmp.lt.u32.totalorder %s15744_s17, %s16012_s9 }
0x4e32   :  { %p15750_p1 = pnand %p15748_p0, %p15745_p13 }
0x4e34   :  { %15753 = shalt.err (!%p15750_p1)
}
0x4e35   :  { %s15807_s27 = smov 128   ;;  %s15808_s25 = smov 8  }
0x4e36   :  { %12726 = dma.vmem_to_hbm [thread:$0]  %s12721_s13, 256, %s16012_s9, [#allocation3], %s15807_s27, %s15807_s27, %s15808_s25  }
0x4e37   :  { %15754 = dma.done.wait [#allocation3], 256  }
0x4e38   :  { %15755 = vsyncadd [#allocation3], 4294967040 }
0x4e39   :  { %15756 = dma.done.wait [#allocation5], 32  }
0x4e3a   :  { %15757 = vsyncadd [#allocation5], 4294967264 }
0x4e3b   :  { %12745 = vsyncpa [#allocation3], 1 }
0x4e3c   :  { %12746 = vsyncpa [#allocation5], 1 }

</bundles_post_ra>
